<compile_context>
chip_gen: v6e
topology: v6e:2x2x1
jax: 0.10.0
libtpu: 0.0.40
codegen_flags: <defaults>
</compile_context>

<pallas_src>
import functools

import jax
import jax.numpy as jnp
from jax import lax
from jax.experimental import pallas as pl
from jax.experimental.pallas import tpu as pltpu

ALPHA = 0.2                    # LeakyReLU negative slope (module default)
C1 = 0.5 * (1.0 + ALPHA)       # leakyrelu(s) == C1*s + C2*|s|
C2 = 0.5 * (1.0 - ALPHA)


def _gat_fused_kernel(B, N, Fin, Fout,
                      a_ref, x_ref, w_ref, adj_ref, out_ref,
                      wh_scr, e_scr, ssq_scr):
    p = pl.program_id(0)       # 0: scores pass, 1: softmax/aggregate pass
    b = pl.program_id(1)       # batch index

    # ---------------- pass 0: Wh, scores, global sum of squares --------------
    @pl.when(p == 0)
    def _scores():
        # Hoisted matmul: all batches at once on the MXU, once per call.
        @pl.when(b == 0)
        def _prep():
            wh_all = jnp.dot(x_ref[...].reshape(B * N, Fin), w_ref[...],
                             preferred_element_type=jnp.float32)
            wh_scr[...] = wh_all.reshape(B, N, Fout)
            ssq_scr[...] = jnp.zeros_like(ssq_scr)

        wh = wh_scr[b]                            # (N, Fout)
        whT = wh.T                                # (Fout, N), small XLU transpose

        # e[i, j] = sum_f a[f] * leakyrelu(wh[i, f] + wh[j, f])
        #         = C1*(u[i] + u[j]) + C2 * sum_f a[f] * |wh[i, f] + wh[j, f]|
        # Only the |.| term is pairwise; accumulate it per feature into an
        # (N, N) accumulator (never building an (N, N, Fout) intermediate).
        acc = jnp.zeros((N, N), jnp.float32)
        u_col = jnp.zeros((N, 1), jnp.float32)
        u_row = jnp.zeros((1, N), jnp.float32)
        for f in range(Fout):                     # static -> fully unrolled
            af = a_ref[f]                         # scalar from SMEM
            col = wh[:, f:f + 1]                  # (N, 1): wh[i, f]
            row = whT[f:f + 1, :]                 # (1, N): wh[j, f]
            acc = acc + af * jnp.abs(col + row)
            u_col = u_col + af * col
            u_row = u_row + af * row
        e = C1 * (u_col + u_row) + C2 * acc       # (N, N), unmasked scores

        # Global Frobenius norm is taken over the *unmasked* scores.
        ssq_scr[...] = ssq_scr[...] + jnp.sum(e * e)

        # Mask here so pass 1 never touches adj (-inf * positive stays -inf).
        e_scr[b] = jnp.where(adj_ref[0] == 0.0, -jnp.inf, e)

    # ---------------- pass 1: scale, softmax, aggregate, ELU -----------------
    @pl.when(p == 1)
    def _aggregate():
        inv_norm = lax.rsqrt(ssq_scr[...])        # (1, 1), EUP rsqrt
        e = e_scr[b] * inv_norm                   # (N, N); -inf stays -inf
        m = jnp.max(e, axis=-1, keepdims=True)
        ex = jnp.exp(e - m)
        denom = jnp.sum(ex, axis=-1, keepdims=True)
        att = ex * pl.reciprocal(denom, approx=True)           # EUP reciprocal
        h = jnp.dot(att, wh_scr[b], preferred_element_type=jnp.float32)
        out_ref[0] = jnp.where(h > 0, h, jnp.exp(jnp.minimum(h, 0.0)) - 1.0)  # ELU


def gat_forward(x, adj, W, a_fc):
    B, N, Fin = x.shape
    Fout = W.shape[1]
    kernel = functools.partial(_gat_fused_kernel, B, N, Fin, Fout)

    return pl.pallas_call(
        kernel,
        out_shape=jax.ShapeDtypeStruct((B, N, Fout), jnp.float32),
        grid=(2, B),                                       # (pass, batch)
        in_specs=[
            # attn_fc weight vector: SMEM, scalar-indexed inside the f loop.
            pl.BlockSpec(memory_space=pltpu.MemorySpace.SMEM),
            # x and W fully resident (constant index map -> DMA'd once).
            pl.BlockSpec((B, N, Fin), lambda p, b: (0, 0, 0)),
            pl.BlockSpec((Fin, Fout), lambda p, b: (0, 0)),
            # adj is only needed in pass 0; pin its block index in pass 1 so
            # it is never re-fetched.
            pl.BlockSpec((1, N, N),
                         lambda p, b: (jnp.where(p == 0, b, B - 1), 0, 0)),
        ],
        # Written only in pass 1; during pass 0 the index stays at block 0, so
        # no uninitialized buffer is flushed before real data is written.
        out_specs=pl.BlockSpec((1, N, Fout), lambda p, b: (b * p, 0, 0)),
        scratch_shapes=[
            pltpu.VMEM((B, N, Fout), jnp.float32),   # Wh for all batches
            pltpu.VMEM((B, N, N), jnp.float32),      # masked scores
            pltpu.VMEM((1, 1), jnp.float32),         # global sum of squares
        ],
        compiler_params=pltpu.CompilerParams(
            # The shared sum-of-squares scratch couples every grid step, so
            # neither axis may be split across cores.
            dimension_semantics=("arbitrary", "arbitrary"),
        ),
    )(a_fc, x, W, adj)


def gat_reference(x, adj, W, a_fc):
    """Pure-JAX reference mirroring the PyTorch forward."""
    wh = jnp.einsum("bnf,fo->bno", x, W)
    pair = wh[:, :, None, :] + wh[:, None, :, :]
    pair = jnp.where(pair > 0, pair, ALPHA * pair)
    e = jnp.sum(pair * a_fc, axis=-1)
    e = e / jnp.linalg.norm(e)
    e = jnp.where(adj == 0.0, -jnp.inf, e)
    att = jax.nn.softmax(e, axis=-1)
    h = jnp.einsum("bij,bjf->bif", att, wh)
    return jnp.where(h > 0, h, jnp.exp(jnp.minimum(h, 0.0)) - 1.0)


if __name__ == "__main__":
    B, N, Fin, Fout = 2, 64, 32, 32

    key = jax.random.PRNGKey(0)
    kx, kadj, kw, ka = jax.random.split(key, 4)

    # Inputs.
    x = jax.random.normal(kx, (B, N, Fin), dtype=jnp.float32)
    adj = (jax.random.uniform(kadj, (B, N, N)) < 0.6).astype(jnp.float32)
    adj = jnp.maximum(adj, jnp.eye(N, dtype=jnp.float32)[None])  # self-loops

    # Parameters (deterministic, matching the module's init shapes).
    gain = 1.414
    bound_w = gain * (6.0 / (Fin + Fout)) ** 0.5               # xavier_uniform
    W = jax.random.uniform(kw, (Fin, Fout), jnp.float32, -bound_w, bound_w)
    bound_a = 1.0 / (Fout ** 0.5)                              # nn.Linear default
    a_fc = jax.random.uniform(ka, (Fout,), jnp.float32, -bound_a, bound_a)

    out = jax.block_until_ready(gat_forward(x, adj, W, a_fc))
    ref = jax.block_until_ready(gat_reference(x, adj, W, a_fc))

    assert out.shape == (B, N, Fout)
    assert jnp.allclose(out, ref, rtol=2e-3, atol=2e-3), float(
        jnp.max(jnp.abs(out - ref)))

    print("KERNEL_OK")
</pallas_src>

<mosaic_0001>
module attributes {stable_mosaic.version = 11 : i64} {
  func.func @_gat_fused_kernel(%arg0: i32, %arg1: i32, %arg2: memref<32xf32, #tpu.memory_space<smem>>, %arg3: memref<2x64x32xf32, #tpu.memory_space<vmem>>, %arg4: memref<32x32xf32, #tpu.memory_space<vmem>>, %arg5: memref<1x64x64xf32, #tpu.memory_space<vmem>>, %arg6: memref<1x64x32xf32, #tpu.memory_space<vmem>>, %arg7: memref<2x64x32xf32, #tpu.memory_space<vmem>>, %arg8: memref<2x64x64xf32, #tpu.memory_space<vmem>>, %arg9: memref<1x1xf32, #tpu.memory_space<vmem>>) attributes {dimension_semantics = [#tpu.dimension_semantics<arbitrary>, #tpu.dimension_semantics<arbitrary>], iteration_bounds = array<i64: 2, 2>, scalar_prefetch = 0 : i64, scratch_operands = 3 : i64, tpu.core_type = #tpu.core_type<tc>, window_params = [{transform_indices = @transform_0, window_bounds = array<i64: 32>}, {pipeline_mode = #tpu.pipeline_mode<synchronous>, transform_indices = @transform_1, window_bounds = array<i64: 2, 64, 32>}, {pipeline_mode = #tpu.pipeline_mode<synchronous>, transform_indices = @transform_2, window_bounds = array<i64: 32, 32>}, {transform_indices = @transform_3, window_bounds = array<i64: 1, 64, 64>}, {transform_indices = @transform_4, window_bounds = array<i64: 1, 64, 32>}]} {
    %c0_i32 = arith.constant 0 : i32
    %0 = arith.cmpi eq, %arg0, %c0_i32 : i32
    %1 = arith.extui %0 : i1 to i32
    %c0_i32_0 = arith.constant 0 : i32
    %2 = arith.cmpi ne, %1, %c0_i32_0 : i32
    scf.if %2 {
      %c0_i32_2 = arith.constant 0 : i32
      %6 = arith.cmpi eq, %arg1, %c0_i32_2 : i32
      %7 = arith.extui %6 : i1 to i32
      %c0_i32_3 = arith.constant 0 : i32
      %8 = arith.cmpi ne, %7, %c0_i32_3 : i32
      scf.if %8 {
        %c0_22 = arith.constant 0 : index
        %c0_23 = arith.constant 0 : index
        %c0_24 = arith.constant 0 : index
        %555 = vector.load %arg3[%c0_22, %c0_23, %c0_24] : memref<2x64x32xf32, #tpu.memory_space<vmem>>, vector<2x64x32xf32>
        %556 = vector.shape_cast %555 : vector<2x64x32xf32> to vector<128x32xf32>
        %c0_25 = arith.constant 0 : index
        %c0_26 = arith.constant 0 : index
        %557 = vector.load %arg4[%c0_25, %c0_26] : memref<32x32xf32, #tpu.memory_space<vmem>>, vector<32x32xf32>
        %cst_27 = arith.constant dense<0.000000e+00> : vector<128x32xf32>
        %558 = tpu.matmul %556, %557, %cst_27 {dimension_numbers = #tpu.dot_dimension_numbers<[1], [0], [0], [1], [0, 0, 1, 1], [], []>} : vector<128x32xf32>, vector<32x32xf32>, vector<128x32xf32> -> vector<128x32xf32>
        %559 = vector.shape_cast %558 : vector<128x32xf32> to vector<2x64x32xf32>
        %c0_28 = arith.constant 0 : index
        %c0_29 = arith.constant 0 : index
        %c0_30 = arith.constant 0 : index
        %560 = vector.load %arg7[%c0_28, %c0_29, %c0_30] : memref<2x64x32xf32, #tpu.memory_space<vmem>>, vector<2x64x32xf32>
        tpu.vector_store %arg7[%c0_28, %c0_29, %c0_30], %559 {strides = array<i32>} : memref<2x64x32xf32, #tpu.memory_space<vmem>>, vector<2x64x32xf32>,
        %cst_31 = arith.constant 0.000000e+00 : f32
        %561 = vector.broadcast %cst_31 : f32 to vector<1x1xf32>
        %c0_32 = arith.constant 0 : index
        %c0_33 = arith.constant 0 : index
        %562 = vector.load %arg9[%c0_32, %c0_33] : memref<1x1xf32, #tpu.memory_space<vmem>>, vector<1x1xf32>
        tpu.vector_store %arg9[%c0_32, %c0_33], %561 {strides = array<i32>} : memref<1x1xf32, #tpu.memory_space<vmem>>, vector<1x1xf32>,
      } else {
      }
      %9 = arith.index_cast %arg1 : i32 to index
      %c0 = arith.constant 0 : index
      %c0_4 = arith.constant 0 : index
      %10 = vector.load %arg7[%9, %c0, %c0_4] : memref<2x64x32xf32, #tpu.memory_space<vmem>>, vector<1x64x32xf32>
      %11 = vector.shape_cast %10 : vector<1x64x32xf32> to vector<64x32xf32>
      %12 = tpu.transpose %11, [1, 0] : vector<64x32xf32> -> vector<32x64xf32>
      %cst = arith.constant 0.000000e+00 : f32
      %13 = vector.broadcast %cst : f32 to vector<64x64xf32>
      %cst_5 = arith.constant 0.000000e+00 : f32
      %14 = vector.broadcast %cst_5 : f32 to vector<64x1xf32>
      %cst_6 = arith.constant 0.000000e+00 : f32
      %15 = vector.broadcast %cst_6 : f32 to vector<1x64xf32>
      %c0_7 = arith.constant 0 : index
      %16 = memref.load %arg2[%c0_7] : memref<32xf32, #tpu.memory_space<smem>>
      %17 = vector.extract_strided_slice %11 {offsets = [0, 0], sizes = [64, 1], strides = [1, 1]} : vector<64x32xf32> to vector<64x1xf32>
      %18 = vector.extract_strided_slice %12 {offsets = [0, 0], sizes = [1, 64], strides = [1, 1]} : vector<32x64xf32> to vector<1x64xf32>
      %19 = vector.broadcast %17 : vector<64x1xf32> to vector<64x64xf32>
      %20 = vector.broadcast %18 : vector<1x64xf32> to vector<64x64xf32>
      %21 = arith.addf %19, %20 : vector<64x64xf32>
      %22 = math.absf %21 : vector<64x64xf32>
      %23 = vector.broadcast %16 : f32 to vector<64x64xf32>
      %24 = arith.mulf %23, %22 : vector<64x64xf32>
      %25 = arith.addf %13, %24 : vector<64x64xf32>
      %26 = vector.broadcast %16 : f32 to vector<64x1xf32>
      %27 = arith.mulf %26, %17 : vector<64x1xf32>
      %28 = arith.addf %14, %27 : vector<64x1xf32>
      %29 = vector.broadcast %16 : f32 to vector<1x64xf32>
      %30 = arith.mulf %29, %18 : vector<1x64xf32>
      %31 = arith.addf %15, %30 : vector<1x64xf32>
      %c1 = arith.constant 1 : index
      %32 = memref.load %arg2[%c1] : memref<32xf32, #tpu.memory_space<smem>>
      %33 = vector.extract_strided_slice %11 {offsets = [0, 1], sizes = [64, 1], strides = [1, 1]} : vector<64x32xf32> to vector<64x1xf32>
      %34 = vector.extract_strided_slice %12 {offsets = [1, 0], sizes = [1, 64], strides = [1, 1]} : vector<32x64xf32> to vector<1x64xf32>
      %35 = vector.broadcast %33 : vector<64x1xf32> to vector<64x64xf32>
      %36 = vector.broadcast %34 : vector<1x64xf32> to vector<64x64xf32>
      %37 = arith.addf %35, %36 : vector<64x64xf32>
      %38 = math.absf %37 : vector<64x64xf32>
      %39 = vector.broadcast %32 : f32 to vector<64x64xf32>
      %40 = arith.mulf %39, %38 : vector<64x64xf32>
      %41 = arith.addf %25, %40 : vector<64x64xf32>
      %42 = vector.broadcast %32 : f32 to vector<64x1xf32>
      %43 = arith.mulf %42, %33 : vector<64x1xf32>
      %44 = arith.addf %28, %43 : vector<64x1xf32>
      %45 = vector.broadcast %32 : f32 to vector<1x64xf32>
      %46 = arith.mulf %45, %34 : vector<1x64xf32>
      %47 = arith.addf %31, %46 : vector<1x64xf32>
      %c2 = arith.constant 2 : index
      %48 = memref.load %arg2[%c2] : memref<32xf32, #tpu.memory_space<smem>>
      %49 = vector.extract_strided_slice %11 {offsets = [0, 2], sizes = [64, 1], strides = [1, 1]} : vector<64x32xf32> to vector<64x1xf32>
      %50 = vector.extract_strided_slice %12 {offsets = [2, 0], sizes = [1, 64], strides = [1, 1]} : vector<32x64xf32> to vector<1x64xf32>
      %51 = vector.broadcast %49 : vector<64x1xf32> to vector<64x64xf32>
      %52 = vector.broadcast %50 : vector<1x64xf32> to vector<64x64xf32>
      %53 = arith.addf %51, %52 : vector<64x64xf32>
      %54 = math.absf %53 : vector<64x64xf32>
      %55 = vector.broadcast %48 : f32 to vector<64x64xf32>
      %56 = arith.mulf %55, %54 : vector<64x64xf32>
      %57 = arith.addf %41, %56 : vector<64x64xf32>
      %58 = vector.broadcast %48 : f32 to vector<64x1xf32>
      %59 = arith.mulf %58, %49 : vector<64x1xf32>
      %60 = arith.addf %44, %59 : vector<64x1xf32>
      %61 = vector.broadcast %48 : f32 to vector<1x64xf32>
      %62 = arith.mulf %61, %50 : vector<1x64xf32>
      %63 = arith.addf %47, %62 : vector<1x64xf32>
      %c3 = arith.constant 3 : index
      %64 = memref.load %arg2[%c3] : memref<32xf32, #tpu.memory_space<smem>>
      %65 = vector.extract_strided_slice %11 {offsets = [0, 3], sizes = [64, 1], strides = [1, 1]} : vector<64x32xf32> to vector<64x1xf32>
      %66 = vector.extract_strided_slice %12 {offsets = [3, 0], sizes = [1, 64], strides = [1, 1]} : vector<32x64xf32> to vector<1x64xf32>
      %67 = vector.broadcast %65 : vector<64x1xf32> to vector<64x64xf32>
      %68 = vector.broadcast %66 : vector<1x64xf32> to vector<64x64xf32>
      %69 = arith.addf %67, %68 : vector<64x64xf32>
      %70 = math.absf %69 : vector<64x64xf32>
      %71 = vector.broadcast %64 : f32 to vector<64x64xf32>
      %72 = arith.mulf %71, %70 : vector<64x64xf32>
      %73 = arith.addf %57, %72 : vector<64x64xf32>
      %74 = vector.broadcast %64 : f32 to vector<64x1xf32>
      %75 = arith.mulf %74, %65 : vector<64x1xf32>
      %76 = arith.addf %60, %75 : vector<64x1xf32>
      %77 = vector.broadcast %64 : f32 to vector<1x64xf32>
      %78 = arith.mulf %77, %66 : vector<1x64xf32>
      %79 = arith.addf %63, %78 : vector<1x64xf32>
      %c4 = arith.constant 4 : index
      %80 = memref.load %arg2[%c4] : memref<32xf32, #tpu.memory_space<smem>>
      %81 = vector.extract_strided_slice %11 {offsets = [0, 4], sizes = [64, 1], strides = [1, 1]} : vector<64x32xf32> to vector<64x1xf32>
      %82 = vector.extract_strided_slice %12 {offsets = [4, 0], sizes = [1, 64], strides = [1, 1]} : vector<32x64xf32> to vector<1x64xf32>
      %83 = vector.broadcast %81 : vector<64x1xf32> to vector<64x64xf32>
      %84 = vector.broadcast %82 : vector<1x64xf32> to vector<64x64xf32>
      %85 = arith.addf %83, %84 : vector<64x64xf32>
      %86 = math.absf %85 : vector<64x64xf32>
      %87 = vector.broadcast %80 : f32 to vector<64x64xf32>
      %88 = arith.mulf %87, %86 : vector<64x64xf32>
      %89 = arith.addf %73, %88 : vector<64x64xf32>
      %90 = vector.broadcast %80 : f32 to vector<64x1xf32>
      %91 = arith.mulf %90, %81 : vector<64x1xf32>
      %92 = arith.addf %76, %91 : vector<64x1xf32>
      %93 = vector.broadcast %80 : f32 to vector<1x64xf32>
      %94 = arith.mulf %93, %82 : vector<1x64xf32>
      %95 = arith.addf %79, %94 : vector<1x64xf32>
      %c5 = arith.constant 5 : index
      %96 = memref.load %arg2[%c5] : memref<32xf32, #tpu.memory_space<smem>>
      %97 = vector.extract_strided_slice %11 {offsets = [0, 5], sizes = [64, 1], strides = [1, 1]} : vector<64x32xf32> to vector<64x1xf32>
      %98 = vector.extract_strided_slice %12 {offsets = [5, 0], sizes = [1, 64], strides = [1, 1]} : vector<32x64xf32> to vector<1x64xf32>
      %99 = vector.broadcast %97 : vector<64x1xf32> to vector<64x64xf32>
      %100 = vector.broadcast %98 : vector<1x64xf32> to vector<64x64xf32>
      %101 = arith.addf %99, %100 : vector<64x64xf32>
      %102 = math.absf %101 : vector<64x64xf32>
      %103 = vector.broadcast %96 : f32 to vector<64x64xf32>
      %104 = arith.mulf %103, %102 : vector<64x64xf32>
      %105 = arith.addf %89, %104 : vector<64x64xf32>
      %106 = vector.broadcast %96 : f32 to vector<64x1xf32>
      %107 = arith.mulf %106, %97 : vector<64x1xf32>
      %108 = arith.addf %92, %107 : vector<64x1xf32>
      %109 = vector.broadcast %96 : f32 to vector<1x64xf32>
      %110 = arith.mulf %109, %98 : vector<1x64xf32>
      %111 = arith.addf %95, %110 : vector<1x64xf32>
      %c6 = arith.constant 6 : index
      %112 = memref.load %arg2[%c6] : memref<32xf32, #tpu.memory_space<smem>>
      %113 = vector.extract_strided_slice %11 {offsets = [0, 6], sizes = [64, 1], strides = [1, 1]} : vector<64x32xf32> to vector<64x1xf32>
      %114 = vector.extract_strided_slice %12 {offsets = [6, 0], sizes = [1, 64], strides = [1, 1]} : vector<32x64xf32> to vector<1x64xf32>
      %115 = vector.broadcast %113 : vector<64x1xf32> to vector<64x64xf32>
      %116 = vector.broadcast %114 : vector<1x64xf32> to vector<64x64xf32>
      %117 = arith.addf %115, %116 : vector<64x64xf32>
      %118 = math.absf %117 : vector<64x64xf32>
      %119 = vector.broadcast %112 : f32 to vector<64x64xf32>
      %120 = arith.mulf %119, %118 : vector<64x64xf32>
      %121 = arith.addf %105, %120 : vector<64x64xf32>
      %122 = vector.broadcast %112 : f32 to vector<64x1xf32>
      %123 = arith.mulf %122, %113 : vector<64x1xf32>
      %124 = arith.addf %108, %123 : vector<64x1xf32>
      %125 = vector.broadcast %112 : f32 to vector<1x64xf32>
      %126 = arith.mulf %125, %114 : vector<1x64xf32>
      %127 = arith.addf %111, %126 : vector<1x64xf32>
      %c7 = arith.constant 7 : index
      %128 = memref.load %arg2[%c7] : memref<32xf32, #tpu.memory_space<smem>>
      %129 = vector.extract_strided_slice %11 {offsets = [0, 7], sizes = [64, 1], strides = [1, 1]} : vector<64x32xf32> to vector<64x1xf32>
      %130 = vector.extract_strided_slice %12 {offsets = [7, 0], sizes = [1, 64], strides = [1, 1]} : vector<32x64xf32> to vector<1x64xf32>
      %131 = vector.broadcast %129 : vector<64x1xf32> to vector<64x64xf32>
      %132 = vector.broadcast %130 : vector<1x64xf32> to vector<64x64xf32>
      %133 = arith.addf %131, %132 : vector<64x64xf32>
      %134 = math.absf %133 : vector<64x64xf32>
      %135 = vector.broadcast %128 : f32 to vector<64x64xf32>
      %136 = arith.mulf %135, %134 : vector<64x64xf32>
      %137 = arith.addf %121, %136 : vector<64x64xf32>
      %138 = vector.broadcast %128 : f32 to vector<64x1xf32>
      %139 = arith.mulf %138, %129 : vector<64x1xf32>
      %140 = arith.addf %124, %139 : vector<64x1xf32>
      %141 = vector.broadcast %128 : f32 to vector<1x64xf32>
      %142 = arith.mulf %141, %130 : vector<1x64xf32>
      %143 = arith.addf %127, %142 : vector<1x64xf32>
      %c8 = arith.constant 8 : index
      %144 = memref.load %arg2[%c8] : memref<32xf32, #tpu.memory_space<smem>>
      %145 = vector.extract_strided_slice %11 {offsets = [0, 8], sizes = [64, 1], strides = [1, 1]} : vector<64x32xf32> to vector<64x1xf32>
      %146 = vector.extract_strided_slice %12 {offsets = [8, 0], sizes = [1, 64], strides = [1, 1]} : vector<32x64xf32> to vector<1x64xf32>
      %147 = vector.broadcast %145 : vector<64x1xf32> to vector<64x64xf32>
      %148 = vector.broadcast %146 : vector<1x64xf32> to vector<64x64xf32>
      %149 = arith.addf %147, %148 : vector<64x64xf32>
      %150 = math.absf %149 : vector<64x64xf32>
      %151 = vector.broadcast %144 : f32 to vector<64x64xf32>
      %152 = arith.mulf %151, %150 : vector<64x64xf32>
      %153 = arith.addf %137, %152 : vector<64x64xf32>
      %154 = vector.broadcast %144 : f32 to vector<64x1xf32>
      %155 = arith.mulf %154, %145 : vector<64x1xf32>
      %156 = arith.addf %140, %155 : vector<64x1xf32>
      %157 = vector.broadcast %144 : f32 to vector<1x64xf32>
      %158 = arith.mulf %157, %146 : vector<1x64xf32>
      %159 = arith.addf %143, %158 : vector<1x64xf32>
      %c9 = arith.constant 9 : index
      %160 = memref.load %arg2[%c9] : memref<32xf32, #tpu.memory_space<smem>>
      %161 = vector.extract_strided_slice %11 {offsets = [0, 9], sizes = [64, 1], strides = [1, 1]} : vector<64x32xf32> to vector<64x1xf32>
      %162 = vector.extract_strided_slice %12 {offsets = [9, 0], sizes = [1, 64], strides = [1, 1]} : vector<32x64xf32> to vector<1x64xf32>
      %163 = vector.broadcast %161 : vector<64x1xf32> to vector<64x64xf32>
      %164 = vector.broadcast %162 : vector<1x64xf32> to vector<64x64xf32>
      %165 = arith.addf %163, %164 : vector<64x64xf32>
      %166 = math.absf %165 : vector<64x64xf32>
      %167 = vector.broadcast %160 : f32 to vector<64x64xf32>
      %168 = arith.mulf %167, %166 : vector<64x64xf32>
      %169 = arith.addf %153, %168 : vector<64x64xf32>
      %170 = vector.broadcast %160 : f32 to vector<64x1xf32>
      %171 = arith.mulf %170, %161 : vector<64x1xf32>
      %172 = arith.addf %156, %171 : vector<64x1xf32>
      %173 = vector.broadcast %160 : f32 to vector<1x64xf32>
      %174 = arith.mulf %173, %162 : vector<1x64xf32>
      %175 = arith.addf %159, %174 : vector<1x64xf32>
      %c10 = arith.constant 10 : index
      %176 = memref.load %arg2[%c10] : memref<32xf32, #tpu.memory_space<smem>>
      %177 = vector.extract_strided_slice %11 {offsets = [0, 10], sizes = [64, 1], strides = [1, 1]} : vector<64x32xf32> to vector<64x1xf32>
      %178 = vector.extract_strided_slice %12 {offsets = [10, 0], sizes = [1, 64], strides = [1, 1]} : vector<32x64xf32> to vector<1x64xf32>
      %179 = vector.broadcast %177 : vector<64x1xf32> to vector<64x64xf32>
      %180 = vector.broadcast %178 : vector<1x64xf32> to vector<64x64xf32>
      %181 = arith.addf %179, %180 : vector<64x64xf32>
      %182 = math.absf %181 : vector<64x64xf32>
      %183 = vector.broadcast %176 : f32 to vector<64x64xf32>
      %184 = arith.mulf %183, %182 : vector<64x64xf32>
      %185 = arith.addf %169, %184 : vector<64x64xf32>
      %186 = vector.broadcast %176 : f32 to vector<64x1xf32>
      %187 = arith.mulf %186, %177 : vector<64x1xf32>
      %188 = arith.addf %172, %187 : vector<64x1xf32>
      %189 = vector.broadcast %176 : f32 to vector<1x64xf32>
      %190 = arith.mulf %189, %178 : vector<1x64xf32>
      %191 = arith.addf %175, %190 : vector<1x64xf32>
      %c11 = arith.constant 11 : index
      %192 = memref.load %arg2[%c11] : memref<32xf32, #tpu.memory_space<smem>>
      %193 = vector.extract_strided_slice %11 {offsets = [0, 11], sizes = [64, 1], strides = [1, 1]} : vector<64x32xf32> to vector<64x1xf32>
      %194 = vector.extract_strided_slice %12 {offsets = [11, 0], sizes = [1, 64], strides = [1, 1]} : vector<32x64xf32> to vector<1x64xf32>
      %195 = vector.broadcast %193 : vector<64x1xf32> to vector<64x64xf32>
      %196 = vector.broadcast %194 : vector<1x64xf32> to vector<64x64xf32>
      %197 = arith.addf %195, %196 : vector<64x64xf32>
      %198 = math.absf %197 : vector<64x64xf32>
      %199 = vector.broadcast %192 : f32 to vector<64x64xf32>
      %200 = arith.mulf %199, %198 : vector<64x64xf32>
      %201 = arith.addf %185, %200 : vector<64x64xf32>
      %202 = vector.broadcast %192 : f32 to vector<64x1xf32>
      %203 = arith.mulf %202, %193 : vector<64x1xf32>
      %204 = arith.addf %188, %203 : vector<64x1xf32>
      %205 = vector.broadcast %192 : f32 to vector<1x64xf32>
      %206 = arith.mulf %205, %194 : vector<1x64xf32>
      %207 = arith.addf %191, %206 : vector<1x64xf32>
      %c12 = arith.constant 12 : index
      %208 = memref.load %arg2[%c12] : memref<32xf32, #tpu.memory_space<smem>>
      %209 = vector.extract_strided_slice %11 {offsets = [0, 12], sizes = [64, 1], strides = [1, 1]} : vector<64x32xf32> to vector<64x1xf32>
      %210 = vector.extract_strided_slice %12 {offsets = [12, 0], sizes = [1, 64], strides = [1, 1]} : vector<32x64xf32> to vector<1x64xf32>
      %211 = vector.broadcast %209 : vector<64x1xf32> to vector<64x64xf32>
      %212 = vector.broadcast %210 : vector<1x64xf32> to vector<64x64xf32>
      %213 = arith.addf %211, %212 : vector<64x64xf32>
      %214 = math.absf %213 : vector<64x64xf32>
      %215 = vector.broadcast %208 : f32 to vector<64x64xf32>
      %216 = arith.mulf %215, %214 : vector<64x64xf32>
      %217 = arith.addf %201, %216 : vector<64x64xf32>
      %218 = vector.broadcast %208 : f32 to vector<64x1xf32>
      %219 = arith.mulf %218, %209 : vector<64x1xf32>
      %220 = arith.addf %204, %219 : vector<64x1xf32>
      %221 = vector.broadcast %208 : f32 to vector<1x64xf32>
      %222 = arith.mulf %221, %210 : vector<1x64xf32>
      %223 = arith.addf %207, %222 : vector<1x64xf32>
      %c13 = arith.constant 13 : index
      %224 = memref.load %arg2[%c13] : memref<32xf32, #tpu.memory_space<smem>>
      %225 = vector.extract_strided_slice %11 {offsets = [0, 13], sizes = [64, 1], strides = [1, 1]} : vector<64x32xf32> to vector<64x1xf32>
      %226 = vector.extract_strided_slice %12 {offsets = [13, 0], sizes = [1, 64], strides = [1, 1]} : vector<32x64xf32> to vector<1x64xf32>
      %227 = vector.broadcast %225 : vector<64x1xf32> to vector<64x64xf32>
      %228 = vector.broadcast %226 : vector<1x64xf32> to vector<64x64xf32>
      %229 = arith.addf %227, %228 : vector<64x64xf32>
      %230 = math.absf %229 : vector<64x64xf32>
      %231 = vector.broadcast %224 : f32 to vector<64x64xf32>
      %232 = arith.mulf %231, %230 : vector<64x64xf32>
      %233 = arith.addf %217, %232 : vector<64x64xf32>
      %234 = vector.broadcast %224 : f32 to vector<64x1xf32>
      %235 = arith.mulf %234, %225 : vector<64x1xf32>
      %236 = arith.addf %220, %235 : vector<64x1xf32>
      %237 = vector.broadcast %224 : f32 to vector<1x64xf32>
      %238 = arith.mulf %237, %226 : vector<1x64xf32>
      %239 = arith.addf %223, %238 : vector<1x64xf32>
      %c14 = arith.constant 14 : index
      %240 = memref.load %arg2[%c14] : memref<32xf32, #tpu.memory_space<smem>>
      %241 = vector.extract_strided_slice %11 {offsets = [0, 14], sizes = [64, 1], strides = [1, 1]} : vector<64x32xf32> to vector<64x1xf32>
      %242 = vector.extract_strided_slice %12 {offsets = [14, 0], sizes = [1, 64], strides = [1, 1]} : vector<32x64xf32> to vector<1x64xf32>
      %243 = vector.broadcast %241 : vector<64x1xf32> to vector<64x64xf32>
      %244 = vector.broadcast %242 : vector<1x64xf32> to vector<64x64xf32>
      %245 = arith.addf %243, %244 : vector<64x64xf32>
      %246 = math.absf %245 : vector<64x64xf32>
      %247 = vector.broadcast %240 : f32 to vector<64x64xf32>
      %248 = arith.mulf %247, %246 : vector<64x64xf32>
      %249 = arith.addf %233, %248 : vector<64x64xf32>
      %250 = vector.broadcast %240 : f32 to vector<64x1xf32>
      %251 = arith.mulf %250, %241 : vector<64x1xf32>
      %252 = arith.addf %236, %251 : vector<64x1xf32>
      %253 = vector.broadcast %240 : f32 to vector<1x64xf32>
      %254 = arith.mulf %253, %242 : vector<1x64xf32>
      %255 = arith.addf %239, %254 : vector<1x64xf32>
      %c15 = arith.constant 15 : index
      %256 = memref.load %arg2[%c15] : memref<32xf32, #tpu.memory_space<smem>>
      %257 = vector.extract_strided_slice %11 {offsets = [0, 15], sizes = [64, 1], strides = [1, 1]} : vector<64x32xf32> to vector<64x1xf32>
      %258 = vector.extract_strided_slice %12 {offsets = [15, 0], sizes = [1, 64], strides = [1, 1]} : vector<32x64xf32> to vector<1x64xf32>
      %259 = vector.broadcast %257 : vector<64x1xf32> to vector<64x64xf32>
      %260 = vector.broadcast %258 : vector<1x64xf32> to vector<64x64xf32>
      %261 = arith.addf %259, %260 : vector<64x64xf32>
      %262 = math.absf %261 : vector<64x64xf32>
      %263 = vector.broadcast %256 : f32 to vector<64x64xf32>
      %264 = arith.mulf %263, %262 : vector<64x64xf32>
      %265 = arith.addf %249, %264 : vector<64x64xf32>
      %266 = vector.broadcast %256 : f32 to vector<64x1xf32>
      %267 = arith.mulf %266, %257 : vector<64x1xf32>
      %268 = arith.addf %252, %267 : vector<64x1xf32>
      %269 = vector.broadcast %256 : f32 to vector<1x64xf32>
      %270 = arith.mulf %269, %258 : vector<1x64xf32>
      %271 = arith.addf %255, %270 : vector<1x64xf32>
      %c16 = arith.constant 16 : index
      %272 = memref.load %arg2[%c16] : memref<32xf32, #tpu.memory_space<smem>>
      %273 = vector.extract_strided_slice %11 {offsets = [0, 16], sizes = [64, 1], strides = [1, 1]} : vector<64x32xf32> to vector<64x1xf32>
      %274 = vector.extract_strided_slice %12 {offsets = [16, 0], sizes = [1, 64], strides = [1, 1]} : vector<32x64xf32> to vector<1x64xf32>
      %275 = vector.broadcast %273 : vector<64x1xf32> to vector<64x64xf32>
      %276 = vector.broadcast %274 : vector<1x64xf32> to vector<64x64xf32>
      %277 = arith.addf %275, %276 : vector<64x64xf32>
      %278 = math.absf %277 : vector<64x64xf32>
      %279 = vector.broadcast %272 : f32 to vector<64x64xf32>
      %280 = arith.mulf %279, %278 : vector<64x64xf32>
      %281 = arith.addf %265, %280 : vector<64x64xf32>
      %282 = vector.broadcast %272 : f32 to vector<64x1xf32>
      %283 = arith.mulf %282, %273 : vector<64x1xf32>
      %284 = arith.addf %268, %283 : vector<64x1xf32>
      %285 = vector.broadcast %272 : f32 to vector<1x64xf32>
      %286 = arith.mulf %285, %274 : vector<1x64xf32>
      %287 = arith.addf %271, %286 : vector<1x64xf32>
      %c17 = arith.constant 17 : index
      %288 = memref.load %arg2[%c17] : memref<32xf32, #tpu.memory_space<smem>>
      %289 = vector.extract_strided_slice %11 {offsets = [0, 17], sizes = [64, 1], strides = [1, 1]} : vector<64x32xf32> to vector<64x1xf32>
      %290 = vector.extract_strided_slice %12 {offsets = [17, 0], sizes = [1, 64], strides = [1, 1]} : vector<32x64xf32> to vector<1x64xf32>
      %291 = vector.broadcast %289 : vector<64x1xf32> to vector<64x64xf32>
      %292 = vector.broadcast %290 : vector<1x64xf32> to vector<64x64xf32>
      %293 = arith.addf %291, %292 : vector<64x64xf32>
      %294 = math.absf %293 : vector<64x64xf32>
      %295 = vector.broadcast %288 : f32 to vector<64x64xf32>
      %296 = arith.mulf %295, %294 : vector<64x64xf32>
      %297 = arith.addf %281, %296 : vector<64x64xf32>
      %298 = vector.broadcast %288 : f32 to vector<64x1xf32>
      %299 = arith.mulf %298, %289 : vector<64x1xf32>
      %300 = arith.addf %284, %299 : vector<64x1xf32>
      %301 = vector.broadcast %288 : f32 to vector<1x64xf32>
      %302 = arith.mulf %301, %290 : vector<1x64xf32>
      %303 = arith.addf %287, %302 : vector<1x64xf32>
      %c18 = arith.constant 18 : index
      %304 = memref.load %arg2[%c18] : memref<32xf32, #tpu.memory_space<smem>>
      %305 = vector.extract_strided_slice %11 {offsets = [0, 18], sizes = [64, 1], strides = [1, 1]} : vector<64x32xf32> to vector<64x1xf32>
      %306 = vector.extract_strided_slice %12 {offsets = [18, 0], sizes = [1, 64], strides = [1, 1]} : vector<32x64xf32> to vector<1x64xf32>
      %307 = vector.broadcast %305 : vector<64x1xf32> to vector<64x64xf32>
      %308 = vector.broadcast %306 : vector<1x64xf32> to vector<64x64xf32>
      %309 = arith.addf %307, %308 : vector<64x64xf32>
      %310 = math.absf %309 : vector<64x64xf32>
      %311 = vector.broadcast %304 : f32 to vector<64x64xf32>
      %312 = arith.mulf %311, %310 : vector<64x64xf32>
      %313 = arith.addf %297, %312 : vector<64x64xf32>
      %314 = vector.broadcast %304 : f32 to vector<64x1xf32>
      %315 = arith.mulf %314, %305 : vector<64x1xf32>
      %316 = arith.addf %300, %315 : vector<64x1xf32>
      %317 = vector.broadcast %304 : f32 to vector<1x64xf32>
      %318 = arith.mulf %317, %306 : vector<1x64xf32>
      %319 = arith.addf %303, %318 : vector<1x64xf32>
      %c19 = arith.constant 19 : index
      %320 = memref.load %arg2[%c19] : memref<32xf32, #tpu.memory_space<smem>>
      %321 = vector.extract_strided_slice %11 {offsets = [0, 19], sizes = [64, 1], strides = [1, 1]} : vector<64x32xf32> to vector<64x1xf32>
      %322 = vector.extract_strided_slice %12 {offsets = [19, 0], sizes = [1, 64], strides = [1, 1]} : vector<32x64xf32> to vector<1x64xf32>
      %323 = vector.broadcast %321 : vector<64x1xf32> to vector<64x64xf32>
      %324 = vector.broadcast %322 : vector<1x64xf32> to vector<64x64xf32>
      %325 = arith.addf %323, %324 : vector<64x64xf32>
      %326 = math.absf %325 : vector<64x64xf32>
      %327 = vector.broadcast %320 : f32 to vector<64x64xf32>
      %328 = arith.mulf %327, %326 : vector<64x64xf32>
      %329 = arith.addf %313, %328 : vector<64x64xf32>
      %330 = vector.broadcast %320 : f32 to vector<64x1xf32>
      %331 = arith.mulf %330, %321 : vector<64x1xf32>
      %332 = arith.addf %316, %331 : vector<64x1xf32>
      %333 = vector.broadcast %320 : f32 to vector<1x64xf32>
      %334 = arith.mulf %333, %322 : vector<1x64xf32>
      %335 = arith.addf %319, %334 : vector<1x64xf32>
      %c20 = arith.constant 20 : index
      %336 = memref.load %arg2[%c20] : memref<32xf32, #tpu.memory_space<smem>>
      %337 = vector.extract_strided_slice %11 {offsets = [0, 20], sizes = [64, 1], strides = [1, 1]} : vector<64x32xf32> to vector<64x1xf32>
      %338 = vector.extract_strided_slice %12 {offsets = [20, 0], sizes = [1, 64], strides = [1, 1]} : vector<32x64xf32> to vector<1x64xf32>
      %339 = vector.broadcast %337 : vector<64x1xf32> to vector<64x64xf32>
      %340 = vector.broadcast %338 : vector<1x64xf32> to vector<64x64xf32>
      %341 = arith.addf %339, %340 : vector<64x64xf32>
      %342 = math.absf %341 : vector<64x64xf32>
      %343 = vector.broadcast %336 : f32 to vector<64x64xf32>
      %344 = arith.mulf %343, %342 : vector<64x64xf32>
      %345 = arith.addf %329, %344 : vector<64x64xf32>
      %346 = vector.broadcast %336 : f32 to vector<64x1xf32>
      %347 = arith.mulf %346, %337 : vector<64x1xf32>
      %348 = arith.addf %332, %347 : vector<64x1xf32>
      %349 = vector.broadcast %336 : f32 to vector<1x64xf32>
      %350 = arith.mulf %349, %338 : vector<1x64xf32>
      %351 = arith.addf %335, %350 : vector<1x64xf32>
      %c21 = arith.constant 21 : index
      %352 = memref.load %arg2[%c21] : memref<32xf32, #tpu.memory_space<smem>>
      %353 = vector.extract_strided_slice %11 {offsets = [0, 21], sizes = [64, 1], strides = [1, 1]} : vector<64x32xf32> to vector<64x1xf32>
      %354 = vector.extract_strided_slice %12 {offsets = [21, 0], sizes = [1, 64], strides = [1, 1]} : vector<32x64xf32> to vector<1x64xf32>
      %355 = vector.broadcast %353 : vector<64x1xf32> to vector<64x64xf32>
      %356 = vector.broadcast %354 : vector<1x64xf32> to vector<64x64xf32>
      %357 = arith.addf %355, %356 : vector<64x64xf32>
      %358 = math.absf %357 : vector<64x64xf32>
      %359 = vector.broadcast %352 : f32 to vector<64x64xf32>
      %360 = arith.mulf %359, %358 : vector<64x64xf32>
      %361 = arith.addf %345, %360 : vector<64x64xf32>
      %362 = vector.broadcast %352 : f32 to vector<64x1xf32>
      %363 = arith.mulf %362, %353 : vector<64x1xf32>
      %364 = arith.addf %348, %363 : vector<64x1xf32>
      %365 = vector.broadcast %352 : f32 to vector<1x64xf32>
      %366 = arith.mulf %365, %354 : vector<1x64xf32>
      %367 = arith.addf %351, %366 : vector<1x64xf32>
      %c22 = arith.constant 22 : index
      %368 = memref.load %arg2[%c22] : memref<32xf32, #tpu.memory_space<smem>>
      %369 = vector.extract_strided_slice %11 {offsets = [0, 22], sizes = [64, 1], strides = [1, 1]} : vector<64x32xf32> to vector<64x1xf32>
      %370 = vector.extract_strided_slice %12 {offsets = [22, 0], sizes = [1, 64], strides = [1, 1]} : vector<32x64xf32> to vector<1x64xf32>
      %371 = vector.broadcast %369 : vector<64x1xf32> to vector<64x64xf32>
      %372 = vector.broadcast %370 : vector<1x64xf32> to vector<64x64xf32>
      %373 = arith.addf %371, %372 : vector<64x64xf32>
      %374 = math.absf %373 : vector<64x64xf32>
      %375 = vector.broadcast %368 : f32 to vector<64x64xf32>
      %376 = arith.mulf %375, %374 : vector<64x64xf32>
      %377 = arith.addf %361, %376 : vector<64x64xf32>
      %378 = vector.broadcast %368 : f32 to vector<64x1xf32>
      %379 = arith.mulf %378, %369 : vector<64x1xf32>
      %380 = arith.addf %364, %379 : vector<64x1xf32>
      %381 = vector.broadcast %368 : f32 to vector<1x64xf32>
      %382 = arith.mulf %381, %370 : vector<1x64xf32>
      %383 = arith.addf %367, %382 : vector<1x64xf32>
      %c23 = arith.constant 23 : index
      %384 = memref.load %arg2[%c23] : memref<32xf32, #tpu.memory_space<smem>>
      %385 = vector.extract_strided_slice %11 {offsets = [0, 23], sizes = [64, 1], strides = [1, 1]} : vector<64x32xf32> to vector<64x1xf32>
      %386 = vector.extract_strided_slice %12 {offsets = [23, 0], sizes = [1, 64], strides = [1, 1]} : vector<32x64xf32> to vector<1x64xf32>
      %387 = vector.broadcast %385 : vector<64x1xf32> to vector<64x64xf32>
      %388 = vector.broadcast %386 : vector<1x64xf32> to vector<64x64xf32>
      %389 = arith.addf %387, %388 : vector<64x64xf32>
      %390 = math.absf %389 : vector<64x64xf32>
      %391 = vector.broadcast %384 : f32 to vector<64x64xf32>
      %392 = arith.mulf %391, %390 : vector<64x64xf32>
      %393 = arith.addf %377, %392 : vector<64x64xf32>
      %394 = vector.broadcast %384 : f32 to vector<64x1xf32>
      %395 = arith.mulf %394, %385 : vector<64x1xf32>
      %396 = arith.addf %380, %395 : vector<64x1xf32>
      %397 = vector.broadcast %384 : f32 to vector<1x64xf32>
      %398 = arith.mulf %397, %386 : vector<1x64xf32>
      %399 = arith.addf %383, %398 : vector<1x64xf32>
      %c24 = arith.constant 24 : index
      %400 = memref.load %arg2[%c24] : memref<32xf32, #tpu.memory_space<smem>>
      %401 = vector.extract_strided_slice %11 {offsets = [0, 24], sizes = [64, 1], strides = [1, 1]} : vector<64x32xf32> to vector<64x1xf32>
      %402 = vector.extract_strided_slice %12 {offsets = [24, 0], sizes = [1, 64], strides = [1, 1]} : vector<32x64xf32> to vector<1x64xf32>
      %403 = vector.broadcast %401 : vector<64x1xf32> to vector<64x64xf32>
      %404 = vector.broadcast %402 : vector<1x64xf32> to vector<64x64xf32>
      %405 = arith.addf %403, %404 : vector<64x64xf32>
      %406 = math.absf %405 : vector<64x64xf32>
      %407 = vector.broadcast %400 : f32 to vector<64x64xf32>
      %408 = arith.mulf %407, %406 : vector<64x64xf32>
      %409 = arith.addf %393, %408 : vector<64x64xf32>
      %410 = vector.broadcast %400 : f32 to vector<64x1xf32>
      %411 = arith.mulf %410, %401 : vector<64x1xf32>
      %412 = arith.addf %396, %411 : vector<64x1xf32>
      %413 = vector.broadcast %400 : f32 to vector<1x64xf32>
      %414 = arith.mulf %413, %402 : vector<1x64xf32>
      %415 = arith.addf %399, %414 : vector<1x64xf32>
      %c25 = arith.constant 25 : index
      %416 = memref.load %arg2[%c25] : memref<32xf32, #tpu.memory_space<smem>>
      %417 = vector.extract_strided_slice %11 {offsets = [0, 25], sizes = [64, 1], strides = [1, 1]} : vector<64x32xf32> to vector<64x1xf32>
      %418 = vector.extract_strided_slice %12 {offsets = [25, 0], sizes = [1, 64], strides = [1, 1]} : vector<32x64xf32> to vector<1x64xf32>
      %419 = vector.broadcast %417 : vector<64x1xf32> to vector<64x64xf32>
      %420 = vector.broadcast %418 : vector<1x64xf32> to vector<64x64xf32>
      %421 = arith.addf %419, %420 : vector<64x64xf32>
      %422 = math.absf %421 : vector<64x64xf32>
      %423 = vector.broadcast %416 : f32 to vector<64x64xf32>
      %424 = arith.mulf %423, %422 : vector<64x64xf32>
      %425 = arith.addf %409, %424 : vector<64x64xf32>
      %426 = vector.broadcast %416 : f32 to vector<64x1xf32>
      %427 = arith.mulf %426, %417 : vector<64x1xf32>
      %428 = arith.addf %412, %427 : vector<64x1xf32>
      %429 = vector.broadcast %416 : f32 to vector<1x64xf32>
      %430 = arith.mulf %429, %418 : vector<1x64xf32>
      %431 = arith.addf %415, %430 : vector<1x64xf32>
      %c26 = arith.constant 26 : index
      %432 = memref.load %arg2[%c26] : memref<32xf32, #tpu.memory_space<smem>>
      %433 = vector.extract_strided_slice %11 {offsets = [0, 26], sizes = [64, 1], strides = [1, 1]} : vector<64x32xf32> to vector<64x1xf32>
      %434 = vector.extract_strided_slice %12 {offsets = [26, 0], sizes = [1, 64], strides = [1, 1]} : vector<32x64xf32> to vector<1x64xf32>
      %435 = vector.broadcast %433 : vector<64x1xf32> to vector<64x64xf32>
      %436 = vector.broadcast %434 : vector<1x64xf32> to vector<64x64xf32>
      %437 = arith.addf %435, %436 : vector<64x64xf32>
      %438 = math.absf %437 : vector<64x64xf32>
      %439 = vector.broadcast %432 : f32 to vector<64x64xf32>
      %440 = arith.mulf %439, %438 : vector<64x64xf32>
      %441 = arith.addf %425, %440 : vector<64x64xf32>
      %442 = vector.broadcast %432 : f32 to vector<64x1xf32>
      %443 = arith.mulf %442, %433 : vector<64x1xf32>
      %444 = arith.addf %428, %443 : vector<64x1xf32>
      %445 = vector.broadcast %432 : f32 to vector<1x64xf32>
      %446 = arith.mulf %445, %434 : vector<1x64xf32>
      %447 = arith.addf %431, %446 : vector<1x64xf32>
      %c27 = arith.constant 27 : index
      %448 = memref.load %arg2[%c27] : memref<32xf32, #tpu.memory_space<smem>>
      %449 = vector.extract_strided_slice %11 {offsets = [0, 27], sizes = [64, 1], strides = [1, 1]} : vector<64x32xf32> to vector<64x1xf32>
      %450 = vector.extract_strided_slice %12 {offsets = [27, 0], sizes = [1, 64], strides = [1, 1]} : vector<32x64xf32> to vector<1x64xf32>
      %451 = vector.broadcast %449 : vector<64x1xf32> to vector<64x64xf32>
      %452 = vector.broadcast %450 : vector<1x64xf32> to vector<64x64xf32>
      %453 = arith.addf %451, %452 : vector<64x64xf32>
      %454 = math.absf %453 : vector<64x64xf32>
      %455 = vector.broadcast %448 : f32 to vector<64x64xf32>
      %456 = arith.mulf %455, %454 : vector<64x64xf32>
      %457 = arith.addf %441, %456 : vector<64x64xf32>
      %458 = vector.broadcast %448 : f32 to vector<64x1xf32>
      %459 = arith.mulf %458, %449 : vector<64x1xf32>
      %460 = arith.addf %444, %459 : vector<64x1xf32>
      %461 = vector.broadcast %448 : f32 to vector<1x64xf32>
      %462 = arith.mulf %461, %450 : vector<1x64xf32>
      %463 = arith.addf %447, %462 : vector<1x64xf32>
      %c28 = arith.constant 28 : index
      %464 = memref.load %arg2[%c28] : memref<32xf32, #tpu.memory_space<smem>>
      %465 = vector.extract_strided_slice %11 {offsets = [0, 28], sizes = [64, 1], strides = [1, 1]} : vector<64x32xf32> to vector<64x1xf32>
      %466 = vector.extract_strided_slice %12 {offsets = [28, 0], sizes = [1, 64], strides = [1, 1]} : vector<32x64xf32> to vector<1x64xf32>
      %467 = vector.broadcast %465 : vector<64x1xf32> to vector<64x64xf32>
      %468 = vector.broadcast %466 : vector<1x64xf32> to vector<64x64xf32>
      %469 = arith.addf %467, %468 : vector<64x64xf32>
      %470 = math.absf %469 : vector<64x64xf32>
      %471 = vector.broadcast %464 : f32 to vector<64x64xf32>
      %472 = arith.mulf %471, %470 : vector<64x64xf32>
      %473 = arith.addf %457, %472 : vector<64x64xf32>
      %474 = vector.broadcast %464 : f32 to vector<64x1xf32>
      %475 = arith.mulf %474, %465 : vector<64x1xf32>
      %476 = arith.addf %460, %475 : vector<64x1xf32>
      %477 = vector.broadcast %464 : f32 to vector<1x64xf32>
      %478 = arith.mulf %477, %466 : vector<1x64xf32>
      %479 = arith.addf %463, %478 : vector<1x64xf32>
      %c29 = arith.constant 29 : index
      %480 = memref.load %arg2[%c29] : memref<32xf32, #tpu.memory_space<smem>>
      %481 = vector.extract_strided_slice %11 {offsets = [0, 29], sizes = [64, 1], strides = [1, 1]} : vector<64x32xf32> to vector<64x1xf32>
      %482 = vector.extract_strided_slice %12 {offsets = [29, 0], sizes = [1, 64], strides = [1, 1]} : vector<32x64xf32> to vector<1x64xf32>
      %483 = vector.broadcast %481 : vector<64x1xf32> to vector<64x64xf32>
      %484 = vector.broadcast %482 : vector<1x64xf32> to vector<64x64xf32>
      %485 = arith.addf %483, %484 : vector<64x64xf32>
      %486 = math.absf %485 : vector<64x64xf32>
      %487 = vector.broadcast %480 : f32 to vector<64x64xf32>
      %488 = arith.mulf %487, %486 : vector<64x64xf32>
      %489 = arith.addf %473, %488 : vector<64x64xf32>
      %490 = vector.broadcast %480 : f32 to vector<64x1xf32>
      %491 = arith.mulf %490, %481 : vector<64x1xf32>
      %492 = arith.addf %476, %491 : vector<64x1xf32>
      %493 = vector.broadcast %480 : f32 to vector<1x64xf32>
      %494 = arith.mulf %493, %482 : vector<1x64xf32>
      %495 = arith.addf %479, %494 : vector<1x64xf32>
      %c30 = arith.constant 30 : index
      %496 = memref.load %arg2[%c30] : memref<32xf32, #tpu.memory_space<smem>>
      %497 = vector.extract_strided_slice %11 {offsets = [0, 30], sizes = [64, 1], strides = [1, 1]} : vector<64x32xf32> to vector<64x1xf32>
      %498 = vector.extract_strided_slice %12 {offsets = [30, 0], sizes = [1, 64], strides = [1, 1]} : vector<32x64xf32> to vector<1x64xf32>
      %499 = vector.broadcast %497 : vector<64x1xf32> to vector<64x64xf32>
      %500 = vector.broadcast %498 : vector<1x64xf32> to vector<64x64xf32>
      %501 = arith.addf %499, %500 : vector<64x64xf32>
      %502 = math.absf %501 : vector<64x64xf32>
      %503 = vector.broadcast %496 : f32 to vector<64x64xf32>
      %504 = arith.mulf %503, %502 : vector<64x64xf32>
      %505 = arith.addf %489, %504 : vector<64x64xf32>
      %506 = vector.broadcast %496 : f32 to vector<64x1xf32>
      %507 = arith.mulf %506, %497 : vector<64x1xf32>
      %508 = arith.addf %492, %507 : vector<64x1xf32>
      %509 = vector.broadcast %496 : f32 to vector<1x64xf32>
      %510 = arith.mulf %509, %498 : vector<1x64xf32>
      %511 = arith.addf %495, %510 : vector<1x64xf32>
      %c31 = arith.constant 31 : index
      %512 = memref.load %arg2[%c31] : memref<32xf32, #tpu.memory_space<smem>>
      %513 = vector.extract_strided_slice %11 {offsets = [0, 31], sizes = [64, 1], strides = [1, 1]} : vector<64x32xf32> to vector<64x1xf32>
      %514 = vector.extract_strided_slice %12 {offsets = [31, 0], sizes = [1, 64], strides = [1, 1]} : vector<32x64xf32> to vector<1x64xf32>
      %515 = vector.broadcast %513 : vector<64x1xf32> to vector<64x64xf32>
      %516 = vector.broadcast %514 : vector<1x64xf32> to vector<64x64xf32>
      %517 = arith.addf %515, %516 : vector<64x64xf32>
      %518 = math.absf %517 : vector<64x64xf32>
      %519 = vector.broadcast %512 : f32 to vector<64x64xf32>
      %520 = arith.mulf %519, %518 : vector<64x64xf32>
      %521 = arith.addf %505, %520 : vector<64x64xf32>
      %522 = vector.broadcast %512 : f32 to vector<64x1xf32>
      %523 = arith.mulf %522, %513 : vector<64x1xf32>
      %524 = arith.addf %508, %523 : vector<64x1xf32>
      %525 = vector.broadcast %512 : f32 to vector<1x64xf32>
      %526 = arith.mulf %525, %514 : vector<1x64xf32>
      %527 = arith.addf %511, %526 : vector<1x64xf32>
      %528 = vector.broadcast %524 : vector<64x1xf32> to vector<64x64xf32>
      %529 = vector.broadcast %527 : vector<1x64xf32> to vector<64x64xf32>
      %530 = arith.addf %528, %529 : vector<64x64xf32>
      %cst_8 = arith.constant 6.000000e-01 : f32
      %531 = vector.broadcast %cst_8 : f32 to vector<64x64xf32>
      %532 = arith.mulf %531, %530 : vector<64x64xf32>
      %cst_9 = arith.constant 4.000000e-01 : f32
      %533 = vector.broadcast %cst_9 : f32 to vector<64x64xf32>
      %534 = arith.mulf %533, %521 : vector<64x64xf32>
      %535 = arith.addf %532, %534 : vector<64x64xf32>
      %c0_10 = arith.constant 0 : index
      %c0_11 = arith.constant 0 : index
      %536 = vector.load %arg9[%c0_10, %c0_11] : memref<1x1xf32, #tpu.memory_space<vmem>>, vector<1x1xf32>
      %537 = arith.mulf %535, %535 : vector<64x64xf32>
      %538 = vector.shape_cast %537 : vector<64x64xf32> to vector<1x64x64xf32>
      %cst_12 = arith.constant dense<0.000000e+00> : vector<1xf32>
      %539 = vector.multi_reduction <add>, %538, %cst_12 [1, 2] : vector<1x64x64xf32> to vector<1xf32>
      %540 = vector.shape_cast %539 : vector<1xf32> to vector<1x1x1xf32>
      %541 = vector.extract %540[0, 0, 0] : f32 from vector<1x1x1xf32>
      %542 = vector.broadcast %541 : f32 to vector<1x1xf32>
      %543 = arith.addf %536, %542 : vector<1x1xf32>
      %c0_13 = arith.constant 0 : index
      %c0_14 = arith.constant 0 : index
      %544 = vector.load %arg9[%c0_13, %c0_14] : memref<1x1xf32, #tpu.memory_space<vmem>>, vector<1x1xf32>
      tpu.vector_store %arg9[%c0_13, %c0_14], %543 {strides = array<i32>} : memref<1x1xf32, #tpu.memory_space<vmem>>, vector<1x1xf32>,
      %c0_15 = arith.constant 0 : index
      %c0_16 = arith.constant 0 : index
      %c0_17 = arith.constant 0 : index
      %545 = vector.load %arg5[%c0_15, %c0_16, %c0_17] : memref<1x64x64xf32, #tpu.memory_space<vmem>>, vector<1x64x64xf32>
      %546 = vector.shape_cast %545 : vector<1x64x64xf32> to vector<64x64xf32>
      %cst_18 = arith.constant 0.000000e+00 : f32
      %547 = vector.broadcast %cst_18 : f32 to vector<64x64xf32>
      %548 = arith.cmpf oeq, %546, %547 : vector<64x64xf32>
      %cst_19 = arith.constant 0xFF800000 : f32
      %549 = vector.broadcast %cst_19 : f32 to vector<64x64xf32>
      %550 = arith.select %548, %549, %535 : vector<64x64xi1>, vector<64x64xf32>
      %551 = arith.index_cast %arg1 : i32 to index
      %c0_20 = arith.constant 0 : index
      %c0_21 = arith.constant 0 : index
      %552 = vector.load %arg8[%551, %c0_20, %c0_21] : memref<2x64x64xf32, #tpu.memory_space<vmem>>, vector<1x64x64xf32>
      %553 = vector.shape_cast %552 : vector<1x64x64xf32> to vector<64x64xf32>
      %554 = vector.shape_cast %550 : vector<64x64xf32> to vector<1x64x64xf32>
      tpu.vector_store %arg8[%551, %c0_20, %c0_21], %554 {strides = array<i32>} : memref<2x64x64xf32, #tpu.memory_space<vmem>>, vector<1x64x64xf32>,
    } else {
    }
    %c1_i32 = arith.constant 1 : i32
    %3 = arith.cmpi eq, %arg0, %c1_i32 : i32
    %4 = arith.extui %3 : i1 to i32
    %c0_i32_1 = arith.constant 0 : i32
    %5 = arith.cmpi ne, %4, %c0_i32_1 : i32
    scf.if %5 {
      %c0 = arith.constant 0 : index
      %c0_2 = arith.constant 0 : index
      %6 = vector.load %arg9[%c0, %c0_2] : memref<1x1xf32, #tpu.memory_space<vmem>>, vector<1x1xf32>
      %7 = math.rsqrt %6 : vector<1x1xf32>
      %8 = arith.index_cast %arg1 : i32 to index
      %c0_3 = arith.constant 0 : index
      %c0_4 = arith.constant 0 : index
      %9 = vector.load %arg8[%8, %c0_3, %c0_4] : memref<2x64x64xf32, #tpu.memory_space<vmem>>, vector<1x64x64xf32>
      %10 = vector.shape_cast %9 : vector<1x64x64xf32> to vector<64x64xf32>
      %11 = vector.broadcast %7 : vector<1x1xf32> to vector<64x64xf32>
      %12 = arith.mulf %10, %11 : vector<64x64xf32>
      %cst = arith.constant dense<0xFF800000> : vector<64xf32>
      %13 = vector.multi_reduction <maximumf>, %12, %cst [1] : vector<64x64xf32> to vector<64xf32>
      %14 = vector.shape_cast %13 : vector<64xf32> to vector<64x1xf32>
      %15 = vector.broadcast %14 : vector<64x1xf32> to vector<64x64xf32>
      %16 = arith.subf %12, %15 : vector<64x64xf32>
      %17 = math.exp %16 : vector<64x64xf32>
      %cst_5 = arith.constant dense<0.000000e+00> : vector<64xf32>
      %18 = vector.multi_reduction <add>, %17, %cst_5 [1] : vector<64x64xf32> to vector<64xf32>
      %19 = vector.shape_cast %18 : vector<64xf32> to vector<64x1xf32>
      %20 = tpu.reciprocal %19 {approx = true} : vector<64x1xf32> -> vector<64x1xf32>
      %21 = vector.broadcast %20 : vector<64x1xf32> to vector<64x64xf32>
      %22 = arith.mulf %17, %21 : vector<64x64xf32>
      %23 = arith.index_cast %arg1 : i32 to index
      %c0_6 = arith.constant 0 : index
      %c0_7 = arith.constant 0 : index
      %24 = vector.load %arg7[%23, %c0_6, %c0_7] : memref<2x64x32xf32, #tpu.memory_space<vmem>>, vector<1x64x32xf32>
      %25 = vector.shape_cast %24 : vector<1x64x32xf32> to vector<64x32xf32>
      %cst_8 = arith.constant dense<0.000000e+00> : vector<64x32xf32>
      %26 = tpu.matmul %22, %25, %cst_8 {dimension_numbers = #tpu.dot_dimension_numbers<[1], [0], [0], [1], [0, 0, 1, 1], [], []>} : vector<64x64xf32>, vector<64x32xf32>, vector<64x32xf32> -> vector<64x32xf32>
      %cst_9 = arith.constant 0.000000e+00 : f32
      %27 = vector.broadcast %cst_9 : f32 to vector<64x32xf32>
      %28 = arith.cmpf ogt, %26, %27 : vector<64x32xf32>
      %cst_10 = arith.constant 0.000000e+00 : f32
      %29 = vector.broadcast %cst_10 : f32 to vector<64x32xf32>
      %30 = arith.minimumf %26, %29 : vector<64x32xf32>
      %31 = math.exp %30 : vector<64x32xf32>
      %cst_11 = arith.constant 1.000000e+00 : f32
      %32 = vector.broadcast %cst_11 : f32 to vector<64x32xf32>
      %33 = arith.subf %31, %32 : vector<64x32xf32>
      %34 = arith.select %28, %26, %33 : vector<64x32xi1>, vector<64x32xf32>
      %c0_12 = arith.constant 0 : index
      %c0_13 = arith.constant 0 : index
      %c0_14 = arith.constant 0 : index
      %35 = vector.load %arg6[%c0_12, %c0_13, %c0_14] : memref<1x64x32xf32, #tpu.memory_space<vmem>>, vector<1x64x32xf32>
      %36 = vector.shape_cast %35 : vector<1x64x32xf32> to vector<64x32xf32>
      %37 = vector.shape_cast %34 : vector<64x32xf32> to vector<1x64x32xf32>
      tpu.vector_store %arg6[%c0_12, %c0_13, %c0_14], %37 {strides = array<i32>} : memref<1x64x32xf32, #tpu.memory_space<vmem>>, vector<1x64x32xf32>,
    } else {
    }
    return
  }
  func.func @transform_0(%arg0: i32, %arg1: i32) -> i32 {
    %c0_i32 = arith.constant 0 : i32
    %c0_i32_0 = arith.constant 0 : i32
    return %c0_i32 : i32
  }
  func.func @transform_1(%arg0: i32, %arg1: i32) -> (i32, i32, i32) {
    %c0_i32 = arith.constant 0 : i32
    %c0_i32_0 = arith.constant 0 : i32
    %c0_i32_1 = arith.constant 0 : i32
    %c0_i32_2 = arith.constant 0 : i32
    return %c0_i32, %c0_i32_0, %c0_i32_1 : i32, i32, i32
  }
  func.func @transform_2(%arg0: i32, %arg1: i32) -> (i32, i32) {
    %c0_i32 = arith.constant 0 : i32
    %c0_i32_0 = arith.constant 0 : i32
    %c0_i32_1 = arith.constant 0 : i32
    return %c0_i32, %c0_i32_0 : i32, i32
  }
  func.func @transform_3(%arg0: i32, %arg1: i32) -> (i32, i32, i32) {
    %c0_i32 = arith.constant 0 : i32
    %0 = arith.cmpi eq, %arg0, %c0_i32 : i32
    %c1_i32 = arith.constant 1 : i32
    %1 = arith.select %0, %arg1, %c1_i32 : i32
    %c0_i32_0 = arith.constant 0 : i32
    %c0_i32_1 = arith.constant 0 : i32
    %c0_i32_2 = arith.constant 0 : i32
    return %1, %c0_i32_0, %c0_i32_1 : i32, i32, i32
  }
  func.func @transform_4(%arg0: i32, %arg1: i32) -> (i32, i32, i32) {
    %0 = arith.muli %arg1, %arg0 : i32
    %c0_i32 = arith.constant 0 : i32
    %c0_i32_0 = arith.constant 0 : i32
    %c0_i32_1 = arith.constant 0 : i32
    return %0, %c0_i32, %c0_i32_0 : i32, i32, i32
  }
}

</mosaic_0001>

<bundles_post_ra>
// kernel: tpu_custom_call.1
= control target key start
LH: loop header
LB: loop body
LE: loop exit
PB: predicated region body
PF: predicated region fallthrough
CT: control target
= control target key end

     0   :  { %9 = vsyncpa [#allocation6], 0  ;;  %s5620_s15 = smov 0   ;;  %s5622_s16 = smov 0   ;;  %s9587_s0 = inlined_call_operand.vmem [shape: f32[32], index: 0, kind: input, shape index: {}]   ;;  %s9588_s1 = inlined_call_operand.vmem [shape: f32[2,64,32], index: 1, kind: input, shape index: {}]   ;;  %s9589_s2 = inlined_call_operand.vmem [shape: f32[32,32], index: 2, kind: input, shape index: {}]   ;;  %s9590_s3 = inlined_call_operand.vmem [shape: f32[2,64,64], index: 3, kind: input, shape index: {}]   ;;  %s9591_s4 = inlined_call_operand.vmem [shape: f32[2,64,32], index: 4, kind: output, shape index: {}]  }
   0x1   :  { %s5624_s17 = smov 0   ;;  %s5626_s18 = smov 0  }
   0x2   :  { %s5628_s19 = smov 0  }
   0x3 LB: > { %s4979_s20 = sadd.s32 4294967295, %s5527_s19   ;;  %s24_s21 = sadd.s32 1, %s5519_s17  ;;  %s5527_s19 = sphi %s5628_s19, %s15_s19   ;;  %s5523_s18 = sphi %s5626_s18, %s10799_s18   ;;  %s5519_s17 = sphi %s5624_s17, %s10798_s17   ;;  %s5515_s16 = sphi %s5622_s16, %s10797_s16   ;;  %s5511_s15 = sphi %s5620_s15, %s10796_s15  }
   0x4   : > { %p25_p0 = scmp.ge.s32.totalorder %s24_s21, 2  ;;  %s27_s22 = sadd.s32 1, %s5523_s18 }
   0x5   : > { %p4981_p1 = scmp.ge.s32.totalorder %s5527_s19, 1  ;;  %p153_p2 = scmp.lt.s32.totalorder %s5527_s19, 5 }
   0x6   : > { %s10801_s21 = smov (%p25_p0, %s24_s21), 0  ;;  %s10803_s22 = smov (!%p25_p0, %s27_s22), %s5523_s18 }
   0x7   : > { %p5653_p3 = pnand %p4981_p1, %p153_p2  ;;  %p29_p4 = scmp.ge.s32.totalorder %s10803_s22, 2 }
   0x8   : > { %p5657_p5 = scmp.eq.s32.totalorder %s4979_s20, 0  ;;  %s166_s27 = sshll.u32 %s9587_s0, 4  ;;  %s167_s27 = int_to_ptr.vmem [resolvable:$true] %s166_s27 }
   0x9   : > { %p5188_p6 = pneg %p5653_p3  ;;  %s10805_s22 = smov (%p29_p4, %s10803_s22), 0 }
   0xa   : > { %s5470_s28 = scalar_lea.vmem %s167_s27, 16  ;;  %p5478_p12 = scmp.lt.s32.totalorder %s167_s27, %s167_s27 }
   0xb   : > { %p5189_p7 = pnand %p5657_p5, %p5188_p6  ;;  %p5471_p8 = scmp.ne.s32.totalorder %s167_s27, %s5470_s28 }
   0xc   : > { %p5479_p13 = scmp.lt.s32.totalorder %s5470_s28, %s5470_s28 }
   0xd   : > { %p5472_p9 = pneg %p5189_p7 }
   0xe   : > { %p5480_p0 = por %p5479_p13, %p5478_p12 }
   0xf   : > { %p5473_p10 = pnand %p5472_p9, %p5471_p8 }
  0x11   : > { %p5474_p11 = pneg %p5473_p10 }
  0x13   : > { %p5481_p1 = pnand %p5480_p0, %p5474_p11 }
  0x15   : > { %5484 = shalt.err (!%p5481_p1)
}
  0x16   : > { %s5529_s29 = smov [#allocation5]   ;;  %197 = sbr.rel (%p5653_p3) target bundleno = 2478 (0x9ae), region = 36 }
  0x17   : > { %5191 = dma.vmem_to_smem (!%p5189_p7), %s167_s27, 16, %s5529_s29, [#allocation6]  }
  0x1b   : > { %5506 = dma.done.wait (%p5657_p5), [#allocation6], 16  }
  0x1c   : > { %5508 = vsyncadd (%p5657_p5), [#allocation6], 4294967280 }
  0x1d   : > { %203 = sfence }
  0x1e   : > { %p227_p2 = scmp.eq.s32.totalorder %s5515_s16, 0  ;;  %s236_s30 = smul.u32 %s5511_s15, %s5515_s16 }
  0x1f   : > { %p4990_p3 = scmp.ne.s32.totalorder %s5515_s16, 0 }
  0x20   : > { %s228_s5 = scalar_select %p227_p2, %s5511_s15, 1 }
  0x21   : > { %p237_p4 = scmp.lt.s32.totalorder %s236_s30, 1 }
  0x22   : > { %p229_p6 = scmp.lt.s32.totalorder %s228_s5, 1  ;;  %246 = sbr.rel (%p4990_p3) target bundleno = 1775 (0x6ef), region = 44 }
  0x23   : > { %s10807_s30 = smov (!%p237_p4, %s236_s30), 1 }
  0x24   : > { %s10809_s5 = smov (!%p229_p6, %s228_s5), 1  ;;  %s5061_s6 = sshll.u32 %s10807_s30, 6 }
  0x25   : > { %s5060_s7 = sshll.u32 %s10809_s5, 6  ;;  %s5683_s10 = scalar_lea.vmem %s9591_s4, %s5061_s6 }
  0x26   : > { %s5688_s13 = scalar_lea.vmem %s9590_s3, %s5060_s7 }
  0x27   : > { %p4991_p5 = scmp.ne.s32.totalorder %s5511_s15, 0 }
  0x29   : > { %250 = sbr.rel (%p4991_p5) target bundleno = 264 (0x108), region = 48 }
  0x2e   : > { %v270_v0 = vld [vmem:[%s9589_s2 + $0x18] sm:$0xff]  ;;  %v269_v1 = vld [vmem:[%s9589_s2 + $0x10] sm:$0xff]  ;;  %v268_v2 = vld [vmem:[%s9589_s2 + $0x8] sm:$0xff]  ;;  %vm271_vm0 = vcmask 261120   ;;  %vm481_vm1 = vcmask 0   ;;  %v5530_v20 = vmov 0.0  }
  0x2f   : > { %5098 = vmatprep.subr.mxu0 %v270_v0  ;;  %5158 = vmatprep.subr.mxu1 %v270_v0  ;;  %v267_v3 = vld [vmem:[%s9589_s2] sm:$0xff]  ;;  %v252_v6 = vld [vmem:[%s9588_s1 + $0x8] sm:$0xff]  ;;  %v253_v8 = vld [vmem:[%s9588_s1 + $0x10] sm:$0xff]  ;;  %482 = vst.msk [vmem:[#allocation4] sm:$0x1] %vm481_vm1, %v5530_v20 }
  0x30   : > { %5099 = vmatpush3.msra.mxu0 %v270_v0  ;;  %5162 = vmatpush3.msra.mxu1 %v270_v0  ;;  %v251_v4 = vld [vmem:[%s9588_s1] sm:$0xff]  ;;  %v260_v7 = vld [vmem:[%s9588_s1 + $0x48] sm:$0xff]  ;;  %v261_v9 = vld [vmem:[%s9588_s1 + $0x50] sm:$0xff] }
  0x31   : > { %5100 = vmatprep.subr.mxu0 %v269_v1  ;;  %5159 = vmatprep.subr.mxu1 %v269_v1  ;;  %v259_v5 = vld [vmem:[%s9588_s1 + $0x40] sm:$0xff]  ;;  %v254_v10 = vld [vmem:[%s9588_s1 + $0x18] sm:$0xff]  ;;  %v256_v14 = vld [vmem:[%s9588_s1 + $0x28] sm:$0xff] }
  0x32   : > { %5101 = vmatpush3.msra.mxu0 %v269_v1  ;;  %5163 = vmatpush3.msra.mxu1 %v269_v1  ;;  %v262_v11 = vld [vmem:[%s9588_s1 + $0x58] sm:$0xff]  ;;  %v255_v12 = vld [vmem:[%s9588_s1 + $0x20] sm:$0xff]  ;;  %v264_v15 = vld [vmem:[%s9588_s1 + $0x68] sm:$0xff] }
  0x33   : > { %5102 = vmatprep.subr.mxu0 %v268_v2  ;;  %5160 = vmatprep.subr.mxu1 %v268_v2  ;;  %v263_v13 = vld [vmem:[%s9588_s1 + $0x60] sm:$0xff]  ;;  %v257_v16 = vld [vmem:[%s9588_s1 + $0x30] sm:$0xff]  ;;  %v258_v18 = vld [vmem:[%s9588_s1 + $0x38] sm:$0xff] }
  0x34   : > { %5103 = vmatpush3.msra.mxu0 %v268_v2  ;;  %5164 = vmatpush3.msra.mxu1 %v268_v2  ;;  %v265_v17 = vld [vmem:[%s9588_s1 + $0x70] sm:$0xff]  ;;  %v266_v19 = vld [vmem:[%s9588_s1 + $0x78] sm:$0xff] }
  0x35   : > { %5104 = vmatprep.subr.mxu0 %v267_v3  ;;  %5161 = vmatprep.subr.mxu1 %v267_v3 }
  0x36   : > { %5105 = vmatpush3.msra.mxu0 %v267_v3  ;;  %5165 = vmatpush3.msra.mxu1 %v267_v3 }
  0x37   : > { %5106 = vmatprep.mubr.msk.f32.mxu0 %vm271_vm0, %v251_v4  ;;  %5118 = vmatprep.mubr.msk.f32.mxu1 %vm271_vm0, %v259_v5 }
  0x38   : > { %5107 = vmatmul.mubr.msk.f32.vlgmr.msra.gmra.mxu0 %vm271_vm0, %v252_v6  ;;  %5119 = vmatmul.mubr.msk.f32.vlgmr.msra.gmra.mxu1 %vm271_vm0, %v260_v7 }
  0x39   : > { %5109 = vmatprep.mubr.msk.f32.mxu0 %vm271_vm0, %v253_v8  ;;  %5121 = vmatprep.mubr.msk.f32.mxu1 %vm271_vm0, %v261_v9 }
  0x3c   : > { %5110 = vmatmul.mubr.msk.f32.gmra.mxu0 %vm271_vm0, %v254_v10  ;;  %5122 = vmatmul.mubr.msk.f32.gmra.mxu1 %vm271_vm0, %v262_v11 }
  0x3d   : > { %5112 = vmatprep.mubr.msk.f32.mxu0 %vm271_vm0, %v255_v12  ;;  %5124 = vmatprep.mubr.msk.f32.mxu1 %vm271_vm0, %v263_v13 }
  0x40   : > { %5113 = vmatmul.mubr.msk.f32.gmra.mxu0 %vm271_vm0, %v256_v14  ;;  %5125 = vmatmul.mubr.msk.f32.gmra.mxu1 %vm271_vm0, %v264_v15 }
  0x41   : > { %5115 = vmatprep.mubr.msk.f32.mxu0 %vm271_vm0, %v257_v16  ;;  %5127 = vmatprep.mubr.msk.f32.mxu1 %vm271_vm0, %v265_v17 }
  0x44   : > { %5116 = vmatmul.mubr.msk.f32.gmra.mxu0 %vm271_vm0, %v258_v18  ;;  %5128 = vmatmul.mubr.msk.f32.gmra.mxu1 %vm271_vm0, %v266_v19 }
  0xf8   : > { %v5108_v21 = vpop.f32.mrf.mxu0  ;;  %v5120_v22 = vpop.f32.mrf.mxu1 }
  0xf9   : > { %466 = vst.msk [vmem:[#allocation2 + $0x8] sm:$0xff] %vm271_vm0, %v5108_v21  ;;  %474 = vst.msk [vmem:[#allocation2 + $0x48] sm:$0xff] %vm271_vm0, %v5120_v22 }
  0xfa   : > { %v386_v23 = vpop.f32.mrf.mxu0  ;;  %v426_v24 = vpop.f32.mrf.mxu1 }
  0xfb   : > { %465 = vst.msk [vmem:[#allocation2] sm:$0xff] %vm271_vm0, %v386_v23  ;;  %473 = vst.msk [vmem:[#allocation2 + $0x40] sm:$0xff] %vm271_vm0, %v426_v24 }
  0xfc   : > { %v5111_v25 = vpop.f32.mrf.mxu0  ;;  %v5123_v26 = vpop.f32.mrf.mxu1 }
  0xfd   : > { %468 = vst.msk [vmem:[#allocation2 + $0x18] sm:$0xff] %vm271_vm0, %v5111_v25  ;;  %476 = vst.msk [vmem:[#allocation2 + $0x58] sm:$0xff] %vm271_vm0, %v5123_v26 }
  0xfe   : > { %v396_v27 = vpop.f32.mrf.mxu0  ;;  %v436_v28 = vpop.f32.mrf.mxu1 }
  0xff   : > { %467 = vst.msk [vmem:[#allocation2 + $0x10] sm:$0xff] %vm271_vm0, %v396_v27  ;;  %475 = vst.msk [vmem:[#allocation2 + $0x50] sm:$0xff] %vm271_vm0, %v436_v28 }
 0x100   : > { %v5114_v29 = vpop.f32.mrf.mxu0  ;;  %v5126_v30 = vpop.f32.mrf.mxu1 }
 0x101   : > { %470 = vst.msk [vmem:[#allocation2 + $0x28] sm:$0xff] %vm271_vm0, %v5114_v29  ;;  %478 = vst.msk [vmem:[#allocation2 + $0x68] sm:$0xff] %vm271_vm0, %v5126_v30 }
 0x102   : > { %v406_v31 = vpop.f32.mrf.mxu0  ;;  %v446_v32 = vpop.f32.mrf.mxu1 }
 0x103   : > { %469 = vst.msk [vmem:[#allocation2 + $0x20] sm:$0xff] %vm271_vm0, %v406_v31  ;;  %477 = vst.msk [vmem:[#allocation2 + $0x60] sm:$0xff] %vm271_vm0, %v446_v32 }
 0x104   : > { %v5117_v33 = vpop.f32.mrf.mxu0  ;;  %v5129_v34 = vpop.f32.mrf.mxu1 }
 0x105   : > { %472 = vst.msk [vmem:[#allocation2 + $0x38] sm:$0xff] %vm271_vm0, %v5117_v33  ;;  %480 = vst.msk [vmem:[#allocation2 + $0x78] sm:$0xff] %vm271_vm0, %v5129_v34 }
 0x106   : > { %v416_v35 = vpop.f32.mrf.mxu0  ;;  %v456_v36 = vpop.f32.mrf.mxu1 }
 0x107   : > { %471 = vst.msk [vmem:[#allocation2 + $0x30] sm:$0xff] %vm271_vm0, %v416_v35  ;;  %479 = vst.msk [vmem:[#allocation2 + $0x70] sm:$0xff] %vm271_vm0, %v456_v36 }
 0x108 PF: > { %s5008_s27 = sshll.u32 %s5511_s15, 6  ;;  %v9592_v37 = vmov 0   ;;  %v5532_v46 = vmov 1   ;;  %s5009_s29 = sld [smem:[#allocation5 + $0x1]]  ;;  %v5534_v50 = vmov 2   ;;  %v5536_v61 = vmov 3  }
 0x109   : > { %5301 = vset.pattern.permute.xlu1 %v9592_v37  ;;  %s5788_s28 = scalar_lea.vmem [#allocation2], %s5008_s27  ;;  %s5533_s30 = smov 127   ;;  %v5538_v8 = vmov 4   ;;  %v566_v25 = vlaneseq  ;;  %v5540_v26 = vmov 5   ;;  %vm4510_vm3 = vcmask 523264  }
 0x10a   : > { %s5010_s5 = sld [smem:[#allocation5 + $0x2]]  ;;  %s5535_s6 = smov 126   ;;  %vm4537_vm11 = vcmask 0  }
 0x10b   : > { %s5011_s7 = sld [smem:[#allocation5 + $0x3]]  ;;  %s5537_s8 = smov 125   ;;  %v5943_v29 = vshrl.u32 %v566_v25, 7 }
 0x10c   : > { %s5012_s9 = sld [smem:[#allocation5 + $0x4]]  ;;  %s5539_s11 = smov 124  }
 0x10d   : > { %v5954_v33 = vsub.s32 0, %v5943_v29  ;;  %s5013_s12 = sld [smem:[#allocation5 + $0x5]]  ;;  %s5541_s20 = smov 123  }
 0x10e   : > { %v5791_v38 = vld [vmem:[%s5788_s28] sm:$0xff]  ;;  %v5796_v39 = vld [vmem:[%s5788_s28 + $0x8] sm:$0xff]  ;;  %v5801_v40 = vld [vmem:[%s5788_s28 + $0x10] sm:$0xff]  ;;  %v5836_v47 = vstv %s5009_s29  ;;  %s525_s14 = sld [smem:[#allocation5]]  ;;  %s5543_s24 = smov 122  }
 0x10f   : > { %493 = vxpose.xlu0.b32.start [1/8] (short) (narrow) %v5791_v38, 32  ;;  %528 = vperm.xlu1 %5301, %v5791_v38   ;;  %v5806_v41 = vld [vmem:[%s5788_s28 + $0x18] sm:$0xff]  ;;  %v5811_v42 = vld [vmem:[%s5788_s28 + $0x20] sm:$0xff]  ;;  %v5816_v43 = vld [vmem:[%s5788_s28 + $0x28] sm:$0xff]  ;;  %9743 = vst [vmem:[#allocation8_spill] sm:$0xff] %v5836_v47  ;;  %v691_v48 = vmul.f32 %v5836_v47, %v5791_v38  ;;  %v692_v49 = vmul.f32 %v5836_v47, %v5796_v39  ;;  %s5014_s23 = sld [smem:[#allocation5 + $0x6]] }
 0x110   : > { %v5821_v44 = vld [vmem:[%s5788_s28 + $0x30] sm:$0xff]  ;;  %v5826_v45 = vld [vmem:[%s5788_s28 + $0x38] sm:$0xff]  ;;  %v693_v51 = vmul.f32 %v5836_v47, %v5801_v40  ;;  %v694_v52 = vmul.f32 %v5836_v47, %v5806_v41  ;;  %v695_v53 = vmul.f32 %v5836_v47, %v5811_v42  ;;  %v696_v54 = vmul.f32 %v5836_v47, %v5816_v43  ;;  %9748 = vst [vmem:[#allocation13_spill] sm:$0xff] %v5954_v33  ;;  %s5015_s25 = sld [smem:[#allocation5 + $0x7]]  ;;  %s5545_s26 = smov 121  }
 0x111   : > { %v697_v55 = vmul.f32 %v5836_v47, %v5821_v44  ;;  %v698_v56 = vmul.f32 %v5836_v47, %v5826_v45  ;;  %v5861_v57 = vstv %s5010_s5  ;;  %v5885_v3 = vstv %s5011_s7  ;;  %s5016_s29 = sld [smem:[#allocation5 + $0x8]] }
 0x112   : > { %9744 = vst [vmem:[#allocation9_spill] sm:$0xff] %v5861_v57  ;;  %v815_v58 = vmul.f32 %v5861_v57, %v5796_v39  ;;  %v814_v59 = vmul.f32 %v5861_v57, %v5791_v38  ;;  %v817_v60 = vmul.f32 %v5861_v57, %v5806_v41  ;;  %v816_v62 = vmul.f32 %v5861_v57, %v5801_v40  ;;  %s5017_s5 = sld [smem:[#allocation5 + $0x9]] }
 0x113   : > { %494 = vxpose.xlu0.b32.cont [2/8] (short) (narrow) %v5796_v39, 32  ;;  %533 = vperm.xlu1 %5301, %v5796_v39   ;;  %v819_v63 = vmul.f32 %v5861_v57, %v5816_v43  ;;  %v818_v0 = vmul.f32 %v5861_v57, %v5811_v42  ;;  %v821_v1 = vmul.f32 %v5861_v57, %v5826_v45  ;;  %v5923_v20 = vstv %s5012_s9  ;;  %s5018_s7 = sld [smem:[#allocation5 + $0xa]] }
 0x114   : > { %v820_v2 = vmul.f32 %v5861_v57, %v5821_v44  ;;  %9745 = vst [vmem:[#allocation10_spill] sm:$0xff] %v5885_v3  ;;  %v937_v4 = vmul.f32 %v5885_v3, %v5791_v38  ;;  %v939_v6 = vmul.f32 %v5885_v3, %v5801_v40  ;;  %v941_v9 = vmul.f32 %v5885_v3, %v5811_v42  ;;  %s5019_s9 = sld [smem:[#allocation5 + $0xb]] }
 0x115   : > { %v938_v11 = vmul.f32 %v5885_v3, %v5796_v39  ;;  %v943_v12 = vmul.f32 %v5885_v3, %v5821_v44  ;;  %v940_v14 = vmul.f32 %v5885_v3, %v5806_v41  ;;  %v942_v16 = vmul.f32 %v5885_v3, %v5816_v43 }
 0x116   : > { %v944_v18 = vmul.f32 %v5885_v3, %v5826_v45  ;;  %v1061_v22 = vmul.f32 %v5923_v20, %v5796_v39  ;;  %v1063_v24 = vmul.f32 %v5923_v20, %v5806_v41  ;;  %v1065_v28 = vmul.f32 %v5923_v20, %v5816_v43 }
 0x117   : > { %495 = vxpose.xlu0.b32.cont [3/8] (short) (narrow) %v5801_v40, 32  ;;  %538 = vperm.xlu1 %5301, %v5801_v40   ;;  %v1060_v31 = vmul.f32 %v5923_v20, %v5791_v38  ;;  %v1067_v32 = vmul.f32 %v5923_v20, %v5826_v45  ;;  %v1062_v36 = vmul.f32 %v5923_v20, %v5801_v40 }
 0x11b   : > { %496 = vxpose.xlu0.b32.cont [4/8] (short) (narrow) %v5806_v41, 32  ;;  %543 = vperm.xlu1 %5301, %v5806_v41  }
 0x11f   : > { %497 = vxpose.xlu0.b32.cont [5/8] (short) (narrow) %v5811_v42, 32  ;;  %548 = vperm.xlu1 %5301, %v5811_v42  }
 0x123   : > { %498 = vxpose.xlu0.b32.cont [6/8] (short) (narrow) %v5816_v43, 32  ;;  %553 = vperm.xlu1 %5301, %v5816_v43  }
 0x127   : > { %499 = vxpose.xlu0.b32.cont [7/8] (short) (narrow) %v5821_v44, 32  ;;  %558 = vperm.xlu1 %5301, %v5821_v44  }
 0x12b   : > { %500 = vxpose.xlu0.b32.end [8/8] (short) (narrow) %v5826_v45, 32  ;;  %563 = vperm.xlu1 %5301, %v5826_v45  }
 0x12f   : > { %5303 = vset.pattern.permute.xlu1 %v5532_v46 }
 0x130   : > { %627 = vperm.xlu1 %5303, %v5796_v39  }
 0x134   : > { %631 = vperm.xlu1 %5303, %v5801_v40  }
 0x138   : > { %635 = vperm.xlu1 %5303, %v5806_v41  }
 0x13c   : > { %639 = vperm.xlu1 %5303, %v5811_v42  }
 0x140   : > { %643 = vperm.xlu1 %5303, %v5816_v43  }
 0x144   : > { %647 = vperm.xlu1 %5303, %v5821_v44  }
 0x148   : > { %651 = vperm.xlu1 %5303, %v5826_v45  }
 0x14c   : > { %707 = vrot.lane.b32.xlu1 %v691_v48, %s5533_s30  ;;  %v5969_v48 = vsub.s32 1, %v5943_v29 }
 0x14d   : > { %5305 = vset.pattern.permute.xlu1 %v5534_v50 }
 0x14e   : > { %9749 = vst [vmem:[#allocation14_spill] sm:$0xff] %v5969_v48 }
 0x150   : > { %709 = vrot.lane.b32.xlu1 %v692_v49, %s5533_s30 }
 0x154   : > { %5302 = vset.pattern.permute.xlu0 %v5532_v46  ;;  %711 = vrot.lane.b32.xlu1 %v693_v51, %s5533_s30  ;;  %v1064_v51 = vmul.f32 %v5923_v20, %v5811_v42 }
 0x155   : > { %623 = vperm.xlu0 %5302, %v5791_v38  }
 0x158   : > { %713 = vrot.lane.b32.xlu1 %v694_v52, %s5533_s30 }
 0x159   : > { %715 = vrot.lane.b32.xlu0 %v695_v53, %s5533_s30 }
 0x15a   : > { %5304 = vset.pattern.permute.xlu0 %v5534_v50 }
 0x15c   : > { %717 = vrot.lane.b32.xlu1 %v696_v54, %s5533_s30 }
 0x15d   : > { %719 = vrot.lane.b32.xlu0 %v697_v55, %s5533_s30 }
 0x160   : > { %721 = vrot.lane.b32.xlu1 %v698_v56, %s5533_s30  ;;  %s5547_s30 = smov 120  }
 0x161   : > { %746 = vperm.xlu0 %5304, %v5791_v38  }
 0x164   : > { %750 = vperm.xlu1 %5305, %v5796_v39  }
 0x165   : > { %758 = vperm.xlu0 %5304, %v5806_v41  }
 0x168   : > { %754 = vperm.xlu1 %5305, %v5801_v40  }
 0x169   : > { %766 = vperm.xlu0 %5304, %v5816_v43  }
 0x16c   : > { %762 = vperm.xlu1 %5305, %v5811_v42  }
 0x16d   : > { %774 = vperm.xlu0 %5304, %v5826_v45  }
 0x170   : > { %770 = vperm.xlu1 %5305, %v5821_v44  }
 0x171   : > { %832 = vrot.lane.b32.xlu0 %v815_v58, %s5535_s6  ;;  %v1066_v58 = vmul.f32 %v5923_v20, %v5821_v44 }
 0x172   : > { %5307 = vset.pattern.permute.xlu0 %v5536_v61 }
 0x174   : > { %830 = vrot.lane.b32.xlu1 %v814_v59, %s5535_s6  ;;  %v5989_v59 = vstv %s5013_s12  ;;  %s5020_s12 = sld [smem:[#allocation5 + $0xc]] }
 0x175   : > { %836 = vrot.lane.b32.xlu0 %v817_v60, %s5535_s6  ;;  %5306 = vset.pattern.permute.xlu1 %v5536_v61  ;;  %9750 = vst [vmem:[#allocation15_spill] sm:$0xff] %v5989_v59  ;;  %v5991_v61 = vstv %s525_s14  ;;  %s5555_s14 = smov 116  }
 0x178   : > { %834 = vrot.lane.b32.xlu1 %v816_v62, %s5535_s6 }
 0x179   : > { %840 = vrot.lane.b32.xlu0 %v819_v63, %s5535_s6 }
 0x17c   : > { %838 = vrot.lane.b32.xlu1 %v818_v0, %s5535_s6 }
 0x17d   : > { %844 = vrot.lane.b32.xlu0 %v821_v1, %s5535_s6 }
 0x180   : > { %842 = vrot.lane.b32.xlu1 %v820_v2, %s5535_s6  ;;  %v1183_v2 = vmul.f32 %v5989_v59, %v5791_v38  ;;  %s5549_s6 = smov 119  }
 0x181   : > { %873 = vperm.xlu0 %5307, %v5796_v39  }
 0x184   : > { %869 = vperm.xlu1 %5306, %v5791_v38  }
 0x185   : > { %885 = vperm.xlu0 %5307, %v5811_v42  }
 0x188   : > { %877 = vperm.xlu1 %5306, %v5801_v40  }
 0x189   : > { %893 = vperm.xlu0 %5307, %v5821_v44  }
 0x18a   : > { %v5891_v5 = vpop.permute.xlu1 %528 }
 0x18b   : > { %v5956_v34 = vpop.trf.xlu0 }
 0x18c   : > { %881 = vperm.xlu1 %5306, %v5806_v41   ;;  %v5966_v46 = vrot.slane %v5956_v34, %v5954_v33  ;;  %v5980_v52 = vrot.slane %v5956_v34, %v5969_v48 }
 0x18d   : > { %953 = vrot.lane.b32.xlu0 %v937_v4, %s5537_s8 }
 0x18e   : > { %v5896_v7 = vpop.permute.xlu1 %533  ;;  %5308 = vset.pattern.permute.xlu0 %v5538_v8 }
 0x18f   : > { %v5982_v53 = vpop.trf.xlu0 }
 0x190   : > { %889 = vperm.xlu1 %5306, %v5816_v43  }
 0x191   : > { %957 = vrot.lane.b32.xlu0 %v939_v6, %s5537_s8 }
 0x192   : > { %v5901_v10 = vpop.permute.xlu1 %538 }
 0x193   : > { %v5998_v1 = vpop.trf.xlu0 }
 0x194   : > { %897 = vperm.xlu1 %5306, %v5826_v45  }
 0x195   : > { %961 = vrot.lane.b32.xlu0 %v941_v9, %s5537_s8 }
 0x196   : > { %v5908_v13 = vpop.permute.xlu1 %543 }
 0x197   : > { %v6011_v9 = vpop.trf.xlu0 }
 0x198   : > { %955 = vrot.lane.b32.xlu1 %v938_v11, %s5537_s8  ;;  %v5542_v11 = vmov 6  }
 0x199   : > { %965 = vrot.lane.b32.xlu0 %v943_v12, %s5537_s8  ;;  %5309 = vset.pattern.permute.xlu1 %v5538_v8  ;;  %v1185_v8 = vmul.f32 %v5989_v59, %v5801_v40 }
 0x19a   : > { %v5912_v15 = vpop.permute.xlu1 %548 }
 0x19c   : > { %959 = vrot.lane.b32.xlu1 %v940_v14, %s5537_s8  ;;  %v1187_v14 = vmul.f32 %v5989_v59, %v5811_v42 }
 0x19d   : > { %992 = vperm.xlu0 %5308, %v5791_v38  }
 0x19e   : > { %v5917_v17 = vpop.permute.xlu1 %553 }
 0x19f   : > { %9746 = vst [vmem:[#allocation11_spill] sm:$0xff] %v5917_v17 }
 0x1a0   : > { %963 = vrot.lane.b32.xlu1 %v942_v16, %s5537_s8 }
 0x1a1   : > { %1004 = vperm.xlu0 %5308, %v5806_v41  }
 0x1a2   : > { %v559_v19 = vpop.permute.xlu1 %558 }
 0x1a3   : > { %v576_v50 = vadd.f32 %v5966_v46, %v559_v19  ;;  %v1189_v19 = vmul.f32 %v5989_v59, %v5821_v44 }
 0x1a4   : > { %967 = vrot.lane.b32.xlu1 %v944_v18, %s5537_s8  ;;  %s5551_s8 = smov 118  }
 0x1a5   : > { %1012 = vperm.xlu0 %5308, %v5816_v43   ;;  %v584_v55 = vand.u32 2147483647, %v576_v50 }
 0x1a6   : > { %v5925_v21 = vpop.permute.xlu1 %563 }
 0x1a7   : > { %9747 = vst [vmem:[#allocation12_spill] sm:$0xff] %v5925_v21  ;;  %v593_v63 = vmul.f32 %v5991_v61, %v584_v55  ;;  %v6057_v55 = vstv %s5014_s23  ;;  %s5557_s23 = smov 115  }
 0x1a8   : > { %996 = vperm.xlu1 %5309, %v5796_v39  }
 0x1a9   : > { %1020 = vperm.xlu0 %5308, %v5826_v45  }
 0x1ab   : > { %v5931_v23 = vpop.permute.xlu1 %627 }
 0x1ac   : > { %1000 = vperm.xlu1 %5309, %v5801_v40  }
 0x1ad   : > { %1078 = vrot.lane.b32.xlu0 %v1061_v22, %s5539_s11 }
 0x1ae   : > { %5311 = vset.pattern.permute.xlu0 %v5540_v26 }
 0x1af   : > { %v5937_v27 = vpop.permute.xlu1 %631 }
 0x1b0   : > { %1008 = vperm.xlu1 %5309, %v5811_v42  }
 0x1b1   : > { %1082 = vrot.lane.b32.xlu0 %v1063_v24, %s5539_s11 }
 0x1b3   : > { %v5945_v30 = vpop.permute.xlu1 %635 }
 0x1b4   : > { %1016 = vperm.xlu1 %5309, %v5821_v44  }
 0x1b5   : > { %1086 = vrot.lane.b32.xlu0 %v1065_v28, %s5539_s11  ;;  %v1184_v28 = vmul.f32 %v5989_v59, %v5796_v39 }
 0x1b7   : > { %v5958_v35 = vpop.permute.xlu1 %639 }
 0x1b8   : > { %1076 = vrot.lane.b32.xlu1 %v1060_v31, %s5539_s11 }
 0x1b9   : > { %1090 = vrot.lane.b32.xlu0 %v1067_v32, %s5539_s11  ;;  %5310 = vset.pattern.permute.xlu1 %v5540_v26 }
 0x1bb   : > { %v5971_v49 = vpop.permute.xlu1 %643 }
 0x1bc   : > { %1080 = vrot.lane.b32.xlu1 %v1062_v36, %s5539_s11  ;;  %v1186_v36 = vmul.f32 %v5989_v59, %v5806_v41 }
 0x1bd   : > { %1119 = vperm.xlu0 %5311, %v5796_v39  }
 0x1bf   : > { %v648_v54 = vpop.permute.xlu1 %647 }
 0x1c0   : > { %v664_v56 = vadd.f32 %v5980_v52, %v648_v54  ;;  %1084 = vrot.lane.b32.xlu1 %v1064_v51, %s5539_s11  ;;  %v1188_v54 = vmul.f32 %v5989_v59, %v5816_v43 }
 0x1c1   : > { %1131 = vperm.xlu0 %5311, %v5811_v42  }
 0x1c2   : > { %v672_v60 = vand.u32 2147483647, %v664_v56 }
 0x1c3   : > { %v5993_v62 = vpop.permute.xlu1 %651 }
 0x1c4   : > { %9751 = vst [vmem:[#allocation16_spill] sm:$0xff] %v5993_v62  ;;  %v681_v0 = vmul.f32 %v5836_v47, %v672_v60  ;;  %1088 = vrot.lane.b32.xlu1 %v1066_v58, %s5539_s11  ;;  %v1190_v60 = vmul.f32 %v5989_v59, %v5826_v45  ;;  %s5553_s11 = smov 117  }
 0x1c5   : > { %1139 = vperm.xlu0 %5311, %v5821_v44  }
 0x1c6   : > { %v6003_v4 = vadd.f32 %v681_v0, %v593_v63  ;;  %v1307_v63 = vmul.f32 %v6057_v55, %v5796_v39  ;;  %v6070_v0 = vsub.s32 2, %v5943_v29 }
 0x1c7   : > { %v6005_v6 = vpop.permute.xlu1 %707 }
 0x1c8   : > { %9752 = vst [vmem:[#allocation17_spill] sm:$0xff] %v6005_v6  ;;  %1115 = vperm.xlu1 %5310, %v5791_v38   ;;  %9766 = vst [vmem:[#allocation31_spill] sm:$0xff] %v6070_v0 }
 0x1c9   : > { %1199 = vrot.lane.b32.xlu0 %v1183_v2, %s5541_s20 }
 0x1ca   : > { %5312 = vset.pattern.permute.xlu0 %v5542_v11 }
 0x1cb   : > { %v6013_v12 = vpop.permute.xlu1 %709 }
 0x1cc   : > { %9753 = vst [vmem:[#allocation18_spill] sm:$0xff] %v6013_v12  ;;  %1123 = vperm.xlu1 %5310, %v5801_v40  }
 0x1cd   : > { %1203 = vrot.lane.b32.xlu0 %v1185_v8, %s5541_s20 }
 0x1cf   : > { %v6019_v16 = vpop.permute.xlu1 %711 }
 0x1d0   : > { %9754 = vst [vmem:[#allocation19_spill] sm:$0xff] %v6019_v16  ;;  %v6021_v18 = vpop.permute.xlu0 %623  ;;  %1127 = vperm.xlu1 %5310, %v5806_v41  }
 0x1d1   : > { %9755 = vst [vmem:[#allocation20_spill] sm:$0xff] %v6021_v18  ;;  %1207 = vrot.lane.b32.xlu0 %v1187_v14, %s5541_s20  ;;  %v6082_v14 = vrot.slane %v5956_v34, %v6070_v0 }
 0x1d3   : > { %v6027_v22 = vpop.permute.xlu1 %713  ;;  %9769 = vst [vmem:[#allocation34_spill] sm:$0xff] %v6082_v14 }
 0x1d4   : > { %9756 = vst [vmem:[#allocation21_spill] sm:$0xff] %v6027_v22  ;;  %v6029_v24 = vpop.permute.xlu0 %715  ;;  %1135 = vperm.xlu1 %5310, %v5816_v43  }
 0x1d5   : > { %9757 = vst [vmem:[#allocation22_spill] sm:$0xff] %v6029_v24  ;;  %1211 = vrot.lane.b32.xlu0 %v1189_v19, %s5541_s20  ;;  %v5544_v19 = vmov 7  }
 0x1d7   : > { %v6033_v25 = vpop.permute.xlu1 %717 }
 0x1d8   : > { %9758 = vst [vmem:[#allocation23_spill] sm:$0xff] %v6033_v25  ;;  %v6035_v26 = vpop.permute.xlu0 %719  ;;  %1143 = vperm.xlu1 %5310, %v5826_v45  }
 0x1d9   : > { %9759 = vst [vmem:[#allocation24_spill] sm:$0xff] %v6035_v26  ;;  %1238 = vperm.xlu0 %5312, %v5791_v38  }
 0x1db   : > { %v6041_v31 = vpop.permute.xlu1 %721 }
 0x1dc   : > { %9760 = vst [vmem:[#allocation25_spill] sm:$0xff] %v6041_v31  ;;  %v6043_v32 = vpop.permute.xlu0 %746  ;;  %1201 = vrot.lane.b32.xlu1 %v1184_v28, %s5541_s20 }
 0x1dd   : > { %9761 = vst [vmem:[#allocation26_spill] sm:$0xff] %v6043_v32  ;;  %1250 = vperm.xlu0 %5312, %v5806_v41   ;;  %5313 = vset.pattern.permute.xlu1 %v5542_v11  ;;  %v1309_v11 = vmul.f32 %v6057_v55, %v5806_v41 }
 0x1df   : > { %v6049_v50 = vpop.permute.xlu1 %750 }
 0x1e0   : > { %9762 = vst [vmem:[#allocation27_spill] sm:$0xff] %v6049_v50  ;;  %v6051_v51 = vpop.permute.xlu0 %758  ;;  %1205 = vrot.lane.b32.xlu1 %v1186_v36, %s5541_s20 }
 0x1e1   : > { %9763 = vst [vmem:[#allocation28_spill] sm:$0xff] %v6051_v51  ;;  %1258 = vperm.xlu0 %5312, %v5816_v43  }
 0x1e3   : > { %v6059_v56 = vpop.permute.xlu1 %754 }
 0x1e4   : > { %9764 = vst [vmem:[#allocation29_spill] sm:$0xff] %v6059_v56  ;;  %v6061_v58 = vpop.permute.xlu0 %766  ;;  %1209 = vrot.lane.b32.xlu1 %v1188_v54, %s5541_s20 }
 0x1e5   : > { %9765 = vst [vmem:[#allocation30_spill] sm:$0xff] %v6061_v58  ;;  %1266 = vperm.xlu0 %5312, %v5826_v45  }
 0x1e7   : > { %v6072_v2 = vpop.permute.xlu1 %762 }
 0x1e8   : > { %9767 = vst [vmem:[#allocation32_spill] sm:$0xff] %v6072_v2  ;;  %v6074_v8 = vpop.permute.xlu0 %774  ;;  %1213 = vrot.lane.b32.xlu1 %v1190_v60, %s5541_s20  ;;  %v1311_v60 = vmul.f32 %v6057_v55, %v5816_v43  ;;  %v5550_v2 = vmov 10   ;;  %s5021_s20 = sld [smem:[#allocation5 + $0xd]] }
 0x1e9   : > { %9768 = vst [vmem:[#allocation33_spill] sm:$0xff] %v6074_v8  ;;  %1324 = vrot.lane.b32.xlu0 %v1307_v63, %s5543_s24 }
 0x1ea   : > { %5315 = vset.pattern.permute.xlu0 %v5544_v19 }
 0x1eb   : > { %v771_v28 = vpop.permute.xlu1 %770 }
 0x1ec   : > { %v787_v36 = vadd.f32 %v6082_v14, %v771_v28  ;;  %v6085_v54 = vpop.permute.xlu0 %832  ;;  %1242 = vperm.xlu1 %5313, %v5796_v39   ;;  %v1313_v28 = vmul.f32 %v6057_v55, %v5826_v45  ;;  %v9613_v14 = vmov 14  }
 0x1ed   : > { %9770 = vst [vmem:[#allocation35_spill] sm:$0xff] %v6085_v54  ;;  %1328 = vrot.lane.b32.xlu0 %v1309_v11, %s5543_s24 }
 0x1ee   : > { %v795_v63 = vand.u32 2147483647, %v787_v36 }
 0x1ef   : > { %v6091_v37 = vpop.permute.xlu1 %830 }
 0x1f0   : > { %9771 = vst [vmem:[#allocation36_spill] sm:$0xff] %v6091_v37  ;;  %v804_v31 = vmul.f32 %v5861_v57, %v795_v63  ;;  %v6094_v26 = vpop.permute.xlu0 %836  ;;  %1246 = vperm.xlu1 %5313, %v5801_v40  }
 0x1f1   : > { %9772 = vst [vmem:[#allocation37_spill] sm:$0xff] %v6094_v26  ;;  %1332 = vrot.lane.b32.xlu0 %v1311_v60, %s5543_s24  ;;  %v1306_v60 = vmul.f32 %v6057_v55, %v5791_v38 }
 0x1f2   : > { %v812_v54 = vadd.f32 %v804_v31, %v6003_v4 }
 0x1f3   : > { %v6101_v11 = vpop.permute.xlu1 %834 }
 0x1f4   : > { %9773 = vst [vmem:[#allocation38_spill] sm:$0xff] %v6101_v11  ;;  %v6103_v25 = vpop.permute.xlu0 %840  ;;  %1254 = vperm.xlu1 %5313, %v5811_v42  }
 0x1f5   : > { %9774 = vst [vmem:[#allocation39_spill] sm:$0xff] %v6103_v25  ;;  %1336 = vrot.lane.b32.xlu0 %v1313_v28, %s5543_s24  ;;  %v1308_v28 = vmul.f32 %v6057_v55, %v5801_v40 }
 0x1f7   : > { %v6107_v36 = vpop.permute.xlu1 %838 }
 0x1f8   : > { %9775 = vst [vmem:[#allocation40_spill] sm:$0xff] %v6107_v36  ;;  %v6109_v63 = vpop.permute.xlu0 %844  ;;  %1262 = vperm.xlu1 %5313, %v5821_v44   ;;  %v6126_v36 = vsub.s32 3, %v5943_v29 }
 0x1f9   : > { %9776 = vst [vmem:[#allocation41_spill] sm:$0xff] %v6109_v63  ;;  %1365 = vperm.xlu0 %5315, %v5796_v39   ;;  %v6123_v63 = vstv %s5015_s25  ;;  %s5559_s25 = smov 114  }
 0x1fa   : > { %9779 = vst [vmem:[#allocation44_spill] sm:$0xff] %v6126_v36 }
 0x1fb   : > { %v6115_v4 = vpop.permute.xlu1 %842 }
 0x1fc   : > { %9777 = vst [vmem:[#allocation42_spill] sm:$0xff] %v6115_v4  ;;  %v6117_v31 = vpop.permute.xlu0 %873  ;;  %1322 = vrot.lane.b32.xlu1 %v1306_v60, %s5543_s24  ;;  %v1310_v60 = vmul.f32 %v6057_v55, %v5811_v42  ;;  %v1429_v4 = vmul.f32 %v6123_v63, %v5791_v38 }
 0x1fd   : > { %9778 = vst [vmem:[#allocation43_spill] sm:$0xff] %v6117_v31  ;;  %1377 = vperm.xlu0 %5315, %v5811_v42   ;;  %5314 = vset.pattern.permute.xlu1 %v5544_v19  ;;  %v6140_v19 = vrot.slane %v5956_v34, %v6126_v36  ;;  %v5546_v31 = vmov 8  }
 0x1ff   : > { %v6128_v25 = vpop.permute.xlu1 %869  ;;  %9782 = vst [vmem:[#allocation47_spill] sm:$0xff] %v6140_v19 }
 0x200   : > { %9780 = vst [vmem:[#allocation45_spill] sm:$0xff] %v6128_v25  ;;  %v6130_v11 = vpop.permute.xlu0 %885  ;;  %1326 = vrot.lane.b32.xlu1 %v1308_v28, %s5543_s24  ;;  %v1312_v28 = vmul.f32 %v6057_v55, %v5821_v44  ;;  %v1431_v25 = vmul.f32 %v6123_v63, %v5801_v40 }
 0x201   : > { %9781 = vst [vmem:[#allocation46_spill] sm:$0xff] %v6130_v11  ;;  %1385 = vperm.xlu0 %5315, %v5821_v44  }
 0x203   : > { %v6142_v26 = vpop.permute.xlu1 %877 }
 0x204   : > { %9783 = vst [vmem:[#allocation48_spill] sm:$0xff] %v6142_v26  ;;  %v894_v37 = vpop.permute.xlu0 %893  ;;  %1330 = vrot.lane.b32.xlu1 %v1310_v60, %s5543_s24 }
 0x205   : > { %v910_v11 = vadd.f32 %v6140_v19, %v894_v37  ;;  %1445 = vrot.lane.b32.xlu0 %v1429_v4, %s5545_s26  ;;  %v1433_v37 = vmul.f32 %v6123_v63, %v5811_v42 }
 0x206   : > { %5316 = vset.pattern.permute.xlu0 %v5546_v31 }
 0x207   : > { %v918_v24 = vand.u32 2147483647, %v910_v11  ;;  %v6151_v22 = vpop.permute.xlu1 %881  ;;  %v1435_v11 = vmul.f32 %v6123_v63, %v5821_v44 }
 0x208   : > { %9784 = vst [vmem:[#allocation49_spill] sm:$0xff] %v6151_v22  ;;  %v6153_v26 = vpop.permute.xlu0 %953  ;;  %1334 = vrot.lane.b32.xlu1 %v1312_v28, %s5543_s24  ;;  %s5022_s24 = sld [smem:[#allocation5 + $0xe]] }
 0x209   : > { %9785 = vst [vmem:[#allocation50_spill] sm:$0xff] %v6153_v26  ;;  %v927_v60 = vmul.f32 %v5885_v3, %v918_v24  ;;  %1449 = vrot.lane.b32.xlu0 %v1431_v25, %s5545_s26 }
 0x20b   : > { %v6160_v4 = vadd.f32 %v927_v60, %v812_v54  ;;  %v6162_v19 = vpop.permute.xlu1 %889 }
 0x20c   : > { %9786 = vst [vmem:[#allocation51_spill] sm:$0xff] %v6162_v19  ;;  %v6164_v16 = vpop.permute.xlu0 %957  ;;  %1361 = vperm.xlu1 %5314, %v5791_v38  }
 0x20d   : > { %9787 = vst [vmem:[#allocation52_spill] sm:$0xff] %v6164_v16  ;;  %1453 = vrot.lane.b32.xlu0 %v1433_v37, %s5545_s26 }
 0x20f   : > { %v6170_v28 = vpop.permute.xlu1 %897 }
 0x210   : > { %9788 = vst [vmem:[#allocation53_spill] sm:$0xff] %v6170_v28  ;;  %v6172_v24 = vpop.permute.xlu0 %961  ;;  %1369 = vperm.xlu1 %5314, %v5801_v40  }
 0x211   : > { %9789 = vst [vmem:[#allocation54_spill] sm:$0xff] %v6172_v24  ;;  %1457 = vrot.lane.b32.xlu0 %v1435_v11, %s5545_s26 }
 0x213   : > { %v6176_v25 = vpop.permute.xlu1 %955 }
 0x214   : > { %9790 = vst [vmem:[#allocation55_spill] sm:$0xff] %v6176_v25  ;;  %v6178_v54 = vpop.permute.xlu0 %965  ;;  %1373 = vperm.xlu1 %5314, %v5806_v41  }
 0x215   : > { %9791 = vst [vmem:[#allocation56_spill] sm:$0xff] %v6178_v54  ;;  %1484 = vperm.xlu0 %5316, %v5791_v38   ;;  %v1430_v54 = vmul.f32 %v6123_v63, %v5796_v39 }
 0x217   : > { %v6182_v60 = vpop.permute.xlu1 %959 }
 0x218   : > { %9792 = vst [vmem:[#allocation57_spill] sm:$0xff] %v6182_v60  ;;  %v6184_v37 = vpop.permute.xlu0 %992  ;;  %1381 = vperm.xlu1 %5314, %v5816_v43   ;;  %v6198_v60 = vstv %s5016_s29  ;;  %s5561_s29 = smov 113  }
 0x219   : > { %9793 = vst [vmem:[#allocation58_spill] sm:$0xff] %v6184_v37  ;;  %1496 = vperm.xlu0 %5316, %v5806_v41   ;;  %v1553_v26 = vmul.f32 %v6198_v60, %v5796_v39 }
 0x21b   : > { %v6188_v24 = vpop.permute.xlu1 %963 }
 0x21c   : > { %9794 = vst [vmem:[#allocation59_spill] sm:$0xff] %v6188_v24  ;;  %v6190_v11 = vpop.permute.xlu0 %1004  ;;  %1389 = vperm.xlu1 %5314, %v5826_v45   ;;  %v1432_v24 = vmul.f32 %v6123_v63, %v5806_v41 }
 0x21d   : > { %9795 = vst [vmem:[#allocation60_spill] sm:$0xff] %v6190_v11  ;;  %1504 = vperm.xlu0 %5316, %v5816_v43  }
 0x21f   : > { %v6196_v25 = vpop.permute.xlu1 %967 }
 0x220   : > { %9796 = vst [vmem:[#allocation61_spill] sm:$0xff] %v6196_v25  ;;  %v6200_v16 = vpop.permute.xlu0 %1012  ;;  %1447 = vrot.lane.b32.xlu1 %v1430_v54, %s5545_s26  ;;  %v1434_v25 = vmul.f32 %v6123_v63, %v5816_v43  ;;  %v1555_v54 = vmul.f32 %v6198_v60, %v5806_v41 }
 0x221   : > { %9797 = vst [vmem:[#allocation62_spill] sm:$0xff] %v6200_v16  ;;  %1512 = vperm.xlu0 %5316, %v5826_v45   ;;  %5317 = vset.pattern.permute.xlu1 %v5546_v31  ;;  %v5548_v16 = vmov 9  }
 0x223   : > { %v6208_v11 = vpop.permute.xlu1 %996 }
 0x224   : > { %9798 = vst [vmem:[#allocation63_spill] sm:$0xff] %v6208_v11  ;;  %v6210_v37 = vpop.permute.xlu0 %1020  ;;  %1451 = vrot.lane.b32.xlu1 %v1432_v24, %s5545_s26  ;;  %v1436_v24 = vmul.f32 %v6123_v63, %v5826_v45 }
 0x225   : > { %9799 = vst [vmem:[#allocation64_spill] sm:$0xff] %v6210_v37  ;;  %1570 = vrot.lane.b32.xlu0 %v1553_v26, %s5547_s30  ;;  %v1557_v37 = vmul.f32 %v6198_v60, %v5816_v43  ;;  %v6229_v26 = vsub.s32 4, %v5943_v29 }
 0x226   : > { %5319 = vset.pattern.permute.xlu0 %v5548_v16 }
 0x227   : > { %v6218_v28 = vpop.permute.xlu1 %1000  ;;  %9802 = vst [vmem:[#allocation67_spill] sm:$0xff] %v6229_v26 }
 0x228   : > { %9800 = vst [vmem:[#allocation65_spill] sm:$0xff] %v6218_v28  ;;  %v6220_v31 = vpop.permute.xlu0 %1078  ;;  %1455 = vrot.lane.b32.xlu1 %v1434_v25, %s5545_s26  ;;  %v1559_v25 = vmul.f32 %v6198_v60, %v5826_v45 }
 0x229   : > { %9801 = vst [vmem:[#allocation66_spill] sm:$0xff] %v6220_v31  ;;  %1574 = vrot.lane.b32.xlu0 %v1555_v54, %s5547_s30  ;;  %v6241_v54 = vrot.slane %v5956_v34, %v6229_v26 }
 0x22b   : > { %v6231_v11 = vpop.permute.xlu1 %1008  ;;  %9805 = vst [vmem:[#allocation70_spill] sm:$0xff] %v6241_v54 }
 0x22c   : > { %9803 = vst [vmem:[#allocation68_spill] sm:$0xff] %v6231_v11  ;;  %v6233_v19 = vpop.permute.xlu0 %1082  ;;  %1459 = vrot.lane.b32.xlu1 %v1436_v24, %s5545_s26  ;;  %s5023_s26 = sld [smem:[#allocation5 + $0xf]] }
 0x22d   : > { %9804 = vst [vmem:[#allocation69_spill] sm:$0xff] %v6233_v19  ;;  %1578 = vrot.lane.b32.xlu0 %v1557_v37, %s5547_s30 }
 0x22f   : > { %v1017_v31 = vpop.permute.xlu1 %1016 }
 0x230   : > { %v1033_v28 = vadd.f32 %v6241_v54, %v1017_v31  ;;  %v6244_v22 = vpop.permute.xlu0 %1086  ;;  %1488 = vperm.xlu1 %5317, %v5796_v39  }
 0x231   : > { %9806 = vst [vmem:[#allocation71_spill] sm:$0xff] %v6244_v22  ;;  %1582 = vrot.lane.b32.xlu0 %v1559_v25, %s5547_s30  ;;  %v6267_v25 = vstv %s5017_s5  ;;  %s5563_s5 = smov 112  }
 0x232   : > { %v1041_v19 = vand.u32 2147483647, %v1033_v28  ;;  %v6263_v28 = vsub.s32 5, %v5943_v29  ;;  %9813 = vst [vmem:[#allocation78_spill] sm:$0xff] %v6267_v25  ;;  %v1674_v8 = vmul.f32 %v6267_v25, %v5801_v40 }
 0x233   : > { %v6248_v24 = vpop.permute.xlu1 %1076 }
 0x234   : > { %9807 = vst [vmem:[#allocation72_spill] sm:$0xff] %v6248_v24  ;;  %v1050_v37 = vmul.f32 %v5923_v20, %v1041_v19  ;;  %v6251_v11 = vpop.permute.xlu0 %1090  ;;  %1492 = vperm.xlu1 %5317, %v5801_v40   ;;  %9811 = vst [vmem:[#allocation76_spill] sm:$0xff] %v6263_v28 }
 0x235   : > { %9808 = vst [vmem:[#allocation73_spill] sm:$0xff] %v6251_v11  ;;  %1608 = vperm.xlu0 %5319, %v5796_v39  }
 0x236   : > { %v1058_v31 = vadd.f32 %v1050_v37, %v6160_v4  ;;  %v1552_v4 = vmul.f32 %v6198_v60, %v5791_v38  ;;  %v1672_v37 = vmul.f32 %v6267_v25, %v5791_v38 }
 0x237   : > { %v6256_v54 = vpop.permute.xlu1 %1080 }
 0x238   : > { %9809 = vst [vmem:[#allocation74_spill] sm:$0xff] %v6256_v54  ;;  %v6258_v22 = vpop.permute.xlu0 %1119  ;;  %1500 = vperm.xlu1 %5317, %v5811_v42   ;;  %v6279_v54 = vrot.slane %v5956_v34, %v6263_v28 }
 0x239   : > { %9810 = vst [vmem:[#allocation75_spill] sm:$0xff] %v6258_v22  ;;  %1620 = vperm.xlu0 %5319, %v5811_v42  }
 0x23a   : > { %9815 = vst [vmem:[#allocation80_spill] sm:$0xff] %v6279_v54 }
 0x23b   : > { %v6265_v19 = vpop.permute.xlu1 %1084 }
 0x23c   : > { %9812 = vst [vmem:[#allocation77_spill] sm:$0xff] %v6265_v19  ;;  %v6269_v11 = vpop.permute.xlu0 %1131  ;;  %1508 = vperm.xlu1 %5317, %v5821_v44  }
 0x23d   : > { %9814 = vst [vmem:[#allocation79_spill] sm:$0xff] %v6269_v11  ;;  %1628 = vperm.xlu0 %5319, %v5821_v44   ;;  %v1554_v11 = vmul.f32 %v6198_v60, %v5801_v40 }
 0x23f   : > { %v6281_v24 = vpop.permute.xlu1 %1088 }
 0x240   : > { %9816 = vst [vmem:[#allocation81_spill] sm:$0xff] %v6281_v24  ;;  %v1140_v19 = vpop.permute.xlu0 %1139  ;;  %1568 = vrot.lane.b32.xlu1 %v1552_v4, %s5547_s30  ;;  %v1556_v4 = vmul.f32 %v6198_v60, %v5811_v42 }
 0x241   : > { %v1156_v22 = vadd.f32 %v6279_v54, %v1140_v19  ;;  %1688 = vrot.lane.b32.xlu0 %v1672_v37, %s5549_s6  ;;  %5318 = vset.pattern.permute.xlu1 %v5548_v16  ;;  %v1676_v37 = vmul.f32 %v6267_v25, %v5811_v42 }
 0x242   : > { %5320 = vset.pattern.permute.xlu0 %v5550_v2 }
 0x243   : > { %v1164_v58 = vand.u32 2147483647, %v1156_v22  ;;  %v6290_v56 = vpop.permute.xlu1 %1115 }
 0x244   : > { %9817 = vst [vmem:[#allocation82_spill] sm:$0xff] %v6290_v56  ;;  %v6292_v24 = vpop.permute.xlu0 %1199  ;;  %1572 = vrot.lane.b32.xlu1 %v1554_v11, %s5547_s30  ;;  %v1558_v11 = vmul.f32 %v6198_v60, %v5821_v44  ;;  %v6413_v56 = vstv %s5019_s9  ;;  %s5567_s9 = smov 110  }
 0x245   : > { %9818 = vst [vmem:[#allocation83_spill] sm:$0xff] %v6292_v24  ;;  %v1173_v19 = vmul.f32 %v5989_v59, %v1164_v58  ;;  %1692 = vrot.lane.b32.xlu0 %v1674_v8, %s5549_s6  ;;  %v1678_v58 = vmul.f32 %v6267_v25, %v5821_v44 }
 0x247   : > { %v6301_v16 = vadd.f32 %v1173_v19, %v1058_v31  ;;  %v6303_v54 = vpop.permute.xlu1 %1123 }
 0x248   : > { %9819 = vst [vmem:[#allocation84_spill] sm:$0xff] %v6303_v54  ;;  %v6305_v22 = vpop.permute.xlu0 %1203  ;;  %1576 = vrot.lane.b32.xlu1 %v1556_v4, %s5547_s30 }
 0x249   : > { %9820 = vst [vmem:[#allocation85_spill] sm:$0xff] %v6305_v22  ;;  %1696 = vrot.lane.b32.xlu0 %v1676_v37, %s5549_s6 }
 0x24b   : > { %v6313_v8 = vpop.permute.xlu1 %1127 }
 0x24c   : > { %9821 = vst [vmem:[#allocation86_spill] sm:$0xff] %v6313_v8  ;;  %v6315_v24 = vpop.permute.xlu0 %1207  ;;  %1580 = vrot.lane.b32.xlu1 %v1558_v11, %s5547_s30  ;;  %v9600_v8 = vmov 11   ;;  %s5024_s30 = sld [smem:[#allocation5 + $0x10]] }
 0x24d   : > { %9822 = vst [vmem:[#allocation87_spill] sm:$0xff] %v6315_v24  ;;  %1700 = vrot.lane.b32.xlu0 %v1678_v58, %s5549_s6 }
 0x24f   : > { %v6319_v31 = vpop.permute.xlu1 %1135 }
 0x250   : > { %9823 = vst [vmem:[#allocation88_spill] sm:$0xff] %v6319_v31  ;;  %v6321_v19 = vpop.permute.xlu0 %1211  ;;  %1604 = vperm.xlu1 %5318, %v5791_v38  }
 0x251   : > { %9824 = vst [vmem:[#allocation89_spill] sm:$0xff] %v6321_v19  ;;  %1727 = vperm.xlu0 %5320, %v5791_v38  }
 0x253   : > { %v6325_v4 = vpop.permute.xlu1 %1143 }
 0x254   : > { %9825 = vst [vmem:[#allocation90_spill] sm:$0xff] %v6325_v4  ;;  %v6327_v37 = vpop.permute.xlu0 %1238  ;;  %1612 = vperm.xlu1 %5318, %v5801_v40  }
 0x255   : > { %9826 = vst [vmem:[#allocation91_spill] sm:$0xff] %v6327_v37  ;;  %1739 = vperm.xlu0 %5320, %v5806_v41   ;;  %v6342_v37 = vstv %s5018_s7  ;;  %s5565_s7 = smov 111  }
 0x256   : > { %v1796_v31 = vmul.f32 %v6342_v37, %v5796_v39 }
 0x257   : > { %v6331_v11 = vpop.permute.xlu1 %1201 }
 0x258   : > { %9827 = vst [vmem:[#allocation92_spill] sm:$0xff] %v6331_v11  ;;  %v6333_v58 = vpop.permute.xlu0 %1250  ;;  %1616 = vperm.xlu1 %5318, %v5806_v41  }
 0x259   : > { %9828 = vst [vmem:[#allocation93_spill] sm:$0xff] %v6333_v58  ;;  %1747 = vperm.xlu0 %5320, %v5816_v43  }
 0x25b   : > { %v6337_v19 = vpop.permute.xlu1 %1205 }
 0x25c   : > { %9829 = vst [vmem:[#allocation94_spill] sm:$0xff] %v6337_v19  ;;  %v6339_v22 = vpop.permute.xlu0 %1258  ;;  %1624 = vperm.xlu1 %5318, %v5816_v43   ;;  %v1673_v19 = vmul.f32 %v6267_v25, %v5796_v39 }
 0x25d   : > { %9830 = vst [vmem:[#allocation95_spill] sm:$0xff] %v6339_v22  ;;  %1755 = vperm.xlu0 %5320, %v5826_v45   ;;  %v1798_v22 = vmul.f32 %v6342_v37, %v5806_v41 }
 0x25f   : > { %v6347_v11 = vpop.permute.xlu1 %1209 }
 0x260   : > { %9831 = vst [vmem:[#allocation96_spill] sm:$0xff] %v6347_v11  ;;  %v6349_v58 = vpop.permute.xlu0 %1266  ;;  %1632 = vperm.xlu1 %5318, %v5826_v45   ;;  %v1675_v11 = vmul.f32 %v6267_v25, %v5806_v41 }
 0x261   : > { %9832 = vst [vmem:[#allocation97_spill] sm:$0xff] %v6349_v58  ;;  %1813 = vrot.lane.b32.xlu0 %v1796_v31, %s5551_s8  ;;  %v1800_v31 = vmul.f32 %v6342_v37, %v5816_v43 }
 0x262   : > { %5323 = vset.pattern.permute.xlu0 %v9600_v8  ;;  %v1677_v8 = vmul.f32 %v6267_v25, %v5816_v43 }
 0x263   : > { %v6358_v54 = vpop.permute.xlu1 %1213 }
 0x264   : > { %9833 = vst [vmem:[#allocation98_spill] sm:$0xff] %v6358_v54  ;;  %v6360_v24 = vpop.permute.xlu0 %1324  ;;  %1690 = vrot.lane.b32.xlu1 %v1673_v19, %s5549_s6  ;;  %v1802_v19 = vmul.f32 %v6342_v37, %v5826_v45 }
 0x265   : > { %9834 = vst [vmem:[#allocation99_spill] sm:$0xff] %v6360_v24  ;;  %1817 = vrot.lane.b32.xlu0 %v1798_v22, %s5551_s8  ;;  %5321 = vset.pattern.permute.xlu1 %v5550_v2  ;;  %v1679_v2 = vmul.f32 %v6267_v25, %v5826_v45 }
 0x267   : > { %v6368_v58 = vpop.permute.xlu1 %1242 }
 0x268   : > { %9835 = vst [vmem:[#allocation100_spill] sm:$0xff] %v6368_v58  ;;  %v6370_v4 = vpop.permute.xlu0 %1328  ;;  %1694 = vrot.lane.b32.xlu1 %v1675_v11, %s5549_s6  ;;  %v6387_v11 = vsub.s32 6, %v5943_v29 }
 0x269   : > { %9836 = vst [vmem:[#allocation101_spill] sm:$0xff] %v6370_v4  ;;  %1821 = vrot.lane.b32.xlu0 %v1800_v31, %s5551_s8 }
 0x26a   : > { %9839 = vst [vmem:[#allocation104_spill] sm:$0xff] %v6387_v11 }
 0x26b   : > { %v6378_v24 = vpop.permute.xlu1 %1246 }
 0x26c   : > { %9837 = vst [vmem:[#allocation102_spill] sm:$0xff] %v6378_v24  ;;  %v6380_v22 = vpop.permute.xlu0 %1332  ;;  %1698 = vrot.lane.b32.xlu1 %v1677_v8, %s5549_s6  ;;  %v6397_v8 = vrot.slane %v5956_v34, %v6387_v11 }
 0x26d   : > { %9838 = vst [vmem:[#allocation103_spill] sm:$0xff] %v6380_v22  ;;  %1825 = vrot.lane.b32.xlu0 %v1802_v19, %s5551_s8 }
 0x26e   : > { %9842 = vst [vmem:[#allocation107_spill] sm:$0xff] %v6397_v8 }
 0x26f   : > { %v6389_v4 = vpop.permute.xlu1 %1254 }
 0x270   : > { %9840 = vst [vmem:[#allocation105_spill] sm:$0xff] %v6389_v4  ;;  %v6391_v31 = vpop.permute.xlu0 %1336  ;;  %1702 = vrot.lane.b32.xlu1 %v1679_v2, %s5549_s6  ;;  %s5025_s6 = sld [smem:[#allocation5 + $0x11]] }
 0x271   : > { %9841 = vst [vmem:[#allocation106_spill] sm:$0xff] %v6391_v31  ;;  %1854 = vperm.xlu0 %5323, %v5796_v39   ;;  %v6405_v31 = vsub.s32 7, %v5943_v29 }
 0x273   : > { %v1263_v22 = vpop.permute.xlu1 %1262  ;;  %9844 = vst [vmem:[#allocation109_spill] sm:$0xff] %v6405_v31  ;;  %v6421_v29 = vrot.slane %v5956_v34, %v6405_v31 }
 0x274   : > { %v1279_v54 = vadd.f32 %v6397_v8, %v1263_v22  ;;  %v6400_v19 = vpop.permute.xlu0 %1365  ;;  %1731 = vperm.xlu1 %5321, %v5796_v39   ;;  %v1918_v39 = vmul.f32 %v6413_v56, %v5791_v38 }
 0x275   : > { %9843 = vst [vmem:[#allocation108_spill] sm:$0xff] %v6400_v19  ;;  %1866 = vperm.xlu0 %5323, %v5811_v42   ;;  %9847 = vst [vmem:[#allocation112_spill] sm:$0xff] %v6421_v29  ;;  %v9605_v19 = vmov 12  }
 0x276   : > { %v1287_v24 = vand.u32 2147483647, %v1279_v54 }
 0x277   : > { %v6407_v2 = vpop.permute.xlu1 %1322 }
 0x278   : > { %9845 = vst [vmem:[#allocation110_spill] sm:$0xff] %v6407_v2  ;;  %v1296_v4 = vmul.f32 %v6057_v55, %v1287_v24  ;;  %v6410_v58 = vpop.permute.xlu0 %1377  ;;  %1735 = vperm.xlu1 %5321, %v5801_v40  }
 0x279   : > { %9846 = vst [vmem:[#allocation111_spill] sm:$0xff] %v6410_v58  ;;  %1874 = vperm.xlu0 %5323, %v5821_v44   ;;  %v1920_v58 = vmul.f32 %v6413_v56, %v5801_v40 }
 0x27a   : > { %v1304_v54 = vadd.f32 %v1296_v4, %v6301_v16 }
 0x27b   : > { %v6423_v22 = vpop.permute.xlu1 %1326 }
 0x27c   : > { %9848 = vst [vmem:[#allocation113_spill] sm:$0xff] %v6423_v22  ;;  %v1386_v24 = vpop.permute.xlu0 %1385  ;;  %1743 = vperm.xlu1 %5321, %v5811_v42   ;;  %v1795_v22 = vmul.f32 %v6342_v37, %v5791_v38 }
 0x27d   : > { %v1402_v2 = vadd.f32 %v6421_v29, %v1386_v24  ;;  %1934 = vrot.lane.b32.xlu0 %v1918_v39, %s5553_s11  ;;  %v1922_v39 = vmul.f32 %v6413_v56, %v5811_v42 }
 0x27e   : > { %5324 = vset.pattern.permute.xlu0 %v9605_v19 }
 0x27f   : > { %v1410_v16 = vand.u32 2147483647, %v1402_v2  ;;  %v6431_v4 = vpop.permute.xlu1 %1330 }
 0x280   : > { %9849 = vst [vmem:[#allocation114_spill] sm:$0xff] %v6431_v4  ;;  %v6433_v8 = vpop.permute.xlu0 %1445  ;;  %1751 = vperm.xlu1 %5321, %v5821_v44  }
 0x281   : > { %9850 = vst [vmem:[#allocation115_spill] sm:$0xff] %v6433_v8  ;;  %v1419_v24 = vmul.f32 %v6123_v63, %v1410_v16  ;;  %1938 = vrot.lane.b32.xlu0 %v1920_v58, %s5553_s11  ;;  %v1797_v8 = vmul.f32 %v6342_v37, %v5801_v40  ;;  %v1924_v16 = vmul.f32 %v6413_v56, %v5821_v44  ;;  %v9853_v58 = vmov 11  }
 0x283   : > { %v6442_v29 = vadd.f32 %v1419_v24, %v1304_v54  ;;  %v6444_v19 = vpop.permute.xlu1 %1334 }
 0x284   : > { %9851 = vst [vmem:[#allocation116_spill] sm:$0xff] %v6444_v19  ;;  %v6446_v2 = vpop.permute.xlu0 %1449  ;;  %1811 = vrot.lane.b32.xlu1 %v1795_v22, %s5551_s8  ;;  %v1799_v22 = vmul.f32 %v6342_v37, %v5811_v42 }
 0x285   : > { %9852 = vst [vmem:[#allocation117_spill] sm:$0xff] %v6446_v2  ;;  %1942 = vrot.lane.b32.xlu0 %v1922_v39, %s5553_s11  ;;  %5322 = vset.pattern.permute.xlu1 %v9853_v58  ;;  %v1801_v39 = vmul.f32 %v6342_v37, %v5821_v44  ;;  %v6530_v2 = vld [vmem:[%s5788_s28 + $0x38] sm:$0xff] }
 0x287   : > { %v6455_v4 = vpop.permute.xlu1 %1361 }
 0x288   : > { %9854 = vst [vmem:[#allocation118_spill] sm:$0xff] %v6455_v4  ;;  %v6457_v54 = vpop.permute.xlu0 %1453  ;;  %1815 = vrot.lane.b32.xlu1 %v1797_v8, %s5551_s8 }
 0x289   : > { %9855 = vst [vmem:[#allocation119_spill] sm:$0xff] %v6457_v54  ;;  %1946 = vrot.lane.b32.xlu0 %v1924_v16, %s5553_s11 }
 0x28b   : > { %v6463_v40 = vpop.permute.xlu1 %1369 }
 0x28c   : > { %9856 = vst [vmem:[#allocation120_spill] sm:$0xff] %v6463_v40  ;;  %v6465_v24 = vpop.permute.xlu0 %1457  ;;  %1819 = vrot.lane.b32.xlu1 %v1799_v22, %s5551_s8  ;;  %v6482_v22 = vld [vmem:[%s5788_s28] sm:$0xff] }
 0x28d   : > { %9857 = vst [vmem:[#allocation121_spill] sm:$0xff] %v6465_v24  ;;  %1973 = vperm.xlu0 %5324, %v5791_v38   ;;  %v9606_v24 = vmov 13  }
 0x28f   : > { %v6471_v58 = vpop.permute.xlu1 %1373 }
 0x290   : > { %9858 = vst [vmem:[#allocation122_spill] sm:$0xff] %v6471_v58  ;;  %v6473_v8 = vpop.permute.xlu0 %1484  ;;  %1823 = vrot.lane.b32.xlu1 %v1801_v39, %s5551_s8  ;;  %v6498_v39 = vld [vmem:[%s5788_s28 + $0x8] sm:$0xff]  ;;  %s5026_s8 = sld [smem:[#allocation5 + $0x12]] }
 0x291   : > { %9859 = vst [vmem:[#allocation123_spill] sm:$0xff] %v6473_v8  ;;  %1985 = vperm.xlu0 %5324, %v5806_v41   ;;  %v6491_v8 = vld [vmem:[%s5788_s28 + $0x10] sm:$0xff]  ;;  %v6494_v41 = vstv %s5020_s12  ;;  %s5569_s12 = smov 109  }
 0x293   : > { %v6477_v42 = vpop.permute.xlu1 %1381 }
 0x294   : > { %9860 = vst [vmem:[#allocation124_spill] sm:$0xff] %v6477_v42  ;;  %v6479_v16 = vpop.permute.xlu0 %1496  ;;  %1850 = vperm.xlu1 %5322, %v6482_v22  }
 0x295   : > { %9861 = vst [vmem:[#allocation125_spill] sm:$0xff] %v6479_v16  ;;  %1993 = vperm.xlu0 %5324, %v5816_v43   ;;  %v2042_v16 = vmul.f32 %v6498_v39, %v6494_v41 }
 0x297   : > { %v6486_v38 = vpop.permute.xlu1 %1389 }
 0x298   : > { %9862 = vst [vmem:[#allocation126_spill] sm:$0xff] %v6486_v38  ;;  %v6488_v44 = vpop.permute.xlu0 %1504  ;;  %1858 = vperm.xlu1 %5322, %v6491_v8  }
 0x299   : > { %9863 = vst [vmem:[#allocation127_spill] sm:$0xff] %v6488_v44  ;;  %2001 = vperm.xlu0 %5324, %v5826_v45   ;;  %v6507_v44 = vld [vmem:[%s5788_s28 + $0x18] sm:$0xff] }
 0x29a   : > { %v2044_v45 = vmul.f32 %v6507_v44, %v6494_v41 }
 0x29b   : > { %v6502_v42 = vpop.permute.xlu1 %1447 }
 0x29c   : > { %9864 = vst [vmem:[#allocation128_spill] sm:$0xff] %v6502_v42  ;;  %v6504_v43 = vpop.permute.xlu0 %1512  ;;  %1862 = vperm.xlu1 %5322, %v6507_v44   ;;  %v6519_v42 = vld [vmem:[%s5788_s28 + $0x28] sm:$0xff] }
 0x29d   : > { %9865 = vst [vmem:[#allocation129_spill] sm:$0xff] %v6504_v43  ;;  %2059 = vrot.lane.b32.xlu0 %v2042_v16, %s5555_s14  ;;  %v2046_v19 = vmul.f32 %v6519_v42, %v6494_v41 }
 0x29e   : > { %5327 = vset.pattern.permute.xlu0 %v9606_v24  ;;  %v1919_v24 = vmul.f32 %v6498_v39, %v6413_v56 }
 0x29f   : > { %v6514_v58 = vpop.permute.xlu1 %1451 }
 0x2a0   : > { %9866 = vst [vmem:[#allocation130_spill] sm:$0xff] %v6514_v58  ;;  %v6516_v40 = vpop.permute.xlu0 %1570  ;;  %1870 = vperm.xlu1 %5322, %v6519_v42  }
 0x2a1   : > { %9867 = vst [vmem:[#allocation131_spill] sm:$0xff] %v6516_v40  ;;  %2063 = vrot.lane.b32.xlu0 %v2044_v45, %s5555_s14  ;;  %v2048_v40 = vmul.f32 %v6530_v2, %v6494_v41 }
 0x2a3   : > { %v6525_v16 = vpop.permute.xlu1 %1455 }
 0x2a4   : > { %9868 = vst [vmem:[#allocation132_spill] sm:$0xff] %v6525_v16  ;;  %v6527_v4 = vpop.permute.xlu0 %1574  ;;  %1878 = vperm.xlu1 %5322, %v6530_v2   ;;  %v1921_v16 = vmul.f32 %v6507_v44, %v6413_v56 }
 0x2a5   : > { %9869 = vst [vmem:[#allocation133_spill] sm:$0xff] %v6527_v4  ;;  %2067 = vrot.lane.b32.xlu0 %v2046_v19, %s5555_s14  ;;  %v9872_v4 = vmov 12  }
 0x2a7   : > { %v6538_v45 = vpop.permute.xlu1 %1459 }
 0x2a8   : > { %9870 = vst [vmem:[#allocation134_spill] sm:$0xff] %v6538_v45  ;;  %v6540_v58 = vpop.permute.xlu0 %1578  ;;  %1936 = vrot.lane.b32.xlu1 %v1919_v24, %s5553_s11  ;;  %v1923_v45 = vmul.f32 %v6519_v42, %v6413_v56 }
 0x2a9   : > { %9871 = vst [vmem:[#allocation135_spill] sm:$0xff] %v6540_v58  ;;  %2071 = vrot.lane.b32.xlu0 %v2048_v40, %s5555_s14  ;;  %5325 = vset.pattern.permute.xlu1 %v9872_v4  ;;  %v1925_v4 = vmul.f32 %v6530_v2, %v6413_v56  ;;  %v6563_v40 = vld [vmem:[%s5788_s28 + $0x20] sm:$0xff] }
 0x2ab   : > { %v6547_v43 = vpop.permute.xlu1 %1488 }
 0x2ac   : > { %9873 = vst [vmem:[#allocation136_spill] sm:$0xff] %v6547_v43  ;;  %v6549_v19 = vpop.permute.xlu0 %1582  ;;  %1940 = vrot.lane.b32.xlu1 %v1921_v16, %s5553_s11  ;;  %v6571_v43 = vstv %s5021_s20  ;;  %s5571_s20 = smov 108  }
 0x2ad   : > { %9874 = vst [vmem:[#allocation137_spill] sm:$0xff] %v6549_v19  ;;  %2100 = vperm.xlu0 %5327, %v6498_v39   ;;  %9879 = vst [vmem:[#allocation142_spill] sm:$0xff] %v6571_v43  ;;  %v2166_v51 = vmul.f32 %v6491_v8, %v6571_v43 }
 0x2af   : > { %v6555_v24 = vpop.permute.xlu1 %1492 }
 0x2b0   : > { %9875 = vst [vmem:[#allocation138_spill] sm:$0xff] %v6555_v24  ;;  %v6557_v58 = vpop.permute.xlu0 %1608  ;;  %1944 = vrot.lane.b32.xlu1 %v1923_v45, %s5553_s11  ;;  %v6574_v24 = vld [vmem:[%s5788_s28 + $0x30] sm:$0xff]  ;;  %v2164_v45 = vmul.f32 %v6482_v22, %v6571_v43 }
 0x2b1   : > { %9876 = vst [vmem:[#allocation139_spill] sm:$0xff] %v6557_v58  ;;  %2112 = vperm.xlu0 %5327, %v6563_v40   ;;  %v6581_v58 = vrot.slane %v5982_v53, %v5954_v33 }
 0x2b3   : > { %v6566_v16 = vpop.permute.xlu1 %1500  ;;  %9880 = vst [vmem:[#allocation143_spill] sm:$0xff] %v6581_v58 }
 0x2b4   : > { %9877 = vst [vmem:[#allocation140_spill] sm:$0xff] %v6566_v16  ;;  %v6568_v19 = vpop.permute.xlu0 %1620  ;;  %1948 = vrot.lane.b32.xlu1 %v1925_v4, %s5553_s11  ;;  %v6585_v16 = vrot.slane %v5982_v53, %v5969_v48  ;;  %s5027_s11 = sld [smem:[#allocation5 + $0x13]] }
 0x2b5   : > { %9878 = vst [vmem:[#allocation141_spill] sm:$0xff] %v6568_v19  ;;  %2120 = vperm.xlu0 %5327, %v6574_v24  }
 0x2b6   : > { %9881 = vst [vmem:[#allocation144_spill] sm:$0xff] %v6585_v16 }
 0x2b7   : > { %v1509_v19 = vpop.permute.xlu1 %1508 }
 0x2b8   : > { %v1525_v4 = vadd.f32 %v6581_v58, %v1509_v19  ;;  %v1629_v54 = vpop.permute.xlu0 %1628  ;;  %1977 = vperm.xlu1 %5325, %v6498_v39  }
 0x2b9   : > { %v1645_v38 = vadd.f32 %v6585_v16, %v1629_v54  ;;  %2180 = vrot.lane.b32.xlu0 %v2164_v45, %s5557_s23  ;;  %v2168_v45 = vmul.f32 %v6563_v40, %v6571_v43 }
 0x2ba   : > { %v1533_v50 = vand.u32 2147483647, %v1525_v4  ;;  %5328 = vset.pattern.permute.xlu0 %v9613_v14 }
 0x2bb   : > { %v1653_v32 = vand.u32 2147483647, %v1645_v38  ;;  %v6594_v12 = vpop.permute.xlu1 %1568 }
 0x2bc   : > { %9882 = vst [vmem:[#allocation145_spill] sm:$0xff] %v6594_v12  ;;  %v1542_v19 = vmul.f32 %v6198_v60, %v1533_v50  ;;  %v6597_v58 = vpop.permute.xlu0 %1688  ;;  %1981 = vperm.xlu1 %5325, %v6491_v8  }
 0x2bd   : > { %9883 = vst [vmem:[#allocation146_spill] sm:$0xff] %v6597_v58  ;;  %v1662_v54 = vmul.f32 %v6267_v25, %v1653_v32  ;;  %2184 = vrot.lane.b32.xlu0 %v2166_v51, %s5557_s23  ;;  %v2170_v32 = vmul.f32 %v6574_v24, %v6571_v43 }
 0x2be   : > { %v1550_v4 = vadd.f32 %v1542_v19, %v6442_v29  ;;  %v2041_v29 = vmul.f32 %v6482_v22, %v6494_v41 }
 0x2bf   : > { %v6605_v16 = vpop.permute.xlu1 %1572 }
 0x2c0   : > { %9884 = vst [vmem:[#allocation147_spill] sm:$0xff] %v6605_v16  ;;  %v6607_v38 = vadd.f32 %v1662_v54, %v1550_v4  ;;  %v6609_v14 = vpop.permute.xlu0 %1692  ;;  %1989 = vperm.xlu1 %5325, %v6563_v40   ;;  %v9890_v4 = vmov 13  }
 0x2c1   : > { %9885 = vst [vmem:[#allocation148_spill] sm:$0xff] %v6609_v14  ;;  %2188 = vrot.lane.b32.xlu0 %v2168_v45, %s5557_s23  ;;  %v2043_v45 = vmul.f32 %v6491_v8, %v6494_v41 }
 0x2c3   : > { %v6615_v50 = vpop.permute.xlu1 %1576 }
 0x2c4   : > { %9886 = vst [vmem:[#allocation149_spill] sm:$0xff] %v6615_v50  ;;  %v6617_v51 = vpop.permute.xlu0 %1696  ;;  %1997 = vperm.xlu1 %5325, %v6574_v24  }
 0x2c5   : > { %9887 = vst [vmem:[#allocation150_spill] sm:$0xff] %v6617_v51  ;;  %2192 = vrot.lane.b32.xlu0 %v2170_v32, %s5557_s23  ;;  %v2045_v32 = vmul.f32 %v6563_v40, %v6494_v41 }
 0x2c7   : > { %v6623_v19 = vpop.permute.xlu1 %1580 }
 0x2c8   : > { %9888 = vst [vmem:[#allocation151_spill] sm:$0xff] %v6623_v19  ;;  %v6625_v54 = vpop.permute.xlu0 %1700  ;;  %2057 = vrot.lane.b32.xlu1 %v2041_v29, %s5555_s14 }
 0x2c9   : > { %9889 = vst [vmem:[#allocation152_spill] sm:$0xff] %v6625_v54  ;;  %2219 = vperm.xlu0 %5328, %v6482_v22   ;;  %5326 = vset.pattern.permute.xlu1 %v9890_v4  ;;  %v2047_v4 = vmul.f32 %v6574_v24, %v6494_v41 }
 0x2cb   : > { %v6632_v58 = vpop.permute.xlu1 %1604 }
 0x2cc   : > { %9891 = vst [vmem:[#allocation153_spill] sm:$0xff] %v6632_v58  ;;  %v6634_v12 = vpop.permute.xlu0 %1727  ;;  %2061 = vrot.lane.b32.xlu1 %v2043_v45, %s5555_s14 }
 0x2cd   : > { %9892 = vst [vmem:[#allocation154_spill] sm:$0xff] %v6634_v12  ;;  %2231 = vperm.xlu0 %5328, %v6507_v44   ;;  %v6653_v12 = vstv %s5022_s24  ;;  %s5573_s24 = smov 107  }
 0x2ce   : > { %9897 = vst [vmem:[#allocation159_spill] sm:$0xff] %v6653_v12 }
 0x2cf   : > { %v6640_v29 = vpop.permute.xlu1 %1612 }
 0x2d0   : > { %9893 = vst [vmem:[#allocation155_spill] sm:$0xff] %v6640_v29  ;;  %v6642_v54 = vpop.permute.xlu0 %1739  ;;  %2065 = vrot.lane.b32.xlu1 %v2045_v32, %s5555_s14 }
 0x2d1   : > { %9894 = vst [vmem:[#allocation156_spill] sm:$0xff] %v6642_v54  ;;  %2239 = vperm.xlu0 %5328, %v6519_v42   ;;  %v2288_v54 = vmul.f32 %v6498_v39, %v6653_v12 }
 0x2d3   : > { %v6648_v19 = vpop.permute.xlu1 %1616 }
 0x2d4   : > { %9895 = vst [vmem:[#allocation157_spill] sm:$0xff] %v6648_v19  ;;  %v6650_v45 = vpop.permute.xlu0 %1747  ;;  %2069 = vrot.lane.b32.xlu1 %v2047_v4, %s5555_s14  ;;  %v9614_v4 = vmov 15   ;;  %s5028_s14 = sld [smem:[#allocation5 + $0x14]] }
 0x2d5   : > { %9896 = vst [vmem:[#allocation158_spill] sm:$0xff] %v6650_v45  ;;  %2247 = vperm.xlu0 %5328, %v6530_v2   ;;  %v2290_v45 = vmul.f32 %v6507_v44, %v6653_v12 }
 0x2d7   : > { %v6658_v29 = vpop.permute.xlu1 %1624 }
 0x2d8   : > { %9898 = vst [vmem:[#allocation160_spill] sm:$0xff] %v6658_v29  ;;  %v6660_v32 = vpop.permute.xlu0 %1755  ;;  %2096 = vperm.xlu1 %5326, %v6482_v22   ;;  %v2292_v29 = vmul.f32 %v6519_v42, %v6653_v12 }
 0x2d9   : > { %9899 = vst [vmem:[#allocation161_spill] sm:$0xff] %v6660_v32  ;;  %2305 = vrot.lane.b32.xlu0 %v2288_v54, %s5559_s25  ;;  %v6713_v32 = vstv %s5023_s26  ;;  %s5575_s26 = smov 106  }
 0x2da   : > { %5331 = vset.pattern.permute.xlu0 %v9614_v4  ;;  %v2294_v4 = vmul.f32 %v6530_v2, %v6653_v12  ;;  %9913 = vst [vmem:[#allocation174_spill] sm:$0xff] %v6713_v32 }
 0x2db   : > { %v6667_v19 = vpop.permute.xlu1 %1632 }
 0x2dc   : > { %9900 = vst [vmem:[#allocation162_spill] sm:$0xff] %v6667_v19  ;;  %v6669_v58 = vpop.permute.xlu0 %1813  ;;  %2104 = vperm.xlu1 %5326, %v6491_v8  }
 0x2dd   : > { %9901 = vst [vmem:[#allocation163_spill] sm:$0xff] %v6669_v58  ;;  %2309 = vrot.lane.b32.xlu0 %v2290_v45, %s5559_s25 }
 0x2df   : > { %v6675_v14 = vpop.permute.xlu1 %1690 }
 0x2e0   : > { %9902 = vst [vmem:[#allocation164_spill] sm:$0xff] %v6675_v14  ;;  %v6677_v54 = vpop.permute.xlu0 %1817  ;;  %2108 = vperm.xlu1 %5326, %v6507_v44  }
 0x2e1   : > { %9903 = vst [vmem:[#allocation165_spill] sm:$0xff] %v6677_v54  ;;  %2313 = vrot.lane.b32.xlu0 %v2292_v29, %s5559_s25  ;;  %v2165_v29 = vmul.f32 %v6498_v39, %v6571_v43 }
 0x2e3   : > { %v6683_v16 = vpop.permute.xlu1 %1694 }
 0x2e4   : > { %9904 = vst [vmem:[#allocation166_spill] sm:$0xff] %v6683_v16  ;;  %v6685_v58 = vpop.permute.xlu0 %1821  ;;  %2116 = vperm.xlu1 %5326, %v6519_v42  }
 0x2e5   : > { %9905 = vst [vmem:[#allocation167_spill] sm:$0xff] %v6685_v58  ;;  %2317 = vrot.lane.b32.xlu0 %v2294_v4, %s5559_s25  ;;  %v2167_v4 = vmul.f32 %v6507_v44, %v6571_v43 }
 0x2e7   : > { %v6689_v45 = vpop.permute.xlu1 %1698 }
 0x2e8   : > { %9906 = vst [vmem:[#allocation168_spill] sm:$0xff] %v6689_v45  ;;  %v6691_v14 = vpop.permute.xlu0 %1825  ;;  %2124 = vperm.xlu1 %5326, %v6530_v2  }
 0x2e9   : > { %9907 = vst [vmem:[#allocation169_spill] sm:$0xff] %v6691_v14  ;;  %2346 = vperm.xlu0 %5331, %v6498_v39   ;;  %v9910_v14 = vmov 14  }
 0x2eb   : > { %v6697_v54 = vpop.permute.xlu1 %1702 }
 0x2ec   : > { %9908 = vst [vmem:[#allocation170_spill] sm:$0xff] %v6697_v54  ;;  %v6699_v16 = vpop.permute.xlu0 %1854  ;;  %2182 = vrot.lane.b32.xlu1 %v2165_v29, %s5557_s23  ;;  %v2169_v54 = vmul.f32 %v6519_v42, %v6571_v43  ;;  %v2410_v29 = vmul.f32 %v6482_v22, %v6713_v32 }
 0x2ed   : > { %9909 = vst [vmem:[#allocation171_spill] sm:$0xff] %v6699_v16  ;;  %2358 = vperm.xlu0 %5331, %v6563_v40   ;;  %5329 = vset.pattern.permute.xlu1 %v9910_v14  ;;  %v2171_v14 = vmul.f32 %v6530_v2, %v6571_v43 }
 0x2ef   : > { %v6706_v58 = vpop.permute.xlu1 %1731 }
 0x2f0   : > { %9911 = vst [vmem:[#allocation172_spill] sm:$0xff] %v6706_v58  ;;  %v6708_v45 = vpop.permute.xlu0 %1866  ;;  %2186 = vrot.lane.b32.xlu1 %v2167_v4, %s5557_s23  ;;  %v2412_v4 = vmul.f32 %v6491_v8, %v6713_v32 }
 0x2f1   : > { %9912 = vst [vmem:[#allocation173_spill] sm:$0xff] %v6708_v45  ;;  %2366 = vperm.xlu0 %5331, %v6574_v24   ;;  %v9615_v45 = vmov 16  }
 0x2f3   : > { %v6718_v16 = vpop.permute.xlu1 %1735 }
 0x2f4   : > { %9914 = vst [vmem:[#allocation175_spill] sm:$0xff] %v6718_v16  ;;  %v1875_v51 = vpop.permute.xlu0 %1874  ;;  %2190 = vrot.lane.b32.xlu1 %v2169_v54, %s5557_s23  ;;  %v6731_v16 = vrot.slane %v5982_v53, %v6126_v36  ;;  %v2414_v54 = vmul.f32 %v6563_v40, %v6713_v32 }
 0x2f5   : > { %2426 = vrot.lane.b32.xlu0 %v2410_v29, %s5561_s29  ;;  %v6741_v29 = vrot.slane %v5982_v53, %v6070_v0 }
 0x2f6   : > { %5332 = vset.pattern.permute.xlu0 %v9615_v45  ;;  %9916 = vst [vmem:[#allocation177_spill] sm:$0xff] %v6731_v16  ;;  %v1891_v45 = vadd.f32 %v6731_v16, %v1875_v51 }
 0x2f7   : > { %v6727_v58 = vpop.permute.xlu1 %1743  ;;  %9918 = vst [vmem:[#allocation179_spill] sm:$0xff] %v6741_v29 }
 0x2f8   : > { %9915 = vst [vmem:[#allocation176_spill] sm:$0xff] %v6727_v58  ;;  %v6733_v19 = vpop.permute.xlu0 %1934  ;;  %2194 = vrot.lane.b32.xlu1 %v2171_v14, %s5557_s23  ;;  %v2416_v14 = vmul.f32 %v6574_v24, %v6713_v32  ;;  %s5029_s23 = sld [smem:[#allocation5 + $0x15]] }
 0x2f9   : > { %9917 = vst [vmem:[#allocation178_spill] sm:$0xff] %v6733_v19  ;;  %2430 = vrot.lane.b32.xlu0 %v2412_v4, %s5561_s29  ;;  %v1899_v4 = vand.u32 2147483647, %v1891_v45 }
 0x2fb   : > { %v1752_v58 = vpop.permute.xlu1 %1751 }
 0x2fc   : > { %v1768_v50 = vadd.f32 %v6741_v29, %v1752_v58  ;;  %v6745_v36 = vpop.permute.xlu0 %1938  ;;  %2223 = vperm.xlu1 %5329, %v6498_v39   ;;  %v1908_v58 = vmul.f32 %v6413_v56, %v1899_v4  ;;  %v2289_v4 = vmul.f32 %v6491_v8, %v6653_v12 }
 0x2fd   : > { %9919 = vst [vmem:[#allocation180_spill] sm:$0xff] %v6745_v36  ;;  %2434 = vrot.lane.b32.xlu0 %v2414_v54, %s5561_s29 }
 0x2fe   : > { %v1776_v19 = vand.u32 2147483647, %v1768_v50 }
 0x2ff   : > { %v6751_v18 = vpop.permute.xlu1 %1811 }
 0x300   : > { %9920 = vst [vmem:[#allocation181_spill] sm:$0xff] %v6751_v18  ;;  %v1785_v0 = vmul.f32 %v6342_v37, %v1776_v19  ;;  %v6754_v48 = vpop.permute.xlu0 %1942  ;;  %2227 = vperm.xlu1 %5329, %v6491_v8  }
 0x301   : > { %9921 = vst [vmem:[#allocation182_spill] sm:$0xff] %v6754_v48  ;;  %2438 = vrot.lane.b32.xlu0 %v2416_v14, %s5561_s29  ;;  %v2287_v14 = vmul.f32 %v6482_v22, %v6653_v12  ;;  %v9625_v48 = vmov 18  }
 0x302   : > { %v1793_v51 = vadd.f32 %v1785_v0, %v6607_v38 }
 0x303   : > { %v6760_v54 = vpop.permute.xlu1 %1815 }
 0x304   : > { %9922 = vst [vmem:[#allocation183_spill] sm:$0xff] %v6760_v54  ;;  %v6762_v36 = vpop.permute.xlu0 %1946  ;;  %2235 = vperm.xlu1 %5329, %v6563_v40   ;;  %v6765_v50 = vadd.f32 %v1908_v58, %v1793_v51  ;;  %v9928_v58 = vmov 15  }
 0x305   : > { %9923 = vst [vmem:[#allocation184_spill] sm:$0xff] %v6762_v36  ;;  %2465 = vperm.xlu0 %5332, %v6482_v22  }
 0x307   : > { %v6768_v19 = vpop.permute.xlu1 %1819 }
 0x308   : > { %9924 = vst [vmem:[#allocation185_spill] sm:$0xff] %v6768_v19  ;;  %v6770_v45 = vpop.permute.xlu0 %1973  ;;  %2243 = vperm.xlu1 %5329, %v6574_v24  }
 0x309   : > { %9925 = vst [vmem:[#allocation186_spill] sm:$0xff] %v6770_v45  ;;  %2477 = vperm.xlu0 %5332, %v6507_v44   ;;  %v6792_v45 = vstv %s5024_s30  ;;  %s5577_s30 = smov 105  }
 0x30a   : > { %9931 = vst [vmem:[#allocation191_spill] sm:$0xff] %v6792_v45 }
 0x30b   : > { %v6776_v0 = vpop.permute.xlu1 %1823 }
 0x30c   : > { %9926 = vst [vmem:[#allocation187_spill] sm:$0xff] %v6776_v0  ;;  %v6778_v38 = vpop.permute.xlu0 %1985  ;;  %2303 = vrot.lane.b32.xlu1 %v2287_v14, %s5559_s25  ;;  %v2291_v0 = vmul.f32 %v6563_v40, %v6653_v12  ;;  %v2534_v14 = vmul.f32 %v6498_v39, %v6792_v45 }
 0x30d   : > { %9927 = vst [vmem:[#allocation188_spill] sm:$0xff] %v6778_v38  ;;  %2485 = vperm.xlu0 %5332, %v6519_v42   ;;  %5330 = vset.pattern.permute.xlu1 %v9928_v58  ;;  %v2293_v58 = vmul.f32 %v6574_v24, %v6653_v12 }
 0x30f   : > { %v6785_v51 = vpop.permute.xlu1 %1850 }
 0x310   : > { %9929 = vst [vmem:[#allocation189_spill] sm:$0xff] %v6785_v51  ;;  %v6787_v36 = vpop.permute.xlu0 %1993  ;;  %2307 = vrot.lane.b32.xlu1 %v2289_v4, %s5559_s25  ;;  %v2536_v4 = vmul.f32 %v6507_v44, %v6792_v45 }
 0x311   : > { %9930 = vst [vmem:[#allocation190_spill] sm:$0xff] %v6787_v36  ;;  %2493 = vperm.xlu0 %5332, %v6530_v2   ;;  %v9622_v36 = vmov 17  }
 0x313   : > { %v6797_v38 = vpop.permute.xlu1 %1858 }
 0x314   : > { %9932 = vst [vmem:[#allocation192_spill] sm:$0xff] %v6797_v38  ;;  %v6799_v18 = vpop.permute.xlu0 %2001  ;;  %2311 = vrot.lane.b32.xlu1 %v2291_v0, %s5559_s25  ;;  %v2538_v0 = vmul.f32 %v6519_v42, %v6792_v45 }
 0x315   : > { %9933 = vst [vmem:[#allocation193_spill] sm:$0xff] %v6799_v18  ;;  %2551 = vrot.lane.b32.xlu0 %v2534_v14, %s5563_s5  ;;  %v9948_v18 = vmov 16  }
 0x316   : > { %5335 = vset.pattern.permute.xlu0 %v9622_v36  ;;  %v2540_v36 = vmul.f32 %v6530_v2, %v6792_v45 }
 0x317   : > { %v6808_v51 = vpop.permute.xlu1 %1862 }
 0x318   : > { %9934 = vst [vmem:[#allocation194_spill] sm:$0xff] %v6808_v51  ;;  %v6810_v54 = vpop.permute.xlu0 %2059  ;;  %2315 = vrot.lane.b32.xlu1 %v2293_v58, %s5559_s25  ;;  %s5030_s25 = sld [smem:[#allocation5 + $0x16]] }
 0x319   : > { %9935 = vst [vmem:[#allocation195_spill] sm:$0xff] %v6810_v54  ;;  %2555 = vrot.lane.b32.xlu0 %v2536_v4, %s5563_s5 }
 0x31b   : > { %v6816_v38 = vpop.permute.xlu1 %1870 }
 0x31c   : > { %9936 = vst [vmem:[#allocation196_spill] sm:$0xff] %v6816_v38  ;;  %v6818_v14 = vpop.permute.xlu0 %2063  ;;  %2342 = vperm.xlu1 %5330, %v6482_v22  }
 0x31d   : > { %9937 = vst [vmem:[#allocation197_spill] sm:$0xff] %v6818_v14  ;;  %2559 = vrot.lane.b32.xlu0 %v2538_v0, %s5563_s5 }
 0x31f   : > { %v6824_v51 = vpop.permute.xlu1 %1878 }
 0x320   : > { %9938 = vst [vmem:[#allocation198_spill] sm:$0xff] %v6824_v51  ;;  %v6826_v54 = vpop.permute.xlu0 %2067  ;;  %2350 = vperm.xlu1 %5330, %v6491_v8  }
 0x321   : > { %9939 = vst [vmem:[#allocation199_spill] sm:$0xff] %v6826_v54  ;;  %2563 = vrot.lane.b32.xlu0 %v2540_v36, %s5563_s5 }
 0x323   : > { %v6830_v58 = vpop.permute.xlu1 %1936 }
 0x324   : > { %9940 = vst [vmem:[#allocation200_spill] sm:$0xff] %v6830_v58  ;;  %v6832_v4 = vpop.permute.xlu0 %2071  ;;  %2354 = vperm.xlu1 %5330, %v6507_v44   ;;  %v6849_v58 = vstv %s5025_s6  ;;  %s5579_s6 = smov 104  }
 0x325   : > { %9941 = vst [vmem:[#allocation201_spill] sm:$0xff] %v6832_v4  ;;  %2589 = vperm.xlu0 %5335, %v6498_v39   ;;  %v2411_v4 = vmul.f32 %v6498_v39, %v6713_v32  ;;  %9946 = vst [vmem:[#allocation206_spill] sm:$0xff] %v6849_v58 }
 0x327   : > { %v6836_v0 = vpop.permute.xlu1 %1940 }
 0x328   : > { %9942 = vst [vmem:[#allocation202_spill] sm:$0xff] %v6836_v0  ;;  %v6838_v38 = vpop.permute.xlu0 %2100  ;;  %2362 = vperm.xlu1 %5330, %v6519_v42  }
 0x329   : > { %9943 = vst [vmem:[#allocation203_spill] sm:$0xff] %v6838_v38  ;;  %2601 = vperm.xlu0 %5335, %v6563_v40   ;;  %v2653_v38 = vmul.f32 %v6482_v22, %v6849_v58 }
 0x32b   : > { %v6842_v54 = vpop.permute.xlu1 %1944 }
 0x32c   : > { %9944 = vst [vmem:[#allocation204_spill] sm:$0xff] %v6842_v54  ;;  %v6844_v36 = vpop.permute.xlu0 %2112  ;;  %2370 = vperm.xlu1 %5330, %v6530_v2   ;;  %v2655_v54 = vmul.f32 %v6491_v8, %v6849_v58 }
 0x32d   : > { %9945 = vst [vmem:[#allocation205_spill] sm:$0xff] %v6844_v36  ;;  %2609 = vperm.xlu0 %5335, %v6574_v24   ;;  %v2413_v36 = vmul.f32 %v6507_v44, %v6713_v32 }
 0x32f   : > { %v6854_v14 = vpop.permute.xlu1 %1948 }
 0x330   : > { %9947 = vst [vmem:[#allocation207_spill] sm:$0xff] %v6854_v14  ;;  %v2121_v0 = vpop.permute.xlu0 %2120  ;;  %2428 = vrot.lane.b32.xlu1 %v2411_v4, %s5561_s29  ;;  %v2415_v4 = vmul.f32 %v6519_v42, %v6713_v32 }
 0x331   : > { %2669 = vrot.lane.b32.xlu0 %v2653_v38, %s5565_s7  ;;  %5333 = vset.pattern.permute.xlu1 %v9948_v18  ;;  %v2657_v38 = vmul.f32 %v6563_v40, %v6849_v58 }
 0x332   : > { %5336 = vset.pattern.permute.xlu0 %v9625_v48  ;;  %v2417_v48 = vmul.f32 %v6530_v2, %v6713_v32 }
 0x333   : > { %v6864_v16 = vpop.permute.xlu1 %1977 }
 0x334   : > { %9949 = vst [vmem:[#allocation208_spill] sm:$0xff] %v6864_v16  ;;  %v6866_v14 = vpop.permute.xlu0 %2180  ;;  %2432 = vrot.lane.b32.xlu1 %v2413_v36, %s5561_s29  ;;  %v2659_v36 = vmul.f32 %v6574_v24, %v6849_v58 }
 0x335   : > { %9950 = vst [vmem:[#allocation209_spill] sm:$0xff] %v6866_v14  ;;  %2673 = vrot.lane.b32.xlu0 %v2655_v54, %s5565_s7  ;;  %v6888_v54 = vrot.slane %v5982_v53, %v6263_v28 }
 0x337   : > { %v6874_v51 = vpop.permute.xlu1 %1981  ;;  %9954 = vst [vmem:[#allocation213_spill] sm:$0xff] %v6888_v54 }
 0x338   : > { %9951 = vst [vmem:[#allocation210_spill] sm:$0xff] %v6874_v51  ;;  %v6876_v18 = vpop.permute.xlu0 %2184  ;;  %2436 = vrot.lane.b32.xlu1 %v2415_v4, %s5561_s29  ;;  %v6896_v4 = vrot.slane %v5982_v53, %v6229_v26 }
 0x339   : > { %9952 = vst [vmem:[#allocation211_spill] sm:$0xff] %v6876_v18  ;;  %2677 = vrot.lane.b32.xlu0 %v2657_v38, %s5565_s7  ;;  %v2137_v38 = vadd.f32 %v6888_v54, %v2121_v0 }
 0x33a   : > { %9956 = vst [vmem:[#allocation215_spill] sm:$0xff] %v6896_v4 }
 0x33b   : > { %v6884_v16 = vpop.permute.xlu1 %1989 }
 0x33c   : > { %9953 = vst [vmem:[#allocation212_spill] sm:$0xff] %v6884_v16  ;;  %v6890_v14 = vpop.permute.xlu0 %2188  ;;  %2440 = vrot.lane.b32.xlu1 %v2417_v48, %s5561_s29  ;;  %s5031_s29 = sld [smem:[#allocation5 + $0x17]] }
 0x33d   : > { %9955 = vst [vmem:[#allocation214_spill] sm:$0xff] %v6890_v14  ;;  %2681 = vrot.lane.b32.xlu0 %v2659_v36, %s5565_s7  ;;  %v2145_v14 = vand.u32 2147483647, %v2137_v38 }
 0x33f   : > { %v1998_v51 = vpop.permute.xlu1 %1997 }
 0x340   : > { %v2014_v18 = vadd.f32 %v6896_v4, %v1998_v51  ;;  %v6900_v16 = vpop.permute.xlu0 %2192  ;;  %2469 = vperm.xlu1 %5333, %v6498_v39   ;;  %v2154_v51 = vmul.f32 %v6571_v43, %v2145_v14  ;;  %v2533_v14 = vmul.f32 %v6482_v22, %v6792_v45 }
 0x341   : > { %9957 = vst [vmem:[#allocation216_spill] sm:$0xff] %v6900_v16  ;;  %2708 = vperm.xlu0 %5336, %v6482_v22  }
 0x342   : > { %v2022_v29 = vand.u32 2147483647, %v2014_v18 }
 0x343   : > { %v6904_v48 = vpop.permute.xlu1 %2057 }
 0x344   : > { %9958 = vst [vmem:[#allocation217_spill] sm:$0xff] %v6904_v48  ;;  %v2031_v36 = vmul.f32 %v6494_v41, %v2022_v29  ;;  %v6907_v19 = vpop.permute.xlu0 %2219  ;;  %2473 = vperm.xlu1 %5333, %v6491_v8   ;;  %v9630_v48 = vmov 19  }
 0x345   : > { %9959 = vst [vmem:[#allocation218_spill] sm:$0xff] %v6907_v19  ;;  %2720 = vperm.xlu0 %5336, %v6507_v44   ;;  %v9967_v19 = vmov 17  }
 0x346   : > { %v2039_v0 = vadd.f32 %v2031_v36, %v6765_v50  ;;  %v6928_v50 = vstv %s5026_s8  ;;  %s5581_s8 = smov 103  }
 0x347   : > { %v6913_v16 = vpop.permute.xlu1 %2061  ;;  %9964 = vst [vmem:[#allocation223_spill] sm:$0xff] %v6928_v50  ;;  %v2777_v36 = vmul.f32 %v6498_v39, %v6928_v50 }
 0x348   : > { %9960 = vst [vmem:[#allocation219_spill] sm:$0xff] %v6913_v16  ;;  %v6915_v54 = vpop.permute.xlu0 %2231  ;;  %2481 = vperm.xlu1 %5333, %v6563_v40   ;;  %v6918_v18 = vadd.f32 %v2154_v51, %v2039_v0 }
 0x349   : > { %9961 = vst [vmem:[#allocation220_spill] sm:$0xff] %v6915_v54  ;;  %2728 = vperm.xlu0 %5336, %v6519_v42   ;;  %v2779_v54 = vmul.f32 %v6507_v44, %v6928_v50 }
 0x34b   : > { %v6921_v29 = vpop.permute.xlu1 %2065 }
 0x34c   : > { %9962 = vst [vmem:[#allocation221_spill] sm:$0xff] %v6921_v29  ;;  %v6923_v38 = vpop.permute.xlu0 %2239  ;;  %2489 = vperm.xlu1 %5333, %v6574_v24  }
 0x34d   : > { %9963 = vst [vmem:[#allocation222_spill] sm:$0xff] %v6923_v38  ;;  %2736 = vperm.xlu0 %5336, %v6530_v2   ;;  %v2535_v38 = vmul.f32 %v6491_v8, %v6792_v45 }
 0x34f   : > { %v6933_v51 = vpop.permute.xlu1 %2069 }
 0x350   : > { %9965 = vst [vmem:[#allocation224_spill] sm:$0xff] %v6933_v51  ;;  %v6935_v0 = vpop.permute.xlu0 %2247  ;;  %2549 = vrot.lane.b32.xlu1 %v2533_v14, %s5563_s5  ;;  %v2537_v14 = vmul.f32 %v6563_v40, %v6792_v45 }
 0x351   : > { %9966 = vst [vmem:[#allocation225_spill] sm:$0xff] %v6935_v0  ;;  %2794 = vrot.lane.b32.xlu0 %v2777_v36, %s5567_s9  ;;  %5334 = vset.pattern.permute.xlu1 %v9967_v19  ;;  %v2781_v36 = vmul.f32 %v6519_v42, %v6928_v50 }
 0x352   : > { %5339 = vset.pattern.permute.xlu0 %v9630_v48  ;;  %v2539_v48 = vmul.f32 %v6574_v24, %v6792_v45 }
 0x353   : > { %v6945_v16 = vpop.permute.xlu1 %2096 }
 0x354   : > { %9968 = vst [vmem:[#allocation226_spill] sm:$0xff] %v6945_v16  ;;  %v6947_v51 = vpop.permute.xlu0 %2305  ;;  %2553 = vrot.lane.b32.xlu1 %v2535_v38, %s5563_s5  ;;  %v2783_v38 = vmul.f32 %v6530_v2, %v6928_v50 }
 0x355   : > { %9969 = vst [vmem:[#allocation227_spill] sm:$0xff] %v6947_v51  ;;  %2798 = vrot.lane.b32.xlu0 %v2779_v54, %s5567_s9 }
 0x357   : > { %v6955_v0 = vpop.permute.xlu1 %2104 }
 0x358   : > { %9970 = vst [vmem:[#allocation228_spill] sm:$0xff] %v6955_v0  ;;  %v6957_v19 = vpop.permute.xlu0 %2309  ;;  %2557 = vrot.lane.b32.xlu1 %v2537_v14, %s5563_s5 }
 0x359   : > { %9971 = vst [vmem:[#allocation229_spill] sm:$0xff] %v6957_v19  ;;  %2802 = vrot.lane.b32.xlu0 %v2781_v36, %s5567_s9 }
 0x35b   : > { %v6965_v16 = vpop.permute.xlu1 %2108 }
 0x35c   : > { %9972 = vst [vmem:[#allocation230_spill] sm:$0xff] %v6965_v16  ;;  %v6967_v54 = vpop.permute.xlu0 %2313  ;;  %2561 = vrot.lane.b32.xlu1 %v2539_v48, %s5563_s5  ;;  %s5032_s5 = sld [smem:[#allocation5 + $0x18]] }
 0x35d   : > { %9973 = vst [vmem:[#allocation231_spill] sm:$0xff] %v6967_v54  ;;  %2806 = vrot.lane.b32.xlu0 %v2783_v38, %s5567_s9  ;;  %v9631_v54 = vmov 20  }
 0x35f   : > { %v6971_v0 = vpop.permute.xlu1 %2116 }
 0x360   : > { %9974 = vst [vmem:[#allocation232_spill] sm:$0xff] %v6971_v0  ;;  %v6973_v51 = vpop.permute.xlu0 %2317  ;;  %2585 = vperm.xlu1 %5334, %v6482_v22   ;;  %v6988_v0 = vstv %s5027_s11  ;;  %s5583_s11 = smov 102  }
 0x361   : > { %9975 = vst [vmem:[#allocation233_spill] sm:$0xff] %v6973_v51  ;;  %2835 = vperm.xlu0 %5339, %v6498_v39   ;;  %9980 = vst [vmem:[#allocation238_spill] sm:$0xff] %v6988_v0  ;;  %v2899_v16 = vmul.f32 %v6482_v22, %v6988_v0 }
 0x363   : > { %v6977_v14 = vpop.permute.xlu1 %2124 }
 0x364   : > { %9976 = vst [vmem:[#allocation234_spill] sm:$0xff] %v6977_v14  ;;  %v6979_v36 = vpop.permute.xlu0 %2346  ;;  %2593 = vperm.xlu1 %5334, %v6491_v8  }
 0x365   : > { %9977 = vst [vmem:[#allocation235_spill] sm:$0xff] %v6979_v36  ;;  %2847 = vperm.xlu0 %5339, %v6563_v40  }
 0x367   : > { %v6983_v48 = vpop.permute.xlu1 %2182 }
 0x368   : > { %9978 = vst [vmem:[#allocation236_spill] sm:$0xff] %v6983_v48  ;;  %v6985_v38 = vpop.permute.xlu0 %2358  ;;  %2597 = vperm.xlu1 %5334, %v6507_v44  }
 0x369   : > { %9979 = vst [vmem:[#allocation237_spill] sm:$0xff] %v6985_v38  ;;  %2855 = vperm.xlu0 %5339, %v6574_v24   ;;  %v2901_v38 = vmul.f32 %v6491_v8, %v6988_v0 }
 0x36b   : > { %v6993_v51 = vpop.permute.xlu1 %2186 }
 0x36c   : > { %9981 = vst [vmem:[#allocation239_spill] sm:$0xff] %v6993_v51  ;;  %v6995_v36 = vpop.permute.xlu0 %2366  ;;  %2605 = vperm.xlu1 %5334, %v6519_v42  }
 0x36d   : > { %9982 = vst [vmem:[#allocation240_spill] sm:$0xff] %v6995_v36  ;;  %2915 = vrot.lane.b32.xlu0 %v2899_v16, %s5569_s12  ;;  %v2654_v36 = vmul.f32 %v6498_v39, %v6849_v58  ;;  %v2903_v16 = vmul.f32 %v6563_v40, %v6988_v0 }
 0x36e   : > { %5340 = vset.pattern.permute.xlu0 %v9631_v54  ;;  %v2656_v54 = vmul.f32 %v6507_v44, %v6849_v58 }
 0x36f   : > { %v7002_v48 = vpop.permute.xlu1 %2190 }
 0x370   : > { %9983 = vst [vmem:[#allocation241_spill] sm:$0xff] %v7002_v48  ;;  %v7004_v19 = vpop.permute.xlu0 %2426  ;;  %2613 = vperm.xlu1 %5334, %v6530_v2   ;;  %v2905_v48 = vmul.f32 %v6574_v24, %v6988_v0 }
 0x371   : > { %9984 = vst [vmem:[#allocation242_spill] sm:$0xff] %v7004_v19  ;;  %2919 = vrot.lane.b32.xlu0 %v2901_v38, %s5569_s12  ;;  %v9987_v19 = vmov 18  }
 0x373   : > { %v7012_v51 = vpop.permute.xlu1 %2194 }
 0x374   : > { %9985 = vst [vmem:[#allocation243_spill] sm:$0xff] %v7012_v51  ;;  %v7014_v14 = vpop.permute.xlu0 %2430  ;;  %2671 = vrot.lane.b32.xlu1 %v2654_v36, %s5565_s7  ;;  %v2658_v51 = vmul.f32 %v6519_v42, %v6849_v58 }
 0x375   : > { %9986 = vst [vmem:[#allocation244_spill] sm:$0xff] %v7014_v14  ;;  %2923 = vrot.lane.b32.xlu0 %v2903_v16, %s5569_s12  ;;  %5337 = vset.pattern.permute.xlu1 %v9987_v19  ;;  %v2660_v19 = vmul.f32 %v6530_v2, %v6849_v58 }
 0x377   : > { %v7023_v38 = vpop.permute.xlu1 %2223 }
 0x378   : > { %9988 = vst [vmem:[#allocation245_spill] sm:$0xff] %v7023_v38  ;;  %v7025_v4 = vpop.permute.xlu0 %2434  ;;  %2675 = vrot.lane.b32.xlu1 %v2656_v54, %s5565_s7  ;;  %v7047_v54 = vrot.slane %v5982_v53, %v6387_v11  ;;  %v10083_v11 = vmov 23  }
 0x379   : > { %9989 = vst [vmem:[#allocation246_spill] sm:$0xff] %v7025_v4  ;;  %2927 = vrot.lane.b32.xlu0 %v2905_v48, %s5569_s12  ;;  %v7060_v4 = vstv %s5028_s14  ;;  %s5036_s14 = sld [smem:[#allocation5 + $0x1c]] }
 0x37a   : > { %9994 = vst [vmem:[#allocation251_spill] sm:$0xff] %v7047_v54  ;;  %9998 = vst [vmem:[#allocation255_spill] sm:$0xff] %v7060_v4 }
 0x37b   : > { %v7031_v36 = vpop.permute.xlu1 %2227 }
 0x37c   : > { %9990 = vst [vmem:[#allocation247_spill] sm:$0xff] %v7031_v36  ;;  %v7033_v14 = vpop.permute.xlu0 %2438  ;;  %2679 = vrot.lane.b32.xlu1 %v2658_v51, %s5565_s7 }
 0x37d   : > { %9991 = vst [vmem:[#allocation248_spill] sm:$0xff] %v7033_v14  ;;  %2954 = vperm.xlu0 %5340, %v6482_v22  }
 0x37f   : > { %v7039_v16 = vpop.permute.xlu1 %2235 }
 0x380   : > { %9992 = vst [vmem:[#allocation249_spill] sm:$0xff] %v7039_v16  ;;  %v7041_v38 = vpop.permute.xlu0 %2465  ;;  %2683 = vrot.lane.b32.xlu1 %v2660_v19, %s5565_s7  ;;  %s5033_s7 = sld [smem:[#allocation5 + $0x19]] }
 0x381   : > { %9993 = vst [vmem:[#allocation250_spill] sm:$0xff] %v7041_v38  ;;  %2966 = vperm.xlu0 %5340, %v6507_v44  }
 0x383   : > { %v2244_v48 = vpop.permute.xlu1 %2243 }
 0x384   : > { %v2260_v51 = vadd.f32 %v7047_v54, %v2244_v48  ;;  %v7050_v14 = vpop.permute.xlu0 %2477  ;;  %2712 = vperm.xlu1 %5337, %v6498_v39   ;;  %v3023_v48 = vmul.f32 %v6498_v39, %v7060_v4 }
 0x385   : > { %9995 = vst [vmem:[#allocation252_spill] sm:$0xff] %v7050_v14  ;;  %2974 = vperm.xlu0 %5340, %v6519_v42  }
 0x386   : > { %v2268_v16 = vand.u32 2147483647, %v2260_v51 }
 0x387   : > { %v7054_v38 = vpop.permute.xlu1 %2303 }
 0x388   : > { %9996 = vst [vmem:[#allocation253_spill] sm:$0xff] %v7054_v38  ;;  %v2277_v19 = vmul.f32 %v6653_v12, %v2268_v16  ;;  %v7057_v36 = vpop.permute.xlu0 %2485  ;;  %2716 = vperm.xlu1 %5337, %v6491_v8   ;;  %v3025_v16 = vmul.f32 %v6507_v44, %v7060_v4 }
 0x389   : > { %9997 = vst [vmem:[#allocation254_spill] sm:$0xff] %v7057_v36  ;;  %2982 = vperm.xlu0 %5340, %v6530_v2   ;;  %v9636_v36 = vmov 21  }
 0x38a   : > { %v7066_v14 = vadd.f32 %v2277_v19, %v6918_v18  ;;  %v2776_v18 = vmul.f32 %v6482_v22, %v6928_v50  ;;  %v3027_v19 = vmul.f32 %v6519_v42, %v7060_v4 }
 0x38b   : > { %v7068_v54 = vpop.permute.xlu1 %2307 }
 0x38c   : > { %9999 = vst [vmem:[#allocation256_spill] sm:$0xff] %v7066_v14  ;;  %10000 = vst [vmem:[#allocation257_spill] sm:$0xff] %v7068_v54  ;;  %v7070_v51 = vpop.permute.xlu0 %2493  ;;  %2724 = vperm.xlu1 %5337, %v6563_v40   ;;  %v10006_v54 = vmov 19  }
 0x38d   : > { %10001 = vst [vmem:[#allocation258_spill] sm:$0xff] %v7070_v51  ;;  %3040 = vrot.lane.b32.xlu0 %v3023_v48, %s5571_s20 }
 0x38e   : > { %5343 = vset.pattern.permute.xlu0 %v9636_v36  ;;  %v2778_v36 = vmul.f32 %v6491_v8, %v6928_v50 }
 0x38f   : > { %v7077_v38 = vpop.permute.xlu1 %2311 }
 0x390   : > { %10002 = vst [vmem:[#allocation259_spill] sm:$0xff] %v7077_v38  ;;  %v7079_v29 = vpop.permute.xlu0 %2551  ;;  %2732 = vperm.xlu1 %5337, %v6574_v24  }
 0x391   : > { %10003 = vst [vmem:[#allocation260_spill] sm:$0xff] %v7079_v29  ;;  %3044 = vrot.lane.b32.xlu0 %v3025_v16, %s5571_s20  ;;  %v3029_v29 = vmul.f32 %v6530_v2, %v7060_v4 }
 0x393   : > { %v7087_v48 = vpop.permute.xlu1 %2315 }
 0x394   : > { %10004 = vst [vmem:[#allocation261_spill] sm:$0xff] %v7087_v48  ;;  %v7089_v14 = vpop.permute.xlu0 %2555  ;;  %2792 = vrot.lane.b32.xlu1 %v2776_v18, %s5567_s9  ;;  %v2780_v48 = vmul.f32 %v6563_v40, %v6928_v50 }
 0x395   : > { %10005 = vst [vmem:[#allocation262_spill] sm:$0xff] %v7089_v14  ;;  %3048 = vrot.lane.b32.xlu0 %v3027_v19, %s5571_s20  ;;  %5338 = vset.pattern.permute.xlu1 %v10006_v54  ;;  %v2782_v54 = vmul.f32 %v6574_v24, %v6928_v50 }
 0x397   : > { %v7098_v16 = vpop.permute.xlu1 %2342 }
 0x398   : > { %10007 = vst [vmem:[#allocation263_spill] sm:$0xff] %v7098_v16  ;;  %v7100_v51 = vpop.permute.xlu0 %2559  ;;  %2796 = vrot.lane.b32.xlu1 %v2778_v36, %s5567_s9 }
 0x399   : > { %10008 = vst [vmem:[#allocation264_spill] sm:$0xff] %v7100_v51  ;;  %3052 = vrot.lane.b32.xlu0 %v3029_v29, %s5571_s20 }
 0x39b   : > { %v7106_v18 = vpop.permute.xlu1 %2350 }
 0x39c   : > { %10009 = vst [vmem:[#allocation265_spill] sm:$0xff] %v7106_v18  ;;  %v7108_v14 = vpop.permute.xlu0 %2563  ;;  %2800 = vrot.lane.b32.xlu1 %v2780_v48, %s5567_s9  ;;  %v7125_v48 = vstv %s5029_s23  ;;  %s5585_s23 = smov 101  }
 0x39d   : > { %10010 = vst [vmem:[#allocation266_spill] sm:$0xff] %v7108_v14  ;;  %3081 = vperm.xlu0 %5343, %v6498_v39   ;;  %10015 = vst [vmem:[#allocation271_spill] sm:$0xff] %v7125_v48  ;;  %v3145_v18 = vmul.f32 %v6482_v22, %v7125_v48 }
 0x39f   : > { %v7114_v19 = vpop.permute.xlu1 %2354 }
 0x3a0   : > { %10011 = vst [vmem:[#allocation267_spill] sm:$0xff] %v7114_v19  ;;  %v7116_v36 = vpop.permute.xlu0 %2589  ;;  %2804 = vrot.lane.b32.xlu1 %v2782_v54, %s5567_s9  ;;  %v3147_v54 = vmul.f32 %v6491_v8, %v7125_v48  ;;  %s5034_s9 = sld [smem:[#allocation5 + $0x1a]] }
 0x3a1   : > { %10012 = vst [vmem:[#allocation268_spill] sm:$0xff] %v7116_v36  ;;  %3093 = vperm.xlu0 %5343, %v6563_v40  }
 0x3a3   : > { %v7120_v29 = vpop.permute.xlu1 %2362 }
 0x3a4   : > { %10013 = vst [vmem:[#allocation269_spill] sm:$0xff] %v7120_v29  ;;  %v7122_v16 = vpop.permute.xlu0 %2601  ;;  %2831 = vperm.xlu1 %5338, %v6482_v22   ;;  %v9637_v29 = vmov 22  }
 0x3a5   : > { %10014 = vst [vmem:[#allocation270_spill] sm:$0xff] %v7122_v16  ;;  %3101 = vperm.xlu0 %5343, %v6574_v24  }
 0x3a7   : > { %v7130_v19 = vpop.permute.xlu1 %2370 }
 0x3a8   : > { %10016 = vst [vmem:[#allocation272_spill] sm:$0xff] %v7130_v19  ;;  %v7132_v36 = vpop.permute.xlu0 %2609  ;;  %2839 = vperm.xlu1 %5338, %v6491_v8  }
 0x3a9   : > { %10017 = vst [vmem:[#allocation273_spill] sm:$0xff] %v7132_v36  ;;  %3161 = vrot.lane.b32.xlu0 %v3145_v18, %s5573_s24  ;;  %v3149_v36 = vmul.f32 %v6563_v40, %v7125_v48 }
 0x3aa   : > { %5344 = vset.pattern.permute.xlu0 %v9637_v29  ;;  %v3151_v29 = vmul.f32 %v6574_v24, %v7125_v48 }
 0x3ab   : > { %v7139_v16 = vpop.permute.xlu1 %2428 }
 0x3ac   : > { %10018 = vst [vmem:[#allocation274_spill] sm:$0xff] %v7139_v16  ;;  %v7141_v14 = vpop.permute.xlu0 %2669  ;;  %2843 = vperm.xlu1 %5338, %v6507_v44  }
 0x3ad   : > { %10019 = vst [vmem:[#allocation275_spill] sm:$0xff] %v7141_v14  ;;  %3165 = vrot.lane.b32.xlu0 %v3147_v54, %s5573_s24  ;;  %v2900_v54 = vmul.f32 %v6498_v39, %v6988_v0 }
 0x3af   : > { %v7147_v51 = vpop.permute.xlu1 %2432 }
 0x3b0   : > { %10020 = vst [vmem:[#allocation276_spill] sm:$0xff] %v7147_v51  ;;  %v7149_v18 = vpop.permute.xlu0 %2673  ;;  %2851 = vperm.xlu1 %5338, %v6519_v42  }
 0x3b1   : > { %10021 = vst [vmem:[#allocation277_spill] sm:$0xff] %v7149_v18  ;;  %3169 = vrot.lane.b32.xlu0 %v3149_v36, %s5573_s24  ;;  %v2902_v36 = vmul.f32 %v6507_v44, %v6988_v0 }
 0x3b3   : > { %v7155_v16 = vpop.permute.xlu1 %2436 }
 0x3b4   : > { %10022 = vst [vmem:[#allocation278_spill] sm:$0xff] %v7155_v16  ;;  %v7157_v14 = vpop.permute.xlu0 %2677  ;;  %2859 = vperm.xlu1 %5338, %v6530_v2   ;;  %v10026_v16 = vmov 20  }
 0x3b5   : > { %10023 = vst [vmem:[#allocation279_spill] sm:$0xff] %v7157_v14  ;;  %3173 = vrot.lane.b32.xlu0 %v3151_v29, %s5573_s24  ;;  %v2904_v29 = vmul.f32 %v6519_v42, %v6988_v0 }
 0x3b7   : > { %v7163_v51 = vpop.permute.xlu1 %2440 }
 0x3b8   : > { %10024 = vst [vmem:[#allocation280_spill] sm:$0xff] %v7163_v51  ;;  %v7165_v18 = vpop.permute.xlu0 %2681  ;;  %2917 = vrot.lane.b32.xlu1 %v2900_v54, %s5569_s12 }
 0x3b9   : > { %10025 = vst [vmem:[#allocation281_spill] sm:$0xff] %v7165_v18  ;;  %3200 = vperm.xlu0 %5344, %v6482_v22   ;;  %5341 = vset.pattern.permute.xlu1 %v10026_v16  ;;  %v2906_v16 = vmul.f32 %v6530_v2, %v6988_v0 }
 0x3bb   : > { %v7172_v14 = vpop.permute.xlu1 %2469 }
 0x3bc   : > { %10027 = vst [vmem:[#allocation282_spill] sm:$0xff] %v7172_v14  ;;  %v7174_v19 = vpop.permute.xlu0 %2708  ;;  %2921 = vrot.lane.b32.xlu1 %v2902_v36, %s5569_s12  ;;  %v7193_v14 = vstv %s5030_s25  ;;  %s5038_s25 = sld [smem:[#allocation5 + $0x1e]] }
 0x3bd   : > { %10028 = vst [vmem:[#allocation283_spill] sm:$0xff] %v7174_v19  ;;  %3212 = vperm.xlu0 %5344, %v6507_v44   ;;  %10033 = vst [vmem:[#allocation288_spill] sm:$0xff] %v7193_v14 }
 0x3bf   : > { %v7180_v54 = vpop.permute.xlu1 %2473 }
 0x3c0   : > { %10029 = vst [vmem:[#allocation284_spill] sm:$0xff] %v7180_v54  ;;  %v7182_v18 = vpop.permute.xlu0 %2720  ;;  %2925 = vrot.lane.b32.xlu1 %v2904_v29, %s5569_s12 }
 0x3c1   : > { %10030 = vst [vmem:[#allocation285_spill] sm:$0xff] %v7182_v18  ;;  %3220 = vperm.xlu0 %5344, %v6519_v42   ;;  %v3269_v18 = vmul.f32 %v6498_v39, %v7193_v14 }
 0x3c3   : > { %v7188_v19 = vpop.permute.xlu1 %2481 }
 0x3c4   : > { %10031 = vst [vmem:[#allocation286_spill] sm:$0xff] %v7188_v19  ;;  %v7190_v36 = vpop.permute.xlu0 %2728  ;;  %2929 = vrot.lane.b32.xlu1 %v2906_v16, %s5569_s12  ;;  %v9638_v16 = vmov 23   ;;  %s5035_s12 = sld [smem:[#allocation5 + $0x1b]] }
 0x3c5   : > { %10032 = vst [vmem:[#allocation287_spill] sm:$0xff] %v7190_v36  ;;  %3228 = vperm.xlu0 %5344, %v6530_v2   ;;  %v3271_v36 = vmul.f32 %v6507_v44, %v7193_v14  ;;  %v3275_v44 = vmul.f32 %v6530_v2, %v7193_v14  ;;  %v3024_v2 = vmul.f32 %v6491_v8, %v7060_v4 }
 0x3c7   : > { %v7198_v54 = vpop.permute.xlu1 %2489 }
 0x3c8   : > { %10034 = vst [vmem:[#allocation289_spill] sm:$0xff] %v7198_v54  ;;  %v7200_v29 = vpop.permute.xlu0 %2736  ;;  %2958 = vperm.xlu1 %5341, %v6498_v39   ;;  %v3273_v54 = vmul.f32 %v6519_v42, %v7193_v14  ;;  %v3022_v42 = vmul.f32 %v6482_v22, %v7060_v4 }
 0x3c9   : > { %10035 = vst [vmem:[#allocation290_spill] sm:$0xff] %v7200_v29  ;;  %3286 = vrot.lane.b32.xlu0 %v3269_v18, %s5575_s26 }
 0x3ca   : > { %5347 = vset.pattern.permute.xlu0 %v9638_v16 }
 0x3cb   : > { %v7207_v19 = vpop.permute.xlu1 %2549 }
 0x3cc   : > { %10036 = vst [vmem:[#allocation291_spill] sm:$0xff] %v7207_v19  ;;  %v7209_v51 = vpop.permute.xlu0 %2794  ;;  %2962 = vperm.xlu1 %5341, %v6491_v8  }
 0x3cd   : > { %10037 = vst [vmem:[#allocation292_spill] sm:$0xff] %v7209_v51  ;;  %3290 = vrot.lane.b32.xlu0 %v3271_v36, %s5575_s26 }
 0x3cf   : > { %v7215_v29 = vpop.permute.xlu1 %2553 }
 0x3d0   : > { %10038 = vst [vmem:[#allocation293_spill] sm:$0xff] %v7215_v29  ;;  %v7217_v18 = vpop.permute.xlu0 %2798  ;;  %2970 = vperm.xlu1 %5341, %v6563_v40   ;;  %v7318_v29 = vld [vmem:[%s5788_s28 + $0x8] sm:$0xff] }
 0x3d1   : > { %10039 = vst [vmem:[#allocation294_spill] sm:$0xff] %v7217_v18  ;;  %3294 = vrot.lane.b32.xlu0 %v3273_v54, %s5575_s26  ;;  %v10044_v54 = vmov 21  }
 0x3d3   : > { %v7223_v16 = vpop.permute.xlu1 %2557 }
 0x3d4   : > { %10040 = vst [vmem:[#allocation295_spill] sm:$0xff] %v7223_v16  ;;  %v7225_v51 = vpop.permute.xlu0 %2802  ;;  %2978 = vperm.xlu1 %5341, %v6574_v24   ;;  %v7339_v16 = vstv %s5032_s5  ;;  %s5589_s5 = smov 97  }
 0x3d5   : > { %10041 = vst [vmem:[#allocation296_spill] sm:$0xff] %v7225_v51  ;;  %3298 = vrot.lane.b32.xlu0 %v3275_v44, %s5575_s26  ;;  %v3026_v44 = vmul.f32 %v6563_v40, %v7060_v4  ;;  %10067 = vst [vmem:[#allocation320_spill] sm:$0xff] %v7339_v16 }
 0x3d7   : > { %v7231_v36 = vpop.permute.xlu1 %2561 }
 0x3d8   : > { %10042 = vst [vmem:[#allocation297_spill] sm:$0xff] %v7231_v36  ;;  %v7233_v18 = vpop.permute.xlu0 %2806  ;;  %3038 = vrot.lane.b32.xlu1 %v3022_v42, %s5571_s20 }
 0x3d9   : > { %10043 = vst [vmem:[#allocation298_spill] sm:$0xff] %v7233_v18  ;;  %3327 = vperm.xlu0 %5347, %v6498_v39   ;;  %5342 = vset.pattern.permute.xlu1 %v10044_v54  ;;  %v3028_v39 = vmul.f32 %v6574_v24, %v7060_v4  ;;  %v7255_v54 = vstv %s5031_s29  ;;  %s5039_s29 = sld [smem:[#allocation5 + $0x1f]] }
 0x3da   : > { %10049 = vst [vmem:[#allocation303_spill] sm:$0xff] %v7255_v54 }
 0x3db   : > { %v7240_v51 = vpop.permute.xlu1 %2585 }
 0x3dc   : > { %10045 = vst [vmem:[#allocation299_spill] sm:$0xff] %v7240_v51  ;;  %v7242_v22 = vpop.permute.xlu0 %2835  ;;  %3042 = vrot.lane.b32.xlu1 %v3024_v2, %s5571_s20  ;;  %v7259_v2 = vld [vmem:[%s5788_s28] sm:$0xff] }
 0x3dd   : > { %10046 = vst [vmem:[#allocation300_spill] sm:$0xff] %v7242_v22  ;;  %3339 = vperm.xlu0 %5347, %v6563_v40   ;;  %v3391_v51 = vmul.f32 %v7259_v2, %v7255_v54 }
 0x3df   : > { %v7248_v42 = vpop.permute.xlu1 %2593 }
 0x3e0   : > { %10047 = vst [vmem:[#allocation301_spill] sm:$0xff] %v7248_v42  ;;  %v7250_v8 = vpop.permute.xlu0 %2847  ;;  %3046 = vrot.lane.b32.xlu1 %v3026_v44, %s5571_s20  ;;  %v7270_v44 = vld [vmem:[%s5788_s28 + $0x10] sm:$0xff]  ;;  %v9639_v42 = vmov 24  }
 0x3e1   : > { %10048 = vst [vmem:[#allocation302_spill] sm:$0xff] %v7250_v8  ;;  %3347 = vperm.xlu0 %5347, %v6574_v24   ;;  %v3393_v8 = vmul.f32 %v7270_v44, %v7255_v54  ;;  %v3516_v17 = vmul.f32 %v7270_v44, %v7339_v16 }
 0x3e3   : > { %v7263_v22 = vpop.permute.xlu1 %2597 }
 0x3e4   : > { %10050 = vst [vmem:[#allocation304_spill] sm:$0xff] %v7263_v22  ;;  %v7265_v36 = vpop.permute.xlu0 %2855  ;;  %3050 = vrot.lane.b32.xlu1 %v3028_v39, %s5571_s20  ;;  %s5037_s20 = sld [smem:[#allocation5 + $0x1d]] }
 0x3e5   : > { %10051 = vst [vmem:[#allocation305_spill] sm:$0xff] %v7265_v36  ;;  %3407 = vrot.lane.b32.xlu0 %v3391_v51, %s5577_s30  ;;  %v3395_v51 = vmul.f32 %v6563_v40, %v7255_v54 }
 0x3e6   : > { %5348 = vset.pattern.permute.xlu0 %v9639_v42  ;;  %v3397_v42 = vmul.f32 %v6574_v24, %v7255_v54 }
 0x3e7   : > { %v7275_v18 = vpop.permute.xlu1 %2605 }
 0x3e8   : > { %10052 = vst [vmem:[#allocation306_spill] sm:$0xff] %v7275_v18  ;;  %v7277_v19 = vpop.permute.xlu0 %2915  ;;  %3077 = vperm.xlu1 %5342, %v7259_v2  }
 0x3e9   : > { %10053 = vst [vmem:[#allocation307_spill] sm:$0xff] %v7277_v19  ;;  %3411 = vrot.lane.b32.xlu0 %v3393_v8, %s5577_s30  ;;  %v7296_v8 = vld [vmem:[%s5788_s28 + $0x18] sm:$0xff] }
 0x3eb   : > { %v7283_v39 = vpop.permute.xlu1 %2613 }
 0x3ec   : > { %10054 = vst [vmem:[#allocation308_spill] sm:$0xff] %v7283_v39  ;;  %v7285_v36 = vpop.permute.xlu0 %2919  ;;  %3085 = vperm.xlu1 %5342, %v7270_v44  }
 0x3ed   : > { %10055 = vst [vmem:[#allocation309_spill] sm:$0xff] %v7285_v36  ;;  %3415 = vrot.lane.b32.xlu0 %v3395_v51, %s5577_s30  ;;  %v7305_v36 = vld [vmem:[%s5788_s28 + $0x28] sm:$0xff] }
 0x3ef   : > { %v7291_v18 = vpop.permute.xlu1 %2671 }
 0x3f0   : > { %10056 = vst [vmem:[#allocation310_spill] sm:$0xff] %v7291_v18  ;;  %v7293_v22 = vpop.permute.xlu0 %2923  ;;  %3089 = vperm.xlu1 %5342, %v7296_v8   ;;  %v7314_v18 = vld [vmem:[%s5788_s28 + $0x38] sm:$0xff] }
 0x3f1   : > { %10057 = vst [vmem:[#allocation311_spill] sm:$0xff] %v7293_v22  ;;  %3419 = vrot.lane.b32.xlu0 %v3397_v42, %s5577_s30  ;;  %v3146_v42 = vmul.f32 %v7318_v29, %v7125_v48 }
 0x3f3   : > { %v7300_v40 = vpop.permute.xlu1 %2675 }
 0x3f4   : > { %10058 = vst [vmem:[#allocation312_spill] sm:$0xff] %v7300_v40  ;;  %v7302_v19 = vpop.permute.xlu0 %2927  ;;  %3097 = vperm.xlu1 %5342, %v7305_v36  }
 0x3f5   : > { %10059 = vst [vmem:[#allocation313_spill] sm:$0xff] %v7302_v19  ;;  %3446 = vperm.xlu0 %5348, %v7259_v2  }
 0x3f7   : > { %v7309_v24 = vpop.permute.xlu1 %2679 }
 0x3f8   : > { %10060 = vst [vmem:[#allocation314_spill] sm:$0xff] %v7309_v24  ;;  %v7311_v51 = vpop.permute.xlu0 %2954  ;;  %3105 = vperm.xlu1 %5342, %v7314_v18   ;;  %v10064_v24 = vmov 22  }
 0x3f9   : > { %10061 = vst [vmem:[#allocation315_spill] sm:$0xff] %v7311_v51  ;;  %3458 = vperm.xlu0 %5348, %v7296_v8   ;;  %v3148_v51 = vmul.f32 %v7296_v8, %v7125_v48 }
 0x3fb   : > { %v7323_v19 = vpop.permute.xlu1 %2683 }
 0x3fc   : > { %10062 = vst [vmem:[#allocation316_spill] sm:$0xff] %v7323_v19  ;;  %v7325_v40 = vpop.permute.xlu0 %2966  ;;  %3163 = vrot.lane.b32.xlu1 %v3146_v42, %s5573_s24  ;;  %v3150_v19 = vmul.f32 %v7305_v36, %v7125_v48  ;;  %v3515_v42 = vmul.f32 %v7318_v29, %v7339_v16 }
 0x3fd   : > { %10063 = vst [vmem:[#allocation317_spill] sm:$0xff] %v7325_v40  ;;  %3466 = vperm.xlu0 %5348, %v7305_v36   ;;  %5345 = vset.pattern.permute.xlu1 %v10064_v24  ;;  %v3152_v24 = vmul.f32 %v7314_v18, %v7125_v48 }
 0x3ff   : > { %v7332_v22 = vpop.permute.xlu1 %2712 }
 0x400   : > { %10065 = vst [vmem:[#allocation318_spill] sm:$0xff] %v7332_v22  ;;  %v7334_v39 = vpop.permute.xlu0 %2974  ;;  %3167 = vrot.lane.b32.xlu1 %v3148_v51, %s5573_s24  ;;  %v3517_v51 = vmul.f32 %v7296_v8, %v7339_v16 }
 0x401   : > { %10066 = vst [vmem:[#allocation319_spill] sm:$0xff] %v7334_v39  ;;  %3474 = vperm.xlu0 %5348, %v7314_v18   ;;  %v9640_v39 = vmov 25  }
 0x403   : > { %v7344_v40 = vpop.permute.xlu1 %2716 }
 0x404   : > { %10068 = vst [vmem:[#allocation321_spill] sm:$0xff] %v7344_v40  ;;  %v7346_v38 = vpop.permute.xlu0 %2982  ;;  %3171 = vrot.lane.b32.xlu1 %v3150_v19, %s5573_s24  ;;  %v3519_v19 = vmul.f32 %v7305_v36, %v7339_v16 }
 0x405   : > { %10069 = vst [vmem:[#allocation322_spill] sm:$0xff] %v7346_v38  ;;  %3532 = vrot.lane.b32.xlu0 %v3515_v42, %s5579_s6 }
 0x406   : > { %5351 = vset.pattern.permute.xlu0 %v9640_v39  ;;  %v3521_v39 = vmul.f32 %v7314_v18, %v7339_v16 }
 0x407   : > { %v7355_v22 = vpop.permute.xlu1 %2724 }
 0x408   : > { %10070 = vst [vmem:[#allocation323_spill] sm:$0xff] %v7355_v22  ;;  %v7357_v40 = vpop.permute.xlu0 %3040  ;;  %3175 = vrot.lane.b32.xlu1 %v3152_v24, %s5573_s24  ;;  %s5586_s24 = smov 100  }
 0x409   : > { %10071 = vst [vmem:[#allocation324_spill] sm:$0xff] %v7357_v40  ;;  %3536 = vrot.lane.b32.xlu0 %v3517_v51, %s5579_s6  ;;  %v7382_v40 = vld [vmem:[%s5788_s28 + $0x20] sm:$0xff] }
 0x40b   : > { %v7363_v38 = vpop.permute.xlu1 %2732 }
 0x40c   : > { %10072 = vst [vmem:[#allocation325_spill] sm:$0xff] %v7363_v38  ;;  %v7365_v42 = vpop.permute.xlu0 %3044  ;;  %3204 = vperm.xlu1 %5345, %v7318_v29  }
 0x40d   : > { %10073 = vst [vmem:[#allocation326_spill] sm:$0xff] %v7365_v42  ;;  %3540 = vrot.lane.b32.xlu0 %v3519_v19, %s5579_s6 }
 0x40f   : > { %v7371_v22 = vpop.permute.xlu1 %2792 }
 0x410   : > { %10074 = vst [vmem:[#allocation327_spill] sm:$0xff] %v7371_v22  ;;  %v7373_v24 = vpop.permute.xlu0 %3048  ;;  %3208 = vperm.xlu1 %5345, %v7270_v44  }
 0x411   : > { %10075 = vst [vmem:[#allocation328_spill] sm:$0xff] %v7373_v24  ;;  %3544 = vrot.lane.b32.xlu0 %v3521_v39, %s5579_s6  ;;  %v7391_v24 = vld [vmem:[%s5788_s28 + $0x30] sm:$0xff]  ;;  %v3268_v39 = vmul.f32 %v7259_v2, %v7193_v14 }
 0x413   : > { %v7377_v51 = vpop.permute.xlu1 %2796 }
 0x414   : > { %10076 = vst [vmem:[#allocation329_spill] sm:$0xff] %v7377_v51  ;;  %v7379_v38 = vpop.permute.xlu0 %3052  ;;  %3216 = vperm.xlu1 %5345, %v7382_v40   ;;  %v3270_v51 = vmul.f32 %v7270_v44, %v7193_v14 }
 0x415   : > { %10077 = vst [vmem:[#allocation330_spill] sm:$0xff] %v7379_v38  ;;  %3570 = vperm.xlu0 %5351, %v7318_v29  }
 0x417   : > { %v7386_v19 = vpop.permute.xlu1 %2800 }
 0x418   : > { %10078 = vst [vmem:[#allocation331_spill] sm:$0xff] %v7386_v19  ;;  %v7388_v42 = vpop.permute.xlu0 %3081  ;;  %3224 = vperm.xlu1 %5345, %v7391_v24   ;;  %v7404_v19 = vstv %s5033_s7 }
 0x419   : > { %10079 = vst [vmem:[#allocation332_spill] sm:$0xff] %v7388_v42  ;;  %3582 = vperm.xlu0 %5351, %v7382_v40   ;;  %10082 = vst [vmem:[#allocation335_spill] sm:$0xff] %v7404_v19  ;;  %v3634_v42 = vmul.f32 %v7259_v2, %v7404_v19 }
 0x41b   : > { %v7397_v38 = vpop.permute.xlu1 %2804 }
 0x41c   : > { %10080 = vst [vmem:[#allocation333_spill] sm:$0xff] %v7397_v38  ;;  %v7399_v22 = vpop.permute.xlu0 %3093  ;;  %3284 = vrot.lane.b32.xlu1 %v3268_v39, %s5575_s26  ;;  %v3272_v39 = vmul.f32 %v7382_v40, %v7193_v14  ;;  %v9649_v38 = vmov 26  }
 0x41d   : > { %10081 = vst [vmem:[#allocation334_spill] sm:$0xff] %v7399_v22  ;;  %3590 = vperm.xlu0 %5351, %v7391_v24   ;;  %5346 = vset.pattern.permute.xlu1 %v10083_v11  ;;  %v3636_v22 = vmul.f32 %v7270_v44, %v7404_v19 }
 0x41f   : > { %v7410_v28 = vpop.permute.xlu1 %2831 }
 0x420   : > { %10084 = vst [vmem:[#allocation336_spill] sm:$0xff] %v7410_v28  ;;  %v7412_v26 = vpop.permute.xlu0 %3101  ;;  %3288 = vrot.lane.b32.xlu1 %v3270_v51, %s5575_s26  ;;  %v3274_v51 = vmul.f32 %v7391_v24, %v7193_v14 }
 0x421   : > { %10085 = vst [vmem:[#allocation337_spill] sm:$0xff] %v7412_v26  ;;  %3650 = vrot.lane.b32.xlu0 %v3634_v42, %s5581_s8  ;;  %v3638_v42 = vmul.f32 %v7382_v40, %v7404_v19 }
 0x422   : > { %5352 = vset.pattern.permute.xlu0 %v9649_v38  ;;  %v3640_v38 = vmul.f32 %v7391_v24, %v7404_v19 }
 0x423   : > { %v7421_v33 = vpop.permute.xlu1 %2839 }
 0x424   : > { %10086 = vst [vmem:[#allocation338_spill] sm:$0xff] %v7421_v33  ;;  %v7423_v11 = vpop.permute.xlu0 %3161  ;;  %3292 = vrot.lane.b32.xlu1 %v3272_v39, %s5575_s26 }
 0x425   : > { %10087 = vst [vmem:[#allocation339_spill] sm:$0xff] %v7423_v11  ;;  %3654 = vrot.lane.b32.xlu0 %v3636_v22, %s5581_s8 }
 0x427   : > { %v7431_v26 = vpop.permute.xlu1 %2843 }
 0x428   : > { %10088 = vst [vmem:[#allocation340_spill] sm:$0xff] %v7431_v26  ;;  %v7433_v28 = vpop.permute.xlu0 %3165  ;;  %3296 = vrot.lane.b32.xlu1 %v3274_v51, %s5575_s26  ;;  %s5587_s26 = smov 99  }
 0x429   : > { %10089 = vst [vmem:[#allocation341_spill] sm:$0xff] %v7433_v28  ;;  %3658 = vrot.lane.b32.xlu0 %v3638_v42, %s5581_s8 }
 0x42b   : > { %v7439_v39 = vpop.permute.xlu1 %2851 }
 0x42c   : > { %10090 = vst [vmem:[#allocation342_spill] sm:$0xff] %v7439_v39  ;;  %v7441_v33 = vpop.permute.xlu0 %3169  ;;  %3323 = vperm.xlu1 %5346, %v7259_v2  }
 0x42d   : > { %10091 = vst [vmem:[#allocation343_spill] sm:$0xff] %v7441_v33  ;;  %3662 = vrot.lane.b32.xlu0 %v3640_v38, %s5581_s8  ;;  %v10103_v33 = vmov 24  }
 0x42f   : > { %v7445_v22 = vpop.permute.xlu1 %2859 }
 0x430   : > { %10092 = vst [vmem:[#allocation344_spill] sm:$0xff] %v7445_v22  ;;  %v7447_v26 = vpop.permute.xlu0 %3173  ;;  %3331 = vperm.xlu1 %5346, %v7270_v44   ;;  %v9652_v22 = vmov 28  }
 0x431   : > { %10093 = vst [vmem:[#allocation345_spill] sm:$0xff] %v7447_v26  ;;  %3689 = vperm.xlu0 %5352, %v7259_v2  }
 0x433   : > { %v7451_v51 = vpop.permute.xlu1 %2917 }
 0x434   : > { %10094 = vst [vmem:[#allocation346_spill] sm:$0xff] %v7451_v51  ;;  %v7453_v42 = vpop.permute.xlu0 %3200  ;;  %3335 = vperm.xlu1 %5346, %v7296_v8   ;;  %v7470_v51 = vstv %s5034_s9 }
 0x435   : > { %10095 = vst [vmem:[#allocation347_spill] sm:$0xff] %v7453_v42  ;;  %3701 = vperm.xlu0 %5352, %v7296_v8   ;;  %v3392_v42 = vmul.f32 %v7318_v29, %v7255_v54  ;;  %10100 = vst [vmem:[#allocation352_spill] sm:$0xff] %v7470_v51 }
 0x437   : > { %v7457_v39 = vpop.permute.xlu1 %2921 }
 0x438   : > { %10096 = vst [vmem:[#allocation348_spill] sm:$0xff] %v7457_v39  ;;  %v7459_v38 = vpop.permute.xlu0 %3212  ;;  %3343 = vperm.xlu1 %5346, %v7305_v36  }
 0x439   : > { %10097 = vst [vmem:[#allocation349_spill] sm:$0xff] %v7459_v38  ;;  %3709 = vperm.xlu0 %5352, %v7305_v36   ;;  %v3758_v38 = vmul.f32 %v7318_v29, %v7470_v51 }
 0x43b   : > { %v7463_v26 = vpop.permute.xlu1 %2925 }
 0x43c   : > { %10098 = vst [vmem:[#allocation350_spill] sm:$0xff] %v7463_v26  ;;  %v7465_v11 = vpop.permute.xlu0 %3220  ;;  %3351 = vperm.xlu1 %5346, %v7314_v18   ;;  %v3760_v26 = vmul.f32 %v7296_v8, %v7470_v51 }
 0x43d   : > { %10099 = vst [vmem:[#allocation351_spill] sm:$0xff] %v7465_v11  ;;  %3717 = vperm.xlu0 %5352, %v7314_v18   ;;  %v3394_v11 = vmul.f32 %v7296_v8, %v7255_v54 }
 0x43f   : > { %v7475_v39 = vpop.permute.xlu1 %2929 }
 0x440   : > { %10101 = vst [vmem:[#allocation353_spill] sm:$0xff] %v7475_v39  ;;  %v7477_v28 = vpop.permute.xlu0 %3228  ;;  %3409 = vrot.lane.b32.xlu1 %v3392_v42, %s5577_s30  ;;  %v3396_v42 = vmul.f32 %v7305_v36, %v7255_v54 }
 0x441   : > { %10102 = vst [vmem:[#allocation354_spill] sm:$0xff] %v7477_v28  ;;  %3775 = vrot.lane.b32.xlu0 %v3758_v38, %s5583_s11  ;;  %5349 = vset.pattern.permute.xlu1 %v10103_v33  ;;  %v3762_v38 = vmul.f32 %v7305_v36, %v7470_v51 }
 0x442   : > { %5356 = vset.pattern.permute.xlu0 %v9652_v22  ;;  %v3398_v22 = vmul.f32 %v7314_v18, %v7255_v54 }
 0x443   : > { %v7487_v31 = vpop.permute.xlu1 %2958 }
 0x444   : > { %10104 = vst [vmem:[#allocation355_spill] sm:$0xff] %v7487_v31  ;;  %v7489_v39 = vpop.permute.xlu0 %3286  ;;  %3413 = vrot.lane.b32.xlu1 %v3394_v11, %s5577_s30  ;;  %v3764_v11 = vmul.f32 %v7314_v18, %v7470_v51 }
 0x445   : > { %10105 = vst [vmem:[#allocation356_spill] sm:$0xff] %v7489_v39  ;;  %3779 = vrot.lane.b32.xlu0 %v3760_v26, %s5583_s11 }
 0x447   : > { %v7497_v28 = vpop.permute.xlu1 %2962 }
 0x448   : > { %10106 = vst [vmem:[#allocation357_spill] sm:$0xff] %v7497_v28  ;;  %v7499_v33 = vpop.permute.xlu0 %3290  ;;  %3417 = vrot.lane.b32.xlu1 %v3396_v42, %s5577_s30  ;;  %v7512_v28 = vstv %s5035_s12 }
 0x449   : > { %10107 = vst [vmem:[#allocation358_spill] sm:$0xff] %v7499_v33  ;;  %3783 = vrot.lane.b32.xlu0 %v3762_v38, %s5583_s11  ;;  %10110 = vst [vmem:[#allocation361_spill] sm:$0xff] %v7512_v28  ;;  %v3881_v42 = vmul.f32 %v7318_v29, %v7512_v28  ;;  %v7522_v38 = vstv %s5036_s14 }
 0x44a   : > { %10113 = vst [vmem:[#allocation364_spill] sm:$0xff] %v7522_v38 }
 0x44b   : > { %v7507_v31 = vpop.permute.xlu1 %2970 }
 0x44c   : > { %10108 = vst [vmem:[#allocation359_spill] sm:$0xff] %v7507_v31  ;;  %v7509_v26 = vpop.permute.xlu0 %3294  ;;  %3421 = vrot.lane.b32.xlu1 %v3398_v22, %s5577_s30  ;;  %v4003_v22 = vmul.f32 %v7259_v2, %v7522_v38  ;;  %s5588_s30 = smov 98  }
 0x44d   : > { %10109 = vst [vmem:[#allocation360_spill] sm:$0xff] %v7509_v26  ;;  %3787 = vrot.lane.b32.xlu0 %v3764_v11, %s5583_s11 }
 0x44f   : > { %v7517_v39 = vpop.permute.xlu1 %2978 }
 0x450   : > { %10111 = vst [vmem:[#allocation362_spill] sm:$0xff] %v7517_v39  ;;  %v7519_v33 = vpop.permute.xlu0 %3298  ;;  %3450 = vperm.xlu1 %5349, %v7318_v29   ;;  %v739_v39 = vmul.f32 %v5836_v47, %v5956_v34  ;;  %v862_v47 = vmul.f32 %v5861_v57, %v5956_v34  ;;  %v985_v57 = vmul.f32 %v5885_v3, %v5956_v34  ;;  %v10123_v3 = vmov 25  }
 0x451   : > { %10112 = vst [vmem:[#allocation363_spill] sm:$0xff] %v7519_v33  ;;  %3898 = vrot.lane.b32.xlu0 %v3881_v42, %s5585_s23  ;;  %v3883_v33 = vmul.f32 %v7296_v8, %v7512_v28 }
 0x452   : > { %v741_v6 = vrot.slane %v739_v39, 1  ;;  %v864_v39 = vrot.slane %v862_v47, 2  ;;  %v987_v47 = vrot.slane %v985_v57, 3  ;;  %v7583_v57 = vstv %s5038_s25 }
 0x453   : > { %v7527_v31 = vpop.permute.xlu1 %3038  ;;  %10126 = vst [vmem:[#allocation376_spill] sm:$0xff] %v7583_v57 }
 0x454   : > { %10114 = vst [vmem:[#allocation365_spill] sm:$0xff] %v7527_v31  ;;  %v7529_v11 = vpop.permute.xlu0 %3327  ;;  %3454 = vperm.xlu1 %5349, %v7270_v44   ;;  %v7542_v31 = vstv %s5037_s20 }
 0x455   : > { %10115 = vst [vmem:[#allocation366_spill] sm:$0xff] %v7529_v11  ;;  %4019 = vrot.lane.b32.xlu0 %v4003_v22, %s5586_s24  ;;  %10118 = vst [vmem:[#allocation369_spill] sm:$0xff] %v7542_v31  ;;  %v619_v11 = vmul.f32 %v5991_v61, %v5956_v34  ;;  %v4126_v22 = vmul.f32 %v7259_v2, %v7542_v31 }
 0x457   : > { %v7537_v26 = vpop.permute.xlu1 %3042  ;;  %v743_v62 = vadd.f32 %v741_v6, %v619_v11  ;;  %v1108_v11 = vmul.f32 %v5923_v20, %v5956_v34 }
 0x458   : > { %10116 = vst [vmem:[#allocation367_spill] sm:$0xff] %v7537_v26  ;;  %v7539_v42 = vpop.permute.xlu0 %3339  ;;  %3462 = vperm.xlu1 %5349, %v7382_v40  }
 0x459   : > { %10117 = vst [vmem:[#allocation368_spill] sm:$0xff] %v7539_v42  ;;  %3902 = vrot.lane.b32.xlu0 %v3883_v33, %s5585_s23  ;;  %v3514_v42 = vmul.f32 %v7259_v2, %v7339_v16  ;;  %v3884_v33 = vmul.f32 %v7382_v40, %v7512_v28  ;;  %v866_v6 = vadd.f32 %v864_v39, %v743_v62  ;;  %v1110_v39 = vrot.slane %v1108_v11, 4 }
 0x45a   : > { %v3518_v62 = vmul.f32 %v7382_v40, %v7339_v16  ;;  %v1354_v11 = vmul.f32 %v6057_v55, %v5956_v34 }
 0x45b   : > { %v7551_v21 = vpop.permute.xlu1 %3046 }
 0x45c   : > { %10119 = vst [vmem:[#allocation370_spill] sm:$0xff] %v7551_v21  ;;  %v7553_v26 = vpop.permute.xlu0 %3347  ;;  %3470 = vperm.xlu1 %5349, %v7391_v24  }
 0x45d   : > { %10120 = vst [vmem:[#allocation371_spill] sm:$0xff] %v7553_v26  ;;  %4142 = vrot.lane.b32.xlu0 %v4126_v22, %s5587_s26  ;;  %v4128_v22 = vmul.f32 %v7270_v44, %v7542_v31 }
 0x45f   : > { %v7563_v21 = vpop.permute.xlu1 %3050 }
 0x460   : > { %10121 = vst [vmem:[#allocation372_spill] sm:$0xff] %v7563_v21  ;;  %v7565_v26 = vpop.permute.xlu0 %3407  ;;  %3530 = vrot.lane.b32.xlu1 %v3514_v42, %s5579_s6  ;;  %v989_v42 = vadd.f32 %v987_v47, %v866_v6 }
 0x461   : > { %10122 = vst [vmem:[#allocation373_spill] sm:$0xff] %v7565_v26  ;;  %3904 = vrot.lane.b32.xlu0 %v3884_v33, %s5585_s23  ;;  %5350 = vset.pattern.permute.xlu1 %v10123_v3  ;;  %v1231_v33 = vmul.f32 %v5989_v59, %v5956_v34  ;;  %v4250_v3 = vmul.f32 %v7318_v29, %v7583_v57  ;;  %v1356_v59 = vrot.slane %v1354_v11, 6 }
 0x462   : > { %v1112_v6 = vadd.f32 %v1110_v39, %v989_v42  ;;  %v1477_v42 = vmul.f32 %v6123_v63, %v5956_v34  ;;  %v4251_v39 = vmul.f32 %v7270_v44, %v7583_v57  ;;  %v1600_v11 = vmul.f32 %v6198_v60, %v5982_v53 }
 0x463   : > { %v7576_v21 = vpop.permute.xlu1 %3077  ;;  %v1233_v47 = vrot.slane %v1231_v33, 5 }
 0x464   : > { %10124 = vst [vmem:[#allocation374_spill] sm:$0xff] %v7576_v21  ;;  %v7578_v26 = vpop.permute.xlu0 %3411  ;;  %3534 = vrot.lane.b32.xlu1 %v3516_v17, %s5579_s6  ;;  %v3520_v17 = vmul.f32 %v7391_v24, %v7339_v16 }
 0x465   : > { %10125 = vst [vmem:[#allocation375_spill] sm:$0xff] %v7578_v26  ;;  %4146 = vrot.lane.b32.xlu0 %v4128_v22, %s5587_s26  ;;  %v4007_v22 = vmul.f32 %v7382_v40, %v7522_v38 }
 0x467   : > { %v7590_v21 = vpop.permute.xlu1 %3085 }
 0x468   : > { %10127 = vst [vmem:[#allocation377_spill] sm:$0xff] %v7590_v21  ;;  %v7592_v26 = vpop.permute.xlu0 %3415  ;;  %3538 = vrot.lane.b32.xlu1 %v3518_v62, %s5579_s6  ;;  %v1235_v62 = vadd.f32 %v1233_v47, %v1112_v6 }
 0x469   : > { %10128 = vst [vmem:[#allocation378_spill] sm:$0xff] %v7592_v26  ;;  %4267 = vrot.lane.b32.xlu0 %v4250_v3, %s5588_s30 }
 0x46b   : > { %v7602_v21 = vpop.permute.xlu1 %3089 }
 0x46c   : > { %10129 = vst [vmem:[#allocation379_spill] sm:$0xff] %v7602_v21  ;;  %v7604_v26 = vpop.permute.xlu0 %3419  ;;  %3542 = vrot.lane.b32.xlu1 %v3520_v17, %s5579_s6  ;;  %v7617_v21 = vstv %s5039_s29  ;;  %v1479_v17 = vrot.slane %v1477_v42, 7 }
 0x46d   : > { %10130 = vst [vmem:[#allocation380_spill] sm:$0xff] %v7604_v26  ;;  %4027 = vrot.lane.b32.xlu0 %v4007_v22, %s5586_s24  ;;  %10133 = vst [vmem:[#allocation383_spill] sm:$0xff] %v7617_v21  ;;  %v1358_v26 = vadd.f32 %v1356_v59, %v1235_v62  ;;  %v4373_v34 = vmul.f32 %v7318_v29, %v7617_v21  ;;  %v1720_v22 = vmul.f32 %v6267_v25, %v5982_v53 }
 0x46e   : > { %v4008_v59 = vmul.f32 %v7305_v36, %v7522_v38 }
 0x46f   : > { %v7612_v33 = vpop.permute.xlu1 %3097  ;;  %v1481_v62 = vadd.f32 %v1479_v17, %v1358_v26  ;;  %v3887_v26 = vmul.f32 %v7314_v18, %v7512_v28 }
 0x470   : > { %10131 = vst [vmem:[#allocation381_spill] sm:$0xff] %v7612_v33  ;;  %v7614_v3 = vpop.permute.xlu0 %3446  ;;  %3566 = vperm.xlu1 %5350, %v7259_v2   ;;  %v4252_v33 = vmul.f32 %v7296_v8, %v7583_v57 }
 0x471   : > { %10132 = vst [vmem:[#allocation382_spill] sm:$0xff] %v7614_v3  ;;  %4269 = vrot.lane.b32.xlu0 %v4251_v39, %s5588_s30  ;;  %v1722_v3 = vrot.slane %v1720_v22, 1 }
 0x473   : > { %v7622_v6 = vpop.permute.xlu1 %3105 }
 0x474   : > { %10134 = vst [vmem:[#allocation384_spill] sm:$0xff] %v7622_v6  ;;  %v7624_v47 = vpop.permute.xlu0 %3458  ;;  %3574 = vperm.xlu1 %5350, %v7270_v44  }
 0x475   : > { %10135 = vst [vmem:[#allocation385_spill] sm:$0xff] %v7624_v47  ;;  %4390 = vrot.lane.b32.xlu0 %v4373_v34, %s5589_s5  ;;  %v1601_v47 = vadd.f32 %v1600_v11, %v1481_v62  ;;  %v1843_v34 = vmul.f32 %v6342_v37, %v5982_v53  ;;  %v1966_v11 = vmul.f32 %v6413_v56, %v5982_v53 }
 0x477   : > { %v7634_v42 = vpop.permute.xlu1 %3163  ;;  %v1724_v17 = vadd.f32 %v1722_v3, %v1601_v47  ;;  %v1968_v3 = vrot.slane %v1966_v11, 3  ;;  %v2089_v47 = vmul.f32 %v6494_v41, %v5982_v53  ;;  %v2212_v11 = vmul.f32 %v6571_v43, %v5982_v53 }
 0x478   : > { %10136 = vst [vmem:[#allocation386_spill] sm:$0xff] %v7634_v42  ;;  %v7636_v39 = vpop.permute.xlu0 %3466  ;;  %3578 = vperm.xlu1 %5350, %v7296_v8  }
 0x479   : > { %10137 = vst [vmem:[#allocation387_spill] sm:$0xff] %v7636_v39  ;;  %4029 = vrot.lane.b32.xlu0 %v4008_v59, %s5586_s24  ;;  %v1845_v59 = vrot.slane %v1843_v34, 2  ;;  %v3635_v39 = vmul.f32 %v7318_v29, %v7404_v19 }
 0x47b   : > { %v7644_v6 = vpop.permute.xlu1 %3167  ;;  %v1847_v42 = vadd.f32 %v1845_v59, %v1724_v17  ;;  %v2091_v59 = vrot.slane %v2089_v47, 4 }
 0x47c   : > { %10138 = vst [vmem:[#allocation388_spill] sm:$0xff] %v7644_v6  ;;  %v7646_v25 = vpop.permute.xlu0 %3474  ;;  %3586 = vperm.xlu1 %5350, %v7305_v36   ;;  %v10144_v6 = vmov 26  }
 0x47d   : > { %10139 = vst [vmem:[#allocation389_spill] sm:$0xff] %v7646_v25  ;;  %4271 = vrot.lane.b32.xlu0 %v4252_v33, %s5588_s30  ;;  %v4131_v33 = vmul.f32 %v7305_v36, %v7542_v31  ;;  %v1970_v17 = vadd.f32 %v1968_v3, %v1847_v42  ;;  %v2214_v42 = vrot.slane %v2212_v11, 5  ;;  %v2335_v3 = vmul.f32 %v6653_v12, %v5982_v53 }
 0x47f   : > { %v7654_v22 = vpop.permute.xlu1 %3171 }
 0x480   : > { %10140 = vst [vmem:[#allocation390_spill] sm:$0xff] %v7654_v22  ;;  %v7656_v62 = vpop.permute.xlu0 %3532  ;;  %3594 = vperm.xlu1 %5350, %v7314_v18  }
 0x481   : > { %10141 = vst [vmem:[#allocation391_spill] sm:$0xff] %v7656_v62  ;;  %3910 = vrot.lane.b32.xlu0 %v3887_v26, %s5585_s23  ;;  %v3637_v62 = vmul.f32 %v7296_v8, %v7404_v19  ;;  %v4375_v26 = vmul.f32 %v7296_v8, %v7617_v21 }
 0x483   : > { %v7666_v34 = vpop.permute.xlu1 %3175 }
 0x484   : > { %10142 = vst [vmem:[#allocation392_spill] sm:$0xff] %v7666_v34  ;;  %v7668_v22 = vpop.permute.xlu0 %3536  ;;  %3652 = vrot.lane.b32.xlu1 %v3635_v39, %s5581_s8  ;;  %v3639_v39 = vmul.f32 %v7305_v36, %v7404_v19 }
 0x485   : > { %10143 = vst [vmem:[#allocation393_spill] sm:$0xff] %v7668_v22  ;;  %4152 = vrot.lane.b32.xlu0 %v4131_v33, %s5587_s26  ;;  %5353 = vset.pattern.permute.xlu1 %v10144_v6  ;;  %v4132_v33 = vmul.f32 %v7391_v24, %v7542_v31  ;;  %v2093_v6 = vadd.f32 %v2091_v59, %v1970_v17  ;;  %v2337_v17 = vrot.slane %v2335_v3, 6 }
 0x486   : > { %v2458_v59 = vmul.f32 %v6713_v32, %v5982_v53 }
 0x487   : > { %v7679_v34 = vpop.permute.xlu1 %3204 }
 0x488   : > { %10145 = vst [vmem:[#allocation394_spill] sm:$0xff] %v7679_v34  ;;  %v7681_v22 = vpop.permute.xlu0 %3540  ;;  %3656 = vrot.lane.b32.xlu1 %v3637_v62, %s5581_s8  ;;  %v3641_v62 = vmul.f32 %v7314_v18, %v7404_v19 }
 0x489   : > { %10146 = vst [vmem:[#allocation395_spill] sm:$0xff] %v7681_v22  ;;  %4394 = vrot.lane.b32.xlu0 %v4375_v26, %s5589_s5  ;;  %v4376_v26 = vmul.f32 %v7382_v40, %v7617_v21  ;;  %v2216_v22 = vadd.f32 %v2214_v42, %v2093_v6  ;;  %v4256_v42 = vmul.f32 %v7314_v18, %v7583_v57 }
 0x48b   : > { %v7691_v47 = vpop.permute.xlu1 %3208 }
 0x48c   : > { %10147 = vst [vmem:[#allocation396_spill] sm:$0xff] %v7691_v47  ;;  %v7693_v34 = vpop.permute.xlu0 %3544  ;;  %3660 = vrot.lane.b32.xlu1 %v3639_v39, %s5581_s8  ;;  %v4255_v39 = vmul.f32 %v7391_v24, %v7583_v57 }
 0x48d   : > { %10148 = vst [vmem:[#allocation397_spill] sm:$0xff] %v7693_v34  ;;  %4154 = vrot.lane.b32.xlu0 %v4132_v33, %s5587_s26  ;;  %v2339_v33 = vadd.f32 %v2337_v17, %v2216_v22  ;;  %v2460_v34 = vrot.slane %v2458_v59, 7  ;;  %v4379_v59 = vmul.f32 %v7314_v18, %v7617_v21 }
 0x48f   : > { %v7703_v11 = vpop.permute.xlu1 %3216  ;;  %v2462_v3 = vadd.f32 %v2460_v34, %v2339_v33  ;;  %v2824_v34 = vmul.f32 %v6928_v50, %v5998_v1 }
 0x490   : > { %10149 = vst [vmem:[#allocation398_spill] sm:$0xff] %v7703_v11  ;;  %v7705_v47 = vpop.permute.xlu0 %3570  ;;  %3664 = vrot.lane.b32.xlu1 %v3641_v62, %s5581_s8  ;;  %v2581_v62 = vmul.f32 %v6792_v45, %v5998_v1  ;;  %v10173_v45 = vld [vmem:[#allocation12_spill] sm:$0xff] }
 0x491   : > { %10150 = vst [vmem:[#allocation399_spill] sm:$0xff] %v7705_v47  ;;  %4396 = vrot.lane.b32.xlu0 %v4376_v26, %s5589_s5  ;;  %v2701_v26 = vmul.f32 %v6849_v58, %v5998_v1  ;;  %v2826_v11 = vrot.slane %v2824_v34, 2  ;;  %v3759_v34 = vmul.f32 %v7270_v44, %v7470_v51  ;;  %v9688_v58 = vmov 29  }
 0x493   : > { %v7711_v25 = vpop.permute.xlu1 %3224 }
 0x494   : > { %10151 = vst [vmem:[#allocation400_spill] sm:$0xff] %v7711_v25  ;;  %v7713_v6 = vpop.permute.xlu0 %3582  ;;  %3693 = vperm.xlu1 %5353, %v7318_v29   ;;  %v2703_v25 = vrot.slane %v2701_v26, 1 }
 0x495   : > { %10152 = vst [vmem:[#allocation401_spill] sm:$0xff] %v7713_v6  ;;  %4277 = vrot.lane.b32.xlu0 %v4255_v39, %s5588_s30  ;;  %v2582_v39 = vadd.f32 %v2581_v62, %v2462_v3  ;;  %v3757_v62 = vmul.f32 %v7259_v2, %v7470_v51 }
 0x497   : > { %v7723_v22 = vpop.permute.xlu1 %3284 }
 0x498   : > { %10153 = vst [vmem:[#allocation402_spill] sm:$0xff] %v7723_v22  ;;  %v7725_v17 = vpop.permute.xlu0 %3590  ;;  %3697 = vperm.xlu1 %5353, %v7270_v44   ;;  %v9666_v22 = vmov 27  }
 0x499   : > { %10154 = vst [vmem:[#allocation403_spill] sm:$0xff] %v7725_v17  ;;  %4279 = vrot.lane.b32.xlu0 %v4256_v42, %s5588_s30  ;;  %v2705_v17 = vadd.f32 %v2703_v25, %v2582_v39  ;;  %v2947_v42 = vmul.f32 %v6988_v0, %v5998_v1  ;;  %v3070_v25 = vmul.f32 %v7060_v4, %v5998_v1 }
 0x49b   : > { %v7733_v33 = vpop.permute.xlu1 %3288  ;;  %v2828_v26 = vadd.f32 %v2826_v11, %v2705_v17  ;;  %v3072_v11 = vrot.slane %v3070_v25, 4  ;;  %v3193_v17 = vmul.f32 %v7125_v48, %v5998_v1  ;;  %v660_v48 = vadd.f32 %v5980_v52, %v5937_v27 }
 0x49c   : > { %10155 = vst [vmem:[#allocation404_spill] sm:$0xff] %v7733_v33  ;;  %v7735_v6 = vpop.permute.xlu0 %3650  ;;  %3705 = vperm.xlu1 %5353, %v7382_v40   ;;  %v9668_v33 = vmov 31   ;;  %v574_v27 = vadd.f32 %v5966_v46, %v5912_v15  ;;  %v4004_v15 = vmul.f32 %v7318_v29, %v7522_v38 }
 0x49d   : > { %10156 = vst [vmem:[#allocation405_spill] sm:$0xff] %v7735_v6  ;;  %4402 = vrot.lane.b32.xlu0 %v4379_v59, %s5589_s5  ;;  %v2949_v6 = vrot.slane %v2947_v42, 3  ;;  %v3195_v4 = vrot.slane %v3193_v17, 5  ;;  %v571_v17 = vadd.f32 %v5966_v46, %v5896_v7 }
 0x49f   : > { %v7741_v47 = vpop.permute.xlu1 %3292 }
 0x4a0   : > { %10157 = vst [vmem:[#allocation406_spill] sm:$0xff] %v7741_v47  ;;  %v7743_v3 = vpop.permute.xlu0 %3654  ;;  %3713 = vperm.xlu1 %5353, %v7391_v24  }
 0x4a1   : > { %10158 = vst [vmem:[#allocation407_spill] sm:$0xff] %v7743_v3  ;;  %3939 = vperm.xlu0 %5356, %v7318_v29   ;;  %v2951_v3 = vadd.f32 %v2949_v6, %v2828_v26  ;;  %v3316_v6 = vmul.f32 %v7193_v14, %v5998_v1 }
 0x4a3   : > { %v7751_v59 = vpop.permute.xlu1 %3296 }
 0x4a4   : > { %10159 = vst [vmem:[#allocation408_spill] sm:$0xff] %v7751_v59  ;;  %v7753_v39 = vpop.permute.xlu0 %3658  ;;  %3773 = vrot.lane.b32.xlu1 %v3757_v62, %s5583_s11  ;;  %v3761_v62 = vmul.f32 %v7382_v40, %v7470_v51 }
 0x4a5   : > { %10160 = vst [vmem:[#allocation409_spill] sm:$0xff] %v7753_v39  ;;  %3947 = vperm.xlu0 %5356, %v7296_v8   ;;  %5354 = vset.pattern.permute.xlu1 %v9666_v22  ;;  %v3074_v39 = vadd.f32 %v3072_v11, %v2951_v3  ;;  %v3439_v3 = vmul.f32 %v7255_v54, %v5998_v1  ;;  %v10165_v11 = vmov 27  }
 0x4a6   : > { %v573_v54 = vadd.f32 %v5966_v46, %v5908_v13  ;;  %v3682_v13 = vmul.f32 %v7404_v19, %v6011_v9 }
 0x4a7   : > { %v7762_v42 = vpop.permute.xlu1 %3323  ;;  %v3197_v22 = vadd.f32 %v3195_v4, %v3074_v39  ;;  %v3880_v4 = vmul.f32 %v7259_v2, %v7512_v28  ;;  %v7795_v39 = vmul.f32 %v7259_v2, %v5991_v61 }
 0x4a8   : > { %10161 = vst [vmem:[#allocation410_spill] sm:$0xff] %v7762_v42  ;;  %v7764_v59 = vpop.permute.xlu0 %3662  ;;  %3777 = vrot.lane.b32.xlu1 %v3759_v34, %s5583_s11  ;;  %v3763_v34 = vmul.f32 %v7391_v24, %v7470_v51  ;;  %v3318_v42 = vrot.slane %v3316_v6, 6  ;;  %v3441_v6 = vrot.slane %v3439_v3, 7  ;;  %v7823_v3 = vmul.f32 %v7391_v24, %v5991_v61 }
 0x4a9   : > { %10162 = vst [vmem:[#allocation411_spill] sm:$0xff] %v7764_v59  ;;  %5367 = vset.pattern.permute.xlu0 %v9668_v33  ;;  %v7813_v59 = vmul.f32 %v7382_v40, %v5991_v61 }
 0x4aa   : > { %4308 = vperm.xlu0 %5367, %v7318_v29   ;;  %v3320_v7 = vadd.f32 %v3318_v42, %v3197_v22  ;;  %v572_v22 = vadd.f32 %v5966_v46, %v5901_v10  ;;  %v7819_v42 = vmul.f32 %v7305_v36, %v5991_v61  ;;  %v3882_v10 = vmul.f32 %v7270_v44, %v7512_v28 }
 0x4ab   : > { %v7773_v26 = vpop.permute.xlu1 %3331 }
 0x4ac   : > { %10163 = vst [vmem:[#allocation412_spill] sm:$0xff] %v7773_v26  ;;  %v7775_v25 = vpop.permute.xlu0 %3689  ;;  %3781 = vrot.lane.b32.xlu1 %v3761_v62, %s5583_s11  ;;  %v7799_v62 = vmul.f32 %v7318_v29, %v5991_v61  ;;  %v579_v26 = vand.u32 2147483647, %v571_v17  ;;  %v659_v17 = vadd.f32 %v5980_v52, %v5931_v23  ;;  %v3443_v47 = vadd.f32 %v3441_v6, %v3320_v7  ;;  %v10170_v7 = vld [vmem:[#allocation11_spill] sm:$0xff] }
 0x4ad   : > { %10164 = vst [vmem:[#allocation413_spill] sm:$0xff] %v7775_v25  ;;  %v661_v23 = vadd.f32 %v5980_v52, %v5945_v30  ;;  %v580_v50 = vand.u32 2147483647, %v572_v22  ;;  %v575_v6 = vadd.f32 %v5966_v46, %v10170_v7 }
 0x4ae   : > { %5368 = vset.pattern.permute.xlu0 %v10165_v11  ;;  %v3684_v11 = vrot.slane %v3682_v13, 1 }
 0x4af   : > { %3816 = vperm.xlu0 %5368, %v7318_v29   ;;  %v7786_v33 = vpop.permute.xlu1 %3335 }
 0x4b0   : > { %10166 = vst [vmem:[#allocation414_spill] sm:$0xff] %v7786_v33  ;;  %v7788_v25 = vpop.permute.xlu0 %3701  ;;  %3785 = vrot.lane.b32.xlu1 %v3763_v34, %s5583_s11  ;;  %v7803_v33 = vmul.f32 %v7270_v44, %v5991_v61  ;;  %v570_v34 = vadd.f32 %v5966_v46, %v5891_v5 }
 0x4b1   : > { %10167 = vst [vmem:[#allocation415_spill] sm:$0xff] %v7788_v25  ;;  %v7809_v25 = vmul.f32 %v7296_v8, %v5991_v61 }
 0x4b2   : > { %v578_v0 = vand.u32 2147483647, %v570_v34  ;;  %v667_v34 = vand.u32 2147483647, %v659_v17  ;;  %v582_v17 = vand.u32 2147483647, %v574_v27  ;;  %v589_v27 = vmul.f32 %v5991_v61, %v580_v50 }
 0x4b3   : > { %3840 = vperm.xlu0 %5368, %v7314_v18   ;;  %v7826_v5 = vpop.permute.xlu1 %3343 }
 0x4b4   : > { %10168 = vst [vmem:[#allocation416_spill] sm:$0xff] %v7826_v5  ;;  %v7832_v14 = vpop.permute.xlu0 %3709  ;;  %3896 = vrot.lane.b32.xlu1 %v3880_v4, %s5585_s23  ;;  %v3562_v5 = vmul.f32 %v7339_v16, %v6011_v9  ;;  %v663_v4 = vadd.f32 %v5980_v52, %v5971_v49  ;;  %v10171_v16 = vld [vmem:[#allocation16_spill] sm:$0xff]  ;;  %v577_v49 = vadd.f32 %v5966_v46, %v10173_v45 }
 0x4b5   : > { %10169 = vst [vmem:[#allocation417_spill] sm:$0xff] %v7832_v14  ;;  %v662_v14 = vadd.f32 %v5980_v52, %v5958_v35  ;;  %v665_v19 = vadd.f32 %v5980_v52, %v10171_v16  ;;  %v581_v35 = vand.u32 2147483647, %v573_v54  ;;  %v668_v16 = vand.u32 2147483647, %v660_v48 }
 0x4b6   : > { %v3563_v7 = vadd.f32 %v3562_v5, %v3443_v47  ;;  %v669_v54 = vand.u32 2147483647, %v661_v23  ;;  %v671_v32 = vand.u32 2147483647, %v663_v4  ;;  %v7870_v46 = vmul.f32 %v7314_v18, %v5991_v61  ;;  %v10176_v47 = vld [vmem:[#allocation8_spill] sm:$0xff] }
 0x4b7   : > { %5373 = vset.pattern.permute.xlu0 %v9688_v58  ;;  %v7856_v30 = vpop.permute.xlu1 %3351  ;;  %v3805_v58 = vmul.f32 %v7470_v51, %v6011_v9  ;;  %v588_v45 = vmul.f32 %v5991_v61, %v579_v26  ;;  %v585_v48 = vand.u32 2147483647, %v577_v49  ;;  %v676_v5 = vmul.f32 %v10176_v47, %v667_v34 }
 0x4b8   : > { %10172 = vst [vmem:[#allocation11_spill] sm:$0xff] %v7856_v30  ;;  %4058 = vperm.xlu0 %5373, %v7259_v2   ;;  %v7861_v22 = vpop.permute.xlu0 %3717  ;;  %3900 = vrot.lane.b32.xlu1 %v3882_v10, %s5585_s23  ;;  %v670_v30 = vand.u32 2147483647, %v662_v14  ;;  %v583_v10 = vand.u32 2147483647, %v575_v6  ;;  %v7877_v13 = vmul.f32 %v5991_v61, %v578_v0  ;;  %v4005_v18 = vmul.f32 %v7270_v44, %v7522_v38 }
 0x4b9   : > { %10174 = vst [vmem:[#allocation16_spill] sm:$0xff] %v7861_v22  ;;  %v673_v22 = vand.u32 2147483647, %v665_v19  ;;  %v677_v26 = vmul.f32 %v10176_v47, %v668_v16  ;;  %v3686_v19 = vadd.f32 %v3684_v11, %v3563_v7  ;;  %v3807_v23 = vrot.slane %v3805_v58, 2 }
 0x4ba   : > { %v3928_v4 = vmul.f32 %v7512_v28, %v6011_v9  ;;  %v678_v0 = vmul.f32 %v10176_v47, %v669_v54  ;;  %v679_v6 = vmul.f32 %v10176_v47, %v670_v30  ;;  %v680_v49 = vmul.f32 %v10176_v47, %v671_v32 }
 0x4bb   : > { %v7873_v12 = vpop.permute.xlu1 %3409  ;;  %v590_v34 = vmul.f32 %v5991_v61, %v581_v35  ;;  %v592_v44 = vmul.f32 %v5991_v61, %v583_v10  ;;  %v682_v11 = vmul.f32 %v10176_v47, %v673_v22  ;;  %v594_v16 = vmul.f32 %v5991_v61, %v585_v48  ;;  %v10180_v10 = vld [vmem:[#allocation17_spill] sm:$0xff] }
 0x4bc   : > { %10175 = vst [vmem:[#allocation12_spill] sm:$0xff] %v7873_v12  ;;  %4070 = vperm.xlu0 %5373, %v7296_v8   ;;  %v7880_v14 = vpop.permute.xlu0 %3775  ;;  %4021 = vrot.lane.b32.xlu1 %v4004_v15, %s5586_s24  ;;  %v591_v15 = vmul.f32 %v5991_v61, %v582_v17  ;;  %v7899_v7 = vadd.f32 %v676_v5, %v588_v45  ;;  %v3930_v54 = vrot.slane %v3928_v4, 3  ;;  %v10185_v4 = vld [vmem:[#allocation14_spill] sm:$0xff] }
 0x4bd   : > { %10177 = vst [vmem:[#allocation8_spill] sm:$0xff] %v7880_v14  ;;  %v4127_v32 = vmul.f32 %v7318_v29, %v7542_v31  ;;  %v7907_v30 = vadd.f32 %v677_v26, %v589_v27  ;;  %v3809_v35 = vadd.f32 %v3807_v23, %v3686_v19  ;;  %v4051_v22 = vmul.f32 %v7522_v38, %v6011_v9  ;;  %v10183_v19 = vld [vmem:[#allocation13_spill] sm:$0xff] }
 0x4be   : > { %v7911_v17 = vadd.f32 %v678_v0, %v590_v34  ;;  %v7913_v61 = vadd.f32 %v679_v6, %v591_v15  ;;  %v7915_v45 = vadd.f32 %v680_v49, %v592_v44  ;;  %v7919_v48 = vadd.f32 %v10180_v10, %v7795_v39  ;;  %v10188_v6 = vld [vmem:[#allocation20_spill] sm:$0xff]  ;;  %v10189_v49 = vld [vmem:[#allocation31_spill] sm:$0xff] }
 0x4bf   : > { %v7896_v58 = vpop.permute.xlu1 %3413  ;;  %v7921_v5 = vadd.f32 %v682_v11, %v594_v16  ;;  %v7929_v23 = vrot.slane %v5998_v1, %v10183_v19  ;;  %v7933_v27 = vrot.slane %v5998_v1, %v10185_v4  ;;  %v658_v39 = vadd.f32 %v5980_v52, %v10188_v6  ;;  %v10192_v52 = vld [vmem:[#allocation18_spill] sm:$0xff]  ;;  %v10193_v6 = vld [vmem:[#allocation44_spill] sm:$0xff] }
 0x4c0   : > { %10178 = vst [vmem:[#allocation418_spill] sm:$0xff] %v7896_v58  ;;  %4074 = vperm.xlu0 %5373, %v7382_v40   ;;  %v7902_v50 = vpop.permute.xlu0 %3779  ;;  %4023 = vrot.lane.b32.xlu1 %v4005_v18, %s5586_s24  ;;  %v10181_v18 = vld [vmem:[#allocation109_spill] sm:$0xff]  ;;  %v7941_v34 = vrot.slane %v5998_v1, %v10189_v49  ;;  %v4006_v15 = vmul.f32 %v7296_v8, %v7522_v38  ;;  %v4053_v11 = vrot.slane %v4051_v22, 4  ;;  %v9701_v58 = vmov 30  }
 0x4c1   : > { %10179 = vst [vmem:[#allocation419_spill] sm:$0xff] %v7902_v50  ;;  %v7925_v26 = vrot.slane %v5982_v53, %v10181_v18  ;;  %10184 = vst [vmem:[#allocation109_spill] sm:$0xff] %v7929_v23  ;;  %v3932_v44 = vadd.f32 %v3930_v54, %v3809_v35  ;;  %v4174_v16 = vmul.f32 %v7542_v31, %v6011_v9  ;;  %v10199_v35 = vld [vmem:[#allocation104_spill] sm:$0xff] }
 0x4c2   : > { %10186 = vst [vmem:[#allocation14_spill] sm:$0xff] %v7933_v27  ;;  %10190 = vst [vmem:[#allocation20_spill] sm:$0xff] %v7941_v34  ;;  %v7953_v10 = vadd.f32 %v10192_v52, %v7799_v62  ;;  %v7957_v14 = vrot.slane %v5998_v1, %v10193_v6  ;;  %v7969_v54 = vrot.slane %v5998_v1, %v10199_v35 }
 0x4c3   : > { %10182 = vst [vmem:[#allocation17_spill] sm:$0xff] %v7925_v26  ;;  %v7935_v0 = vpop.permute.xlu1 %3417  ;;  %v7973_v62 = vrot.slane %v5998_v1, %v10181_v18  ;;  %v7977_v22 = vrot.slane %v6011_v9, %v10183_v19  ;;  %v7981_v52 = vrot.slane %v6011_v9, %v10185_v4  ;;  %v7987_v50 = vrot.slane %v6011_v9, %v10189_v49 }
 0x4c4   : > { %10187 = vst [vmem:[#allocation420_spill] sm:$0xff] %v7935_v0  ;;  %4082 = vperm.xlu0 %5373, %v7391_v24   ;;  %v7944_v53 = vpop.permute.xlu0 %3783  ;;  %4144 = vrot.lane.b32.xlu1 %v4127_v32, %s5587_s26  ;;  %10194 = vst [vmem:[#allocation18_spill] sm:$0xff] %v7957_v14  ;;  %v10195_v0 = vld [vmem:[#allocation67_spill] sm:$0xff]  ;;  %v10197_v32 = vld [vmem:[#allocation76_spill] sm:$0xff]  ;;  %v4297_v4 = vmul.f32 %v7583_v57, %v6011_v9  ;;  %v666_v19 = vand.u32 2147483647, %v658_v39  ;;  %v4055_v49 = vadd.f32 %v4053_v11, %v3932_v44 }
 0x4c5   : > { %10191 = vst [vmem:[#allocation31_spill] sm:$0xff] %v7944_v53  ;;  %v7961_v53 = vrot.slane %v5998_v1, %v10195_v0  ;;  %v7965_v8 = vrot.slane %v5998_v1, %v10197_v32  ;;  %10200 = vst [vmem:[#allocation76_spill] sm:$0xff] %v7969_v54  ;;  %v4249_v1 = vmul.f32 %v7259_v2, %v7583_v57  ;;  %v10211_v54 = vld [vmem:[#allocation29_spill] sm:$0xff]  ;;  %v10213_v39 = vld [vmem:[#allocation30_spill] sm:$0xff] }
 0x4c6   : > { %10201 = vst [vmem:[#allocation104_spill] sm:$0xff] %v7973_v62  ;;  %10202 = vst [vmem:[#allocation421_spill] sm:$0xff] %v7977_v22  ;;  %v10209_v62 = vld [vmem:[#allocation27_spill] sm:$0xff]  ;;  %v8018_v11 = vrot.slane %v6011_v9, %v10181_v18  ;;  %v4420_v18 = vmul.f32 %v7617_v21, %v6011_v9 }
 0x4c7   : > { %10196 = vst [vmem:[#allocation44_spill] sm:$0xff] %v7961_v53  ;;  %10198 = vst [vmem:[#allocation67_spill] sm:$0xff] %v7965_v8  ;;  %v7983_v12 = vpop.permute.xlu1 %3421  ;;  %v8008_v8 = vrot.slane %v6011_v9, %v10195_v0  ;;  %v10214_v53 = vld [vmem:[#allocation32_spill] sm:$0xff] }
 0x4c8   : > { %10203 = vst [vmem:[#allocation422_spill] sm:$0xff] %v7981_v52  ;;  %10204 = vst [vmem:[#allocation423_spill] sm:$0xff] %v7983_v12  ;;  %5378 = vset.pattern.permute.xlu0 %v9701_v58  ;;  %v7990_v51 = vpop.permute.xlu0 %3787  ;;  %4025 = vrot.lane.b32.xlu1 %v4006_v15, %s5586_s24  ;;  %v10207_v52 = vld [vmem:[#allocation26_spill] sm:$0xff] }
 0x4c9   : > { %10205 = vst [vmem:[#allocation424_spill] sm:$0xff] %v7987_v50  ;;  %10206 = vst [vmem:[#allocation425_spill] sm:$0xff] %v7990_v51  ;;  %v10208_v12 = vld [vmem:[#allocation34_spill] sm:$0xff]  ;;  %4185 = vperm.xlu0 %5378, %v7318_v29   ;;  %v4176_v50 = vrot.slane %v4174_v16, 5  ;;  %v10210_v51 = vld [vmem:[#allocation28_spill] sm:$0xff] }
 0x4ca   : > { %v781_v22 = vadd.f32 %v10208_v12, %v10207_v52  ;;  %v782_v58 = vadd.f32 %v10208_v12, %v10209_v62  ;;  %v784_v15 = vadd.f32 %v10208_v12, %v10210_v51  ;;  %v783_v2 = vadd.f32 %v10208_v12, %v10211_v54  ;;  %10212 = vst [vmem:[#allocation26_spill] sm:$0xff] %v8008_v8  ;;  %v10218_v16 = vld [vmem:[#allocation33_spill] sm:$0xff] }
 0x4cb   : > { %v786_v52 = vadd.f32 %v10208_v12, %v10213_v39  ;;  %v785_v29 = vadd.f32 %v10208_v12, %v10214_v53  ;;  %v8014_v44 = vpop.permute.xlu1 %3450  ;;  %10216 = vst [vmem:[#allocation27_spill] sm:$0xff] %v8018_v11  ;;  %v8022_v51 = vrot.slane %v6011_v9, %v10193_v6  ;;  %v788_v0 = vadd.f32 %v10208_v12, %v10218_v16 }
 0x4cc   : > { %10215 = vst [vmem:[#allocation34_spill] sm:$0xff] %v8014_v44  ;;  %v8026_v54 = vpop.permute.xlu0 %3898  ;;  %4265 = vrot.lane.b32.xlu1 %v4249_v1, %s5588_s30  ;;  %v3885_v53 = vmul.f32 %v7305_v36, %v7512_v28  ;;  %v8033_v62 = vrot.slane %v6011_v9, %v10197_v32  ;;  %v675_v6 = vmul.f32 %v10176_v47, %v666_v19  ;;  %v789_v39 = vand.u32 2147483647, %v781_v22  ;;  %v10221_v1 = vld [vmem:[#allocation19_spill] sm:$0xff]  ;;  %v10222_v32 = vld [vmem:[#allocation21_spill] sm:$0xff]  ;;  %v10225_v47 = vld [vmem:[#allocation22_spill] sm:$0xff] }
 0x4cd   : > { %10217 = vst [vmem:[#allocation28_spill] sm:$0xff] %v8022_v51  ;;  %10219 = vst [vmem:[#allocation29_spill] sm:$0xff] %v8026_v54  ;;  %4197 = vperm.xlu0 %5378, %v7382_v40   ;;  %v4178_v12 = vadd.f32 %v4176_v50, %v4055_v49  ;;  %v4299_v16 = vrot.slane %v4297_v4, 6  ;;  %v8041_v11 = vadd.f32 %v10221_v1, %v7803_v33  ;;  %v790_v36 = vand.u32 2147483647, %v782_v58  ;;  %v8057_v58 = vld [vmem:[%s5788_s28 + $0x18] sm:$0xff] }
 0x4ce   : > { %10220 = vst [vmem:[#allocation30_spill] sm:$0xff] %v8033_v62  ;;  %v792_v8 = vand.u32 2147483647, %v784_v15  ;;  %v791_v44 = vand.u32 2147483647, %v783_v2  ;;  %v734_v62 = vadd.f32 %v10222_v32, %v7809_v25  ;;  %v8049_v40 = vrot.slane %v6011_v9, %v10199_v35  ;;  %10227 = vst [vmem:[#allocation21_spill] sm:$0xff] %v8057_v58 }
 0x4cf   : > { %v794_v54 = vand.u32 2147483647, %v786_v52  ;;  %v793_v51 = vand.u32 2147483647, %v785_v29  ;;  %v8045_v14 = vpop.permute.xlu1 %3454  ;;  %v735_v50 = vadd.f32 %v10225_v47, %v7813_v59  ;;  %v796_v19 = vand.u32 2147483647, %v788_v0 }
 0x4d0   : > { %10223 = vst [vmem:[#allocation32_spill] sm:$0xff] %v8045_v14  ;;  %10224 = vst [vmem:[#allocation33_spill] sm:$0xff] %v8049_v40  ;;  %v8053_v33 = vpop.permute.xlu0 %4019  ;;  %3906 = vrot.lane.b32.xlu1 %v3885_v53, %s5585_s23  ;;  %v4129_v25 = vmul.f32 %v8057_v58, %v7542_v31  ;;  %v4422_v22 = vrot.slane %v4420_v18, 7  ;;  %v683_v4 = vadd.f32 %v675_v6, %v7877_v13  ;;  %v10228_v49 = vld [vmem:[#allocation9_spill] sm:$0xff]  ;;  %v10229_v9 = vld [vmem:[#allocation43_spill] sm:$0xff] }
 0x4d1   : > { %10226 = vst [vmem:[#allocation19_spill] sm:$0xff] %v8053_v33  ;;  %v798_v15 = vmul.f32 %v10228_v49, %v789_v39  ;;  %v10230_v35 = vld [vmem:[#allocation47_spill] sm:$0xff]  ;;  %4205 = vperm.xlu0 %5378, %v7391_v24   ;;  %v4301_v59 = vadd.f32 %v4299_v16, %v4178_v12  ;;  %v799_v0 = vmul.f32 %v10228_v49, %v790_v36  ;;  %v10232_v13 = vld [vmem:[#allocation24_spill] sm:$0xff]  ;;  %v10233_v32 = vld [vmem:[#allocation45_spill] sm:$0xff] }
 0x4d2   : > { %v905_v2 = vadd.f32 %v10230_v35, %v10229_v9  ;;  %v10231_v52 = vld [vmem:[#allocation23_spill] sm:$0xff]  ;;  %v801_v53 = vmul.f32 %v10228_v49, %v792_v8  ;;  %v800_v18 = vmul.f32 %v10228_v49, %v791_v44  ;;  %v737_v6 = vadd.f32 %v10232_v13, %v7823_v3  ;;  %v10236_v47 = vld [vmem:[#allocation46_spill] sm:$0xff]  ;;  %v10238_v13 = vld [vmem:[#allocation48_spill] sm:$0xff] }
 0x4d3   : > { %v736_v29 = vadd.f32 %v10231_v52, %v7819_v42  ;;  %v803_v39 = vmul.f32 %v10228_v49, %v794_v54  ;;  %v802_v1 = vmul.f32 %v10228_v49, %v793_v51  ;;  %v904_v12 = vadd.f32 %v10230_v35, %v10233_v32  ;;  %v8077_v16 = vpop.permute.xlu1 %3462  ;;  %v10235_v42 = vld [vmem:[#allocation25_spill] sm:$0xff]  ;;  %v8088_v3 = vld [vmem:[%s5788_s28] sm:$0xff] }
 0x4d4   : > { %10234 = vst [vmem:[#allocation22_spill] sm:$0xff] %v8077_v16  ;;  %v738_v36 = vadd.f32 %v10235_v42, %v7870_v46  ;;  %v805_v8 = vmul.f32 %v10228_v49, %v796_v19  ;;  %v908_v44 = vadd.f32 %v10230_v35, %v10236_v47  ;;  %v8084_v9 = vpop.permute.xlu0 %3902  ;;  %4148 = vrot.lane.b32.xlu1 %v4129_v25, %s5587_s26  ;;  %v913_v52 = vand.u32 2147483647, %v905_v2  ;;  %v8095_v46 = vld [vmem:[%s5788_s28 + $0x38] sm:$0xff]  ;;  %v10240_v47 = vld [vmem:[#allocation49_spill] sm:$0xff] }
 0x4d5   : > { %10237 = vst [vmem:[#allocation9_spill] sm:$0xff] %v8084_v9  ;;  %v4372_v51 = vmul.f32 %v8088_v3, %v7617_v21  ;;  %v806_v54 = vadd.f32 %v798_v15, %v683_v4  ;;  %v906_v32 = vadd.f32 %v10230_v35, %v10238_v13  ;;  %4209 = vperm.xlu0 %5378, %v8095_v46   ;;  %v10241_v2 = vld [vmem:[#allocation35_spill] sm:$0xff] }
 0x4d6   : > { %v8098_v19 = vadd.f32 %v4422_v22, %v4301_v59  ;;  %v807_v49 = vadd.f32 %v799_v0, %v7899_v7  ;;  %v809_v25 = vadd.f32 %v801_v53, %v7911_v17  ;;  %v808_v42 = vadd.f32 %v800_v18, %v7907_v30  ;;  %v10243_v30 = vld [vmem:[#allocation51_spill] sm:$0xff]  ;;  %v10246_v18 = vld [vmem:[#allocation37_spill] sm:$0xff] }
 0x4d7   : > { %v907_v16 = vadd.f32 %v10230_v35, %v10240_v47  ;;  %v8106_v4 = vadd.f32 %v803_v39, %v7915_v45  ;;  %v810_v15 = vadd.f32 %v802_v1, %v7913_v61  ;;  %v8111_v13 = vadd.f32 %v10241_v2, %v7953_v10  ;;  %v8113_v59 = vpop.permute.xlu1 %3470  ;;  %v10245_v45 = vld [vmem:[#allocation36_spill] sm:$0xff]  ;;  %v10247_v1 = vld [vmem:[#allocation10_spill] sm:$0xff]  ;;  %v10250_v2 = vld [vmem:[#allocation39_spill] sm:$0xff] }
 0x4d8   : > { %10239 = vst [vmem:[#allocation43_spill] sm:$0xff] %v8098_v19  ;;  %v912_v22 = vand.u32 2147483647, %v904_v12  ;;  %10242 = vst [vmem:[#allocation47_spill] sm:$0xff] %v8113_v59  ;;  %v8116_v7 = vadd.f32 %v805_v8, %v7921_v5  ;;  %v916_v17 = vand.u32 2147483647, %v908_v44  ;;  %v909_v0 = vadd.f32 %v10230_v35, %v10243_v30  ;;  %v8120_v53 = vpop.permute.xlu0 %4142  ;;  %4388 = vrot.lane.b32.xlu1 %v4372_v51, %s5589_s5 }
 0x4d9   : > { %10244 = vst [vmem:[#allocation23_spill] sm:$0xff] %v8120_v53  ;;  %v3886_v61 = vmul.f32 %v7391_v24, %v7512_v28  ;;  %v854_v10 = vadd.f32 %v10245_v45, %v7919_v48  ;;  %v8128_v39 = vadd.f32 %v10246_v18, %v734_v62  ;;  %v922_v5 = vmul.f32 %v10247_v1, %v913_v52  ;;  %v10249_v44 = vld [vmem:[#allocation38_spill] sm:$0xff]  ;;  %v10251_v24 = vld [vmem:[#allocation53_spill] sm:$0xff]  ;;  %v10252_v48 = vld [vmem:[#allocation40_spill] sm:$0xff] }
 0x4da   : > { %v914_v12 = vand.u32 2147483647, %v906_v32  ;;  %v10248_v8 = vmov 0   ;;  %v856_v47 = vadd.f32 %v10249_v44, %v8041_v11  ;;  %v8135_v51 = vadd.f32 %v10250_v2, %v736_v29  ;;  %v10253_v62 = vld [vmem:[#allocation41_spill] sm:$0xff]  ;;  %v10254_v32 = vld [vmem:[#allocation58_spill] sm:$0xff]  ;;  %v10257_v44 = vld [vmem:[#allocation60_spill] sm:$0xff] }
 0x4db   : > { %5385 = vset.pattern.permute.xlu0 %v10248_v8  ;;  %v915_v30 = vand.u32 2147483647, %v907_v16  ;;  %v911_v19 = vadd.f32 %v10230_v35, %v10251_v24  ;;  %v858_v45 = vadd.f32 %v10252_v48, %v735_v50  ;;  %v8141_v18 = vadd.f32 %v10253_v62, %v738_v36  ;;  %v10255_v59 = vld [vmem:[#allocation70_spill] sm:$0xff]  ;;  %v8146_v14 = vpop.permute.xlu1 %3530  ;;  %v8155_v50 = vld [vmem:[%s5788_s28 + $0x20] sm:$0xff] }
 0x4dc   : > { %v921_v52 = vmul.f32 %v10247_v1, %v912_v22  ;;  %v1027_v40 = vadd.f32 %v10255_v59, %v10254_v32  ;;  %10256 = vst [vmem:[#allocation24_spill] sm:$0xff] %v8146_v14  ;;  %v925_v11 = vmul.f32 %v10247_v1, %v916_v17  ;;  %v917_v29 = vand.u32 2147483647, %v909_v0  ;;  %v8151_v2 = vpop.permute.xlu0 %3904  ;;  %3908 = vrot.lane.b32.xlu1 %v3886_v61, %s5585_s23  ;;  %v10259_v36 = vld [vmem:[#allocation42_spill] sm:$0xff]  ;;  %v10262_v8 = vld [vmem:[#allocation64_spill] sm:$0xff]  ;;  %v10263_v14 = vld [vmem:[#allocation65_spill] sm:$0xff] }
 0x4dd   : > { %v1030_v16 = vadd.f32 %v10255_v59, %v10257_v44  ;;  %10258 = vst [vmem:[#allocation45_spill] sm:$0xff] %v8151_v2  ;;  %v4130_v35 = vmul.f32 %v8155_v50, %v7542_v31  ;;  %v860_v22 = vadd.f32 %v10259_v36, %v737_v6  ;;  %v930_v24 = vadd.f32 %v922_v5, %v807_v49  ;;  %v10260_v62 = vld [vmem:[#allocation62_spill] sm:$0xff]  ;;  %v10261_v44 = vld [vmem:[#allocation63_spill] sm:$0xff]  ;;  %v10264_v49 = vld [vmem:[#allocation68_spill] sm:$0xff] }
 0x4de   : > { %v923_v48 = vmul.f32 %v10247_v1, %v914_v12  ;;  %v1032_v17 = vadd.f32 %v10255_v59, %v10260_v62  ;;  %v924_v0 = vmul.f32 %v10247_v1, %v915_v30  ;;  %v919_v32 = vand.u32 2147483647, %v911_v19 }
 0x4df   : > { %v1028_v61 = vadd.f32 %v10255_v59, %v10261_v44  ;;  %v1034_v53 = vadd.f32 %v10255_v59, %v10262_v8  ;;  %v929_v9 = vadd.f32 %v921_v52, %v806_v54  ;;  %v1035_v33 = vand.u32 2147483647, %v1027_v40  ;;  %v8172_v12 = vpop.permute.xlu1 %3534  ;;  %v8179_v44 = vld [vmem:[%s5788_s28 + $0x10] sm:$0xff]  ;;  %v10268_v52 = vld [vmem:[#allocation52_spill] sm:$0xff] }
 0x4e0   : > { %v1029_v6 = vadd.f32 %v10255_v59, %v10263_v14  ;;  %v1031_v5 = vadd.f32 %v10255_v59, %v10264_v49  ;;  %10265 = vst [vmem:[#allocation25_spill] sm:$0xff] %v8172_v12  ;;  %v933_v36 = vadd.f32 %v925_v11, %v810_v15  ;;  %v926_v30 = vmul.f32 %v10247_v1, %v917_v29  ;;  %v8175_v62 = vpop.permute.xlu0 %4146  ;;  %v10267_v14 = vld [vmem:[#allocation50_spill] sm:$0xff] }
 0x4e1   : > { %v1038_v19 = vand.u32 2147483647, %v1030_v16  ;;  %10266 = vst [vmem:[#allocation46_spill] sm:$0xff] %v8175_v62  ;;  %4150 = vrot.lane.b32.xlu1 %v4130_v35, %s5587_s26  ;;  %v4374_v40 = vmul.f32 %v8179_v44, %v7617_v21  ;;  %v931_v54 = vadd.f32 %v923_v48, %v808_v42  ;;  %v977_v8 = vadd.f32 %v10267_v14, %v854_v10  ;;  %v10269_v62 = vld [vmem:[#allocation54_spill] sm:$0xff]  ;;  %v10272_v48 = vld [vmem:[#allocation80_spill] sm:$0xff] }
 0x4e2   : > { %v8185_v59 = vadd.f32 %v10268_v52, %v856_v47  ;;  %v1040_v15 = vand.u32 2147483647, %v1032_v17  ;;  %v932_v11 = vadd.f32 %v924_v0, %v809_v25  ;;  %v928_v29 = vmul.f32 %v10247_v1, %v919_v32  ;;  %v10271_v47 = vld [vmem:[#allocation75_spill] sm:$0xff]  ;;  %v10275_v0 = vld [vmem:[#allocation56_spill] sm:$0xff] }
 0x4e3   : > { %v1036_v16 = vand.u32 2147483647, %v1028_v61  ;;  %v1042_v49 = vand.u32 2147483647, %v1034_v53  ;;  %v981_v35 = vadd.f32 %v10269_v62, %v858_v45  ;;  %v1044_v28 = vmul.f32 %v5923_v20, %v1035_v33  ;;  %v8190_v58 = vpop.permute.xlu1 %3538  ;;  %v8200_v53 = vld [vmem:[%s5788_s28 + $0x30] sm:$0xff]  ;;  %v10274_v1 = vld [vmem:[#allocation55_spill] sm:$0xff] }
 0x4e4   : > { %v1037_v12 = vand.u32 2147483647, %v1029_v6  ;;  %v1039_v2 = vand.u32 2147483647, %v1031_v5  ;;  %10270 = vst [vmem:[#allocation48_spill] sm:$0xff] %v8190_v58  ;;  %v934_v42 = vadd.f32 %v926_v30, %v8106_v4  ;;  %v1047_v10 = vmul.f32 %v5923_v20, %v1038_v19  ;;  %v8196_v25 = vpop.permute.xlu0 %4267  ;;  %v10276_v61 = vld [vmem:[#allocation79_spill] sm:$0xff] }
 0x4e5   : > { %v1151_v17 = vadd.f32 %v10272_v48, %v10271_v47  ;;  %10273 = vst [vmem:[#allocation49_spill] sm:$0xff] %v8196_v25  ;;  %4392 = vrot.lane.b32.xlu1 %v4374_v40, %s5589_s5  ;;  %v4009_v33 = vmul.f32 %v8200_v53, %v7522_v38  ;;  %v978_v45 = vadd.f32 %v10274_v1, %v8111_v13  ;;  %v10277_v30 = vld [vmem:[#allocation57_spill] sm:$0xff]  ;;  %v10278_v13 = vld [vmem:[#allocation59_spill] sm:$0xff]  ;;  %v10312_v58 = vld [vmem:[#allocation144_spill] sm:$0xff] }
 0x4e6   : > { %v983_v32 = vadd.f32 %v10275_v0, %v860_v22  ;;  %v1049_v4 = vmul.f32 %v5923_v20, %v1040_v15  ;;  %v1154_v6 = vadd.f32 %v10272_v48, %v10276_v61  ;;  %v936_v5 = vadd.f32 %v928_v29, %v8116_v7  ;;  %v10280_v7 = vld [vmem:[#allocation61_spill] sm:$0xff] }
 0x4e7   : > { %v980_v19 = vadd.f32 %v10277_v30, %v8128_v39  ;;  %v1045_v62 = vmul.f32 %v5923_v20, %v1036_v16  ;;  %v1051_v40 = vmul.f32 %v5923_v20, %v1042_v49  ;;  %v8215_v14 = vadd.f32 %v1044_v28, %v929_v9  ;;  %v8221_v47 = vpop.permute.xlu1 %3542  ;;  %v10285_v0 = vld [vmem:[#allocation77_spill] sm:$0xff] }
 0x4e8   : > { %v982_v52 = vadd.f32 %v10278_v13, %v8135_v51  ;;  %v1046_v22 = vmul.f32 %v5923_v20, %v1037_v12  ;;  %v1048_v15 = vmul.f32 %v5923_v20, %v1039_v2  ;;  %10279 = vst [vmem:[#allocation35_spill] sm:$0xff] %v8221_v47  ;;  %v8223_v1 = vadd.f32 %v1047_v10, %v932_v11  ;;  %v8227_v16 = vpop.permute.xlu0 %4027  ;;  %v10282_v51 = vld [vmem:[#allocation66_spill] sm:$0xff]  ;;  %v10286_v13 = vld [vmem:[#allocation71_spill] sm:$0xff] }
 0x4e9   : > { %v984_v39 = vadd.f32 %v10280_v7, %v8141_v18  ;;  %v1159_v29 = vand.u32 2147483647, %v1151_v17  ;;  %10281 = vst [vmem:[#allocation51_spill] sm:$0xff] %v8227_v16  ;;  %4031 = vrot.lane.b32.xlu1 %v4009_v33, %s5586_s24  ;;  %v4253_v28 = vmul.f32 %v8155_v50, %v7583_v57  ;;  %v8232_v9 = vadd.f32 %v1049_v4, %v934_v42  ;;  %v10283_v2 = vld [vmem:[#allocation82_spill] sm:$0xff]  ;;  %v10284_v18 = vld [vmem:[#allocation69_spill] sm:$0xff]  ;;  %v10289_v7 = vld [vmem:[#allocation72_spill] sm:$0xff] }
 0x4ea   : > { %v8235_v12 = vadd.f32 %v10282_v51, %v978_v45  ;;  %v1162_v20 = vand.u32 2147483647, %v1154_v6  ;;  %v1150_v11 = vadd.f32 %v10272_v48, %v10283_v2  ;;  %v1053_v49 = vadd.f32 %v1045_v62, %v930_v24  ;;  %v10287_v4 = vld [vmem:[#allocation90_spill] sm:$0xff]  ;;  %v10290_v24 = vld [vmem:[#allocation15_spill] sm:$0xff] }
 0x4eb   : > { %v1059_v10 = vadd.f32 %v1051_v40, %v936_v5  ;;  %v8240_v17 = vadd.f32 %v10284_v18, %v980_v19  ;;  %v1104_v61 = vadd.f32 %v10285_v0, %v981_v35  ;;  %v8243_v33 = vadd.f32 %v1046_v22, %v931_v54  ;;  %v8250_v6 = vpop.permute.xlu1 %3566  ;;  %v10291_v62 = vld [vmem:[#allocation87_spill] sm:$0xff]  ;;  %v10293_v54 = vld [vmem:[#allocation73_spill] sm:$0xff]  ;;  %v10297_v0 = vld [vmem:[#allocation86_spill] sm:$0xff] }
 0x4ec   : > { %v1056_v30 = vadd.f32 %v1048_v15, %v933_v36  ;;  %v8246_v42 = vadd.f32 %v10286_v13, %v982_v52  ;;  %v1157_v45 = vadd.f32 %v10272_v48, %v10287_v4  ;;  %10288 = vst [vmem:[#allocation36_spill] sm:$0xff] %v8250_v6  ;;  %v1100_v51 = vadd.f32 %v10289_v7, %v977_v8  ;;  %v8255_v40 = vpop.permute.xlu0 %4269  ;;  %v10294_v15 = vld [vmem:[#allocation97_spill] sm:$0xff]  ;;  %v10295_v2 = vld [vmem:[#allocation107_spill] sm:$0xff]  ;;  %v10299_v4 = vld [vmem:[#allocation114_spill] sm:$0xff] }
 0x4ed   : > { %v1168_v5 = vmul.f32 %v10290_v24, %v1159_v29  ;;  %v1227_v19 = vadd.f32 %v10291_v62, %v1104_v61  ;;  %10292 = vst [vmem:[#allocation37_spill] sm:$0xff] %v8255_v40  ;;  %4273 = vrot.lane.b32.xlu1 %v4253_v28, %s5588_s30  ;;  %v4010_v36 = vmul.f32 %v8095_v46, %v7522_v38  ;;  %v1158_v22 = vand.u32 2147483647, %v1150_v11  ;;  %v10296_v29 = vld [vmem:[#allocation84_spill] sm:$0xff]  ;;  %v10301_v11 = vld [vmem:[#allocation91_spill] sm:$0xff]  ;;  %v10302_v6 = vld [vmem:[#allocation126_spill] sm:$0xff] }
 0x4ee   : > { %v8261_v35 = vadd.f32 %v10293_v54, %v984_v39  ;;  %v1171_v52 = vmul.f32 %v10290_v24, %v1162_v20  ;;  %v1280_v8 = vadd.f32 %v10295_v2, %v10294_v15  ;;  %v1152_v18 = vadd.f32 %v10272_v48, %v10296_v29  ;;  %v10298_v28 = vld [vmem:[#allocation88_spill] sm:$0xff]  ;;  %v10300_v39 = vld [vmem:[#allocation74_spill] sm:$0xff]  ;;  %v10306_v40 = vld [vmem:[#allocation119_spill] sm:$0xff] }
 0x4ef   : > { %v1153_v61 = vadd.f32 %v10272_v48, %v10297_v0  ;;  %v1155_v13 = vadd.f32 %v10272_v48, %v10298_v28  ;;  %v1350_v7 = vadd.f32 %v10299_v4, %v1227_v19  ;;  %v1102_v62 = vadd.f32 %v10300_v39, %v8185_v59  ;;  %v10303_v15 = vld [vmem:[#allocation112_spill] sm:$0xff]  ;;  %v8279_v47 = vpop.permute.xlu1 %3574  ;;  %v10305_v0 = vld [vmem:[#allocation81_spill] sm:$0xff]  ;;  %v10311_v16 = vld [vmem:[#allocation162_spill] sm:$0xff] }
 0x4f0   : > { %v1165_v20 = vand.u32 2147483647, %v1157_v45  ;;  %v1273_v54 = vadd.f32 %v10295_v2, %v10301_v11  ;;  %v1403_v38 = vadd.f32 %v10303_v15, %v10302_v6  ;;  %10304 = vst [vmem:[#allocation10_spill] sm:$0xff] %v8279_v47  ;;  %v8281_v29 = vadd.f32 %v1168_v5, %v1053_v49  ;;  %v8285_v28 = vpop.permute.xlu0 %4390  ;;  %v8289_v59 = vld [vmem:[%s5788_s28 + $0x28] sm:$0xff]  ;;  %v10309_v5 = vld [vmem:[#allocation143_spill] sm:$0xff] }
 0x4f1   : > { %v1106_v25 = vadd.f32 %v10305_v0, %v983_v32  ;;  %v1473_v48 = vadd.f32 %v10306_v40, %v1350_v7  ;;  %10307 = vst [vmem:[#allocation38_spill] sm:$0xff] %v8285_v28  ;;  %4033 = vrot.lane.b32.xlu1 %v4010_v36, %s5586_s24  ;;  %v4254_v45 = vmul.f32 %v8289_v59, %v7583_v57  ;;  %v1288_v4 = vand.u32 2147483647, %v1280_v8  ;;  %v10308_v49 = vld [vmem:[#allocation129_spill] sm:$0xff] }
 0x4f2   : > { %v8293_v19 = vadd.f32 %v1171_v52, %v1056_v30  ;;  %v1167_v6 = vmul.f32 %v10290_v24, %v1158_v22  ;;  %v1526_v39 = vadd.f32 %v10309_v5, %v10308_v49  ;;  %v1160_v32 = vand.u32 2147483647, %v1152_v18  ;;  %v10310_v7 = vld [vmem:[#allocation149_spill] sm:$0xff]  ;;  %v10314_v52 = vld [vmem:[#allocation83_spill] sm:$0xff] }
 0x4f3   : > { %v1161_v11 = vand.u32 2147483647, %v1153_v61  ;;  %v1163_v40 = vand.u32 2147483647, %v1155_v13  ;;  %v1596_v0 = vadd.f32 %v10310_v7, %v1473_v48  ;;  %v1174_v36 = vmul.f32 %v10290_v24, %v1165_v20  ;;  %v8302_v30 = vpop.permute.xlu1 %3578  ;;  %v10315_v8 = vld [vmem:[#allocation93_spill] sm:$0xff]  ;;  %v10316_v18 = vld [vmem:[#allocation95_spill] sm:$0xff] }
 0x4f4   : > { %v1281_v47 = vand.u32 2147483647, %v1273_v54  ;;  %v1411_v28 = vand.u32 2147483647, %v1403_v38  ;;  %v1646_v57 = vadd.f32 %v10312_v58, %v10311_v16  ;;  %10313 = vst [vmem:[#allocation39_spill] sm:$0xff] %v8302_v30  ;;  %v8305_v22 = vadd.f32 %v10314_v52, %v1100_v51  ;;  %v8311_v13 = vpop.permute.xlu0 %4029  ;;  %v10318_v20 = vld [vmem:[#allocation85_spill] sm:$0xff] }
 0x4f5   : > { %v1276_v49 = vadd.f32 %v10295_v2, %v10315_v8  ;;  %v1278_v61 = vadd.f32 %v10295_v2, %v10316_v18  ;;  %10317 = vst [vmem:[#allocation53_spill] sm:$0xff] %v8311_v13  ;;  %4275 = vrot.lane.b32.xlu1 %v4254_v45, %s5588_s30  ;;  %v4133_v38 = vmul.f32 %v8095_v46, %v7542_v31  ;;  %v1534_v48 = vand.u32 2147483647, %v1526_v39  ;;  %v10319_v18 = vld [vmem:[#allocation150_spill] sm:$0xff] }
 0x4f6   : > { %v1175_v16 = vadd.f32 %v1167_v6, %v8215_v14  ;;  %v1225_v54 = vadd.f32 %v10318_v20, %v1102_v62  ;;  %v1297_v51 = vmul.f32 %v6057_v55, %v1288_v4  ;;  %v1169_v7 = vmul.f32 %v10290_v24, %v1160_v32  ;;  %v10321_v4 = vld [vmem:[#allocation185_spill] sm:$0xff] }
 0x4f7   : > { %v1170_v52 = vmul.f32 %v10290_v24, %v1161_v11  ;;  %v1172_v8 = vmul.f32 %v10290_v24, %v1163_v40  ;;  %v1716_v30 = vadd.f32 %v10319_v18, %v1596_v0  ;;  %v1182_v13 = vadd.f32 %v1174_v36, %v1059_v10  ;;  %v8325_v14 = vpop.permute.xlu1 %3586  ;;  %v10324_v11 = vld [vmem:[#allocation179_spill] sm:$0xff]  ;;  %v10326_v40 = vld [vmem:[#allocation177_spill] sm:$0xff] }
 0x4f8   : > { %v1290_v45 = vmul.f32 %v6057_v55, %v1281_v47  ;;  %v1420_v46 = vmul.f32 %v6123_v63, %v1411_v28  ;;  %v1654_v31 = vand.u32 2147483647, %v1646_v57  ;;  %10320 = vst [vmem:[#allocation40_spill] sm:$0xff] %v8325_v14  ;;  %v1284_v62 = vand.u32 2147483647, %v1276_v49  ;;  %v8328_v20 = vpop.permute.xlu0 %4271  ;;  %v10323_v47 = vld [vmem:[#allocation161_spill] sm:$0xff] }
 0x4f9   : > { %v1286_v6 = vand.u32 2147483647, %v1278_v61  ;;  %v1839_v39 = vadd.f32 %v10321_v4, %v1716_v30  ;;  %10322 = vst [vmem:[#allocation41_spill] sm:$0xff] %v8328_v20  ;;  %4156 = vrot.lane.b32.xlu1 %v4133_v38, %s5587_s26  ;;  %v4377_v24 = vmul.f32 %v8289_v59, %v7617_v21  ;;  %v1305_v32 = vadd.f32 %v1297_v51, %v1182_v13  ;;  %v10325_v57 = vld [vmem:[#allocation198_spill] sm:$0xff]  ;;  %v10327_v61 = vld [vmem:[#allocation89_spill] sm:$0xff]  ;;  %v10328_v13 = vld [vmem:[#allocation92_spill] sm:$0xff] }
 0x4fa   : > { %v1543_v10 = vmul.f32 %v6198_v60, %v1534_v48  ;;  %v1769_v28 = vadd.f32 %v10324_v11, %v10323_v47  ;;  %v1892_v0 = vadd.f32 %v10326_v40, %v10325_v57  ;;  %v8339_v36 = vadd.f32 %v1169_v7, %v8243_v33  ;;  %v10329_v4 = vld [vmem:[#allocation78_spill] sm:$0xff]  ;;  %v10335_v57 = vld [vmem:[#allocation113_spill] sm:$0xff] }
 0x4fb   : > { %v1178_v30 = vadd.f32 %v1170_v52, %v8223_v1  ;;  %v1180_v49 = vadd.f32 %v1172_v8, %v8232_v9  ;;  %v8344_v38 = vadd.f32 %v10327_v61, %v1106_v25  ;;  %v8346_v18 = vadd.f32 %v1290_v45, %v1175_v16  ;;  %v8351_v14 = vpop.permute.xlu1 %3594  ;;  %v10330_v7 = vld [vmem:[#allocation94_spill] sm:$0xff]  ;;  %v10336_v61 = vld [vmem:[#allocation221_spill] sm:$0xff] }
 0x4fc   : > { %v1224_v51 = vadd.f32 %v10328_v13, %v8235_v12  ;;  %v1428_v48 = vadd.f32 %v1420_v46, %v1305_v32  ;;  %v1663_v47 = vmul.f32 %v10329_v4, %v1654_v31  ;;  %v1293_v33 = vmul.f32 %v6057_v55, %v1284_v62  ;;  %v10331_v52 = vld [vmem:[#allocation182_spill] sm:$0xff]  ;;  %v8357_v8 = vpop.permute.xlu0 %3910  ;;  %v10333_v46 = vld [vmem:[#allocation100_spill] sm:$0xff]  ;;  %v10334_v32 = vld [vmem:[#allocation105_spill] sm:$0xff] }
 0x4fd   : > { %v1226_v1 = vadd.f32 %v10330_v7, %v8240_v17  ;;  %v1962_v9 = vadd.f32 %v10331_v52, %v1839_v39  ;;  %10332 = vst [vmem:[#allocation58_spill] sm:$0xff] %v8357_v8  ;;  %4398 = vrot.lane.b32.xlu1 %v4377_v24, %s5589_s5  ;;  %v4378_v25 = vmul.f32 %v8200_v53, %v7617_v21  ;;  %v1777_v31 = vand.u32 2147483647, %v1769_v28  ;;  %v10337_v7 = vld [vmem:[#allocation102_spill] sm:$0xff]  ;;  %v10338_v21 = vld [vmem:[#allocation193_spill] sm:$0xff]  ;;  %v10339_v8 = vld [vmem:[#allocation215_spill] sm:$0xff] }
 0x4fe   : > { %v1295_v12 = vmul.f32 %v6057_v55, %v1286_v6  ;;  %v1551_v16 = vadd.f32 %v1543_v10, %v1428_v48  ;;  %v1900_v45 = vand.u32 2147483647, %v1892_v0  ;;  %v1274_v62 = vadd.f32 %v10295_v2, %v10333_v46  ;;  %v10340_v10 = vld [vmem:[#allocation234_spill] sm:$0xff]  ;;  %v10341_v28 = vld [vmem:[#allocation213_spill] sm:$0xff] }
 0x4ff   : > { %v1277_v17 = vadd.f32 %v10295_v2, %v10334_v32  ;;  %v1348_v39 = vadd.f32 %v10335_v57, %v1225_v54  ;;  %v2085_v13 = vadd.f32 %v10336_v61, %v1962_v9  ;;  %v1275_v24 = vadd.f32 %v10295_v2, %v10337_v7  ;;  %v8375_v48 = vpop.permute.xlu1 %3652  ;;  %v10343_v32 = vld [vmem:[#allocation96_spill] sm:$0xff]  ;;  %v10345_v57 = vld [vmem:[#allocation117_spill] sm:$0xff] }
 0x500   : > { %v1671_v52 = vadd.f32 %v1663_v47, %v1551_v16  ;;  %v2015_v6 = vadd.f32 %v10339_v8, %v10338_v21  ;;  %v2138_v0 = vadd.f32 %v10341_v28, %v10340_v10  ;;  %10342 = vst [vmem:[#allocation70_spill] sm:$0xff] %v8375_v48  ;;  %v8377_v46 = vadd.f32 %v1293_v33, %v1178_v30  ;;  %v10344_v54 = vld [vmem:[#allocation108_spill] sm:$0xff]  ;;  %v8384_v2 = vpop.permute.xlu0 %4152  ;;  %v10347_v47 = vld [vmem:[#allocation111_spill] sm:$0xff] }
 0x501   : > { %v1228_v20 = vadd.f32 %v10343_v32, %v8246_v42  ;;  %v1397_v9 = vadd.f32 %v10303_v15, %v10344_v54  ;;  %v1471_v61 = vadd.f32 %v10345_v57, %v1348_v39  ;;  %10346 = vst [vmem:[#allocation60_spill] sm:$0xff] %v8384_v2  ;;  %4400 = vrot.lane.b32.xlu1 %v4378_v25, %s5589_s5  ;;  %v1282_v7 = vand.u32 2147483647, %v1274_v62  ;;  %v10348_v10 = vld [vmem:[#allocation147_spill] sm:$0xff]  ;;  %v10349_v54 = vld [vmem:[#allocation214_spill] sm:$0xff] }
 0x502   : > { %v8387_v21 = vadd.f32 %v1295_v12, %v1180_v49  ;;  %v1400_v16 = vadd.f32 %v10303_v15, %v10347_v47  ;;  %v1786_v30 = vmul.f32 %v6342_v37, %v1777_v31  ;;  %v1909_v33 = vmul.f32 %v6413_v56, %v1900_v45  ;;  %v10350_v49 = vld [vmem:[#allocation98_spill] sm:$0xff]  ;;  %v10351_v47 = vld [vmem:[#allocation99_spill] sm:$0xff] }
 0x503   : > { %v1285_v42 = vand.u32 2147483647, %v1277_v17  ;;  %v1594_v32 = vadd.f32 %v10348_v10, %v1471_v61  ;;  %v2208_v48 = vadd.f32 %v10349_v54, %v2085_v13  ;;  %v1283_v39 = vand.u32 2147483647, %v1275_v24  ;;  %v8395_v25 = vpop.permute.xlu1 %3656  ;;  %v10352_v45 = vld [vmem:[#allocation259_spill] sm:$0xff]  ;;  %v10355_v61 = vld [vmem:[#allocation272_spill] sm:$0xff] }
 0x504   : > { %v2023_v57 = vand.u32 2147483647, %v2015_v6  ;;  %v1794_v2 = vadd.f32 %v1786_v30, %v1671_v52  ;;  %v2146_v28 = vand.u32 2147483647, %v2138_v0  ;;  %v1230_v12 = vadd.f32 %v10350_v49, %v8261_v35  ;;  %v8403_v17 = vpop.permute.xlu0 %4394  ;;  %v10353_v6 = vld [vmem:[#allocation225_spill] sm:$0xff]  ;;  %v10354_v52 = vld [vmem:[#allocation251_spill] sm:$0xff] }
 0x505   : > { %v8400_v8 = vadd.f32 %v10351_v47, %v1224_v51  ;;  %v1405_v31 = vand.u32 2147483647, %v1397_v9  ;;  %v2331_v62 = vadd.f32 %v10352_v45, %v2208_v48  ;;  %3812 = vperm.xlu1 %5354, %v8088_v3   ;;  %v1408_v13 = vand.u32 2147483647, %v1400_v16  ;;  %v10356_v10 = vld [vmem:[#allocation101_spill] sm:$0xff]  ;;  %v10357_v54 = vld [vmem:[#allocation148_spill] sm:$0xff] }
 0x506   : > { %v1917_v24 = vadd.f32 %v1909_v33, %v1794_v2  ;;  %v2261_v0 = vadd.f32 %v10354_v52, %v10353_v6  ;;  %v2384_v30 = vadd.f32 %v7925_v26, %v10355_v61  ;;  %v1291_v35 = vmul.f32 %v6057_v55, %v1282_v7  ;;  %v10358_v47 = vld [vmem:[#allocation103_spill] sm:$0xff]  ;;  %v10360_v7 = vld [vmem:[#allocation118_spill] sm:$0xff]  ;;  %v10420_v52 = vld [vmem:[#allocation293_spill] sm:$0xff] }
 0x507   : > { %v1349_v51 = vadd.f32 %v10356_v10, %v1226_v1  ;;  %v1294_v9 = vmul.f32 %v6057_v55, %v1285_v42  ;;  %v1714_v48 = vadd.f32 %v10357_v54, %v1594_v32  ;;  %v1292_v49 = vmul.f32 %v6057_v55, %v1283_v39  ;;  %v8420_v33 = vpop.permute.xlu1 %3660  ;;  %v10361_v61 = vld [vmem:[#allocation183_spill] sm:$0xff]  ;;  %v10362_v10 = vld [vmem:[#allocation246_spill] sm:$0xff] }
 0x508   : > { %v8416_v45 = vadd.f32 %v10358_v47, %v1228_v20  ;;  %v2032_v2 = vmul.f32 %v6494_v41, %v2023_v57  ;;  %v2155_v16 = vmul.f32 %v6571_v43, %v2146_v28  ;;  %10359 = vst [vmem:[#allocation42_spill] sm:$0xff] %v8420_v33  ;;  %v1414_v6 = vmul.f32 %v6123_v63, %v1405_v31  ;;  %v8427_v54 = vpop.permute.xlu0 %4154  ;;  %v10364_v47 = vld [vmem:[#allocation106_spill] sm:$0xff] }
 0x509   : > { %v1396_v1 = vadd.f32 %v10303_v15, %v10360_v7  ;;  %v1837_v42 = vadd.f32 %v10361_v61, %v1714_v48  ;;  %v2454_v32 = vadd.f32 %v10362_v10, %v2331_v62  ;;  %10363 = vst [vmem:[#allocation62_spill] sm:$0xff] %v8427_v54  ;;  %3820 = vperm.xlu1 %5354, %v8179_v44   ;;  %v2269_v20 = vand.u32 2147483647, %v2261_v0  ;;  %v10365_v7 = vld [vmem:[#allocation295_spill] sm:$0xff]  ;;  %v10366_v62 = vld [vmem:[#allocation110_spill] sm:$0xff] }
 0x50a   : > { %v1417_v55 = vmul.f32 %v6123_v63, %v1408_v13  ;;  %v2040_v39 = vadd.f32 %v2032_v2, %v1917_v24  ;;  %v2392_v28 = vand.u32 2147483647, %v2384_v30  ;;  %v1299_v57 = vadd.f32 %v1291_v35, %v8281_v29  ;;  %v10367_v54 = vld [vmem:[#allocation258_spill] sm:$0xff]  ;;  %v10368_v13 = vld [vmem:[#allocation308_spill] sm:$0xff] }
 0x50b   : > { %v1302_v31 = vadd.f32 %v1294_v9, %v8293_v19  ;;  %v8434_v26 = vadd.f32 %v10364_v47, %v1230_v12  ;;  %v2577_v48 = vadd.f32 %v10365_v7, %v2454_v32  ;;  %v1346_v61 = vadd.f32 %v10366_v62, %v8305_v22  ;;  %v8443_v0 = vpop.permute.xlu1 %3664  ;;  %v10370_v30 = vld [vmem:[#allocation180_spill] sm:$0xff]  ;;  %v10375_v47 = vld [vmem:[#allocation174_spill] sm:$0xff]  ;;  %v10379_v62 = vld [vmem:[#allocation279_spill] sm:$0xff] }
 0x50c   : > { %v2163_v10 = vadd.f32 %v2155_v16, %v2040_v39  ;;  %v2507_v33 = vadd.f32 %v7929_v23, %v10367_v54  ;;  %v2627_v24 = vadd.f32 %v7933_v27, %v10368_v13  ;;  %10369 = vst [vmem:[#allocation63_spill] sm:$0xff] %v8443_v0  ;;  %v8446_v29 = vadd.f32 %v1292_v49, %v8339_v36  ;;  %v8451_v9 = vpop.permute.xlu0 %4396  ;;  %v10373_v16 = vld [vmem:[#allocation115_spill] sm:$0xff]  ;;  %v10376_v36 = vld [vmem:[#allocation116_spill] sm:$0xff]  ;;  %v10400_v0 = vld [vmem:[#allocation166_spill] sm:$0xff] }
 0x50d   : > { %v8448_v19 = vadd.f32 %v1414_v6, %v1299_v57  ;;  %v1404_v12 = vand.u32 2147483647, %v1396_v1  ;;  %v1960_v35 = vadd.f32 %v10370_v30, %v1837_v42  ;;  %10371 = vst [vmem:[#allocation64_spill] sm:$0xff] %v8451_v9  ;;  %v10372_v22 = vmov 28   ;;  %v10374_v54 = vld [vmem:[#allocation159_spill] sm:$0xff]  ;;  %v10377_v6 = vld [vmem:[#allocation120_spill] sm:$0xff] }
 0x50e   : > { %5355 = vset.pattern.permute.xlu1 %v10372_v22  ;;  %v8454_v2 = vadd.f32 %v1417_v55, %v1302_v31  ;;  %v1469_v32 = vadd.f32 %v10373_v16, %v1346_v61  ;;  %v2278_v39 = vmul.f32 %v10374_v54, %v2269_v20  ;;  %v2401_v7 = vmul.f32 %v10375_v47, %v2392_v28  ;;  %v10378_v42 = vld [vmem:[#allocation219_spill] sm:$0xff]  ;;  %v10380_v55 = vld [vmem:[#allocation122_spill] sm:$0xff]  ;;  %v10401_v54 = vld [vmem:[#allocation257_spill] sm:$0xff] }
 0x50f   : > { %3935 = vperm.xlu1 %5355, %v8088_v3   ;;  %v1352_v49 = vadd.f32 %v10376_v36, %v8344_v38  ;;  %v1398_v1 = vadd.f32 %v10303_v15, %v10377_v6  ;;  %v2083_v57 = vadd.f32 %v10378_v42, %v1960_v35  ;;  %v2697_v13 = vadd.f32 %v10379_v62, %v2577_v48  ;;  %v8468_v16 = vpop.permute.xlu1 %3693  ;;  %v10382_v9 = vld [vmem:[#allocation130_spill] sm:$0xff]  ;;  %v10383_v38 = vld [vmem:[#allocation145_spill] sm:$0xff]  ;;  %v10384_v47 = vld [vmem:[#allocation331_spill] sm:$0xff] }
 0x510   : > { %v1399_v31 = vadd.f32 %v10303_v15, %v10380_v55  ;;  %v2515_v61 = vand.u32 2147483647, %v2507_v33  ;;  %v2286_v30 = vadd.f32 %v2278_v39, %v2163_v10  ;;  %v2635_v20 = vand.u32 2147483647, %v2627_v24  ;;  %10381 = vst [vmem:[#allocation65_spill] sm:$0xff] %v8468_v16  ;;  %v8474_v23 = vpop.permute.xlu0 %4277  ;;  %v10386_v35 = vld [vmem:[#allocation121_spill] sm:$0xff] }
 0x511   : > { %v1413_v28 = vmul.f32 %v6123_v63, %v1404_v12  ;;  %v1472_v27 = vadd.f32 %v10382_v9, %v1349_v51  ;;  %v1592_v36 = vadd.f32 %v10383_v38, %v1469_v32  ;;  %v2820_v6 = vadd.f32 %v10384_v47, %v2697_v13  ;;  %10385 = vst [vmem:[#allocation68_spill] sm:$0xff] %v8474_v23  ;;  %v10387_v62 = vld [vmem:[#allocation290_spill] sm:$0xff]  ;;  %v10388_v10 = vld [vmem:[#allocation344_spill] sm:$0xff]  ;;  %v10391_v51 = vld [vmem:[#allocation123_spill] sm:$0xff] }
 0x512   : > { %v8477_v48 = vadd.f32 %v10386_v35, %v1352_v49  ;;  %v2409_v42 = vadd.f32 %v2401_v7, %v2286_v30  ;;  %v2750_v33 = vadd.f32 %v7941_v34, %v10387_v62  ;;  %v10389_v24 = vld [vmem:[#allocation18_spill] sm:$0xff]  ;;  %v10390_v55 = vmov 27   ;;  %v10392_v32 = vld [vmem:[#allocation133_spill] sm:$0xff]  ;;  %v10393_v13 = vld [vmem:[#allocation211_spill] sm:$0xff] }
 0x513   : > { %v2873_v39 = vadd.f32 %v10389_v24, %v10388_v10  ;;  %5357 = vset.pattern.permute.xlu1 %v10390_v55  ;;  %v1406_v12 = vand.u32 2147483647, %v1398_v1  ;;  %v1519_v9 = vadd.f32 %v10309_v5, %v10391_v51  ;;  %v1595_v47 = vadd.f32 %v10392_v32, %v1472_v27  ;;  %v10394_v23 = vld [vmem:[#allocation21_spill] sm:$0xff]  ;;  %v10395_v7 = vld [vmem:[#allocation124_spill] sm:$0xff]  ;;  %v10396_v35 = vld [vmem:[#allocation191_spill] sm:$0xff]  ;;  %v8493_v24 = vpop.permute.xlu1 %3697 }
 0x514   : > { %v2206_v38 = vadd.f32 %v10393_v13, %v2083_v57  ;;  %3824 = vperm.xlu1 %5357, %v10394_v23   ;;  %v1407_v49 = vand.u32 2147483647, %v1399_v31  ;;  %v1401_v30 = vadd.f32 %v10303_v15, %v10395_v7  ;;  %v2524_v62 = vmul.f32 %v10396_v35, %v2515_v61  ;;  %v10397_v16 = vld [vmem:[#allocation206_spill] sm:$0xff]  ;;  %10398 = vst [vmem:[#allocation50_spill] sm:$0xff] %v8493_v24  ;;  %v10402_v32 = vld [vmem:[#allocation311_spill] sm:$0xff]  ;;  %v8499_v13 = vpop.permute.xlu0 %4279  ;;  %v10404_v23 = vld [vmem:[#allocation125_spill] sm:$0xff] }
 0x515   : > { %v2644_v10 = vmul.f32 %v10397_v16, %v2635_v20  ;;  %v10399_v1 = vld [vmem:[#allocation146_spill] sm:$0xff]  ;;  %v1715_v51 = vadd.f32 %v10400_v0, %v1595_v47  ;;  %v2943_v57 = vadd.f32 %v10402_v32, %v2820_v6  ;;  %10403 = vst [vmem:[#allocation52_spill] sm:$0xff] %v8499_v13  ;;  %v1522_v31 = vadd.f32 %v10309_v5, %v10404_v23  ;;  %v10405_v16 = vld [vmem:[#allocation181_spill] sm:$0xff]  ;;  %v10409_v32 = vld [vmem:[#allocation44_spill] sm:$0xff] }
 0x516   : > { %v1712_v34 = vadd.f32 %v10399_v1, %v1592_v36  ;;  %v2329_v27 = vadd.f32 %v10401_v54, %v2206_v38  ;;  %v2758_v15 = vand.u32 2147483647, %v2750_v33  ;;  %v2532_v7 = vadd.f32 %v2524_v62, %v2409_v42  ;;  %v10406_v1 = vld [vmem:[#allocation370_spill] sm:$0xff]  ;;  %v10407_v54 = vld [vmem:[#allocation127_spill] sm:$0xff]  ;;  %v10410_v33 = vld [vmem:[#allocation384_spill] sm:$0xff] }
 0x517   : > { %v2881_v61 = vand.u32 2147483647, %v2873_v39  ;;  %v1421_v20 = vadd.f32 %v1413_v28, %v8346_v18  ;;  %v1415_v24 = vmul.f32 %v6123_v63, %v1406_v12  ;;  %v3066_v0 = vadd.f32 %v10406_v1, %v2943_v57  ;;  %v10408_v38 = vld [vmem:[#allocation322_spill] sm:$0xff]  ;;  %v10411_v42 = vld [vmem:[#allocation67_spill] sm:$0xff]  ;;  %v8515_v18 = vpop.permute.xlu1 %3705  ;;  %v10413_v28 = vld [vmem:[#allocation165_spill] sm:$0xff] }
 0x518   : > { %v1835_v36 = vadd.f32 %v10405_v16, %v1712_v34  ;;  %5358 = vset.pattern.permute.xlu1 %v10372_v22  ;;  %v1524_v6 = vadd.f32 %v10309_v5, %v10407_v54  ;;  %v2652_v47 = vadd.f32 %v2644_v10, %v2532_v7  ;;  %v2996_v23 = vadd.f32 %v10409_v32, %v10408_v38  ;;  %v10414_v62 = vld [vmem:[#allocation244_spill] sm:$0xff]  ;;  %v8520_v1 = vpop.permute.xlu0 %4402  ;;  %v10416_v54 = vld [vmem:[#allocation223_spill] sm:$0xff]  ;;  %v10417_v13 = vld [vmem:[#allocation238_spill] sm:$0xff] }
 0x519   : > { %v3119_v39 = vadd.f32 %v10411_v42, %v10410_v33  ;;  %3943 = vperm.xlu1 %5358, %v8179_v44   ;;  %10412 = vst [vmem:[#allocation54_spill] sm:$0xff] %v8515_v18  ;;  %v1416_v34 = vmul.f32 %v6123_v63, %v1407_v49  ;;  %v1527_v16 = vand.u32 2147483647, %v1519_v9  ;;  %v1838_v12 = vadd.f32 %v10413_v28, %v1715_v51  ;;  %v10418_v33 = vld [vmem:[#allocation202_spill] sm:$0xff]  ;;  %v10421_v9 = vld [vmem:[#allocation343_spill] sm:$0xff] }
 0x51a   : > { %v2452_v57 = vadd.f32 %v10414_v62, %v2329_v27  ;;  %10415 = vst [vmem:[#allocation75_spill] sm:$0xff] %v8520_v1  ;;  %v1409_v10 = vand.u32 2147483647, %v1401_v30  ;;  %v1530_v7 = vand.u32 2147483647, %v1522_v31  ;;  %v2767_v38 = vmul.f32 %v10416_v54, %v2758_v15  ;;  %v10419_v35 = vld [vmem:[#allocation178_spill] sm:$0xff] }
 0x51b   : > { %v2890_v32 = vmul.f32 %v10417_v13, %v2881_v61  ;;  %v1961_v42 = vadd.f32 %v10418_v33, %v1838_v12  ;;  %v1958_v18 = vadd.f32 %v10419_v35, %v1835_v36  ;;  %v3189_v43 = vadd.f32 %v10421_v9, %v3066_v0  ;;  %v8529_v30 = vpop.permute.xlu1 %3713  ;;  %v10424_v61 = vld [vmem:[#allocation217_spill] sm:$0xff]  ;;  %v10425_v35 = vld [vmem:[#allocation406_spill] sm:$0xff]  ;;  %v10430_v33 = vld [vmem:[#allocation104_spill] sm:$0xff] }
 0x51c   : > { %v2575_v49 = vadd.f32 %v10420_v52, %v2452_v57  ;;  %v1532_v51 = vand.u32 2147483647, %v1524_v6  ;;  %v3004_v28 = vand.u32 2147483647, %v2996_v23  ;;  %v2775_v27 = vadd.f32 %v2767_v38, %v2652_v47  ;;  %10423 = vst [vmem:[#allocation80_spill] sm:$0xff] %v8529_v30  ;;  %v8537_v52 = vpop.permute.xlu0 %3939  ;;  %v5411_v0 = vld [vmem:[%s5788_s28 + $0x8] sm:$0xff] }
 0x51d   : > { %v3127_v62 = vand.u32 2147483647, %v3119_v39  ;;  %v10422_v1 = vmov 29   ;;  %v8532_v31 = vadd.f32 %v1415_v24, %v8446_v29  ;;  %v1536_v15 = vmul.f32 %v6198_v60, %v1527_v16  ;;  %10426 = vst [vmem:[#allocation55_spill] sm:$0xff] %v8537_v52  ;;  %v10427_v23 = vld [vmem:[#allocation354_spill] sm:$0xff]  ;;  %v10428_v39 = vld [vmem:[#allocation76_spill] sm:$0xff] }
 0x51e   : > { %5359 = vset.pattern.permute.xlu1 %v10422_v1  ;;  %v2081_v12 = vadd.f32 %v10424_v61, %v1958_v18  ;;  %v3312_v36 = vadd.f32 %v10425_v35, %v3189_v43  ;;  %v1424_v6 = vadd.f32 %v1416_v34, %v8377_v46  ;;  %v2898_v47 = vadd.f32 %v2890_v32, %v2775_v27  ;;  %v10429_v38 = vld [vmem:[#allocation11_spill] sm:$0xff]  ;;  %v10431_v18 = vld [vmem:[#allocation197_spill] sm:$0xff] }
 0x51f   : > { %4062 = vperm.xlu1 %5359, %v5411_v0   ;;  %v3242_v57 = vadd.f32 %v10428_v39, %v10427_v23  ;;  %v3365_v29 = vadd.f32 %v10430_v33, %v10429_v38  ;;  %v1418_v24 = vmul.f32 %v6123_v63, %v1409_v10  ;;  %v1539_v16 = vmul.f32 %v6198_v60, %v1530_v7  ;;  %v10432_v43 = vld [vmem:[#allocation277_spill] sm:$0xff]  ;;  %v10433_v0 = vld [vmem:[#allocation136_spill] sm:$0xff]  ;;  %v10434_v32 = vld [vmem:[#allocation255_spill] sm:$0xff]  ;;  %v8554_v30 = vpop.permute.xlu1 %3773 }
 0x520   : > { %v2084_v9 = vadd.f32 %v10431_v18, %v1961_v42  ;;  %v2695_v61 = vadd.f32 %v10432_v43, %v2575_v49  ;;  %v1541_v35 = vmul.f32 %v6198_v60, %v1532_v51  ;;  %v1520_v46 = vadd.f32 %v10309_v5, %v10433_v0  ;;  %v10435_v27 = vld [vmem:[#allocation271_spill] sm:$0xff]  ;;  %v10437_v63 = vld [vmem:[#allocation209_spill] sm:$0xff]  ;;  %v10439_v42 = vld [vmem:[#allocation378_spill] sm:$0xff]  ;;  %v8560_v49 = vpop.permute.xlu0 %3947 }
 0x521   : > { %v3013_v34 = vmul.f32 %v10434_v32, %v3004_v28  ;;  %v3136_v23 = vmul.f32 %v10435_v27, %v3127_v62  ;;  %v10436_v38 = vld [vmem:[#allocation239_spill] sm:$0xff]  ;;  %v2204_v10 = vadd.f32 %v10437_v63, %v2081_v12  ;;  %v10438_v7 = vld [vmem:[#allocation329_spill] sm:$0xff]  ;;  %v3435_v18 = vadd.f32 %v10439_v42, %v3312_v36  ;;  %10440 = vst [vmem:[#allocation56_spill] sm:$0xff] %v8560_v49  ;;  %v10443_v36 = vld [vmem:[#allocation128_spill] sm:$0xff] }
 0x522   : > { %v2207_v52 = vadd.f32 %v10436_v38, %v2084_v9  ;;  %v2818_v33 = vadd.f32 %v10438_v7, %v2695_v61  ;;  %v8563_v51 = vadd.f32 %v1536_v15, %v1421_v20  ;;  %v3250_v43 = vand.u32 2147483647, %v3242_v57  ;;  %v10441_v12 = vld [vmem:[#allocation253_spill] sm:$0xff]  ;;  %v10442_v61 = vld [vmem:[#allocation48_spill] sm:$0xff] }
 0x523   : > { %5360 = vset.pattern.permute.xlu1 %v10390_v55  ;;  %v3021_v28 = vadd.f32 %v3013_v34, %v2898_v47  ;;  %v3373_v0 = vand.u32 2147483647, %v3365_v29  ;;  %v1426_v62 = vadd.f32 %v1418_v24, %v8387_v21  ;;  %v8567_v9 = vadd.f32 %v1539_v16, %v1424_v6  ;;  %v10444_v49 = vld [vmem:[#allocation389_spill] sm:$0xff]  ;;  %v10446_v47 = vld [vmem:[#allocation422_spill] sm:$0xff]  ;;  %v8577_v29 = vpop.permute.xlu1 %3777  ;;  %v10463_v27 = vld [vmem:[#allocation16_spill] sm:$0xff] }
 0x524   : > { %3828 = vperm.xlu1 %5360, %v8155_v50   ;;  %v2327_v38 = vadd.f32 %v10441_v12, %v2204_v10  ;;  %v3558_v63 = vadd.f32 %v10442_v61, %v3435_v18  ;;  %v1470_v7 = vadd.f32 %v10443_v36, %v8400_v8  ;;  %v10445_v20 = vld [vmem:[#allocation421_spill] sm:$0xff]  ;;  %v3608_v57 = vadd.f32 %v10446_v47, %v8351_v14  ;;  %v10449_v18 = vld [vmem:[#allocation138_spill] sm:$0xff]  ;;  %v10450_v8 = vld [vmem:[#allocation140_spill] sm:$0xff] }
 0x525   : > { %v3144_v42 = vadd.f32 %v3136_v23, %v3021_v28  ;;  %v3488_v15 = vadd.f32 %v10445_v20, %v10444_v49  ;;  %v8579_v34 = vadd.f32 %v1541_v35, %v1426_v62  ;;  %v1528_v21 = vand.u32 2147483647, %v1520_v46  ;;  %v10447_v6 = vld [vmem:[#allocation229_spill] sm:$0xff]  ;;  %v10451_v28 = vld [vmem:[#allocation288_spill] sm:$0xff]  ;;  %v10452_v61 = vld [vmem:[#allocation303_spill] sm:$0xff]  ;;  %v8589_v14 = vpop.permute.xlu0 %4308 }
 0x526   : > { %v2330_v24 = vadd.f32 %v10447_v6, %v2207_v52  ;;  %v10448_v16 = vld [vmem:[#allocation309_spill] sm:$0xff]  ;;  %v1521_v12 = vadd.f32 %v10309_v5, %v10449_v18  ;;  %v1523_v23 = vadd.f32 %v10309_v5, %v10450_v8  ;;  %v3259_v49 = vmul.f32 %v10451_v28, %v3250_v43  ;;  %10453 = vst [vmem:[#allocation79_spill] sm:$0xff] %v8589_v14  ;;  %v10454_v35 = vld [vmem:[#allocation276_spill] sm:$0xff]  ;;  %v10455_v62 = vld [vmem:[#allocation242_spill] sm:$0xff] }
 0x527   : > { %v2941_v10 = vadd.f32 %v10448_v16, %v2818_v33  ;;  %v3382_v36 = vmul.f32 %v10452_v61, %v3373_v0  ;;  %v2450_v52 = vadd.f32 %v10455_v62, %v2327_v38  ;;  %v10456_v6 = vld [vmem:[#allocation367_spill] sm:$0xff]  ;;  %v10457_v16 = vld [vmem:[#allocation409_spill] sm:$0xff]  ;;  %v3496_v43 = vand.u32 2147483647, %v3488_v15  ;;  %v3782_v61 = vpop.permute.xlu1 %3781  ;;  %v10460_v20 = vld [vmem:[#allocation132_spill] sm:$0xff] }
 0x528   : > { %5361 = vset.pattern.permute.xlu1 %v10422_v1  ;;  %v2453_v46 = vadd.f32 %v10454_v35, %v2330_v24  ;;  %v3678_v18 = vadd.f32 %v10457_v16, %v3558_v63  ;;  %v10458_v47 = vld [vmem:[#allocation139_spill] sm:$0xff]  ;;  %v3267_v8 = vadd.f32 %v3259_v49, %v3144_v42  ;;  %v3616_v0 = vand.u32 2147483647, %v3608_v57  ;;  %v10465_v57 = vld [vmem:[#allocation262_spill] sm:$0xff]  ;;  %v10466_v32 = vld [vmem:[#allocation341_spill] sm:$0xff] }
 0x529   : > { %v3064_v33 = vadd.f32 %v10456_v6, %v2941_v10  ;;  %4066 = vperm.xlu1 %5361, %v8179_v44   ;;  %v1640_v5 = vadd.f32 %v10312_v58, %v10458_v47  ;;  %v10459_v14 = vld [vmem:[#allocation131_spill] sm:$0xff]  ;;  %v1474_v24 = vadd.f32 %v10460_v20, %v8416_v45  ;;  %v1537_v10 = vmul.f32 %v6198_v60, %v1528_v21  ;;  %v10462_v6 = vld [vmem:[#allocation141_spill] sm:$0xff]  ;;  %v10464_v47 = vld [vmem:[#allocation424_spill] sm:$0xff] }
 0x52a   : > { %v1593_v28 = vadd.f32 %v10459_v14, %v1470_v7  ;;  %v10461_v35 = vld [vmem:[#allocation291_spill] sm:$0xff]  ;;  %v3801_v62 = vadd.f32 %v3782_v61, %v3678_v18  ;;  %v1643_v63 = vadd.f32 %v10312_v58, %v10462_v6  ;;  %v3390_v16 = vadd.f32 %v3382_v36, %v3267_v8  ;;  %v10467_v14 = vld [vmem:[#allocation45_spill] sm:$0xff]  ;;  %v8611_v45 = vpop.permute.xlu0 %3816 }
 0x52b   : > { %v2573_v38 = vadd.f32 %v10461_v35, %v2450_v52  ;;  %v3731_v15 = vadd.f32 %v10464_v47, %v10463_v27  ;;  %v1531_v42 = vand.u32 2147483647, %v1523_v23  ;;  %v2576_v49 = vadd.f32 %v10465_v57, %v2453_v46  ;;  %10468 = vst [vmem:[#allocation57_spill] sm:$0xff] %v8611_v45  ;;  %v10470_v52 = vld [vmem:[#allocation320_spill] sm:$0xff]  ;;  %v10471_v35 = vld [vmem:[#allocation335_spill] sm:$0xff]  ;;  %v8617_v27 = vpop.permute.xlu1 %3785 }
 0x52c   : > { %v3187_v7 = vadd.f32 %v10466_v32, %v3064_v33  ;;  %v3924_v13 = vadd.f32 %v10467_v14, %v3801_v62  ;;  %v10469_v20 = vmov 30   ;;  %v1529_v61 = vand.u32 2147483647, %v1521_v12  ;;  %v10472_v23 = vld [vmem:[#allocation312_spill] sm:$0xff]  ;;  %v10473_v8 = vld [vmem:[#allocation275_spill] sm:$0xff]  ;;  %v10477_v12 = vld [vmem:[#allocation134_spill] sm:$0xff] }
 0x52d   : > { %5362 = vset.pattern.permute.xlu1 %v10469_v20  ;;  %v1648_v21 = vand.u32 2147483647, %v1640_v5  ;;  %v3505_v18 = vmul.f32 %v10470_v52, %v3496_v43  ;;  %v3625_v36 = vmul.f32 %v10471_v35, %v3616_v0  ;;  %v2696_v46 = vadd.f32 %v10472_v23, %v2576_v49  ;;  %v10474_v33 = vld [vmem:[#allocation404_spill] sm:$0xff]  ;;  %v10475_v6 = vld [vmem:[#allocation51_spill] sm:$0xff] }
 0x52e   : > { %4181 = vperm.xlu1 %5362, %v8088_v3   ;;  %v2693_v32 = vadd.f32 %v10473_v8, %v2573_v38  ;;  %v3310_v62 = vadd.f32 %v10474_v33, %v3187_v7  ;;  %v8623_v57 = vadd.f32 %v10475_v6, %v3924_v13  ;;  %v1476_v5 = vadd.f32 %v10477_v12, %v8434_v26  ;;  %v10478_v0 = vld [vmem:[#allocation135_spill] sm:$0xff]  ;;  %v3841_v38 = vpop.permute.xlu0 %3840  ;;  %v10480_v8 = vld [vmem:[#allocation153_spill] sm:$0xff]  ;;  %v10481_v6 = vld [vmem:[#allocation28_spill] sm:$0xff] }
 0x52f   : > { %v1651_v14 = vand.u32 2147483647, %v1643_v63  ;;  %v3739_v43 = vand.u32 2147483647, %v3731_v15  ;;  %v3513_v45 = vadd.f32 %v3505_v18, %v3390_v16  ;;  %v1597_v35 = vadd.f32 %v10478_v0, %v1474_v24  ;;  %v10479_v49 = vld [vmem:[#allocation327_spill] sm:$0xff]  ;;  %v8636_v63 = vpop.permute.xlu1 %3896  ;;  %v10483_v16 = vld [vmem:[#allocation294_spill] sm:$0xff] }
 0x530   : > { %10476 = vst [vmem:[#allocation59_spill] sm:$0xff] %v8623_v57  ;;  %v1545_v3 = vadd.f32 %v1537_v10, %v8448_v19  ;;  %v1540_v52 = vmul.f32 %v6198_v60, %v1531_v42  ;;  %v2816_v23 = vadd.f32 %v10479_v49, %v2693_v32  ;;  %v1538_v7 = vmul.f32 %v6198_v60, %v1529_v61  ;;  %v10482_v19 = vld [vmem:[#allocation164_spill] sm:$0xff]  ;;  %v10484_v42 = vld [vmem:[#allocation375_spill] sm:$0xff]  ;;  %v10485_v61 = vld [vmem:[#allocation154_spill] sm:$0xff] }
 0x531   : > { %v1639_v13 = vadd.f32 %v10312_v58, %v10480_v8  ;;  %v3633_v33 = vadd.f32 %v3625_v36, %v3513_v45  ;;  %v3854_v26 = vadd.f32 %v10481_v6, %v3841_v38  ;;  %v1657_v24 = vmul.f32 %v10329_v4, %v1648_v21  ;;  %v10486_v36 = vld [vmem:[#allocation352_spill] sm:$0xff]  ;;  %v10488_v38 = vld [vmem:[#allocation307_spill] sm:$0xff]  ;;  %v10489_v8 = vld [vmem:[#allocation25_spill] sm:$0xff] }
 0x532   : > { %5363 = vset.pattern.permute.xlu1 %v10390_v55  ;;  %v1713_v10 = vadd.f32 %v10482_v19, %v1593_v28  ;;  %v2819_v15 = vadd.f32 %v10483_v16, %v2696_v46  ;;  %v3433_v18 = vadd.f32 %v10484_v42, %v3310_v62  ;;  %v1660_v60 = vmul.f32 %v10329_v4, %v1651_v14  ;;  %v10487_v49 = vld [vmem:[#allocation348_spill] sm:$0xff]  ;;  %v10490_v62 = vld [vmem:[#allocation151_spill] sm:$0xff]  ;;  %v10491_v14 = vld [vmem:[#allocation361_spill] sm:$0xff] }
 0x533   : > { %3832 = vperm.xlu1 %5363, %v8289_v59   ;;  %v1762_v45 = vadd.f32 %v10324_v11, %v10485_v61  ;;  %v3748_v32 = vmul.f32 %v10486_v36, %v3739_v43  ;;  %v3862_v12 = vand.u32 2147483647, %v3854_v26  ;;  %v1548_v0 = vadd.f32 %v1540_v52, %v8454_v2  ;;  %v3901_v57 = vpop.permute.xlu1 %3900  ;;  %v10492_v61 = vld [vmem:[#allocation137_spill] sm:$0xff]  ;;  %v10493_v2 = vld [vmem:[#allocation163_spill] sm:$0xff] }
 0x534   : > { %v2942_v21 = vadd.f32 %v10487_v49, %v2819_v15  ;;  %v2939_v28 = vadd.f32 %v10488_v38, %v2816_v23  ;;  %v3556_v46 = vadd.f32 %v10489_v8, %v3433_v18  ;;  %v1598_v19 = vadd.f32 %v10490_v62, %v8477_v48  ;;  %v10494_v26 = vld [vmem:[#allocation365_spill] sm:$0xff]  ;;  %v10495_v48 = vld [vmem:[#allocation168_spill] sm:$0xff] }
 0x535   : > { %v1647_v16 = vand.u32 2147483647, %v1639_v13  ;;  %v3756_v42 = vadd.f32 %v3748_v32, %v3633_v33  ;;  %v3871_v6 = vmul.f32 %v10491_v14, %v3862_v12  ;;  %v1599_v47 = vadd.f32 %v10492_v61, %v1476_v5  ;;  %v10497_v5 = vld [vmem:[#allocation200_spill] sm:$0xff] }
 0x536   : > { %v8656_v43 = vadd.f32 %v1538_v7, %v8532_v31  ;;  %v1836_v52 = vadd.f32 %v10493_v2, %v1713_v10  ;;  %v3062_v15 = vadd.f32 %v10494_v26, %v2939_v28  ;;  %v8661_v23 = vadd.f32 %v1657_v24, %v1545_v3  ;;  %v10498_v7 = vld [vmem:[#allocation326_spill] sm:$0xff]  ;;  %v10499_v10 = vld [vmem:[#allocation407_spill] sm:$0xff]  ;;  %v10500_v38 = vld [vmem:[#allocation152_spill] sm:$0xff] }
 0x537   : > { %5364 = vset.pattern.permute.xlu1 %v10372_v22  ;;  %v1770_v18 = vand.u32 2147483647, %v1762_v45  ;;  %v1717_v13 = vadd.f32 %v10495_v48, %v1597_v35  ;;  %v8664_v33 = vadd.f32 %v3871_v6, %v3756_v42  ;;  %v8667_v32 = vadd.f32 %v1660_v60, %v1548_v0  ;;  %v10501_v24 = vld [vmem:[#allocation157_spill] sm:$0xff]  ;;  %v10502_v6 = vld [vmem:[#allocation170_spill] sm:$0xff]  ;;  %v8679_v8 = vpop.permute.xlu1 %4021  ;;  %v10504_v0 = vld [vmem:[#allocation388_spill] sm:$0xff] }
 0x538   : > { %3951 = vperm.xlu1 %5364, %v8155_v50   ;;  %v1959_v31 = vadd.f32 %v10497_v5, %v1836_v52  ;;  %v3065_v12 = vadd.f32 %v10498_v7, %v2942_v21  ;;  %v3676_v49 = vadd.f32 %v10499_v10, %v3556_v46  ;;  %v8673_v28 = vadd.f32 %v10500_v38, %v1598_v19  ;;  %v10503_v50 = vld [vmem:[#allocation155_spill] sm:$0xff]  ;;  %v10506_v61 = vld [vmem:[#allocation156_spill] sm:$0xff]  ;;  %v10512_v38 = vld [vmem:[#allocation158_spill] sm:$0xff] }
 0x539   : > { %10496 = vst [vmem:[#allocation61_spill] sm:$0xff] %v8664_v33  ;;  %v1656_v3 = vmul.f32 %v10329_v4, %v1647_v16  ;;  %v1642_v35 = vadd.f32 %v10312_v58, %v10501_v24  ;;  %v1719_v45 = vadd.f32 %v10502_v6, %v1599_v47  ;;  %v1641_v60 = vadd.f32 %v10312_v58, %v10503_v50  ;;  %v10505_v21 = vld [vmem:[#allocation339_spill] sm:$0xff]  ;;  %v10507_v2 = vld [vmem:[#allocation160_spill] sm:$0xff]  ;;  %v10513_v24 = vld [vmem:[#allocation169_spill] sm:$0xff] }
 0x53a   : > { %v3188_v62 = vadd.f32 %v10504_v0, %v3065_v12  ;;  %v3185_v42 = vadd.f32 %v10505_v21, %v3062_v15  ;;  %v3799_v46 = vadd.f32 %v8577_v29, %v3676_v49  ;;  %v1779_v19 = vmul.f32 %v6342_v37, %v1770_v18  ;;  %v10508_v47 = vld [vmem:[#allocation167_spill] sm:$0xff]  ;;  %v10509_v48 = vld [vmem:[#allocation172_spill] sm:$0xff]  ;;  %v10511_v15 = vld [vmem:[#allocation402_spill] sm:$0xff] }
 0x53b   : > { %v1765_v16 = vadd.f32 %v10324_v11, %v10506_v61  ;;  %v1644_v52 = vadd.f32 %v10312_v58, %v10507_v2  ;;  %v1840_v26 = vadd.f32 %v10508_v47, %v1717_v13  ;;  %v1763_v5 = vadd.f32 %v10324_v11, %v10509_v48  ;;  %v10510_v7 = vld [vmem:[#allocation195_spill] sm:$0xff]  ;;  %v4024_v6 = vpop.permute.xlu1 %4023  ;;  %v10514_v50 = vld [vmem:[#allocation204_spill] sm:$0xff]  ;;  %v10516_v2 = vld [vmem:[#allocation358_spill] sm:$0xff] }
 0x53c   : > { %5365 = vset.pattern.permute.xlu1 %v10469_v20  ;;  %v2082_v12 = vadd.f32 %v10510_v7, %v1959_v31  ;;  %v3308_v10 = vadd.f32 %v10511_v15, %v3185_v42  ;;  %v3922_v29 = vadd.f32 %v3901_v57, %v3799_v46  ;;  %v1664_v18 = vadd.f32 %v1656_v3, %v8563_v51  ;;  %v10515_v21 = vld [vmem:[#allocation236_spill] sm:$0xff]  ;;  %v10517_v47 = vld [vmem:[#allocation207_spill] sm:$0xff]  ;;  %v10519_v7 = vld [vmem:[#allocation373_spill] sm:$0xff] }
 0x53d   : > { %4189 = vperm.xlu1 %5365, %v8179_v44   ;;  %v1650_v49 = vand.u32 2147483647, %v1642_v35  ;;  %v1767_v58 = vadd.f32 %v10324_v11, %v10512_v38  ;;  %v1842_v13 = vadd.f32 %v10513_v24, %v1719_v45  ;;  %v1963_v0 = vadd.f32 %v10514_v50, %v1840_v26  ;;  %v10518_v35 = vld [vmem:[#allocation418_spill] sm:$0xff]  ;;  %v10525_v50 = vld [vmem:[#allocation24_spill] sm:$0xff]  ;;  %v10648_v33 = vld [vmem:[#allocation355_spill] sm:$0xff] }
 0x53e   : > { %v2205_v61 = vadd.f32 %v10515_v21, %v2082_v12  ;;  %v3311_v31 = vadd.f32 %v10516_v2, %v3188_v62  ;;  %v4045_v42 = vadd.f32 %v4024_v6, %v3922_v29  ;;  %v1649_v57 = vand.u32 2147483647, %v1641_v60  ;;  %v10520_v45 = vld [vmem:[#allocation46_spill] sm:$0xff]  ;;  %v10522_v29 = vld [vmem:[#allocation176_spill] sm:$0xff]  ;;  %v10524_v6 = vld [vmem:[#allocation227_spill] sm:$0xff] }
 0x53f   : > { %v1773_v46 = vand.u32 2147483647, %v1765_v16  ;;  %v1652_v44 = vand.u32 2147483647, %v1644_v52  ;;  %v1965_v51 = vadd.f32 %v10517_v47, %v1842_v13  ;;  %v1771_v3 = vand.u32 2147483647, %v1763_v5  ;;  %v8716_v52 = vpop.permute.xlu1 %4144 }
 0x540   : > { %v3434_v48 = vadd.f32 %v10518_v35, %v3311_v31  ;;  %v3431_v15 = vadd.f32 %v10519_v7, %v3308_v10  ;;  %v4168_v38 = vadd.f32 %v10520_v45, %v4045_v42  ;;  %v10521_v24 = vmov 31   ;;  %v5412_v16 = vld [vmem:[%s5788_s28] sm:$0xff]  ;;  %v10526_v2 = vld [vmem:[#allocation37_spill] sm:$0xff] }
 0x541   : > { %5366 = vset.pattern.permute.xlu1 %v10521_v24  ;;  %v8710_v26 = vadd.f32 %v1779_v19, %v1664_v18  ;;  %v1659_v12 = vmul.f32 %v10329_v4, %v1650_v49  ;;  %v1775_v62 = vand.u32 2147483647, %v1767_v58  ;;  %v1766_v60 = vadd.f32 %v10324_v11, %v10522_v29  ;;  %v10523_v5 = vld [vmem:[#allocation199_spill] sm:$0xff]  ;;  %v10528_v58 = vld [vmem:[#allocation173_spill] sm:$0xff] }
 0x542   : > { %4304 = vperm.xlu1 %5366, %v5412_v16   ;;  %v2086_v13 = vadd.f32 %v10523_v5, %v1963_v0  ;;  %v2328_v10 = vadd.f32 %v10524_v6, %v2205_v61  ;;  %v3554_v21 = vadd.f32 %v10525_v50, %v3431_v15  ;;  %v8722_v31 = vadd.f32 %v10526_v2, %v4168_v38  ;;  %v10527_v18 = vld [vmem:[#allocation171_spill] sm:$0xff]  ;;  %v10529_v47 = vld [vmem:[#allocation201_spill] sm:$0xff]  ;;  %v10531_v61 = vld [vmem:[#allocation274_spill] sm:$0xff] }
 0x543   : > { %v1661_v19 = vmul.f32 %v10329_v4, %v1652_v44  ;;  %v1886_v49 = vadd.f32 %v10326_v40, %v10527_v18  ;;  %v1889_v42 = vadd.f32 %v10326_v40, %v10528_v58  ;;  %v2088_v35 = vadd.f32 %v10529_v47, %v1965_v51  ;;  %v10530_v0 = vld [vmem:[#allocation241_spill] sm:$0xff]  ;;  %v10533_v5 = vld [vmem:[#allocation175_spill] sm:$0xff]  ;;  %v4026_v18 = vpop.permute.xlu1 %4025 }
 0x544   : > { %v1780_v7 = vmul.f32 %v6342_v37, %v1771_v3  ;;  %v2209_v45 = vadd.f32 %v10530_v0, %v2086_v13  ;;  %v2451_v29 = vadd.f32 %v10531_v61, %v2328_v10  ;;  %v10532_v15 = vld [vmem:[#allocation393_spill] sm:$0xff]  ;;  %v1658_v38 = vmul.f32 %v10329_v4, %v1649_v57  ;;  %v10534_v50 = vld [vmem:[#allocation243_spill] sm:$0xff] }
 0x545   : > { %v3557_v16 = vadd.f32 %v10532_v15, %v3434_v48  ;;  %v1764_v44 = vadd.f32 %v10324_v11, %v10533_v5  ;;  %v1774_v6 = vand.u32 2147483647, %v1766_v60  ;;  %v2211_v2 = vadd.f32 %v10534_v50, %v2088_v35  ;;  %v10535_v10 = vld [vmem:[#allocation405_spill] sm:$0xff]  ;;  %v10537_v35 = vld [vmem:[#allocation260_spill] sm:$0xff]  ;;  %v10539_v61 = vld [vmem:[#allocation215_spill] sm:$0xff] }
 0x546   : > { %5369 = vset.pattern.permute.xlu1 %v10390_v55  ;;  %v1782_v51 = vmul.f32 %v6342_v37, %v1773_v46  ;;  %v1784_v3 = vmul.f32 %v6342_v37, %v1775_v62  ;;  %v3674_v58 = vadd.f32 %v10535_v10, %v3554_v21  ;;  %v1667_v4 = vadd.f32 %v1659_v12, %v8567_v9  ;;  %v10536_v55 = vld [vmem:[#allocation231_spill] sm:$0xff]  ;;  %v10538_v21 = vld [vmem:[#allocation186_spill] sm:$0xff]  ;;  %v10540_v15 = vld [vmem:[#allocation233_spill] sm:$0xff] }
 0x547   : > { %v3677_v13 = vadd.f32 %v8395_v25, %v3557_v16  ;;  %3836 = vperm.xlu1 %5369, %v8200_v53   ;;  %v1669_v11 = vadd.f32 %v1661_v19, %v8579_v34  ;;  %v1894_v57 = vand.u32 2147483647, %v1886_v49  ;;  %v1897_v48 = vand.u32 2147483647, %v1889_v42  ;;  %v4266_v12 = vpop.permute.xlu1 %4265  ;;  %v10541_v34 = vld [vmem:[#allocation278_spill] sm:$0xff] }
 0x548   : > { %v1788_v60 = vadd.f32 %v1780_v7, %v8661_v23  ;;  %v2332_v47 = vadd.f32 %v10536_v55, %v2209_v45  ;;  %v2574_v46 = vadd.f32 %v10537_v35, %v2451_v29  ;;  %v3797_v62 = vadd.f32 %v8554_v30, %v3674_v58  ;;  %v10542_v49 = vld [vmem:[#allocation310_spill] sm:$0xff]  ;;  %v10543_v23 = vld [vmem:[#allocation419_spill] sm:$0xff]  ;;  %v10544_v29 = vld [vmem:[#allocation189_spill] sm:$0xff] }
 0x549   : > { %v1772_v0 = vand.u32 2147483647, %v1764_v44  ;;  %v1783_v25 = vmul.f32 %v6342_v37, %v1774_v6  ;;  %v2008_v53 = vadd.f32 %v10539_v61, %v10538_v21  ;;  %v2334_v9 = vadd.f32 %v10540_v15, %v2211_v2  ;;  %v10545_v5 = vld [vmem:[#allocation194_spill] sm:$0xff]  ;;  %v10546_v6 = vld [vmem:[#allocation280_spill] sm:$0xff] }
 0x54a   : > { %v2455_v19 = vadd.f32 %v10541_v34, %v2332_v47  ;;  %v2694_v42 = vadd.f32 %v10542_v49, %v2574_v46  ;;  %v3800_v7 = vadd.f32 %v10543_v23, %v3677_v13  ;;  %v3920_v45 = vadd.f32 %v8636_v63, %v3797_v62  ;;  %v10547_v46 = vld [vmem:[#allocation264_spill] sm:$0xff]  ;;  %v8789_v49 = vld [vmem:[%s5788_s28 + $0x18] sm:$0xff] }
 0x54b   : > { %5370 = vset.pattern.permute.xlu1 %v10372_v22  ;;  %v1903_v30 = vmul.f32 %v6413_v56, %v1894_v57  ;;  %v1885_v16 = vadd.f32 %v10326_v40, %v10544_v29  ;;  %v1888_v44 = vadd.f32 %v10326_v40, %v10545_v5  ;;  %v2457_v50 = vadd.f32 %v10546_v6, %v2334_v9  ;;  %v8774_v35 = vpop.permute.xlu1 %3906  ;;  %v10555_v9 = vld [vmem:[#allocation346_spill] sm:$0xff]  ;;  %v10556_v23 = vld [vmem:[#allocation187_spill] sm:$0xff]  ;;  %v10558_v5 = vld [vmem:[#allocation188_spill] sm:$0xff] }
 0x54c   : > { %3955 = vperm.xlu1 %5370, %v8289_v59   ;;  %v1666_v2 = vadd.f32 %v1658_v38, %v8656_v43  ;;  %v1906_v13 = vmul.f32 %v6413_v56, %v1897_v48  ;;  %v1790_v10 = vadd.f32 %v1782_v51, %v1667_v4  ;;  %v8768_v63 = vadd.f32 %v1784_v3, %v1669_v11  ;;  %v10548_v59 = vld [vmem:[#allocation292_spill] sm:$0xff]  ;;  %v10549_v43 = vld [vmem:[#allocation19_spill] sm:$0xff]  ;;  %v10550_v48 = vld [vmem:[#allocation9_spill] sm:$0xff] }
 0x54d   : > { %v1781_v58 = vmul.f32 %v6342_v37, %v1772_v0  ;;  %v1791_v57 = vadd.f32 %v1783_v25, %v8667_v32  ;;  %v2016_v55 = vand.u32 2147483647, %v2008_v53  ;;  %v8772_v47 = vadd.f32 %v1903_v30, %v1788_v60  ;;  %v10551_v4 = vld [vmem:[#allocation192_spill] sm:$0xff]  ;;  %v10552_v32 = vld [vmem:[#allocation266_spill] sm:$0xff]  ;;  %v10559_v6 = vld [vmem:[#allocation23_spill] sm:$0xff] }
 0x54e   : > { %v2578_v62 = vadd.f32 %v10547_v46, %v2455_v19  ;;  %v2817_v21 = vadd.f32 %v10548_v59, %v2694_v42  ;;  %v4043_v38 = vadd.f32 %v10549_v43, %v3920_v45  ;;  %v3923_v51 = vadd.f32 %v10550_v48, %v3800_v7  ;;  %v10553_v60 = vld [vmem:[#allocation196_spill] sm:$0xff]  ;;  %v10554_v53 = vld [vmem:[#allocation314_spill] sm:$0xff]  ;;  %v10563_v48 = vld [vmem:[#allocation203_spill] sm:$0xff] }
 0x54f   : > { %v1893_v3 = vand.u32 2147483647, %v1885_v16  ;;  %v1887_v37 = vadd.f32 %v10326_v40, %v10551_v4  ;;  %v1896_v11 = vand.u32 2147483647, %v1888_v44  ;;  %v2580_v0 = vadd.f32 %v10552_v32, %v2457_v50  ;;  %v10557_v30 = vld [vmem:[#allocation316_spill] sm:$0xff]  ;;  %v4149_v16 = vpop.permute.xlu1 %4148 }
 0x550   : > { %5371 = vset.pattern.permute.xlu1 %v10469_v20  ;;  %v1890_v25 = vadd.f32 %v10326_v40, %v10553_v60  ;;  %v2698_v15 = vadd.f32 %v10554_v53, %v2578_v62  ;;  %v2940_v34 = vadd.f32 %v10555_v9, %v2817_v21  ;;  %v4046_v19 = vadd.f32 %v4026_v18, %v3923_v51  ;;  %v10561_v62 = vld [vmem:[#allocation296_spill] sm:$0xff]  ;;  %v10564_v51 = vld [vmem:[#allocation213_spill] sm:$0xff]  ;;  %v10568_v53 = vld [vmem:[#allocation350_spill] sm:$0xff] }
 0x551   : > { %4193 = vperm.xlu1 %5371, %v8789_v49   ;;  %v1789_v42 = vadd.f32 %v1781_v58, %v1666_v2  ;;  %v1841_v7 = vadd.f32 %v10556_v23, %v8673_v28  ;;  %v8794_v45 = vadd.f32 %v1906_v13, %v1791_v57  ;;  %v2700_v29 = vadd.f32 %v10557_v30, %v2580_v0  ;;  %v10560_v2 = vld [vmem:[#allocation190_spill] sm:$0xff]  ;;  %v10562_v21 = vld [vmem:[#allocation324_spill] sm:$0xff] }
 0x552   : > { %v2025_v40 = vmul.f32 %v6494_v41, %v2016_v55  ;;  %v2011_v44 = vadd.f32 %v10539_v61, %v10558_v5  ;;  %v4166_v18 = vadd.f32 %v10559_v6, %v4043_v38  ;;  %v4169_v50 = vadd.f32 %v4149_v16, %v4046_v19  ;;  %v10565_v4 = vld [vmem:[#allocation208_spill] sm:$0xff]  ;;  %v10569_v9 = vld [vmem:[#allocation386_spill] sm:$0xff]  ;;  %v10571_v6 = vld [vmem:[#allocation205_spill] sm:$0xff] }
 0x553   : > { %v1902_v46 = vmul.f32 %v6413_v56, %v1893_v3  ;;  %v2013_v58 = vadd.f32 %v10539_v61, %v10560_v2  ;;  %v1895_v28 = vand.u32 2147483647, %v1887_v37  ;;  %v1905_v13 = vmul.f32 %v6413_v56, %v1896_v11  ;;  %v10566_v32 = vld [vmem:[#allocation212_spill] sm:$0xff]  ;;  %v10567_v37 = vld [vmem:[#allocation298_spill] sm:$0xff] }
 0x554   : > { %v1898_v57 = vand.u32 2147483647, %v1890_v25  ;;  %v2821_v59 = vadd.f32 %v10561_v62, %v2698_v15  ;;  %v3063_v55 = vadd.f32 %v10562_v21, %v2940_v34  ;;  %v4289_v43 = vadd.f32 %v4266_v12, %v4166_v18  ;;  %v5414_v11 = vld [vmem:[%s5788_s28 + $0x10] sm:$0xff]  ;;  %v4389_v25 = vpop.permute.xlu1 %4388  ;;  %v10572_v62 = vld [vmem:[#allocation184_spill] sm:$0xff] }
 0x555   : > { %5372 = vset.pattern.permute.xlu1 %v10521_v24  ;;  %v2132_v38 = vadd.f32 %v10564_v51, %v10563_v48  ;;  %v2009_v3 = vadd.f32 %v10539_v61, %v10565_v4  ;;  %v2012_v0 = vadd.f32 %v10539_v61, %v10566_v32  ;;  %v2823_v60 = vadd.f32 %v10567_v37, %v2700_v29  ;;  %v10570_v34 = vld [vmem:[#allocation41_spill] sm:$0xff]  ;;  %v10575_v4 = vld [vmem:[#allocation328_spill] sm:$0xff] }
 0x556   : > { %4312 = vperm.xlu1 %5372, %v5414_v11   ;;  %v2944_v15 = vadd.f32 %v10568_v53, %v2821_v59  ;;  %v3186_v12 = vadd.f32 %v10569_v9, %v3063_v55  ;;  %v4292_v19 = vadd.f32 %v10570_v34, %v4169_v50  ;;  %v4412_v23 = vadd.f32 %v4389_v25, %v4289_v43  ;;  %v10573_v48 = vld [vmem:[#allocation353_spill] sm:$0xff]  ;;  %v10574_v43 = vld [vmem:[#allocation210_spill] sm:$0xff]  ;;  %v10580_v53 = vld [vmem:[#allocation12_spill] sm:$0xff] }
 0x557   : > { %v2019_v30 = vand.u32 2147483647, %v2011_v44  ;;  %v1910_v16 = vadd.f32 %v1902_v46, %v8710_v26  ;;  %v2021_v5 = vand.u32 2147483647, %v2013_v58  ;;  %v2135_v18 = vadd.f32 %v10564_v51, %v10571_v6  ;;  %v8835_v32 = vld [vmem:[%s5788_s28 + $0x30] sm:$0xff] }
 0x558   : > { %v1904_v29 = vmul.f32 %v6413_v56, %v1895_v28  ;;  %v1913_v2 = vadd.f32 %v1905_v13, %v1790_v10  ;;  %v1964_v21 = vadd.f32 %v10572_v62, %v1841_v7  ;;  %v2946_v59 = vadd.f32 %v10573_v48, %v2823_v60  ;;  %4427 = vperm.xlu0 %5385, %v4412_v23   ;;  %v8829_v46 = vpop.permute.xlu1 %3908  ;;  %v10576_v10 = vld [vmem:[#allocation356_spill] sm:$0xff]  ;;  %v10579_v11 = vld [vmem:[#allocation330_spill] sm:$0xff] }
 0x559   : > { %v1907_v55 = vmul.f32 %v6413_v56, %v1898_v57  ;;  %v2017_v50 = vand.u32 2147483647, %v2009_v3  ;;  %v2010_v44 = vadd.f32 %v10539_v61, %v10574_v43  ;;  %v2020_v26 = vand.u32 2147483647, %v2012_v0  ;;  %v10577_v0 = vld [vmem:[#allocation226_spill] sm:$0xff]  ;;  %v10585_v48 = vld [vmem:[#allocation220_spill] sm:$0xff] }
 0x55a   : > { %5374 = vset.pattern.permute.xlu1 %v10372_v22  ;;  %v2140_v58 = vand.u32 2147483647, %v2132_v38  ;;  %v3067_v28 = vadd.f32 %v10575_v4, %v2944_v15  ;;  %v3309_v13 = vadd.f32 %v10576_v10, %v3186_v12  ;;  %v4415_v7 = vadd.f32 %v8403_v17, %v4292_v19  ;;  %v10578_v38 = vld [vmem:[#allocation390_spill] sm:$0xff]  ;;  %v10589_v4 = vld [vmem:[#allocation391_spill] sm:$0xff] }
 0x55b   : > { %3959 = vperm.xlu1 %5374, %v8835_v32   ;;  %v2028_v56 = vmul.f32 %v6494_v41, %v2019_v30  ;;  %v2030_v61 = vmul.f32 %v6494_v41, %v2021_v5  ;;  %v2143_v57 = vand.u32 2147483647, %v2135_v18  ;;  %v2033_v3 = vadd.f32 %v2025_v40, %v1910_v16  ;;  %v10581_v23 = vld [vmem:[#allocation142_spill] sm:$0xff]  ;;  %v10582_v5 = vld [vmem:[#allocation392_spill] sm:$0xff] }
 0x55c   : > { %v2131_v37 = vadd.f32 %v10564_v51, %v10577_v0  ;;  %v3190_v60 = vadd.f32 %v10578_v38, %v3067_v28  ;;  %v3069_v25 = vadd.f32 %v10579_v11, %v2946_v59  ;;  %v3432_v15 = vadd.f32 %v10580_v53, %v3309_v13  ;;  %4442 = vperm.xlu0 %5385, %v4415_v7   ;;  %v8847_v19 = vpop.permute.xlu1 %4150  ;;  %v10591_v0 = vld [vmem:[#allocation228_spill] sm:$0xff]  ;;  %v10594_v53 = vld [vmem:[#allocation70_spill] sm:$0xff] }
 0x55d   : > { %v1912_v17 = vadd.f32 %v1904_v29, %v1789_v42  ;;  %v2026_v9 = vmul.f32 %v6494_v41, %v2017_v50  ;;  %v2018_v12 = vand.u32 2147483647, %v2010_v44  ;;  %v2029_v34 = vmul.f32 %v6494_v41, %v2020_v26  ;;  %v10583_v42 = vld [vmem:[#allocation218_spill] sm:$0xff]  ;;  %v10584_v29 = vld [vmem:[#allocation251_spill] sm:$0xff]  ;;  %v10586_v50 = vld [vmem:[#allocation224_spill] sm:$0xff] }
 0x55e   : > { %v1915_v40 = vadd.f32 %v1907_v55, %v8768_v63  ;;  %v2149_v30 = vmul.f32 %v10581_v23, %v2140_v58  ;;  %v8851_v16 = vadd.f32 %v2028_v56, %v1913_v2  ;;  %v3192_v6 = vadd.f32 %v10582_v5, %v3069_v25  ;;  %v8862_v44 = vld [vmem:[%s5788_s28 + $0x28] sm:$0xff]  ;;  %v10587_v2 = vld [vmem:[#allocation230_spill] sm:$0xff]  ;;  %v10593_v25 = vld [vmem:[#allocation363_spill] sm:$0xff] }
 0x55f   : > { %5375 = vset.pattern.permute.xlu1 %v10422_v1  ;;  %v2152_v18 = vmul.f32 %v10581_v23, %v2143_v57  ;;  %v2254_v62 = vadd.f32 %v10584_v29, %v10583_v42  ;;  %v2257_v59 = vadd.f32 %v10584_v29, %v10585_v48  ;;  %v2087_v43 = vadd.f32 %v10586_v50, %v1964_v21  ;;  %v10588_v26 = vld [vmem:[#allocation360_spill] sm:$0xff]  ;;  %v10590_v56 = vld [vmem:[#allocation222_spill] sm:$0xff]  ;;  %v10598_v50 = vld [vmem:[#allocation423_spill] sm:$0xff] }
 0x560   : > { %4078 = vperm.xlu1 %5375, %v8862_v44   ;;  %v2139_v63 = vand.u32 2147483647, %v2131_v37  ;;  %v2134_v55 = vadd.f32 %v10564_v51, %v10587_v2  ;;  %v3313_v58 = vadd.f32 %v10588_v26, %v3190_v60  ;;  %v3555_v28 = vadd.f32 %v10589_v4, %v3432_v15  ;;  %v8874_v57 = vpop.permute.xlu1 %4392  ;;  %v10592_v38 = vld [vmem:[#allocation420_spill] sm:$0xff] }
 0x561   : > { %v2034_v10 = vadd.f32 %v2026_v9, %v8772_v47  ;;  %v2027_v13 = vmul.f32 %v6494_v41, %v2018_v12  ;;  %v2037_v7 = vadd.f32 %v2029_v34, %v8794_v45  ;;  %v2259_v21 = vadd.f32 %v10584_v29, %v10590_v56  ;;  %v10595_v9 = vld [vmem:[#allocation245_spill] sm:$0xff]  ;;  %v10596_v45 = vld [vmem:[#allocation216_spill] sm:$0xff] }
 0x562   : > { %v2133_v37 = vadd.f32 %v10564_v51, %v10591_v0  ;;  %v3436_v11 = vadd.f32 %v10592_v38, %v3313_v58  ;;  %v3315_v60 = vadd.f32 %v10593_v25, %v3192_v6  ;;  %v3675_v15 = vadd.f32 %v10594_v53, %v3555_v28  ;;  %v10600_v56 = vld [vmem:[#allocation8_spill] sm:$0xff]  ;;  %v10606_v25 = vld [vmem:[#allocation235_spill] sm:$0xff]  ;;  %v10608_v53 = vld [vmem:[#allocation237_spill] sm:$0xff] }
 0x563   : > { %v2262_v5 = vand.u32 2147483647, %v2254_v62  ;;  %v2265_v47 = vand.u32 2147483647, %v2257_v59  ;;  %v2255_v41 = vadd.f32 %v10584_v29, %v10595_v9  ;;  %v2210_v12 = vadd.f32 %v10596_v45, %v2087_v43  ;;  %v10599_v59 = vld [vmem:[#allocation261_spill] sm:$0xff] }
 0x564   : > { %5376 = vset.pattern.permute.xlu1 %v10521_v24  ;;  %v2148_v34 = vmul.f32 %v10581_v23, %v2139_v63  ;;  %v2142_v42 = vand.u32 2147483647, %v2134_v55  ;;  %v8886_v48 = vadd.f32 %v2030_v61, %v1915_v40  ;;  %v3438_v2 = vadd.f32 %v10598_v50, %v3315_v60  ;;  %v8893_v4 = vpop.permute.xlu1 %4031  ;;  %v10601_v55 = vld [vmem:[#allocation395_spill] sm:$0xff]  ;;  %v10607_v60 = vld [vmem:[#allocation17_spill] sm:$0xff] }
 0x565   : > { %4316 = vperm.xlu1 %5376, %v8789_v49   ;;  %v2035_v6 = vadd.f32 %v2027_v13, %v1912_v17  ;;  %v2157_v26 = vadd.f32 %v2149_v30, %v2034_v10  ;;  %v8890_v62 = vadd.f32 %v2152_v18, %v2037_v7  ;;  %v2333_v58 = vadd.f32 %v10599_v59, %v2210_v12  ;;  %v10602_v40 = vld [vmem:[#allocation159_spill] sm:$0xff]  ;;  %v10603_v49 = vld [vmem:[#allocation232_spill] sm:$0xff]  ;;  %v10604_v13 = vld [vmem:[#allocation42_spill] sm:$0xff] }
 0x566   : > { %10597 = vst [vmem:[#allocation66_spill] sm:$0xff] %v8886_v48  ;;  %v2267_v43 = vand.u32 2147483647, %v2259_v21  ;;  %v2141_v28 = vand.u32 2147483647, %v2133_v37  ;;  %v3798_v63 = vadd.f32 %v10600_v56, %v3675_v15  ;;  %v3559_v61 = vadd.f32 %v10601_v55, %v3436_v11  ;;  %v10605_v21 = vld [vmem:[#allocation397_spill] sm:$0xff] }
 0x567   : > { %v2271_v0 = vmul.f32 %v10602_v40, %v2262_v5  ;;  %v2274_v38 = vmul.f32 %v10602_v40, %v2265_v47  ;;  %v2136_v17 = vadd.f32 %v10564_v51, %v10603_v49  ;;  %v2263_v30 = vand.u32 2147483647, %v2255_v41  ;;  %v10609_v5 = vld [vmem:[#allocation247_spill] sm:$0xff]  ;;  %v10610_v51 = vld [vmem:[#allocation248_spill] sm:$0xff]  ;;  %v10615_v55 = vld [vmem:[#allocation297_spill] sm:$0xff] }
 0x568   : > { %v2156_v18 = vadd.f32 %v2148_v34, %v2033_v3  ;;  %v2151_v10 = vmul.f32 %v10581_v23, %v2142_v42  ;;  %v3679_v7 = vadd.f32 %v10604_v13, %v3559_v61  ;;  %v3561_v37 = vadd.f32 %v10605_v21, %v3438_v2  ;;  %v8913_v3 = vld [vmem:[%s5788_s28 + $0x38] sm:$0xff]  ;;  %v8916_v41 = vpop.permute.xlu1 %4273  ;;  %v10613_v42 = vld [vmem:[#allocation29_spill] sm:$0xff]  ;;  %v10614_v59 = vld [vmem:[#allocation240_spill] sm:$0xff] }
 0x569   : > { %5377 = vset.pattern.permute.xlu1 %v10372_v22  ;;  %v2378_v11 = vadd.f32 %v10607_v60, %v10606_v25  ;;  %v2381_v15 = vadd.f32 %v10607_v60, %v10608_v53  ;;  %v2256_v47 = vadd.f32 %v10584_v29, %v10609_v5  ;;  %v2456_v9 = vadd.f32 %v10610_v51, %v2333_v58  ;;  %v10612_v12 = vld [vmem:[#allocation63_spill] sm:$0xff]  ;;  %v10616_v13 = vld [vmem:[#allocation282_spill] sm:$0xff]  ;;  %v10617_v21 = vld [vmem:[#allocation109_spill] sm:$0xff] }
 0x56a   : > { %3963 = vperm.xlu1 %5377, %v8913_v3   ;;  %v8919_v45 = vmul.f32 %v10602_v40, %v2267_v43  ;;  %v2150_v22 = vmul.f32 %v10581_v23, %v2141_v28  ;;  %v3681_v34 = vadd.f32 %v10612_v12, %v3561_v37  ;;  %v3921_v50 = vadd.f32 %v10613_v42, %v3798_v63  ;;  %v10618_v28 = vld [vmem:[#allocation31_spill] sm:$0xff]  ;;  %v10619_v12 = vld [vmem:[#allocation425_spill] sm:$0xff] }
 0x56b   : > { %v2144_v2 = vand.u32 2147483647, %v2136_v17  ;;  %v2383_v56 = vadd.f32 %v10607_v60, %v10614_v59  ;;  %v2272_v58 = vmul.f32 %v10602_v40, %v2263_v30  ;;  %v2579_v61 = vadd.f32 %v10615_v55, %v2456_v9  ;;  %v10626_v59 = vld [vmem:[#allocation268_spill] sm:$0xff] }
 0x56c   : > { %10611 = vst [vmem:[#allocation82_spill] sm:$0xff] %v8919_v45  ;;  %v2159_v49 = vadd.f32 %v2151_v10, %v8851_v16  ;;  %v2501_v43 = vadd.f32 %v10617_v21, %v10616_v13  ;;  %v4044_v25 = vadd.f32 %v8679_v8, %v3921_v50  ;;  %v3802_v53 = vadd.f32 %v10618_v28, %v3679_v7  ;;  %v4034_v51 = vpop.permute.xlu1 %4033  ;;  %v10631_v28 = vld [vmem:[#allocation284_spill] sm:$0xff] }
 0x56d   : > { %v2386_v37 = vand.u32 2147483647, %v2378_v11  ;;  %v2389_v5 = vand.u32 2147483647, %v2381_v15  ;;  %v2264_v63 = vand.u32 2147483647, %v2256_v47  ;;  %v8933_v17 = vadd.f32 %v2271_v0, %v2156_v18 }
 0x56e   : > { %5379 = vset.pattern.permute.xlu1 %v10469_v20  ;;  %v2158_v30 = vadd.f32 %v2150_v22, %v2035_v6  ;;  %v3804_v9 = vadd.f32 %v10619_v12, %v3681_v34  ;;  %v4167_v16 = vadd.f32 %v8716_v52, %v4044_v25  ;;  %v3925_v10 = vadd.f32 %v8774_v35, %v3802_v53  ;;  %v10621_v15 = vld [vmem:[#allocation281_spill] sm:$0xff]  ;;  %v10624_v35 = vld [vmem:[#allocation174_spill] sm:$0xff]  ;;  %v5418_v12 = vld [vmem:[%s5788_s28 + $0x20] sm:$0xff]  ;;  %s9366_s28 = scalar_lea.vmem [#allocation3], %s5008_s27 }
 0x56f   : > { %4201 = vperm.xlu1 %5379, %v8862_v44   ;;  %v8941_v8 = vmul.f32 %v10581_v23, %v2144_v2  ;;  %v2391_v7 = vand.u32 2147483647, %v2383_v56  ;;  %v2280_v11 = vadd.f32 %v2272_v58, %v2157_v26  ;;  %v2699_v0 = vadd.f32 %v10621_v15, %v2579_v61  ;;  %v10622_v18 = vld [vmem:[#allocation249_spill] sm:$0xff]  ;;  %v10627_v56 = vld [vmem:[#allocation14_spill] sm:$0xff] }
 0x570   : > { %v2258_v20 = vadd.f32 %v10584_v29, %v10622_v18  ;;  %v10623_v47 = vld [vmem:[#allocation265_spill] sm:$0xff]  ;;  %v8948_v22 = vadd.f32 %v2274_v38, %v2159_v49  ;;  %v2509_v52 = vand.u32 2147483647, %v2501_v43  ;;  %v2395_v34 = vmul.f32 %v10624_v35, %v2386_v37  ;;  %v4276_v2 = vpop.permute.xlu1 %4275  ;;  %v10630_v49 = vld [vmem:[#allocation58_spill] sm:$0xff] }
 0x571   : > { %10620 = vst [vmem:[#allocation69_spill] sm:$0xff] %v8941_v8  ;;  %v2379_v6 = vadd.f32 %v10607_v60, %v10623_v47  ;;  %v8952_v42 = vmul.f32 %v10624_v35, %v2389_v5  ;;  %v2273_v23 = vmul.f32 %v10602_v40, %v2264_v63  ;;  %v10625_v26 = vld [vmem:[#allocation333_spill] sm:$0xff]  ;;  %v2621_v29 = vadd.f32 %v10627_v56, %v10626_v59  ;;  %v10632_v37 = vld [vmem:[#allocation318_spill] sm:$0xff]  ;;  %v10633_v5 = vld [vmem:[#allocation20_spill] sm:$0xff] }
 0x572   : > { %v2822_v50 = vadd.f32 %v10625_v26, %v2699_v0  ;;  %v10628_v58 = vld [vmem:[#allocation49_spill] sm:$0xff]  ;;  %v3927_v13 = vadd.f32 %v10630_v49, %v3804_v9  ;;  %v8963_v43 = vmul.f32 %v10624_v35, %v2391_v7  ;;  %v2403_v25 = vadd.f32 %v2395_v34, %v2280_v11  ;;  %v10634_v0 = vld [vmem:[#allocation191_spill] sm:$0xff]  ;;  %v10635_v47 = vld [vmem:[#allocation250_spill] sm:$0xff] }
 0x573   : > { %v4290_v55 = vadd.f32 %v10628_v58, %v4167_v16  ;;  %v10629_v61 = vld [vmem:[#allocation53_spill] sm:$0xff]  ;;  %5380 = vset.pattern.permute.xlu1 %v10521_v24  ;;  %v2502_v53 = vadd.f32 %v10617_v21, %v10631_v28  ;;  %v2744_v63 = vadd.f32 %v10633_v5, %v10632_v37  ;;  %v2266_v15 = vand.u32 2147483647, %v2258_v20  ;;  %v10638_v49 = vld [vmem:[#allocation38_spill] sm:$0xff]  ;;  %v10639_v37 = vld [vmem:[#allocation60_spill] sm:$0xff] }
 0x574   : > { %v4048_v38 = vadd.f32 %v10629_v61, %v3925_v10  ;;  %4320 = vperm.xlu1 %5380, %v5418_v12   ;;  %v2387_v16 = vand.u32 2147483647, %v2379_v6  ;;  %v2518_v10 = vmul.f32 %v10634_v0, %v2509_v52  ;;  %v4050_v18 = vadd.f32 %v4034_v51, %v3927_v13  ;;  %v10636_v7 = vld [vmem:[#allocation301_spill] sm:$0xff]  ;;  %v4157_v58 = vpop.permute.xlu1 %4156 }
 0x575   : > { %v2281_v9 = vadd.f32 %v2273_v23, %v2158_v30  ;;  %v8973_v26 = vadd.f32 %v10617_v21, %v10635_v47  ;;  %v2622_v11 = vadd.f32 %v10627_v56, %v10636_v7  ;;  %v10637_v34 = vld [vmem:[#allocation313_spill] sm:$0xff]  ;;  %v2629_v61 = vand.u32 2147483647, %v2621_v29  ;;  %v10641_v23 = vld [vmem:[#allocation372_spill] sm:$0xff] }
 0x576   : > { %v2945_v59 = vadd.f32 %v10637_v34, %v2822_v50  ;;  %v4413_v28 = vadd.f32 %v10638_v49, %v4290_v55  ;;  %v4171_v20 = vadd.f32 %v10639_v37, %v4048_v38  ;;  %v4173_v6 = vadd.f32 %v4157_v58, %v4050_v18  ;;  %v10640_v51 = vld [vmem:[#allocation321_spill] sm:$0xff]  ;;  %v10643_v55 = vld [vmem:[#allocation263_spill] sm:$0xff]  ;;  %v10644_v18 = vld [vmem:[#allocation300_spill] sm:$0xff] }
 0x577   : > { %v2510_v12 = vand.u32 2147483647, %v2502_v53  ;;  %v2752_v52 = vand.u32 2147483647, %v2744_v63  ;;  %v2745_v30 = vadd.f32 %v10633_v5, %v10640_v51  ;;  %v10642_v47 = vmov 0   ;;  %v10645_v53 = vld [vmem:[#allocation18_spill] sm:$0xff] }
 0x578   : > { %v3068_v13 = vadd.f32 %v10641_v23, %v2945_v59  ;;  %5381 = vset.pattern.permute.xlu1 %v10642_v47  ;;  %v2275_v7 = vmul.f32 %v10602_v40, %v2266_v15  ;;  %v2396_v50 = vmul.f32 %v10624_v35, %v2387_v16  ;;  %v2526_v34 = vadd.f32 %v2518_v10, %v2403_v25  ;;  %v10646_v49 = vld [vmem:[#allocation338_spill] sm:$0xff]  ;;  %v4399_v59 = vpop.permute.xlu1 %4398  ;;  %v10649_v40 = vld [vmem:[#allocation44_spill] sm:$0xff]  ;;  %v10652_v8 = vld [vmem:[#allocation357_spill] sm:$0xff] }
 0x579   : > { %v4294_v29 = vadd.f32 %v4276_v2, %v4171_v20  ;;  %4432 = vperm.xlu1 %5381, %v4413_v28   ;;  %v2377_v38 = vadd.f32 %v10607_v60, %v10643_v55  ;;  %v2867_v63 = vadd.f32 %v10645_v53, %v10644_v18  ;;  %v2630_v58 = vand.u32 2147483647, %v2622_v11  ;;  %v10647_v51 = vld [vmem:[#allocation206_spill] sm:$0xff]  ;;  %v10650_v16 = vld [vmem:[#allocation52_spill] sm:$0xff]  ;;  %v10651_v55 = vld [vmem:[#allocation345_spill] sm:$0xff] }
 0x57a   : > { %v2868_v37 = vadd.f32 %v10645_v53, %v10646_v49  ;;  %v2638_v23 = vmul.f32 %v10647_v51, %v2629_v61  ;;  %v2990_v15 = vadd.f32 %v10649_v40, %v10648_v33  ;;  %v4296_v25 = vadd.f32 %v10650_v16, %v4173_v6 }
 0x57b   : > { %v4417_v2 = vadd.f32 %v4399_v59, %v4294_v29  ;;  %v2519_v10 = vmul.f32 %v10634_v0, %v2510_v12  ;;  %v2761_v28 = vmul.f32 %v10416_v54, %v2752_v52  ;;  %v2753_v20 = vand.u32 2147483647, %v2745_v30  ;;  %v10653_v12 = vld [vmem:[#allocation408_spill] sm:$0xff]  ;;  %v9005_v52 = vpop.permute.xlu0 %4058 }
 0x57c   : > { %v3191_v18 = vadd.f32 %v10651_v55, %v3068_v13  ;;  %v2508_v11 = vand.u32 2147483647, %v8973_v26  ;;  %v2404_v45 = vadd.f32 %v2396_v50, %v2281_v9  ;;  %v2646_v49 = vadd.f32 %v2638_v23, %v2526_v34  ;;  %10654 = vst [vmem:[#allocation77_spill] sm:$0xff] %v9005_v52  ;;  %v9008_v30 = vpop.permute.xlu1 %4400  ;;  %v10655_v9 = vld [vmem:[#allocation252_spill] sm:$0xff]  ;;  %v10656_v13 = vld [vmem:[#allocation377_spill] sm:$0xff]  ;;  %v10658_v34 = vld [vmem:[#allocation75_spill] sm:$0xff] }
 0x57d   : > { %v2991_v61 = vadd.f32 %v10649_v40, %v10652_v8  ;;  %5382 = vset.pattern.permute.xlu1 %v10422_v1  ;;  %4452 = vperm.xlu0 %5385, %v4417_v2   ;;  %v2875_v33 = vand.u32 2147483647, %v2867_v63  ;;  %v2639_v6 = vmul.f32 %v10647_v51, %v2630_v58  ;;  %v2876_v29 = vand.u32 2147483647, %v2868_v37  ;;  %v10657_v1 = vld [vmem:[#allocation67_spill] sm:$0xff]  ;;  %v10659_v55 = vld [vmem:[#allocation332_spill] sm:$0xff] }
 0x57e   : > { %v3314_v59 = vadd.f32 %v10653_v12, %v3191_v18  ;;  %4086 = vperm.xlu1 %5382, %v8913_v3   ;;  %v9012_v26 = vadd.f32 %v10617_v21, %v10655_v9  ;;  %v2998_v8 = vand.u32 2147483647, %v2990_v15  ;;  %v3114_v50 = vadd.f32 %v10657_v1, %v10656_v13  ;;  %v10660_v52 = vld [vmem:[#allocation394_spill] sm:$0xff] }
 0x57f   : > { %v4419_v63 = vadd.f32 %v10658_v34, %v4296_v25  ;;  %v2283_v58 = vadd.f32 %v2275_v7, %v8890_v62  ;;  %v2527_v37 = vadd.f32 %v2519_v10, %v2404_v45  ;;  %v2769_v23 = vadd.f32 %v2761_v28, %v2646_v49  ;;  %v10661_v15 = vld [vmem:[#allocation238_spill] sm:$0xff]  ;;  %v10662_v34 = vld [vmem:[#allocation380_spill] sm:$0xff]  ;;  %v10664_v10 = vld [vmem:[#allocation255_spill] sm:$0xff] }
 0x580   : > { %v2762_v16 = vmul.f32 %v10416_v54, %v2753_v20  ;;  %v2385_v2 = vand.u32 2147483647, %v2377_v38  ;;  %v3113_v18 = vadd.f32 %v10657_v1, %v10659_v55  ;;  %v2999_v12 = vand.u32 2147483647, %v2991_v61  ;;  %v9027_v45 = vpop.permute.xlu1 %3812  ;;  %v10668_v55 = vld [vmem:[#allocation412_spill] sm:$0xff] }
 0x581   : > { %v3236_v9 = vadd.f32 %v10428_v39, %v10660_v52  ;;  %4462 = vperm.xlu0 %5385, %v4419_v63   ;;  %v2884_v48 = vmul.f32 %v10661_v15, %v2875_v33  ;;  %v2647_v13 = vadd.f32 %v2639_v6, %v2527_v37  ;;  %v2885_v25 = vmul.f32 %v10661_v15, %v2876_v29  ;;  %v10665_v33 = vld [vmem:[#allocation396_spill] sm:$0xff]  ;;  %v10666_v29 = vld [vmem:[#allocation35_spill] sm:$0xff]  ;;  %v9038_v52 = vpop.permute.xlu0 %4070 }
 0x582   : > { %v3437_v62 = vadd.f32 %v10662_v34, %v3314_v59  ;;  %5383 = vset.pattern.permute.xlu1 %v10521_v24  ;;  %10663 = vst [vmem:[#allocation71_spill] sm:$0xff] %v9027_v45  ;;  %v9030_v7 = vmul.f32 %v10634_v0, %v2508_v11  ;;  %v3007_v28 = vmul.f32 %v10664_v10, %v2998_v8  ;;  %v3122_v20 = vand.u32 2147483647, %v3114_v50  ;;  %v10669_v34 = vld [vmem:[#allocation104_spill] sm:$0xff]  ;;  %v10679_v45 = vld [vmem:[#allocation286_spill] sm:$0xff] }
 0x583   : > { %4324 = vperm.xlu1 %5383, %v8862_v44   ;;  %v2770_v49 = vadd.f32 %v2762_v16, %v2647_v13  ;;  %v2892_v61 = vadd.f32 %v2884_v48, %v2769_v23  ;;  %v3237_v6 = vadd.f32 %v10428_v39, %v10665_v33  ;;  %10667 = vst [vmem:[#allocation90_spill] sm:$0xff] %v9038_v52  ;;  %v3121_v63 = vand.u32 2147483647, %v3113_v18  ;;  %v10670_v13 = vld [vmem:[#allocation366_spill] sm:$0xff]  ;;  %v10673_v33 = vld [vmem:[#allocation421_spill] sm:$0xff] }
 0x584   : > { %v3560_v59 = vadd.f32 %v10666_v29, %v3437_v62  ;;  %v3008_v11 = vmul.f32 %v10664_v10, %v2999_v12  ;;  %v3244_v37 = vand.u32 2147483647, %v3236_v9  ;;  %v3360_v38 = vadd.f32 %v10669_v34, %v10668_v55  ;;  %v3821_v23 = vpop.permute.xlu1 %3820  ;;  %v10671_v12 = vld [vmem:[#allocation271_spill] sm:$0xff]  ;;  %v10672_v62 = vld [vmem:[#allocation34_spill] sm:$0xff] }
 0x585   : > { %v9044_v8 = vmul.f32 %v10624_v35, %v2385_v2  ;;  %v9047_v44 = vadd.f32 %v8952_v42, %v2283_v58  ;;  %v2893_v48 = vadd.f32 %v2885_v25, %v2770_v49  ;;  %v4414_v50 = vadd.f32 %v8874_v57, %v8722_v31  ;;  %v10674_v2 = vld [vmem:[#allocation267_spill] sm:$0xff]  ;;  %v10675_v25 = vld [vmem:[#allocation32_spill] sm:$0xff] }
 0x586   : > { %v3015_v16 = vadd.f32 %v3007_v28, %v2892_v61  ;;  %v3359_v18 = vadd.f32 %v10669_v34, %v10670_v13  ;;  %v3131_v9 = vmul.f32 %v10671_v12, %v3122_v20  ;;  %v3482_v29 = vadd.f32 %v10673_v33, %v10672_v62  ;;  %v10676_v57 = vld [vmem:[#allocation411_spill] sm:$0xff]  ;;  %v10677_v20 = vld [vmem:[#allocation288_spill] sm:$0xff]  ;;  %v10678_v62 = vld [vmem:[#allocation270_spill] sm:$0xff] }
 0x587   : > { %5384 = vset.pattern.permute.xlu1 %v10642_v47  ;;  %v9059_v42 = vadd.f32 %v10607_v60, %v10674_v2  ;;  %v3245_v58 = vand.u32 2147483647, %v3237_v6  ;;  %v3483_v31 = vadd.f32 %v10673_v33, %v10675_v25  ;;  %v3680_v28 = vadd.f32 %v10676_v57, %v3560_v59  ;;  %v10680_v6 = vld [vmem:[#allocation10_spill] sm:$0xff]  ;;  %v9075_v59 = vpop.permute.xlu0 %4074 }
 0x588   : > { %4437 = vperm.xlu1 %5384, %v4414_v50   ;;  %v3130_v49 = vmul.f32 %v10671_v12, %v3121_v63  ;;  %v3016_v61 = vadd.f32 %v3008_v11, %v2893_v48  ;;  %v3253_v55 = vmul.f32 %v10677_v20, %v3244_v37  ;;  %v3368_v13 = vand.u32 2147483647, %v3360_v38  ;;  %v10681_v60 = vld [vmem:[#allocation422_spill] sm:$0xff]  ;;  %10682 = vst [vmem:[#allocation72_spill] sm:$0xff] %v9075_v59  ;;  %v10685_v12 = vld [vmem:[#allocation424_spill] sm:$0xff] }
 0x589   : > { %v9068_v52 = vadd.f32 %v10627_v56, %v10678_v62  ;;  %v2504_v2 = vadd.f32 %v10617_v21, %v10679_v45  ;;  %v3603_v34 = vadd.f32 %v10681_v60, %v10680_v6  ;;  %v3803_v25 = vadd.f32 %v8617_v27, %v3680_v28  ;;  %v10684_v62 = vld [vmem:[#allocation50_spill] sm:$0xff]  ;;  %v10686_v27 = vld [vmem:[#allocation399_spill] sm:$0xff] }
 0x58a   : > { %v3367_v50 = vand.u32 2147483647, %v3359_v18  ;;  %v3139_v63 = vadd.f32 %v3131_v9, %v3016_v61  ;;  %v3138_v11 = vadd.f32 %v3130_v49, %v3015_v16  ;;  %v3490_v48 = vand.u32 2147483647, %v3482_v29  ;;  %v9077_v37 = vpop.permute.xlu1 %3935  ;;  %v10687_v18 = vld [vmem:[#allocation303_spill] sm:$0xff]  ;;  %v10688_v16 = vld [vmem:[#allocation65_spill] sm:$0xff] }
 0x58b   : > { %10683 = vst [vmem:[#allocation15_spill] sm:$0xff] %v9077_v37  ;;  %v3254_v38 = vmul.f32 %v10677_v20, %v3245_v58  ;;  %v3491_v57 = vand.u32 2147483647, %v3483_v31  ;;  %v3726_v33 = vadd.f32 %v10685_v12, %v10684_v62  ;;  %v3926_v45 = vadd.f32 %v8829_v46, %v3803_v25  ;;  %v10689_v31 = vld [vmem:[#allocation59_spill] sm:$0xff]  ;;  %v10690_v46 = vld [vmem:[#allocation28_spill] sm:$0xff] }
 0x58c   : > { %5386 = vset.pattern.permute.xlu1 %v10521_v24  ;;  %v3261_v6 = vadd.f32 %v3253_v55, %v3138_v11  ;;  %v3602_v28 = vadd.f32 %v10681_v60, %v10686_v27  ;;  %v3377_v9 = vmul.f32 %v10687_v18, %v3368_v13  ;;  %v3725_v29 = vadd.f32 %v10685_v12, %v10688_v16  ;;  %v10691_v11 = vld [vmem:[#allocation320_spill] sm:$0xff]  ;;  %v10692_v27 = vld [vmem:[#allocation57_spill] sm:$0xff] }
 0x58d   : > { %4328 = vperm.xlu1 %5386, %v8835_v32   ;;  %v3611_v58 = vand.u32 2147483647, %v3603_v34  ;;  %v4170_v49 = vadd.f32 %v8847_v19, %v10689_v31  ;;  %v4049_v61 = vadd.f32 %v8893_v4, %v3926_v45  ;;  %v3849_v25 = vadd.f32 %v10690_v46, %v3821_v23  ;;  %v9099_v34 = vpop.permute.xlu0 %4082  ;;  %v10695_v4 = vld [vmem:[#allocation323_spill] sm:$0xff] }
 0x58e   : > { %v2512_v24 = vand.u32 2147483647, %v2504_v2  ;;  %v3376_v55 = vmul.f32 %v10687_v18, %v3367_v50  ;;  %v3499_v62 = vmul.f32 %v10691_v11, %v3490_v48  ;;  %v3848_v13 = vadd.f32 %v10690_v46, %v10692_v27  ;;  %10693 = vst [vmem:[#allocation87_spill] sm:$0xff] %v9099_v34  ;;  %v10696_v27 = vld [vmem:[#allocation335_spill] sm:$0xff] }
 0x58f   : > { %v3262_v37 = vadd.f32 %v3254_v38, %v3139_v63  ;;  %v3500_v16 = vmul.f32 %v10691_v11, %v3491_v57  ;;  %v3734_v32 = vand.u32 2147483647, %v3726_v33  ;;  %v4293_v19 = vadd.f32 %v8916_v41, %v4170_v49  ;;  %v9102_v31 = vpop.permute.xlu1 %3824  ;;  %v10697_v38 = vld [vmem:[#allocation62_spill] sm:$0xff] }
 0x590   : > { %10694 = vst [vmem:[#allocation73_spill] sm:$0xff] %v9102_v31  ;;  %v2747_v23 = vadd.f32 %v10633_v5, %v10695_v4  ;;  %v3610_v2 = vand.u32 2147483647, %v3602_v28  ;;  %v3384_v50 = vadd.f32 %v3376_v55, %v3261_v6  ;;  %v3733_v45 = vand.u32 2147483647, %v3725_v29  ;;  %v10698_v28 = vld [vmem:[#allocation64_spill] sm:$0xff] }
 0x591   : > { %4332 = vperm.xlu1 %5386, %v8913_v3   ;;  %v3385_v48 = vadd.f32 %v3377_v9, %v3262_v37  ;;  %v3620_v63 = vmul.f32 %v10696_v27, %v3611_v58  ;;  %v4172_v57 = vadd.f32 %v10697_v38, %v4049_v61  ;;  %v3857_v33 = vand.u32 2147483647, %v3849_v25  ;;  %v10699_v58 = vld [vmem:[#allocation55_spill] sm:$0xff]  ;;  %v10700_v61 = vld [vmem:[#allocation26_spill] sm:$0xff]  ;;  %v4186_v55 = vpop.permute.xlu0 %4185 }
 0x592   : > { %v2388_v34 = vand.u32 2147483647, %v9059_v42  ;;  %v2521_v41 = vmul.f32 %v10634_v0, %v2512_v24  ;;  %v3507_v49 = vadd.f32 %v3499_v62, %v3384_v50  ;;  %v3856_v31 = vand.u32 2147483647, %v3848_v13  ;;  %v10701_v62 = vld [vmem:[#allocation68_spill] sm:$0xff] }
 0x593   : > { %v2632_v59 = vand.u32 2147483647, %v9068_v52  ;;  %v3508_v4 = vadd.f32 %v3500_v16, %v3385_v48  ;;  %v3743_v6 = vmul.f32 %v10486_v36, %v3734_v32  ;;  %v4416_v29 = vadd.f32 %v10698_v28, %v4293_v19  ;;  %v10702_v19 = vld [vmem:[#allocation302_spill] sm:$0xff]  ;;  %v10704_v28 = vld [vmem:[#allocation33_spill] sm:$0xff] }
 0x594   : > { %v2755_v3 = vand.u32 2147483647, %v2747_v23  ;;  %v3619_v37 = vmul.f32 %v10696_v27, %v3610_v2  ;;  %v3742_v9 = vmul.f32 %v10486_v36, %v3733_v45  ;;  %v3971_v25 = vadd.f32 %v10700_v61, %v10699_v58  ;;  %v3944_v42 = vpop.permute.xlu1 %3943  ;;  %v10703_v45 = vld [vmem:[#allocation359_spill] sm:$0xff] }
 0x595   : > { %5387 = vset.pattern.permute.xlu1 %v10642_v47  ;;  %v3628_v24 = vadd.f32 %v3620_v63, %v3508_v4  ;;  %v4295_v52 = vadd.f32 %v10701_v62, %v4172_v57  ;;  %v3866_v13 = vmul.f32 %v10491_v14, %v3857_v33  ;;  %v3972_v16 = vadd.f32 %v10700_v61, %v3944_v42  ;;  %v10707_v42 = vld [vmem:[#allocation27_spill] sm:$0xff] }
 0x596   : > { %4447 = vperm.xlu1 %5387, %v4416_v29   ;;  %v2529_v32 = vadd.f32 %v2521_v41, %v9047_v44  ;;  %v2870_v23 = vadd.f32 %v10645_v53, %v10702_v19  ;;  %v3627_v2 = vadd.f32 %v3619_v37, %v3507_v49  ;;  %v3865_v50 = vmul.f32 %v10491_v14, %v3856_v31  ;;  %v10705_v31 = vld [vmem:[#allocation364_spill] sm:$0xff] }
 0x597   : > { %v2993_v47 = vadd.f32 %v10649_v40, %v10703_v45  ;;  %v3751_v48 = vadd.f32 %v3743_v6, %v3628_v24  ;;  %v4418_v63 = vadd.f32 %v9008_v30, %v4295_v52  ;;  %v3980_v38 = vand.u32 2147483647, %v3972_v16  ;;  %v10706_v30 = vld [vmem:[#allocation79_spill] sm:$0xff] }
 0x598   : > { %v2402_v57 = vadd.f32 %v9044_v8, %v8933_v17  ;;  %v3750_v33 = vadd.f32 %v3742_v9, %v3627_v2  ;;  %v3979_v4 = vand.u32 2147483647, %v3971_v25  ;;  %v4217_v44 = vadd.f32 %v10704_v28, %v4186_v55  ;;  %v10708_v17 = vld [vmem:[#allocation30_spill] sm:$0xff]  ;;  %v10710_v2 = vld [vmem:[#allocation299_spill] sm:$0xff] }
 0x599   : > { %v2641_v41 = vmul.f32 %v10647_v51, %v2632_v59  ;;  %v2764_v49 = vmul.f32 %v10416_v54, %v2755_v3  ;;  %v3874_v29 = vadd.f32 %v3866_v13, %v3751_v48  ;;  %v3989_v37 = vmul.f32 %v10705_v31, %v3980_v38  ;;  %v10709_v59 = vld [vmem:[#allocation289_spill] sm:$0xff]  ;;  %v10711_v48 = vld [vmem:[#allocation334_spill] sm:$0xff] }
 0x59a   : > { %4457 = vperm.xlu1 %5387, %v4418_v63   ;;  %v4063_v58 = vpop.permute.xlu1 %4062  ;;  %v2397_v6 = vmul.f32 %v10624_v35, %v2388_v34  ;;  %v4340_v24 = vadd.f32 %v10707_v42, %v10706_v30  ;;  %v3873_v62 = vadd.f32 %v3865_v50, %v3750_v33  ;;  %v2878_v9 = vand.u32 2147483647, %v2870_v23  ;;  %v10712_v63 = vld [vmem:[#allocation398_spill] sm:$0xff] }
 0x59b   : > { %v4094_v8 = vadd.f32 %v10708_v17, %v4063_v58  ;;  %v2649_v25 = vadd.f32 %v2641_v41, %v2529_v32  ;;  %v3001_v55 = vand.u32 2147483647, %v2993_v47  ;;  %v9139_v52 = vadd.f32 %v3989_v37, %v3874_v29  ;;  %v10714_v41 = vld [vmem:[#allocation369_spill] sm:$0xff]  ;;  %v10715_v29 = vld [vmem:[#allocation256_spill] sm:$0xff] }
 0x59c   : > { %v2506_v3 = vadd.f32 %v10617_v21, %v10709_v59  ;;  %v3988_v13 = vmul.f32 %v10705_v31, %v3979_v4  ;;  %v4225_v16 = vand.u32 2147483647, %v4217_v44  ;;  %v2620_v34 = vadd.f32 %v10627_v56, %v10710_v2 }
 0x59d   : > { %v4102_v19 = vand.u32 2147483647, %v4094_v8  ;;  %v2772_v45 = vadd.f32 %v2764_v49, %v2649_v25  ;;  %v3116_v50 = vadd.f32 %v10657_v1, %v10711_v48  ;;  %v3239_v32 = vadd.f32 %v10428_v39, %v10712_v63  ;;  %v10717_v48 = vld [vmem:[#allocation273_spill] sm:$0xff] }
 0x59e   : > { %v10713_v23 = vand.u32 2147483647, %v9012_v26  ;;  %v4348_v38 = vand.u32 2147483647, %v4340_v24  ;;  %v3996_v33 = vadd.f32 %v3988_v13, %v3873_v62  ;;  %v2408_v37 = vadd.f32 %v8963_v43, %v10715_v29  ;;  %v10716_v26 = vld [vmem:[#allocation376_spill] sm:$0xff]  ;;  %v10718_v43 = vld [vmem:[#allocation283_spill] sm:$0xff] }
 0x59f   : > { %v4111_v4 = vmul.f32 %v10714_v41, %v4102_v19  ;;  %v3829_v44 = vpop.permute.xlu1 %3828  ;;  %v2525_v49 = vadd.f32 %v9030_v7, %v2402_v57  ;;  %v2887_v58 = vmul.f32 %v10661_v15, %v2878_v9  ;;  %v3010_v30 = vmul.f32 %v10664_v10, %v3001_v55  ;;  %v10719_v57 = vld [vmem:[#allocation383_spill] sm:$0xff]  ;;  %v10720_v55 = vld [vmem:[#allocation285_spill] sm:$0xff]  ;;  %v10725_v29 = vld [vmem:[#allocation336_spill] sm:$0xff] }
 0x5a0   : > { %v2520_v47 = vmul.f32 %v10634_v0, %v10713_v23  ;;  %v2405_v8 = vadd.f32 %v2397_v6, %v8948_v22  ;;  %v2514_v25 = vand.u32 2147483647, %v2506_v3  ;;  %v4234_v59 = vmul.f32 %v10716_v26, %v4225_v16  ;;  %v10721_v3 = vld [vmem:[#allocation368_spill] sm:$0xff] }
 0x5a1   : > { %v4119_v2 = vadd.f32 %v4111_v4, %v3996_v33  ;;  %v2628_v24 = vand.u32 2147483647, %v2620_v34  ;;  %v3124_v62 = vand.u32 2147483647, %v3116_v50  ;;  %v2895_v13 = vadd.f32 %v2887_v58, %v2772_v45  ;;  %v10722_v16 = vld [vmem:[#allocation104_spill] sm:$0xff]  ;;  %v10723_v34 = vld [vmem:[#allocation22_spill] sm:$0xff] }
 0x5a2   : > { %v3247_v19 = vand.u32 2147483647, %v3239_v32  ;;  %v2626_v63 = vadd.f32 %v10627_v56, %v10717_v48  ;;  %v2743_v7 = vadd.f32 %v10633_v5, %v10718_v43  ;;  %v4357_v9 = vmul.f32 %v10719_v57, %v4348_v38  ;;  %v10724_v50 = vld [vmem:[#allocation421_spill] sm:$0xff] }
 0x5a3   : > { %v4242_v23 = vadd.f32 %v4234_v59, %v4119_v2  ;;  %v2746_v22 = vadd.f32 %v10633_v5, %v10720_v55  ;;  %v3018_v6 = vadd.f32 %v3010_v30, %v2895_v13  ;;  %v3362_v33 = vadd.f32 %v10722_v16, %v10721_v3  ;;  %v10727_v30 = vld [vmem:[#allocation271_spill] sm:$0xff] }
 0x5a4   : > { %v3485_v45 = vadd.f32 %v10724_v50, %v10723_v34  ;;  %v4067_v32 = vpop.permute.xlu1 %4066  ;;  %v2523_v4 = vmul.f32 %v10634_v0, %v2514_v25  ;;  %v2866_v58 = vadd.f32 %v10645_v53, %v10725_v29  ;;  %v2637_v59 = vmul.f32 %v10647_v51, %v2628_v24  ;;  %v10728_v34 = vld [vmem:[#allocation304_spill] sm:$0xff]  ;;  %v10729_v0 = vld [vmem:[#allocation305_spill] sm:$0xff] }
 0x5a5   : > { %v4095_v48 = vadd.f32 %v10708_v17, %v4067_v32  ;;  %v9176_v38 = vadd.f32 %v4357_v9, %v4242_v23  ;;  %v2528_v2 = vadd.f32 %v2520_v47, %v2405_v8  ;;  %v3133_v13 = vmul.f32 %v10727_v30, %v3124_v62 }
 0x5a6   : > { %v3256_v43 = vmul.f32 %v10677_v20, %v3247_v19  ;;  %v2634_v55 = vand.u32 2147483647, %v2626_v63  ;;  %v2751_v3 = vand.u32 2147483647, %v2743_v7  ;;  %v2623_v57 = vadd.f32 %v10627_v56, %v10728_v34  ;;  %v10730_v63 = vld [vmem:[#allocation401_spill] sm:$0xff]  ;;  %v10731_v34 = vld [vmem:[#allocation54_spill] sm:$0xff] }
 0x5a7   : > { %10726 = vst [vmem:[#allocation97_spill] sm:$0xff] %v9176_v38  ;;  %v4103_v25 = vand.u32 2147483647, %v4095_v48  ;;  %v2872_v29 = vadd.f32 %v10645_v53, %v10729_v0  ;;  %v3370_v35 = vand.u32 2147483647, %v3362_v33  ;;  %v3141_v32 = vadd.f32 %v3133_v13, %v3018_v6  ;;  %v10732_v0 = vld [vmem:[#allocation315_spill] sm:$0xff] }
 0x5a8   : > { %v3493_v9 = vand.u32 2147483647, %v3485_v45  ;;  %v2754_v23 = vand.u32 2147483647, %v2746_v22  ;;  %v2531_v38 = vadd.f32 %v2523_v4, %v2408_v37  ;;  %v2874_v24 = vand.u32 2147483647, %v2866_v58 }
 0x5a9   : > { %v4112_v47 = vmul.f32 %v10714_v41, %v4103_v25  ;;  %v9186_v8 = vpop.permute.xlu1 %4181  ;;  %v2645_v62 = vadd.f32 %v2637_v59, %v2525_v49  ;;  %v3264_v19 = vadd.f32 %v3256_v43, %v3141_v32  ;;  %v3605_v7 = vadd.f32 %v10681_v60, %v10730_v63  ;;  %v10733_v33 = vld [vmem:[#allocation374_spill] sm:$0xff]  ;;  %v10735_v25 = vld [vmem:[#allocation325_spill] sm:$0xff] }
 0x5aa   : > { %v3728_v48 = vadd.f32 %v10685_v12, %v10731_v34  ;;  %v2631_v56 = vand.u32 2147483647, %v2623_v57  ;;  %v2989_v6 = vadd.f32 %v10649_v40, %v10732_v0  ;;  %v3112_v37 = vadd.f32 %v10657_v1, %v10733_v33  ;;  %v10737_v33 = vld [vmem:[#allocation340_spill] sm:$0xff] }
 0x5ab   : > { %v9197_v22 = vadd.f32 %v4112_v47, %v9139_v52  ;;  %v2880_v45 = vand.u32 2147483647, %v2872_v29  ;;  %v3379_v49 = vmul.f32 %v10687_v18, %v3370_v35  ;;  %v3502_v4 = vmul.f32 %v10691_v11, %v3493_v9 }
 0x5ac   : > { %v3851_v58 = vadd.f32 %v10690_v46, %v3829_v44  ;;  %v2643_v59 = vmul.f32 %v10647_v51, %v2634_v55  ;;  %v2760_v57 = vmul.f32 %v10416_v54, %v2751_v3  ;;  %v2763_v13 = vmul.f32 %v10416_v54, %v2754_v23 }
 0x5ad   : > { %10734 = vst [vmem:[#allocation107_spill] sm:$0xff] %v9197_v22  ;;  %v2883_v43 = vmul.f32 %v10661_v15, %v2874_v24  ;;  %v2749_v32 = vadd.f32 %v10633_v5, %v10735_v25  ;;  %v3613_v52 = vand.u32 2147483647, %v3605_v7  ;;  %v3387_v47 = vadd.f32 %v3379_v49, %v3264_v19  ;;  %v10738_v7 = vld [vmem:[#allocation347_spill] sm:$0xff] }
 0x5ae   : > { %v3736_v29 = vand.u32 2147483647, %v3728_v48  ;;  %v9208_v63 = vpop.permute.xlu1 %3832  ;;  %v2640_v35 = vmul.f32 %v10647_v51, %v2631_v56  ;;  %v2997_v9 = vand.u32 2147483647, %v2989_v6  ;;  %v2768_v44 = vadd.f32 %v2760_v57, %v2645_v62  ;;  %v10739_v48 = vld [vmem:[#allocation410_spill] sm:$0xff]  ;;  %v4198_v56 = vpop.permute.xlu0 %4197 }
 0x5af   : > { %10736 = vst [vmem:[#allocation84_spill] sm:$0xff] %v9208_v63  ;;  %v3120_v34 = vand.u32 2147483647, %v3112_v37  ;;  %v9212_v55 = vmul.f32 %v10661_v15, %v2880_v45  ;;  %v2651_v3 = vadd.f32 %v2643_v59, %v2531_v38  ;;  %v3510_v23 = vadd.f32 %v3502_v4, %v3387_v47  ;;  %v10740_v45 = vld [vmem:[#allocation72_spill] sm:$0xff]  ;;  %v10741_v59 = vld [vmem:[#allocation317_spill] sm:$0xff] }
 0x5b0   : > { %v3859_v0 = vand.u32 2147483647, %v3851_v58  ;;  %v2891_v24 = vadd.f32 %v2883_v43, %v2768_v44  ;;  %v2869_v25 = vadd.f32 %v10645_v53, %v10737_v33  ;;  %v3235_v19 = vadd.f32 %v10428_v39, %v10738_v7 }
 0x5b1   : > { %v3358_v49 = vadd.f32 %v10722_v16, %v10739_v48  ;;  %v2757_v6 = vand.u32 2147483647, %v2749_v32  ;;  %v3622_v62 = vmul.f32 %v10696_v27, %v3613_v52  ;;  %v3745_v37 = vmul.f32 %v10486_v36, %v3736_v29 }
 0x5b2   : > { %v4097_v38 = vadd.f32 %v10708_v17, %v10740_v45  ;;  %v2648_v4 = vadd.f32 %v2640_v35, %v2528_v2  ;;  %v3006_v58 = vmul.f32 %v10664_v10, %v2997_v9  ;;  %v2992_v57 = vadd.f32 %v10649_v40, %v10741_v59  ;;  %v10742_v59 = vld [vmem:[#allocation362_spill] sm:$0xff] }
 0x5b3   : > { %v3129_v43 = vmul.f32 %v10727_v30, %v3120_v34  ;;  %v3952_v47 = vpop.permute.xlu1 %3951  ;;  %v3630_v44 = vadd.f32 %v3622_v62, %v3510_v23  ;;  %v4220_v33 = vadd.f32 %v10704_v28, %v4198_v56  ;;  %v3868_v32 = vmul.f32 %v10491_v14, %v3859_v0  ;;  %v10743_v23 = vld [vmem:[#allocation382_spill] sm:$0xff]  ;;  %v10744_v62 = vld [vmem:[#allocation36_spill] sm:$0xff] }
 0x5b4   : > { %v3974_v52 = vadd.f32 %v10700_v61, %v3952_v47  ;;  %v2877_v29 = vand.u32 2147483647, %v2869_v25  ;;  %v3243_v7 = vand.u32 2147483647, %v3235_v19  ;;  %v3014_v48 = vadd.f32 %v3006_v58, %v2891_v24  ;;  %v10745_v47 = vld [vmem:[#allocation337_spill] sm:$0xff] }
 0x5b5   : > { %v3366_v45 = vand.u32 2147483647, %v3358_v49  ;;  %v2766_v2 = vmul.f32 %v10416_v54, %v2757_v6  ;;  %v3753_v35 = vadd.f32 %v3745_v37, %v3630_v44  ;;  %v4105_v9 = vand.u32 2147483647, %v4097_v38 }
 0x5b6   : > { %v3982_v22 = vand.u32 2147483647, %v3974_v52  ;;  %v2995_v34 = vadd.f32 %v10649_v40, %v10742_v59  ;;  %v3137_v63 = vadd.f32 %v3129_v43, %v3014_v48  ;;  %v3481_v56 = vadd.f32 %v10724_v50, %v10743_v23  ;;  %v10747_v52 = vld [vmem:[#allocation379_spill] sm:$0xff] }
 0x5b7   : > { %v3601_v0 = vadd.f32 %v10681_v60, %v10744_v62  ;;  %v3118_v25 = vadd.f32 %v10657_v1, %v10745_v47  ;;  %v4228_v24 = vand.u32 2147483647, %v4220_v33  ;;  %v3876_v19 = vadd.f32 %v3868_v32, %v3753_v35 }
 0x5b8   : > { %v3991_v49 = vmul.f32 %v10705_v31, %v3982_v22  ;;  %v9241_v6 = vpop.permute.xlu1 %4189  ;;  %v2771_v37 = vadd.f32 %v2763_v13, %v2648_v4  ;;  %v2886_v38 = vmul.f32 %v10661_v15, %v2877_v29  ;;  %v3252_v58 = vmul.f32 %v10677_v20, %v3243_v7 }
 0x5b9   : > { %10746 = vst [vmem:[#allocation86_spill] sm:$0xff] %v9241_v6  ;;  %v3375_v43 = vmul.f32 %v10687_v18, %v3366_v45  ;;  %v3000_v44 = vand.u32 2147483647, %v2992_v57  ;;  %v3115_v48 = vadd.f32 %v10657_v1, %v10747_v52  ;;  %v4114_v59 = vmul.f32 %v10714_v41, %v4105_v9  ;;  %v10748_v6 = vld [vmem:[#allocation413_spill] sm:$0xff]  ;;  %v10749_v45 = vld [vmem:[#allocation71_spill] sm:$0xff] }
 0x5ba   : > { %v3999_v23 = vadd.f32 %v3991_v49, %v3876_v19  ;;  %v3003_v33 = vand.u32 2147483647, %v2995_v34  ;;  %v3489_v32 = vand.u32 2147483647, %v3481_v56  ;;  %v3260_v35 = vadd.f32 %v3252_v58, %v3137_v63  ;;  %v10750_v9 = vld [vmem:[#allocation349_spill] sm:$0xff]  ;;  %v10751_v63 = vld [vmem:[#allocation400_spill] sm:$0xff] }
 0x5bb   : > { %v3609_v22 = vand.u32 2147483647, %v3601_v0  ;;  %v2774_v62 = vadd.f32 %v2766_v2, %v2651_v3  ;;  %v3126_v47 = vand.u32 2147483647, %v3118_v25  ;;  %v4237_v13 = vmul.f32 %v10716_v26, %v4228_v24  ;;  %v10753_v19 = vld [vmem:[#allocation15_spill] sm:$0xff]  ;;  %v10756_v58 = vld [vmem:[#allocation269_spill] sm:$0xff] }
 0x5bc   : > { %v4122_v4 = vadd.f32 %v4114_v59, %v3999_v23  ;;  %v2894_v29 = vadd.f32 %v2886_v38, %v2771_v37  ;;  %v3383_v7 = vadd.f32 %v3375_v43, %v3260_v35  ;;  %v3724_v57 = vadd.f32 %v10685_v12, %v10748_v6  ;;  %v10754_v6 = vld [vmem:[#allocation66_spill] sm:$0xff]  ;;  %v10755_v37 = vld [vmem:[#allocation69_spill] sm:$0xff] }
 0x5bd   : > { %v3847_v52 = vadd.f32 %v10690_v46, %v10749_v45  ;;  %v4305_v15 = vpop.permute.xlu1 %4304  ;;  %v3238_v34 = vadd.f32 %v10428_v39, %v10750_v9  ;;  %v3123_v56 = vand.u32 2147483647, %v3115_v48  ;;  %v3241_v3 = vadd.f32 %v10428_v39, %v10751_v63  ;;  %v10757_v43 = vld [vmem:[#allocation17_spill] sm:$0xff]  ;;  %v10758_v23 = vld [vmem:[#allocation414_spill] sm:$0xff] }
 0x5be   : > { %v9258_v2 = vadd.f32 %v4237_v13, %v4122_v4  ;;  %v3012_v0 = vmul.f32 %v10664_v10, %v3003_v33  ;;  %v3498_v25 = vmul.f32 %v10691_v11, %v3489_v32  ;;  %v3618_v24 = vmul.f32 %v10696_v27, %v3609_v22 }
 0x5bf   : > { %v3970_v49 = vadd.f32 %v10700_v61, %v10753_v19  ;;  %v9267_v38 = vadd.f32 %v10755_v37, %v10754_v6  ;;  %v9271_v48 = vadd.f32 %v10757_v43, %v10756_v58  ;;  %v3009_v59 = vmul.f32 %v10664_v10, %v3000_v44  ;;  %v10759_v44 = vld [vmem:[#allocation371_spill] sm:$0xff] }
 0x5c0   : > { %10752 = vst [vmem:[#allocation88_spill] sm:$0xff] %v9258_v2  ;;  %v3361_v33 = vadd.f32 %v10722_v16, %v10758_v23  ;;  %v2897_v32 = vadd.f32 %v9212_v55, %v2774_v62  ;;  %v3732_v35 = vand.u32 2147483647, %v3724_v57  ;;  %v3506_v22 = vadd.f32 %v3498_v25, %v3383_v7  ;;  %v10760_v23 = vld [vmem:[#allocation385_spill] sm:$0xff]  ;;  %v10761_v7 = vld [vmem:[#allocation47_spill] sm:$0xff] }
 0x5c1   : > { %v3855_v13 = vand.u32 2147483647, %v3847_v52  ;;  %v3135_v4 = vmul.f32 %v10727_v30, %v3126_v47  ;;  %v3246_v45 = vand.u32 2147483647, %v3238_v34  ;;  %v3132_v9 = vmul.f32 %v10727_v30, %v3123_v56  ;;  %v10762_v52 = vld [vmem:[#allocation77_spill] sm:$0xff] }
 0x5c2   : > { %v3249_v63 = vand.u32 2147483647, %v3241_v3  ;;  %v3837_v19 = vpop.permute.xlu1 %3836  ;;  %v3020_v6 = vadd.f32 %v3012_v0, %v2897_v32  ;;  %v3017_v37 = vadd.f32 %v3009_v59, %v2894_v29  ;;  %v3626_v58 = vadd.f32 %v3618_v24, %v3506_v22  ;;  %v10763_v24 = vld [vmem:[#allocation39_spill] sm:$0xff] }
 0x5c3   : > { %v3978_v43 = vand.u32 2147483647, %v3970_v49  ;;  %v3364_v2 = vadd.f32 %v10722_v16, %v10759_v44  ;;  %v3484_v55 = vadd.f32 %v10724_v50, %v10760_v23  ;;  %v3369_v62 = vand.u32 2147483647, %v3361_v33 }
 0x5c4   : > { %v3487_v57 = vadd.f32 %v10724_v50, %v10761_v7  ;;  %v3741_v47 = vmul.f32 %v10486_v36, %v3732_v35  ;;  %v4093_v34 = vadd.f32 %v10708_v17, %v10762_v52  ;;  %v3864_v56 = vmul.f32 %v10491_v14, %v3855_v13 }
 0x5c5   : > { %v4216_v29 = vadd.f32 %v10704_v28, %v9186_v8  ;;  %v3255_v3 = vmul.f32 %v10677_v20, %v3246_v45  ;;  %v3140_v0 = vadd.f32 %v3132_v9, %v3017_v37  ;;  %v3258_v25 = vmul.f32 %v10677_v20, %v3249_v63  ;;  %v10764_v45 = vld [vmem:[#allocation403_spill] sm:$0xff] }
 0x5c6   : > { %v3604_v49 = vadd.f32 %v10681_v60, %v10763_v24  ;;  %v3143_v59 = vadd.f32 %v3135_v4, %v3020_v6  ;;  %v3749_v33 = vadd.f32 %v3741_v47, %v3626_v58  ;;  %v3987_v32 = vmul.f32 %v10705_v31, %v3978_v43  ;;  %v10765_v58 = vld [vmem:[#allocation80_spill] sm:$0xff]  ;;  %v10766_v47 = vld [vmem:[#allocation254_spill] sm:$0xff] }
 0x5c7   : > { %v4339_v35 = vadd.f32 %v10707_v42, %v4305_v15  ;;  %v9297_v22 = vpop.permute.xlu1 %3955  ;;  %v3372_v13 = vand.u32 2147483647, %v3364_v2  ;;  %v3492_v44 = vand.u32 2147483647, %v3484_v55  ;;  %v3378_v8 = vmul.f32 %v10687_v18, %v3369_v62  ;;  %v4206_v15 = vpop.permute.xlu0 %4205 }
 0x5c8   : > { %v3495_v23 = vand.u32 2147483647, %v3487_v57  ;;  %v3607_v9 = vadd.f32 %v10681_v60, %v10764_v45  ;;  %v4101_v63 = vand.u32 2147483647, %v4093_v34  ;;  %v3872_v37 = vadd.f32 %v3864_v56, %v3749_v33  ;;  %v10767_v56 = vld [vmem:[#allocation415_spill] sm:$0xff] }
 0x5c9   : > { %v4224_v7 = vand.u32 2147483647, %v4216_v29  ;;  %v3266_v52 = vadd.f32 %v3258_v25, %v3143_v59  ;;  %v3263_v4 = vadd.f32 %v3255_v3, %v3140_v0  ;;  %v3612_v6 = vand.u32 2147483647, %v3604_v49 }
 0x5ca   : > { %v3730_v43 = vadd.f32 %v10685_v12, %v10765_v58  ;;  %v9306_v2 = vadd.f32 %v10617_v21, %v10766_v47  ;;  %v2390_v55 = vand.u32 2147483647, %v9271_v48  ;;  %v3995_v62 = vadd.f32 %v3987_v32, %v3872_v37 }
 0x5cb   : > { %v4347_v57 = vand.u32 2147483647, %v4339_v35  ;;  %v3381_v24 = vmul.f32 %v10687_v18, %v3372_v13  ;;  %v3386_v34 = vadd.f32 %v3378_v8, %v3263_v4  ;;  %v3727_v29 = vadd.f32 %v10685_v12, %v10767_v56  ;;  %v10768_v35 = vld [vmem:[#allocation73_spill] sm:$0xff]  ;;  %v10769_v8 = vld [vmem:[#allocation174_spill] sm:$0xff]  ;;  %v10770_v4 = vld [vmem:[#allocation383_spill] sm:$0xff] }
 0x5cc   : > { %v3504_v3 = vmul.f32 %v10691_v11, %v3495_v23  ;;  %v4194_v0 = vpop.permute.xlu1 %4193  ;;  %v3501_v25 = vmul.f32 %v10691_v11, %v3492_v44  ;;  %v3615_v49 = vand.u32 2147483647, %v3607_v9  ;;  %v4110_v59 = vmul.f32 %v10714_v41, %v4101_v63  ;;  %v9322_v63 = vpop.permute.xlu0 %4209 }
 0x5cd   : > { %v4233_v21 = vmul.f32 %v10716_v26, %v4224_v7  ;;  %v3389_v33 = vadd.f32 %v3381_v24, %v3266_v52  ;;  %v3621_v48 = vmul.f32 %v10696_v27, %v3612_v6  ;;  %v3738_v32 = vand.u32 2147483647, %v3730_v43  ;;  %v10771_v7 = vld [vmem:[#allocation82_spill] sm:$0xff] }
 0x5ce   : > { %v3850_v13 = vadd.f32 %v10690_v46, %v10768_v35  ;;  %v2399_v45 = vmul.f32 %v10769_v8, %v2390_v55  ;;  %v4118_v37 = vadd.f32 %v4110_v59, %v3995_v62  ;;  %v4356_v23 = vmul.f32 %v10770_v4, %v4347_v57  ;;  %v10772_v6 = vld [vmem:[#allocation306_spill] sm:$0xff]  ;;  %v10774_v55 = vld [vmem:[#allocation13_spill] sm:$0xff]  ;;  %v10775_v62 = vld [vmem:[#allocation43_spill] sm:$0xff] }
 0x5cf   : > { %v3853_v58 = vadd.f32 %v10690_v46, %v3837_v19  ;;  %v3735_v44 = vand.u32 2147483647, %v3727_v29  ;;  %v3512_v9 = vadd.f32 %v3504_v3, %v3389_v33  ;;  %v3509_v47 = vadd.f32 %v3501_v25, %v3386_v34  ;;  %v10773_v43 = vld [vmem:[#allocation14_spill] sm:$0xff] }
 0x5d0   : > { %v2284_v52 = vadd.f32 %v10771_v7, %v9267_v38  ;;  %v2625_v24 = vadd.f32 %v10773_v43, %v10772_v6  ;;  %v4241_v56 = vadd.f32 %v4233_v21, %v4118_v37  ;;  %v9332_v59 = vrot.slane %v10775_v62, %v10774_v55  ;;  %v10776_v37 = vld [vmem:[#allocation56_spill] sm:$0xff]  ;;  %v10777_v6 = vld [vmem:[#allocation87_spill] sm:$0xff] }
 0x5d1   : > { %v9328_v35 = vpop.permute.xlu1 %4312  ;;  %v3624_v19 = vmul.f32 %v10696_v27, %v3615_v49  ;;  %v3629_v57 = vadd.f32 %v3621_v48, %v3509_v47  ;;  %v3747_v34 = vmul.f32 %v10486_v36, %v3738_v32  ;;  %v3858_v29 = vand.u32 2147483647, %v3850_v13  ;;  %v10778_v55 = vld [vmem:[#allocation287_spill] sm:$0xff]  ;;  %v10779_v13 = vld [vmem:[#allocation342_spill] sm:$0xff] }
 0x5d2   : > { %v2513_v3 = vand.u32 2147483647, %v9306_v2  ;;  %v2407_v38 = vadd.f32 %v2399_v45, %v2284_v52  ;;  %v4364_v25 = vadd.f32 %v4356_v23, %v4241_v56  ;;  %v3861_v33 = vand.u32 2147483647, %v3853_v58  ;;  %v4539_v45 = vld [vmem:[%s5688_s13] sm:$0xff] }
 0x5d3   : > { %v3744_v21 = vmul.f32 %v10486_v36, %v3735_v44  ;;  %v3632_v8 = vadd.f32 %v3624_v19, %v3512_v9  ;;  %v3973_v7 = vadd.f32 %v10700_v61, %v10776_v37  ;;  %v4099_v43 = vadd.f32 %v10708_v17, %v10777_v6  ;;  %v4428_v49 = vpop.permute.xlu0 %4427  ;;  %v10780_v37 = vld [vmem:[#allocation90_spill] sm:$0xff] }
 0x5d4   : > { %v2748_v48 = vadd.f32 %v10633_v5, %v10778_v55  ;;  %v2633_v32 = vand.u32 2147483647, %v2625_v24  ;;  %v2871_v2 = vadd.f32 %v10645_v53, %v10779_v13  ;;  %v4469_v23 = vadd.f32 %v9332_v59, %v4428_v49 }
 0x5d5   : > { %v3755_v58 = vadd.f32 %v3747_v34, %v3632_v8  ;;  %v4222_v44 = vadd.f32 %v10704_v28, %v4206_v15  ;;  %v3752_v9 = vadd.f32 %v3744_v21, %v3629_v57  ;;  %v3867_v47 = vmul.f32 %v10491_v14, %v3858_v29  ;;  %v10781_v29 = vld [vmem:[#allocation191_spill] sm:$0xff] }
 0x5d6   : > { %v3960_v52 = vpop.permute.xlu1 %3959  ;;  %v3870_v56 = vmul.f32 %v10491_v14, %v3861_v33  ;;  %v4485_v62 = vmul.f32 0.4, %v4364_v25  ;;  %v4477_v19 = vmul.f32 0.6, %v4469_v23  ;;  %v3981_v24 = vand.u32 2147483647, %v3973_v7 }
 0x5d7   : > { %v3976_v5 = vadd.f32 %v10700_v61, %v3960_v52  ;;  %v4096_v53 = vadd.f32 %v10708_v17, %v10780_v37  ;;  %v4107_v6 = vand.u32 2147483647, %v4099_v43  ;;  %vm4547_vm2 = vcmp.eq.f32.partialorder %v4539_v45, 0.0 }
 0x5d8   : > { %v4219_v34 = vadd.f32 %v10704_v28, %v4194_v0  ;;  %v9355_v15 = vadd.f32 %v4485_v62, %v4477_v19  ;;  %v2522_v21 = vmul.f32 %v10781_v29, %v2513_v3  ;;  %v2642_v25 = vmul.f32 %v10647_v51, %v2633_v32  ;;  %v10784_v19 = vld [vmem:[#allocation238_spill] sm:$0xff]  ;;  %v4443_v29 = vpop.permute.xlu0 %4442 }
 0x5d9   : > { %v3984_v57 = vand.u32 2147483647, %v3976_v5  ;;  %v4230_v33 = vand.u32 2147483647, %v4222_v44  ;;  %v3875_v8 = vadd.f32 %v3867_v47, %v3752_v9  ;;  %v3878_v49 = vadd.f32 %v3870_v56, %v3755_v58  ;;  %v10782_v9 = vld [vmem:[#allocation319_spill] sm:$0xff] }
 0x5da   : > { %v4555_v7 = vsel %vm4547_vm2, -inf, %v9355_v15  ;;  %v2756_v13 = vand.u32 2147483647, %v2748_v48  ;;  %v2530_v0 = vadd.f32 %v2522_v21, %v2407_v38  ;;  %v2879_v45 = vand.u32 2147483647, %v2871_v2  ;;  %v10783_v48 = vld [vmem:[#allocation381_spill] sm:$0xff] }
 0x5db   : > { %v3993_v55 = vmul.f32 %v10705_v31, %v3984_v57  ;;  %v9361_v43 = vpop.permute.xlu1 %4078  ;;  %v3990_v23 = vmul.f32 %v10705_v31, %v3981_v24  ;;  %4564 = vst.msk [vmem:[%s9366_s28] sm:$0xff] %vm4510_vm3, %v4555_v7  ;;  %v4104_v51 = vand.u32 2147483647, %v4096_v53  ;;  %v4116_v3 = vmul.f32 %v10714_v41, %v4107_v6 }
 0x5dc   : > { %v4227_v32 = vand.u32 2147483647, %v4219_v34  ;;  %v2650_v44 = vadd.f32 %v2642_v25, %v2530_v0  ;;  %v2994_v47 = vadd.f32 %v10649_v40, %v10782_v9  ;;  %v3117_v38 = vadd.f32 %v10657_v1, %v10783_v48  ;;  %v10787_v48 = vld [vmem:[#allocation387_spill] sm:$0xff] }
 0x5dd   : > { %v4001_v58 = vadd.f32 %v3993_v55, %v3878_v49  ;;  %v4239_v2 = vmul.f32 %v10716_v26, %v4230_v33  ;;  %v3998_v52 = vadd.f32 %v3990_v23, %v3875_v8  ;;  %v2765_v62 = vmul.f32 %v10416_v54, %v2756_v13  ;;  %v10785_v54 = vld [vmem:[#allocation351_spill] sm:$0xff]  ;;  %v10786_v49 = vld [vmem:[#allocation416_spill] sm:$0xff] }
 0x5de   : > { %v2888_v5 = vmul.f32 %v10784_v19, %v2879_v45  ;;  %v4113_v37 = vmul.f32 %v10714_v41, %v4104_v51  ;;  %v4236_v53 = vmul.f32 %v10716_v26, %v4227_v32  ;;  %v3002_v40 = vand.u32 2147483647, %v2994_v47 }
 0x5df   : > { %v4124_v56 = vadd.f32 %v4116_v3, %v4001_v58  ;;  %v2773_v1 = vadd.f32 %v2765_v62, %v2650_v44  ;;  %v3125_v57 = vand.u32 2147483647, %v3117_v38  ;;  %v3240_v8 = vadd.f32 %v10428_v39, %v10785_v54  ;;  %v4542_v3 = vld [vmem:[%s5688_s13 + $0x18] sm:$0xff] }
 0x5e0   : > { %v4317_v24 = vpop.permute.xlu1 %4316  ;;  %v4121_v21 = vadd.f32 %v4113_v37, %v3998_v52  ;;  %v3363_v7 = vadd.f32 %v10722_v16, %v10786_v49  ;;  %v4472_v13 = vadd.f32 %v9332_v59, %v4443_v29  ;;  %v3011_v23 = vmul.f32 %v10664_v10, %v3002_v40  ;;  %v10790_v40 = vld [vmem:[#allocation84_spill] sm:$0xff] }
 0x5e1   : > { %v4342_v6 = vadd.f32 %v10707_v42, %v4317_v24  ;;  %v9381_v34 = vadd.f32 %v4239_v2, %v4124_v56  ;;  %v2896_v33 = vadd.f32 %v2888_v5, %v2773_v1  ;;  %v3134_v51 = vmul.f32 %v10727_v30, %v3125_v57  ;;  %v10788_v2 = vld [vmem:[#allocation40_spill] sm:$0xff] }
 0x5e2   : > { %v4244_v55 = vadd.f32 %v4236_v53, %v4121_v21  ;;  %v3248_v58 = vand.u32 2147483647, %v3240_v8  ;;  %v3371_v39 = vand.u32 2147483647, %v3363_v7  ;;  %v4480_v9 = vmul.f32 0.6, %v4472_v13 }
 0x5e3   : > { %v4350_v25 = vand.u32 2147483647, %v4342_v6  ;;  %v3019_v44 = vadd.f32 %v3011_v23, %v2896_v33  ;;  %v3486_v38 = vadd.f32 %v10724_v50, %v10787_v48  ;;  %v3606_v52 = vadd.f32 %v10681_v60, %v10788_v2  ;;  %v10789_v6 = vld [vmem:[#allocation417_spill] sm:$0xff] }
 0x5e4   : > { %vm4550_vm4 = vcmp.eq.f32.partialorder %v4542_v3, 0.0  ;;  %v3257_v30 = vmul.f32 %v10677_v20, %v3248_v58  ;;  %v3380_v62 = vmul.f32 %v10687_v18, %v3371_v39  ;;  %v3729_v60 = vadd.f32 %v10685_v12, %v10789_v6  ;;  %v4540_v49 = vld [vmem:[%s5688_s13 + $0x8] sm:$0xff] }
 0x5e5   : > { %v4359_v0 = vmul.f32 %v10770_v4, %v4350_v25  ;;  %v9389_v45 = vpop.permute.xlu1 %3963  ;;  %v3142_v16 = vadd.f32 %v3134_v51, %v3019_v44  ;;  %v3494_v5 = vand.u32 2147483647, %v3486_v38  ;;  %v3614_v37 = vand.u32 2147483647, %v3606_v52  ;;  %v10791_v25 = vld [vmem:[#allocation86_spill] sm:$0xff] }
 0x5e6   : > { %v3852_v1 = vadd.f32 %v10690_v46, %v10790_v40  ;;  %v3975_v57 = vadd.f32 %v10700_v61, %v9297_v22  ;;  %v3737_v29 = vand.u32 2147483647, %v3729_v60  ;;  %v4218_v33 = vadd.f32 %v10704_v28, %v10791_v25  ;;  %v4541_v25 = vld [vmem:[%s5688_s13 + $0x10] sm:$0xff] }
 0x5e7   : > { %v4367_v32 = vadd.f32 %v4359_v0, %v4244_v55  ;;  %v3265_v24 = vadd.f32 %v3257_v30, %v3142_v16  ;;  %v3503_v20 = vmul.f32 %v10691_v11, %v3494_v5  ;;  %v3623_v18 = vmul.f32 %v10696_v27, %v3614_v37  ;;  %v10792_v55 = vld [vmem:[#allocation97_spill] sm:$0xff]  ;;  %v10793_v37 = vld [vmem:[#allocation107_spill] sm:$0xff] }
 0x5e8   : > { %v3860_v8 = vand.u32 2147483647, %v3852_v1  ;;  %v4098_v12 = vadd.f32 %v10708_v17, %v9361_v43  ;;  %v4341_v11 = vadd.f32 %v10707_v42, %v9328_v35  ;;  %v3983_v27 = vand.u32 2147483647, %v3975_v57 }
 0x5e9   : > { %v4488_v47 = vmul.f32 0.4, %v4367_v32  ;;  %v3388_v53 = vadd.f32 %v3380_v62, %v3265_v24  ;;  %v4486_v13 = vmul.f32 0.4, %v10792_v55  ;;  %v3746_v23 = vmul.f32 %v10486_v36, %v3737_v29 }
 0x5ea   : > { %v4202_v56 = vpop.permute.xlu1 %4201  ;;  %v4226_v51 = vand.u32 2147483647, %v4218_v33  ;;  %vm4548_vm5 = vcmp.eq.f32.partialorder %v4540_v49, 0.0  ;;  %v3869_v43 = vmul.f32 %v10491_v14, %v3860_v8  ;;  %v4502_v3 = vmul.f32 %v9355_v15, %v9355_v15  ;;  %v4544_v8 = vld [vmem:[%s5688_s13 + $0x28] sm:$0xff] }
 0x5eb   : > { %v9398_v10 = vadd.f32 %v4488_v47, %v4480_v9  ;;  %v3511_v21 = vadd.f32 %v3503_v20, %v3388_v53  ;;  %v4221_v22 = vadd.f32 %v10704_v28, %v4202_v56  ;;  %v4106_v32 = vand.u32 2147483647, %v4098_v12 }
 0x5ec   : > { %v4349_v39 = vand.u32 2147483647, %v4341_v11  ;;  %v3992_v9 = vmul.f32 %v10705_v31, %v3983_v27  ;;  %v4235_v38 = vmul.f32 %v10716_v26, %v4226_v51  ;;  %v4511_v14 = vsel %vm4510_vm3, %v4502_v3, 0.0 }
 0x5ed   : > { %v4558_v19 = vsel %vm4550_vm4, -inf, %v9398_v10  ;;  %v3631_v7 = vadd.f32 %v3623_v18, %v3511_v21  ;;  %v4229_v47 = vand.u32 2147483647, %v4221_v22  ;;  %v4115_v2 = vmul.f32 %v10714_v41, %v4106_v32 }
 0x5ee   : > { %4567 = vst.msk [vmem:[%s9366_s28 + $0x18] sm:$0xff] %vm4510_vm3, %v4558_v19  ;;  %v4358_v52 = vmul.f32 %v10770_v4, %v4349_v39  ;;  %v3977_v19 = vadd.f32 %v10700_v61, %v9389_v45  ;;  %v4243_v53 = vadd.f32 %v4235_v38, %v10793_v37  ;;  %vm4549_vm6 = vcmp.eq.f32.partialorder %v4541_v25, 0.0 }
 0x5ef   : > { %v4321_v50 = vpop.permute.xlu1 %4320  ;;  %v3754_v35 = vadd.f32 %v3746_v23, %v3631_v7  ;;  %v4238_v5 = vmul.f32 %v10716_v26, %v4229_v47  ;;  %vm4552_vm7 = vcmp.eq.f32.partialorder %v4544_v8, 0.0 }
 0x5f0   : > { %v4366_v20 = vadd.f32 %v4358_v52, %v4243_v53  ;;  %v3985_v18 = vand.u32 2147483647, %v3977_v19  ;;  %v4343_v45 = vadd.f32 %v10707_v42, %v4321_v50  ;;  %v4543_v19 = vld [vmem:[%s5688_s13 + $0x20] sm:$0xff] }
 0x5f1   : > { %v3877_v36 = vadd.f32 %v3869_v43, %v3754_v35  ;;  %v10794_v43 = vld [vmem:[#allocation61_spill] sm:$0xff]  ;;  %vm4551_vm8 = vcmp.eq.f32.partialorder %v4543_v19, 0.0 }
 0x5f2   : > { %v4487_v49 = vmul.f32 0.4, %v4366_v20  ;;  %v3994_v7 = vmul.f32 %v10705_v31, %v3985_v18  ;;  %v4351_v22 = vand.u32 2147483647, %v4343_v45  ;;  %v4545_v20 = vld [vmem:[%s5688_s13 + $0x30] sm:$0xff] }
 0x5f3   : > { %v4000_v62 = vadd.f32 %v3992_v9, %v3877_v36  ;;  %vm4553_vm10 = vcmp.eq.f32.partialorder %v4545_v20, 0.0 }
 0x5f4   : > { %v4433_v54 = vpop.permute.xlu1 %4432  ;;  %v4002_v3 = vadd.f32 %v3994_v7, %v10794_v43 }
 0x5f5   : > { %v4470_v46 = vadd.f32 %v9332_v59, %v4433_v54  ;;  %v4123_v60 = vadd.f32 %v4115_v2, %v4000_v62 }
 0x5f7   : > { %v4478_v0 = vmul.f32 0.6, %v4470_v46  ;;  %v4246_v57 = vadd.f32 %v4238_v5, %v4123_v60  ;;  %v4546_v5 = vld [vmem:[%s5688_s13 + $0x38] sm:$0xff] }
 0x5f8   : > { %v4453_v6 = vpop.permute.xlu0 %4452  ;;  %vm4554_vm9 = vcmp.eq.f32.partialorder %v4546_v5, 0.0 }
 0x5f9   : > { %v4494_v58 = vadd.f32 %v4486_v13, %v4478_v0  ;;  %v4087_v44 = vpop.permute.xlu1 %4086  ;;  %v4474_v29 = vadd.f32 %v9332_v59, %v4453_v6 }
 0x5fa   : > { %v4100_v40 = vadd.f32 %v10708_v17, %v4087_v44  ;;  %v4223_v17 = vadd.f32 %v10704_v28, %v9322_v63  ;;  %v4505_v28 = vmul.f32 %v9398_v10, %v9398_v10 }
 0x5fb   : > { %v4503_v16 = vmul.f32 %v4494_v58, %v4494_v58  ;;  %v4556_v48 = vsel %vm4548_vm5, -inf, %v4494_v58  ;;  %v4482_v11 = vmul.f32 0.6, %v4474_v29  ;;  %v4360_v58 = vmul.f32 %v10770_v4, %v4351_v22 }
 0x5fc   : > { %4565 = vst.msk [vmem:[%s9366_s28 + $0x8] sm:$0xff] %vm4510_vm3, %v4556_v48  ;;  %v4108_v54 = vand.u32 2147483647, %v4100_v40  ;;  %v4231_v31 = vand.u32 2147483647, %v4223_v17  ;;  %v4463_v47 = vpop.permute.xlu0 %4462 }
 0x5fd   : > { %v4512_v15 = vsel %vm4510_vm3, %v4503_v16, 0.0  ;;  %v4516_v16 = vsel %vm4510_vm3, %v4505_v28, 0.0  ;;  %v4476_v52 = vadd.f32 %v9332_v59, %v4463_v47 }
 0x5fe   : > { %v4513_v56 = vadd.f32 %v4512_v15, %v4511_v14  ;;  %v4325_v30 = vpop.permute.xlu1 %4324  ;;  %v4117_v13 = vmul.f32 %v10714_v41, %v4108_v54  ;;  %v4240_v48 = vmul.f32 %v10716_v26, %v4231_v31  ;;  %v10795_v14 = vld [vmem:[#allocation88_spill] sm:$0xff] }
 0x5ff   : > { %v4344_v24 = vadd.f32 %v10707_v42, %v4325_v30  ;;  %v4368_v2 = vadd.f32 %v4360_v58, %v10795_v14  ;;  %v4484_v6 = vmul.f32 0.6, %v4476_v52 }
 0x600   : > { %v4125_v39 = vadd.f32 %v4117_v13, %v4002_v3 }
 0x601   : > { %v4352_v1 = vand.u32 2147483647, %v4344_v24  ;;  %v4489_v37 = vmul.f32 0.4, %v4368_v2 }
 0x602   : > { %v4248_v30 = vadd.f32 %v4240_v48, %v4125_v39 }
 0x603   : > { %v4361_v21 = vmul.f32 %v10770_v4, %v4352_v1  ;;  %v4438_v61 = vpop.permute.xlu1 %4437 }
 0x604   : > { %v4471_v33 = vadd.f32 %v9332_v59, %v4438_v61 }
 0x605   : > { %v4369_v12 = vadd.f32 %v4361_v21, %v4246_v57 }
 0x606   : > { %v4479_v46 = vmul.f32 0.6, %v4471_v33 }
 0x607   : > { %v4490_v27 = vmul.f32 0.4, %v4369_v12 }
 0x608   : > { %v4495_v50 = vadd.f32 %v4487_v49, %v4479_v46  ;;  %v4329_v55 = vpop.permute.xlu1 %4328 }
 0x609   : > { %v4498_v0 = vadd.f32 %v4490_v27, %v4482_v11  ;;  %v4345_v23 = vadd.f32 %v10707_v42, %v4329_v55 }
 0x60a   : > { %v4504_v63 = vmul.f32 %v4495_v50, %v4495_v50  ;;  %v4557_v51 = vsel %vm4549_vm6, -inf, %v4495_v50 }
 0x60b   : > { %v4560_v32 = vsel %vm4552_vm7, -inf, %v4498_v0  ;;  %4566 = vst.msk [vmem:[%s9366_s28 + $0x10] sm:$0xff] %vm4510_vm3, %v4557_v51  ;;  %v4353_v44 = vand.u32 2147483647, %v4345_v23  ;;  %v4507_v18 = vmul.f32 %v4498_v0, %v4498_v0 }
 0x60c   : > { %4569 = vst.msk [vmem:[%s9366_s28 + $0x28] sm:$0xff] %vm4510_vm3, %v4560_v32  ;;  %v4514_v41 = vsel %vm4510_vm3, %v4504_v63, 0.0  ;;  %v4333_v35 = vpop.permute.xlu1 %4332  ;;  %v4501_v63 = vld [vmem:[#allocation4] sm:$0x1] }
 0x60d   : > { %v4515_v10 = vadd.f32 %v4514_v41, %v4513_v56  ;;  %v4346_v9 = vadd.f32 %v10707_v42, %v4333_v35  ;;  %v4362_v15 = vmul.f32 %v10770_v4, %v4353_v44  ;;  %v4520_v17 = vsel %vm4510_vm3, %v4507_v18, 0.0 }
 0x60f   : > { %v4354_v38 = vand.u32 2147483647, %v4346_v9  ;;  %v4517_v36 = vadd.f32 %v4516_v16, %v4515_v10  ;;  %v4370_v26 = vadd.f32 %v4362_v15, %v9381_v34 }
 0x611   : > { %v4363_v62 = vmul.f32 %v10770_v4, %v4354_v38  ;;  %v4448_v56 = vpop.permute.xlu1 %4447  ;;  %v4491_v61 = vmul.f32 0.4, %v4370_v26 }
 0x612   : > { %v4473_v42 = vadd.f32 %v9332_v59, %v4448_v56 }
 0x613   : > { %v4371_v24 = vadd.f32 %v4363_v62, %v4248_v30 }
 0x614   : > { %v4481_v53 = vmul.f32 0.6, %v4473_v42 }
 0x615   : > { %v4492_v60 = vmul.f32 0.4, %v4371_v24  ;;  %v4458_v40 = vpop.permute.xlu1 %4457 }
 0x616   : > { %v4497_v1 = vadd.f32 %v4489_v37, %v4481_v53  ;;  %v4475_v4 = vadd.f32 %v9332_v59, %v4458_v40 }
 0x617   : > { %v4500_v57 = vadd.f32 %v4492_v60, %v4484_v6 }
 0x618   : > { %v4506_v29 = vmul.f32 %v4497_v1, %v4497_v1  ;;  %v4559_v21 = vsel %vm4551_vm8, -inf, %v4497_v1  ;;  %v4483_v34 = vmul.f32 0.6, %v4475_v4 }
 0x619   : > { %v4562_v45 = vsel %vm4554_vm9, -inf, %v4500_v57  ;;  %4568 = vst.msk [vmem:[%s9366_s28 + $0x20] sm:$0xff] %vm4510_vm3, %v4559_v21  ;;  %v4509_v59 = vmul.f32 %v4500_v57, %v4500_v57 }
 0x61a   : > { %4571 = vst.msk [vmem:[%s9366_s28 + $0x38] sm:$0xff] %vm4510_vm3, %v4562_v45  ;;  %v4518_v25 = vsel %vm4510_vm3, %v4506_v29, 0.0  ;;  %v4499_v33 = vadd.f32 %v4491_v61, %v4483_v34 }
 0x61b   : > { %v4519_v54 = vadd.f32 %v4518_v25, %v4517_v36  ;;  %v4524_v11 = vsel %vm4510_vm3, %v4509_v59, 0.0 }
 0x61c   : > { %v4508_v8 = vmul.f32 %v4499_v33, %v4499_v33  ;;  %v4561_v12 = vsel %vm4553_vm10, -inf, %v4499_v33 }
 0x61d   : > { %4570 = vst.msk [vmem:[%s9366_s28 + $0x30] sm:$0xff] %vm4510_vm3, %v4561_v12  ;;  %v4521_v49 = vadd.f32 %v4520_v17, %v4519_v54 }
 0x61e   : > { %v4522_v46 = vsel %vm4510_vm3, %v4508_v8, 0.0 }
 0x61f   : > { %v4523_v7 = vadd.f32 %v4522_v46, %v4521_v49 }
 0x621   : > { %v4525_v27 = vadd.f32 %v4524_v11, %v4523_v7 }
 0x623   : > { %4526 = vadd.xlane.f32.xlu1 %v4525_v27 }
 0x6ac   : > { %v4527_v22 = vpop.xlane.xlu1 %4526 }
 0x6ad   : > { %v4528_v50 = vrot.slane %v4527_v22, 4 }
 0x6af   : > { %v4529_v55 = vadd.f32 %v4528_v50, %v4527_v22 }
 0x6b1   : > { %v4530_v13 = vrot.slane %v4529_v55, 2 }
 0x6b3   : > { %v4531_v0 = vadd.f32 %v4530_v13, %v4529_v55 }
 0x6b5   : > { %v4532_v23 = vrot.slane %v4531_v0, 1 }
 0x6b7   : > { %v4533_v28 = vadd.f32 %v4532_v23, %v4531_v0 }
 0x6b9   : > { %5182 = vpush %v4533_v28 }
 0x6ea   : > { %s5183_s13 = spop %5182 }
 0x6eb   : > { %v4535_v51 = vstv %s5183_s13 }
 0x6ec   : > { %v4536_v31 = vadd.f32 %v4535_v51, %v4501_v63 }
 0x6ee   : > { %4538 = vst.msk [vmem:[#allocation4] sm:$0x1] %vm4537_vm11, %v4536_v31 }
 0x6ef PF: > { %p5040_p7 = scmp.ne.s32.totalorder %s5515_s16, 1 }
 0x6f0   : > { %s5041_s27 = sshll.u32 (!%p5040_p7), %s5511_s15, 6 }
 0x6f1   : > { %4575 = sbr.rel (%p5040_p7) target bundleno = 2478 (0x9ae), region = 52  ;;  %s4579_s6 = scalar_lea.vmem (!%p5040_p7), [#allocation3], %s5041_s27 }
 0x6f2   : > { %s9520_s16 = scalar_lea.vmem (!%p5040_p7), [#allocation2], %s5041_s27 }
 0x6f6   : > { %v4576_v43 = vld [vmem:[#allocation4] sm:$0x1]  ;;  %v5594_v3 = vmov 0   ;;  %v4589_v32 = vlaneseq  ;;  %vm4605_vm12 = vcmask 523264   ;;  %v4581_v47 = vld [vmem:[%s4579_s6 + $0x8] sm:$0xff]  ;;  %v4582_v30 = vld [vmem:[%s4579_s6 + $0x10] sm:$0xff] }
 0x6f7   : > { %5419 = vset.pattern.permute.xlu0 %v5594_v3  ;;  %5420 = vrsqrt.f32 %v4576_v43  ;;  %v4584_v39 = vld [vmem:[%s4579_s6 + $0x20] sm:$0xff]  ;;  %v4585_v2 = vld [vmem:[%s4579_s6 + $0x28] sm:$0xff]  ;;  %v4586_v19 = vld [vmem:[%s4579_s6 + $0x30] sm:$0xff]  ;;  %vm4880_vm13 = vcmask 261120  }
 0x6f8   : > { %v4590_v58 = vshrl.u32 %v4589_v32, 7  ;;  %v4580_v10 = vld [vmem:[%s4579_s6] sm:$0xff]  ;;  %v4583_v24 = vld [vmem:[%s4579_s6 + $0x18] sm:$0xff] }
 0x6f9   : > { %v4587_v53 = vld [vmem:[%s4579_s6 + $0x38] sm:$0xff] }
 0x6fa   : > { %v4591_v41 = vsub.s32 0, %v4590_v58  ;;  %v4702_v58 = vld [vmem:[%s9520_s16 + $0x38] sm:$0xff] }
 0x6fb   : > { %5130 = vmatprep.subr.mxu0 %v4702_v58  ;;  %5166 = vmatprep.subr.mxu1 %v4702_v58 }
 0x6fc   : > { %5131 = vmatpush3.msra.mxu0 %v4702_v58  ;;  %5174 = vmatpush3.msra.mxu1 %v4702_v58 }
 0x704   : > { %v5421_v44 = vpop.eup %5420 }
 0x705   : > { %v4592_v35 = vrot.slane %v5421_v44, %v4591_v41  ;;  %v4701_v44 = vld [vmem:[%s9520_s16 + $0x30] sm:$0xff] }
 0x706   : > { %5132 = vmatprep.subr.mxu0 %v4701_v44  ;;  %5167 = vmatprep.subr.mxu1 %v4701_v44 }
 0x707   : > { %4594 = vperm.xlu0 %5419, %v4592_v35   ;;  %5133 = vmatpush3.msra.mxu0 %v4701_v44 }
 0x708   : > { %5175 = vmatpush3.msra.mxu1 %v4701_v44 }
 0x782   : > { %v4595_v9 = vpop.permute.xlu0 %4594 }
 0x783   : > { %v4601_v16 = vmul.f32 %v4595_v9, %v4584_v39  ;;  %v4597_v48 = vmul.f32 %v4595_v9, %v4580_v10  ;;  %v4598_v14 = vmul.f32 %v4595_v9, %v4581_v47  ;;  %v4602_v52 = vmul.f32 %v4595_v9, %v4585_v2  ;;  %v4700_v39 = vld [vmem:[%s9520_s16 + $0x28] sm:$0xff] }
 0x784   : > { %v4599_v56 = vmul.f32 %v4595_v9, %v4582_v30  ;;  %v4603_v5 = vmul.f32 %v4595_v9, %v4586_v19  ;;  %v4600_v37 = vmul.f32 %v4595_v9, %v4583_v24  ;;  %v4604_v60 = vmul.f32 %v4595_v9, %v4587_v53  ;;  %5134 = vmatprep.subr.mxu0 %v4700_v39  ;;  %v4699_v9 = vld [vmem:[%s9520_s16 + $0x20] sm:$0xff] }
 0x785   : > { %v4618_v38 = vsel %vm4605_vm12, %v4601_v16, -inf  ;;  %v4606_v36 = vsel %vm4605_vm12, %v4597_v48, -inf  ;;  %v4609_v15 = vsel %vm4605_vm12, %v4598_v14, -inf  ;;  %v4621_v62 = vsel %vm4605_vm12, %v4602_v52, -inf  ;;  %5135 = vmatpush3.msra.mxu0 %v4700_v39  ;;  %5168 = vmatprep.subr.mxu1 %v4700_v39 }
 0x786   : > { %4619 = vmax.xlane.f32.xlu1 %v4618_v38  ;;  %4607 = vmax.xlane.f32.xlu0 %v4606_v36  ;;  %v4612_v42 = vsel %vm4605_vm12, %v4599_v56, -inf  ;;  %v4624_v26 = vsel %vm4605_vm12, %v4603_v5, -inf  ;;  %v4615_v6 = vsel %vm4605_vm12, %v4600_v37, -inf  ;;  %v4627_v40 = vsel %vm4605_vm12, %v4604_v60, -inf  ;;  %v4696_v36 = vld [vmem:[%s9520_s16 + $0x8] sm:$0xff] }
 0x787   : > { %5136 = vmatprep.subr.mxu0 %v4699_v9  ;;  %5176 = vmatpush3.msra.mxu1 %v4700_v39 }
 0x788   : > { %5137 = vmatpush3.msra.mxu0 %v4699_v9  ;;  %5169 = vmatprep.subr.mxu1 %v4699_v9 }
 0x789   : > { %5177 = vmatpush3.msra.mxu1 %v4699_v9 }
 0x78a   : > { %4610 = vmax.xlane.f32.xlu1 %v4609_v15 }
 0x78e   : > { %4622 = vmax.xlane.f32.xlu1 %v4621_v62 }
 0x792   : > { %4613 = vmax.xlane.f32.xlu1 %v4612_v42 }
 0x796   : > { %4625 = vmax.xlane.f32.xlu1 %v4624_v26 }
 0x79a   : > { %4616 = vmax.xlane.f32.xlu1 %v4615_v6 }
 0x79e   : > { %4628 = vmax.xlane.f32.xlu1 %v4627_v40 }
 0x80f   : > { %v4620_v1 = vpop.xlane.xlu1 %4619  ;;  %v4608_v20 = vpop.xlane.xlu0 %4607 }
 0x810   : > { %v4634_v4 = vsub.f32 %v4601_v16, %v4620_v1  ;;  %v4630_v18 = vsub.f32 %v4597_v48, %v4608_v20  ;;  %v4698_v16 = vld [vmem:[%s9520_s16 + $0x18] sm:$0xff]  ;;  %v4697_v48 = vld [vmem:[%s9520_s16 + $0x10] sm:$0xff] }
 0x811   : > { %5138 = vmatprep.subr.mxu0 %v4698_v16  ;;  %5170 = vmatprep.subr.mxu1 %v4698_v16 }
 0x812   : > { %v4638_v57 = vmul.f32 1.442695, %v4630_v18  ;;  %v4646_v29 = vmul.f32 1.442695, %v4634_v4  ;;  %5139 = vmatpush3.msra.mxu0 %v4698_v16  ;;  %5178 = vmatpush3.msra.mxu1 %v4698_v16 }
 0x813   : > { %v4611_v21 = vpop.xlane.xlu1 %4610  ;;  %5140 = vmatprep.subr.mxu0 %v4697_v48  ;;  %5171 = vmatprep.subr.mxu1 %v4697_v48 }
 0x814   : > { %v4631_v61 = vsub.f32 %v4598_v14, %v4611_v21  ;;  %5422 = vpow2.f32 %v4638_v57  ;;  %5141 = vmatpush3.msra.mxu0 %v4697_v48  ;;  %v4695_v14 = vld [vmem:[%s9520_s16] sm:$0xff]  ;;  %5179 = vmatpush3.msra.mxu1 %v4697_v48 }
 0x815   : > { %5424 = vpow2.f32 %v4646_v29  ;;  %5142 = vmatprep.subr.mxu0 %v4696_v36  ;;  %5172 = vmatprep.subr.mxu1 %v4696_v36 }
 0x816   : > { %v4640_v34 = vmul.f32 1.442695, %v4631_v61  ;;  %5143 = vmatpush3.msra.mxu0 %v4696_v36  ;;  %5180 = vmatpush3.msra.mxu1 %v4696_v36 }
 0x817   : > { %v4623_v45 = vpop.xlane.xlu1 %4622  ;;  %5144 = vmatprep.subr.mxu0 %v4695_v14  ;;  %5173 = vmatprep.subr.mxu1 %v4695_v14 }
 0x818   : > { %5426 = vpow2.f32 %v4640_v34  ;;  %v4635_v25 = vsub.f32 %v4602_v52, %v4623_v45  ;;  %5145 = vmatpush3.msra.mxu0 %v4695_v14  ;;  %5181 = vmatpush3.msra.mxu1 %v4695_v14 }
 0x81a   : > { %v4648_v33 = vmul.f32 1.442695, %v4635_v25 }
 0x81b   : > { %v4614_v54 = vpop.xlane.xlu1 %4613 }
 0x81c   : > { %5428 = vpow2.f32 %v4648_v33  ;;  %v4632_v8 = vsub.f32 %v4599_v56, %v4614_v54 }
 0x81e   : > { %v4642_v12 = vmul.f32 1.442695, %v4632_v8 }
 0x81f   : > { %v4626_v59 = vpop.xlane.xlu1 %4625 }
 0x820   : > { %5430 = vpow2.f32 %v4642_v12  ;;  %v4636_v17 = vsub.f32 %v4603_v5, %v4626_v59 }
 0x821   : > { %v9496_v49 = vpop.eup %5422 }
 0x822   : > { %v4650_v46 = vmul.f32 1.442695, %v4636_v17  ;;  %v4654_v11 = vsel %vm4605_vm12, %v9496_v49, 0.0  ;;  %v9500_v27 = vpop.eup %5424 }
 0x823   : > { %v4617_v7 = vpop.xlane.xlu1 %4616  ;;  %4655 = vadd.xlane.f32.xlu1 %v4654_v11  ;;  %v4666_v23 = vsel %vm4605_vm12, %v9500_v27, 0.0 }
 0x824   : > { %5432 = vpow2.f32 %v4650_v46  ;;  %v4633_v22 = vsub.f32 %v4600_v37, %v4617_v7 }
 0x825   : > { %v9502_v50 = vpop.eup %5426 }
 0x826   : > { %v4644_v55 = vmul.f32 1.442695, %v4633_v22  ;;  %v4657_v13 = vsel %vm4605_vm12, %v9502_v50, 0.0 }
 0x827   : > { %v4629_v0 = vpop.xlane.xlu1 %4628  ;;  %4658 = vadd.xlane.f32.xlu0 %v4657_v13  ;;  %4667 = vadd.xlane.f32.xlu1 %v4666_v23 }
 0x828   : > { %5434 = vpow2.f32 %v4644_v55  ;;  %v4637_v28 = vsub.f32 %v4604_v60, %v4629_v0 }
 0x829   : > { %v9508_v63 = vpop.eup %5428 }
 0x82a   : > { %v4652_v51 = vmul.f32 1.442695, %v4637_v28  ;;  %v4669_v31 = vsel %vm4605_vm12, %v9508_v63, 0.0 }
 0x82b   : > { %4670 = vadd.xlane.f32.xlu1 %v4669_v31 }
 0x82c   : > { %5436 = vpow2.f32 %v4652_v51 }
 0x82d   : > { %v9512_v43 = vpop.eup %5430 }
 0x82e   : > { %v4660_v3 = vsel %vm4605_vm12, %v9512_v43, 0.0 }
 0x82f   : > { %4661 = vadd.xlane.f32.xlu0 %v4660_v3 }
 0x831   : > { %v9516_v32 = vpop.eup %5432 }
 0x832   : > { %v4672_v41 = vsel %vm4605_vm12, %v9516_v32, 0.0 }
 0x833   : > { %4673 = vadd.xlane.f32.xlu1 %v4672_v41 }
 0x835   : > { %v9526_v35 = vpop.eup %5434 }
 0x836   : > { %v4663_v10 = vsel %vm4605_vm12, %v9526_v35, 0.0 }
 0x837   : > { %4664 = vadd.xlane.f32.xlu0 %v4663_v10 }
 0x839   : > { %v9532_v47 = vpop.eup %5436 }
 0x83a   : > { %v4675_v38 = vsel %vm4605_vm12, %v9532_v47, 0.0 }
 0x83b   : > { %4676 = vadd.xlane.f32.xlu1 %v4675_v38 }
 0x8ac   : > { %v4656_v2 = vpop.xlane.xlu1 %4655 }
 0x8ad   : > { %5438 = vrcp.f32 %v4656_v2 }
 0x8b0   : > { %v4659_v15 = vpop.xlane.xlu0 %4658  ;;  %v4668_v52 = vpop.xlane.xlu1 %4667 }
 0x8b1   : > { %5440 = vrcp.f32 %v4659_v15 }
 0x8b2   : > { %5442 = vrcp.f32 %v4668_v52 }
 0x8b4   : > { %v4671_v30 = vpop.xlane.xlu1 %4670 }
 0x8b5   : > { %5444 = vrcp.f32 %v4671_v30 }
 0x8b8   : > { %v4662_v62 = vpop.xlane.xlu0 %4661 }
 0x8b9   : > { %5446 = vrcp.f32 %v4662_v62 }
 0x8ba   : > { %v5439_v56 = vpop.eup %5438 }
 0x8bb   : > { %v4686_v42 = vmul.f32 %v5439_v56, %v9496_v49 }
 0x8bc   : > { %v4674_v19 = vpop.xlane.xlu1 %4673 }
 0x8bd   : > { %5448 = vrcp.f32 %v4674_v19  ;;  %5146 = vmatprep.mubr.msk.f32.mxu0 %vm4605_vm12, %v4686_v42 }
 0x8be   : > { %v5441_v5 = vpop.eup %5440 }
 0x8bf   : > { %v5443_v24 = vpop.eup %5442  ;;  %v4687_v26 = vmul.f32 %v5441_v5, %v9502_v50 }
 0x8c0   : > { %v4665_v37 = vpop.xlane.xlu0 %4664  ;;  %v4690_v53 = vmul.f32 %v5443_v24, %v9500_v27 }
 0x8c1   : > { %5450 = vrcp.f32 %v4665_v37  ;;  %5147 = vmatmul.mubr.msk.f32.vlgmr.msra.gmra.mxu0 %vm4605_vm12, %v4687_v26 }
 0x8c2   : > { %5152 = vmatprep.mubr.msk.f32.mxu1 %vm4605_vm12, %v4690_v53  ;;  %v5445_v6 = vpop.eup %5444 }
 0x8c3   : > { %v4691_v40 = vmul.f32 %v5445_v6, %v9508_v63 }
 0x8c4   : > { %v4677_v60 = vpop.xlane.xlu1 %4676 }
 0x8c5   : > { %5452 = vrcp.f32 %v4677_v60  ;;  %5153 = vmatmul.mubr.msk.f32.vlgmr.msra.gmra.mxu1 %vm4605_vm12, %v4691_v40 }
 0x8c6   : > { %v5447_v1 = vpop.eup %5446 }
 0x8c7   : > { %v4688_v20 = vmul.f32 %v5447_v1, %v9512_v43 }
 0x8c9   : > { %5149 = vmatprep.mubr.msk.f32.mxu0 %vm4605_vm12, %v4688_v20 }
 0x8ca   : > { %v5449_v4 = vpop.eup %5448 }
 0x8cb   : > { %v4692_v18 = vmul.f32 %v5449_v4, %v9516_v32 }
 0x8cd   : > { %5155 = vmatprep.mubr.msk.f32.mxu1 %vm4605_vm12, %v4692_v18 }
 0x8ce   : > { %v5451_v57 = vpop.eup %5450 }
 0x8cf   : > { %v4689_v29 = vmul.f32 %v5451_v57, %v9526_v35 }
 0x8d1   : > { %5150 = vmatmul.mubr.msk.f32.gmra.mxu0 %vm4605_vm12, %v4689_v29 }
 0x8d2   : > { %v5453_v21 = vpop.eup %5452 }
 0x8d3   : > { %v4693_v61 = vmul.f32 %v5453_v21, %v9532_v47 }
 0x8d5   : > { %5156 = vmatmul.mubr.msk.f32.gmra.mxu1 %vm4605_vm12, %v4693_v61 }
 0x981   : > { %v5148_v34 = vpop.f32.mrf.mxu0 }
 0x982   : > { %v4841_v45 = vmin.f32 %v5148_v34, 0.0  ;;  %vm4833_vm14 = vcmp.gt.f32.partialorder %v5148_v34, 0.0 }
 0x983   : > { %v4793_v25 = vpop.f32.mrf.mxu0 }
 0x984   : > { %v4850_v33 = vmul.f32 1.442695, %v4841_v45  ;;  %v4840_v54 = vmin.f32 %v4793_v25, 0.0  ;;  %vm4832_vm15 = vcmp.gt.f32.partialorder %v4793_v25, 0.0 }
 0x985   : > { %v5154_v12 = vpop.f32.mrf.mxu1 }
 0x986   : > { %5454 = vpow2.f32 %v4850_v33  ;;  %v4848_v8 = vmul.f32 1.442695, %v4840_v54  ;;  %v4845_v59 = vmin.f32 %v5154_v12, 0.0  ;;  %vm4837_vm0 = vcmp.gt.f32.partialorder %v5154_v12, 0.0 }
 0x987   : > { %v4813_v17 = vpop.f32.mrf.mxu1 }
 0x988   : > { %5456 = vpow2.f32 %v4848_v8  ;;  %v4858_v49 = vmul.f32 1.442695, %v4845_v59  ;;  %v4844_v46 = vmin.f32 %v4813_v17, 0.0  ;;  %vm4836_vm1 = vcmp.gt.f32.partialorder %v4813_v17, 0.0 }
 0x98a   : > { %5458 = vpow2.f32 %v4858_v49  ;;  %v4856_v7 = vmul.f32 1.442695, %v4844_v46 }
 0x98c   : > { %5460 = vpow2.f32 %v4856_v7 }
 0x991   : > { %v5151_v11 = vpop.f32.mrf.mxu0 }
 0x992   : > { %v4843_v27 = vmin.f32 %v5151_v11, 0.0  ;;  %vm4835_vm2 = vcmp.gt.f32.partialorder %v5151_v11, 0.0 }
 0x993   : > { %v5455_v22 = vpop.eup %5454  ;;  %v4803_v50 = vpop.f32.mrf.mxu0 }
 0x994   : > { %v5051_v55 = vadd.f32 -1.0, %v5455_v22  ;;  %v4854_v13 = vmul.f32 1.442695, %v4843_v27  ;;  %v4842_v0 = vmin.f32 %v4803_v50, 0.0  ;;  %vm4834_vm3 = vcmp.gt.f32.partialorder %v4803_v50, 0.0 }
 0x995   : > { %v5457_v23 = vpop.eup %5456  ;;  %v5157_v28 = vpop.f32.mrf.mxu1 }
 0x996   : > { %v4873_v63 = vsel %vm4833_vm14, %v5148_v34, %v5051_v55  ;;  %v5050_v51 = vadd.f32 -1.0, %v5457_v23  ;;  %5462 = vpow2.f32 %v4854_v13  ;;  %v4852_v31 = vmul.f32 1.442695, %v4842_v0 }
 0x997   : > { %4882 = vst.msk [vmem:[%s5683_s10 + $0x8] sm:$0xff] %vm4880_vm13, %v4873_v63  ;;  %v4847_v43 = vmin.f32 %v5157_v28, 0.0  ;;  %v4823_v3 = vpop.f32.mrf.mxu1  ;;  %v5459_v32 = vpop.eup %5458  ;;  %vm4839_vm4 = vcmp.gt.f32.partialorder %v5157_v28, 0.0 }
 0x998   : > { %v4872_v58 = vsel %vm4832_vm15, %v4793_v25, %v5050_v51  ;;  %5464 = vpow2.f32 %v4852_v31  ;;  %v4846_v41 = vmin.f32 %v4823_v3, 0.0  ;;  %v5055_v44 = vadd.f32 -1.0, %v5459_v32 }
 0x999   : > { %4881 = vst.msk [vmem:[%s5683_s10] sm:$0xff] %vm4880_vm13, %v4872_v58  ;;  %v4862_v35 = vmul.f32 1.442695, %v4847_v43  ;;  %v5461_v39 = vpop.eup %5460  ;;  %vm4838_vm5 = vcmp.gt.f32.partialorder %v4823_v3, 0.0 }
 0x99a   : > { %v4860_v10 = vmul.f32 1.442695, %v4846_v41  ;;  %v4877_v9 = vsel %vm4837_vm0, %v5154_v12, %v5055_v44  ;;  %v5054_v47 = vadd.f32 -1.0, %v5461_v39 }
 0x99b   : > { %5466 = vpow2.f32 %v4862_v35  ;;  %4886 = vst.msk [vmem:[%s5683_s10 + $0x28] sm:$0xff] %vm4880_vm13, %v4877_v9 }
 0x99c   : > { %5468 = vpow2.f32 %v4860_v10  ;;  %v4876_v16 = vsel %vm4836_vm1, %v4813_v17, %v5054_v47 }
 0x99d   : > { %4885 = vst.msk [vmem:[%s5683_s10 + $0x20] sm:$0xff] %vm4880_vm13, %v4876_v16 }
 0x9a3   : > { %v5463_v48 = vpop.eup %5462 }
 0x9a4   : > { %v5053_v38 = vadd.f32 -1.0, %v5463_v48 }
 0x9a5   : > { %v5465_v36 = vpop.eup %5464 }
 0x9a6   : > { %v4875_v14 = vsel %vm4835_vm2, %v5151_v11, %v5053_v38  ;;  %v5052_v2 = vadd.f32 -1.0, %v5465_v36 }
 0x9a7   : > { %4884 = vst.msk [vmem:[%s5683_s10 + $0x18] sm:$0xff] %vm4880_vm13, %v4875_v14 }
 0x9a8   : > { %v5467_v15 = vpop.eup %5466  ;;  %v4874_v52 = vsel %vm4834_vm3, %v4803_v50, %v5052_v2 }
 0x9a9   : > { %v5469_v30 = vpop.eup %5468  ;;  %4883 = vst.msk [vmem:[%s5683_s10 + $0x10] sm:$0xff] %vm4880_vm13, %v4874_v52  ;;  %v5057_v62 = vadd.f32 -1.0, %v5467_v15 }
 0x9aa   : > { %v5056_v56 = vadd.f32 -1.0, %v5469_v30 }
 0x9ab   : > { %v4879_v19 = vsel %vm4839_vm4, %v5157_v28, %v5057_v62 }
 0x9ac   : > { %4888 = vst.msk [vmem:[%s5683_s10 + $0x38] sm:$0xff] %vm4880_vm13, %v4879_v19  ;;  %v4878_v42 = vsel %vm4838_vm5, %v4823_v3, %v5056_v56 }
 0x9ad   : > { %4887 = vst.msk [vmem:[%s5683_s10 + $0x30] sm:$0xff] %vm4880_vm13, %v4878_v42 }
 0x9ae PF: > { %s15_s19 = sadd.s32 1, %s5527_s19   ;;  %s10796_s15 = smov %s5519_s17 }
 0x9af   : > { %p12_p8 = scmp.ge.s32.totalorder %s15_s19, 6   ;;  %s10797_s16 = smov %s5523_s18 }
 0x9b0   : > { %s10798_s17 = smov %s10801_s21  ;;  %s10799_s18 = smov %s10805_s22 }
 0x9b1   :  { %14 = sbr.rel (!%p12_p8) target bundleno = 3 (0x3), region = 87 }
 0x9b6   :  { %4913 = vsyncpa [#allocation6], 1 }
 0x9b7   :  { %4915 = vsyncpa [#allocation6 + $0x1], 1 }

</bundles_post_ra>
